<compile_context>
chip_gen: v5e
topology: v5e:2x2
jax: 0.10.0
libtpu: 0.0.40
codegen_flags: <defaults>
</compile_context>

<pallas_src>
import numpy as np
import jax
import jax.numpy as jnp
from jax.experimental import pallas as pl
from jax.experimental.pallas import tpu as pltpu

N_MAP = 128            # config['n_map']  (LanePooling hard-codes 128)
NUM_SCALES = 2         # config['num_scales']
GN_EPS = 1e-5
TC = 8                 # context rows handled (statically unrolled) per pair-kernel grid step
NT_TILE_MAX = 256      # target-row tile for the pair / tail kernels
ROW_TILE_MAX = 256     # row tile for the remaining row-parallel kernels
MXU_DTYPE = jnp.bfloat16   # matmul operand dtype; accumulation / GN / residuals stay f32

EDGE_KEYS = ([f"pre{s}" for s in range(NUM_SCALES)]
             + [f"suc{s}" for s in range(NUM_SCALES)]
             + ["left", "right"])


# ----------------------------------------------------------------------------- helpers
def _round_up(x, m):
    return ((x + m - 1) // m) * m


def _row_tiling(n, max_tile=ROW_TILE_MAX):
    t = min(max_tile, _round_up(n, 8))
    return t, _round_up(n, t)


def _pad_to(x, rows=None, cols=None):
    pr = 0 if rows is None else rows - x.shape[0]
    pc = 0 if cols is None else cols - x.shape[1]
    if pr or pc:
        x = jnp.pad(x, ((0, pr), (0, pc)))
    return x


def _const(shape):
    nd = len(shape)
    return pl.BlockSpec(shape, lambda *_: (0,) * nd)


def _row(block):
    return pl.BlockSpec(block, lambda i: (i, 0))


# --------------------------------------------------------------------- in-kernel math
def _gn(y, gamma, beta):
    """GroupNorm(1, C) on (rows, C): per-row stats, single pass (E[x], E[x^2])."""
    mu = jnp.mean(y, axis=-1, keepdims=True)
    var = jnp.maximum(jnp.mean(y * y, axis=-1, keepdims=True) - mu * mu, 0.0)
    return (y - mu) * jax.lax.rsqrt(var + GN_EPS) * gamma + beta


def _mxdot(x, w):
    """MXU matmul with bf16 operands, f32 accumulation."""
    return jnp.dot(x.astype(MXU_DTYPE), w.astype(MXU_DTYPE),
                   preferred_element_type=jnp.float32)


# ------------------------------------------------------------------------------ kernels
def _stem_kernel(c_ref, f_ref, w1_ref, b1_ref, w2_ref, g2_ref, be2_ref,
                 ws1_ref, bs1_ref, ws2_ref, gs2_ref, bes2_ref, o_ref):
    # graph_input = relu( GN(relu(ctrs@W1+b1)@W2) + GN(relu(feats@Ws1+bs1)@Ws2) )
    h = jnp.maximum(_mxdot(c_ref[...], w1_ref[...]) + b1_ref[...], 0.0)
    gi = _gn(_mxdot(h, w2_ref[...]), g2_ref[...], be2_ref[...])
    hs = jnp.maximum(_mxdot(f_ref[...], ws1_ref[...]) + bs1_ref[...], 0.0)
    si = _gn(_mxdot(hs, ws2_ref[...]), gs2_ref[...], bes2_ref[...])
    o_ref[...] = jnp.maximum(gi + si, 0.0)


def _pair_kernel(pc_ref, pt_ref, cf_ref, m_ref, wr_ref, br_ref,
                 wtop_ref, wbot_ref, g1_ref, b1_ref, o_ref):
    """Fused LanePooling pair path for one (target-tile, 8-context-rows) block:
         dist_feat = relu(pose_c@Wr + br - pose_t@Wr)
         h         = relu(GN(context_feat@W1_top + dist_feat@W1_bot))
         out[j]   += sum_i mask[i, j] * h[i, j, :]        (== index_add_)
       ctx2 is applied later, after aggregation (it is a pure linear)."""
    i = pl.program_id(1)

    @pl.when(i == 0)
    def _():
        o_ref[...] = jnp.zeros_like(o_ref)

    wr = wr_ref[...]
    a = jnp.dot(pc_ref[...], wr, preferred_element_type=jnp.float32) + br_ref[...]  # (TC,128)
    b = jnp.dot(pt_ref[...], wr, preferred_element_type=jnp.float32)                # (tt,128)
    top = _mxdot(cf_ref[...], wtop_ref[...])                                        # (TC,128)
    wbot = wbot_ref[...].astype(MXU_DTYPE)
    g1 = g1_ref[...]
    b1 = b1_ref[...]
    m = m_ref[0]                                                                     # (tt, TC)

    acc = jnp.zeros(o_ref.shape, jnp.float32)
    for r in range(TC):                               # static unroll over context sub-rows
        d = jnp.maximum(a[r:r + 1, :] - b, 0.0)                          # (tt, 128)
        h = jnp.dot(d.astype(MXU_DTYPE), wbot,
                    preferred_element_type=jnp.float32) + top[r:r + 1, :]
        h = jnp.maximum(_gn(h, g1, b1), 0.0)
        acc = acc + m[:, r:r + 1] * h                 # masked scatter-add contribution
    o_ref[...] += acc


def _lane_tail_kernel(x_ref, agg_ref, win_ref, w2_ref, ng_ref, nb_ref,
                      wm1_ref, gm1_ref, bm1_ref, wm2_ref, gm2_ref, bm2_ref, o_ref):
    x = x_ref[...]
    # self.input(target) + (aggregated ctx) @ ctx2_w    (ctx2 reordered after aggregation)
    t = _mxdot(x, win_ref[...]) + _mxdot(agg_ref[...], w2_ref[...])
    t = jnp.maximum(_gn(t, ng_ref[...], nb_ref[...]), 0.0)                         # norm+relu
    t = jnp.maximum(_gn(_mxdot(t, wm1_ref[...]), gm1_ref[...], bm1_ref[...]), 0.0)  # mlp[0]
    t = _gn(_mxdot(t, wm2_ref[...]), gm2_ref[...], bm2_ref[...])                    # mlp[1]
    o_ref[...] = jnp.maximum(t + x, 0.0)                                            # +id, relu


def _msg_kernel(f_ref, w_ref, o_ref):
    # all 6 edge linears fused into one (128, 6*128) matmul
    o_ref[...] = _mxdot(f_ref[...], w_ref[...])


def _gg_layer_kernel(f_ref, ctrw_ref, msg_ref, adj_ref, res_ref,
                     ng_ref, nb_ref, w2_ref, g2_ref, b2_ref, o_ref):
    d = N_MAP
    temp = _mxdot(f_ref[...], ctrw_ref[...])                      # fuse['ctr']
    for k in range(len(EDGE_KEYS)):                               # index_add_ == A @ msg
        temp = temp + _mxdot(adj_ref[k], msg_ref[:, k * d:(k + 1) * d])
    h = jnp.maximum(_gn(temp, ng_ref[...], nb_ref[...]), 0.0)     # norm + relu
    o_ref[...] = jnp.maximum(
        _gn(_mxdot(h, w2_ref[...]), g2_ref[...], b2_ref[...]) + res_ref[...], 0.0)


# ---------------------------------------------------------------------- interactor stem
def interactor_stem(params, ctrs, feats):
    d = N_MAP
    n = ctrs.shape[0]
    tile, n_pad = _row_tiling(n)
    c8 = _pad_to(jnp.asarray(ctrs, jnp.float32), rows=n_pad, cols=8)
    f8 = _pad_to(jnp.asarray(feats, jnp.float32), rows=n_pad, cols=8)

    def pk(w):          # pad contraction dim 2 -> 8 with zero rows (exact)
        return _pad_to(jnp.asarray(w, jnp.float32), rows=8)

    return pl.pallas_call(
        _stem_kernel,
        out_shape=jax.ShapeDtypeStruct((n_pad, d), jnp.float32),
        grid=(n_pad // tile,),
        in_specs=[_row((tile, 8)), _row((tile, 8)),
                  _const((8, d)), _const((1, d)),
                  _const((d, d)), _const((1, d)), _const((1, d)),
                  _const((8, d)), _const((1, d)),
                  _const((d, d)), _const((1, d)), _const((1, d))],
        out_specs=_row((tile, d)),
        compiler_params=pltpu.CompilerParams(dimension_semantics=("parallel",)),
    )(c8, f8,
      pk(params['input1_w']), params['input1_b'].reshape(1, d),
      params['input2_w'], params['input2_g'].reshape(1, d), params['input2_b'].reshape(1, d),
      pk(params['seg1_w']), params['seg1_b'].reshape(1, d),
      params['seg2_w'], params['seg2_g'].reshape(1, d), params['seg2_b'].reshape(1, d),
      )[:n]


# --------------------------------------------------------------------------- LanePooling
def lane_pooling(p, context_feat, context_ctrs, context_pose, context_bid,
                 target_feat, target_ctrs, target_pose, target_bid, dist_th=6.0):
    d = N_MAP
    nc = context_ctrs.shape[0]
    nt = target_ctrs.shape[0]
    nc_pad = _round_up(nc, TC)
    tile_nt, nt_pad = _row_tiling(nt, NT_TILE_MAX)
    nc_tiles = nc_pad // TC
    nt_tiles = nt_pad // tile_nt

    # block-diagonal pair mask == per-batch torch.nonzero(dist <= dist_th) edge list
    diff = (jnp.asarray(context_ctrs, jnp.float32)[:, None, :]
            - jnp.asarray(target_ctrs, jnp.float32)[None, :, :])
    dist2 = jnp.sum(diff * diff, axis=-1)
    mask = ((dist2 <= dist_th * dist_th)
            & (context_bid[:, None] == target_bid[None, :])).astype(jnp.float32)
    mask = jnp.pad(mask, ((0, nc_pad - nc), (0, nt_pad - nt)))
    # (nc_tiles, nt_pad, TC): target dim on sublanes, 8 context sub-rows on lanes
    mask3 = mask.reshape(nc_tiles, TC, nt_pad).transpose(0, 2, 1)

    pose_c = _pad_to(jnp.asarray(context_pose, jnp.float32), rows=nc_pad, cols=8)
    pose_t = _pad_to(jnp.asarray(target_pose, jnp.float32), rows=nt_pad, cols=8)
    cf = _pad_to(jnp.asarray(context_feat, jnp.float32), rows=nc_pad)
    tf = _pad_to(jnp.asarray(target_feat, jnp.float32), rows=nt_pad)

    wr = _pad_to(jnp.asarray(p['relpose_w'], jnp.float32), rows=8)     # (4,128) -> (8,128)
    br = p['relpose_b'].reshape(1, d)
    w1_top, w1_bot = p['ctx1_w'][:d, :], p['ctx1_w'][d:, :]            # split of the concat
    g1, b1 = p['ctx1_g'].reshape(1, d), p['ctx1_b'].reshape(1, d)

    # per-pair relpose/ctx1 + masked aggregation (never materializes nc*nt features in HBM)
    agg = pl.pallas_call(
        _pair_kernel,
        out_shape=jax.ShapeDtypeStruct((nt_pad, d), jnp.float32),
        grid=(nt_tiles, nc_tiles),
        in_specs=[pl.BlockSpec((TC, 8), lambda j, i: (i, 0)),
                  pl.BlockSpec((tile_nt, 8), lambda j, i: (j, 0)),
                  pl.BlockSpec((TC, d), lambda j, i: (i, 0)),
                  pl.BlockSpec((1, tile_nt, TC), lambda j, i: (i, j, 0)),
                  _const((8, d)), _const((1, d)),
                  _const((d, d)), _const((d, d)),
                  _const((1, d)), _const((1, d))],
        out_specs=pl.BlockSpec((tile_nt, d), lambda j, i: (j, 0)),
        compiler_params=pltpu.CompilerParams(
            dimension_semantics=("parallel", "arbitrary")),
    )(pose_c, pose_t, cf, mask3, wr, br, w1_top, w1_bot, g1, b1)

    # fused tail: input-linear + ctx2-on-aggregate + norm + mlp + residual + relu
    out = pl.pallas_call(
        _lane_tail_kernel,
        out_shape=jax.ShapeDtypeStruct((nt_pad, d), jnp.float32),
        grid=(nt_tiles,),
        in_specs=[_row((tile_nt, d)), _row((tile_nt, d)),
                  _const((d, d)), _const((d, d)),
                  _const((1, d)), _const((1, d)),
                  _const((d, d)), _const((1, d)), _const((1, d)),
                  _const((d, d)), _const((1, d)), _const((1, d))],
        out_specs=_row((tile_nt, d)),
        compiler_params=pltpu.CompilerParams(dimension_semantics=("parallel",)),
    )(tf, agg,
      p['input_w'], p['ctx2_w'],
      p['norm_g'].reshape(1, d), p['norm_b'].reshape(1, d),
      p['mlp1_w'], p['mlp1_g'].reshape(1, d), p['mlp1_b'].reshape(1, d),
      p['mlp2_w'], p['mlp2_g'].reshape(1, d), p['mlp2_b'].reshape(1, d))
    return out[:nt]


# ------------------------------------------------------------------------ GlobalGraphNet
def global_graph_net(layers, feat, adj):
    # TODO(synk): the reference's empty-graph early return (graph['feats']/pre/suc empty)
    # is a dynamic-shape branch; handled by construction on the host, not in-kernel.
    d = N_MAP
    n = feat.shape[0]
    tile, n_pad = _row_tiling(n, 128)
    feat = _pad_to(jnp.asarray(feat, jnp.float32), rows=n_pad)
    adj_stack = jnp.stack(
        [_pad_to(jnp.asarray(adj[k], jnp.float32), rows=n_pad, cols=n_pad)
         for k in EDGE_KEYS], axis=0)
    ne = len(EDGE_KEYS)

    row = _row((tile, d))
    grid = (n_pad // tile,)
    pp = pltpu.CompilerParams(dimension_semantics=("parallel",))

    res = feat
    for p in layers:
        w_edges = jnp.concatenate([p[k + '_w'] for k in EDGE_KEYS], axis=1)   # (128, 6*128)
        msg = pl.pallas_call(
            _msg_kernel,
            out_shape=jax.ShapeDtypeStruct((n_pad, ne * d), jnp.float32),
            grid=grid,
            in_specs=[row, _const((d, ne * d))],
            out_specs=_row((tile, ne * d)),
            compiler_params=pp,
        )(feat, w_edges)
        # aggregate (A @ msg for all 6 edge types) + norm + ctr2 + residual, fused
        feat = pl.pallas_call(
            _gg_layer_kernel,
            out_shape=jax.ShapeDtypeStruct((n_pad, d), jnp.float32),
            grid=grid,
            in_specs=[row, _const((d, d)),
                      _const((n_pad, ne * d)),                       # full msg, VMEM-resident
                      pl.BlockSpec((ne, tile, n_pad), lambda i: (0, i, 0)),
                      row,
                      _const((1, d)), _const((1, d)),
                      _const((d, d)), _const((1, d)), _const((1, d))],
            out_specs=row,
            compiler_params=pp,
        )(feat, p['ctr_w'], msg, adj_stack, res,
          p['norm_g'].reshape(1, d), p['norm_b'].reshape(1, d),
          p['ctr2_w'], p['ctr2_g'].reshape(1, d), p['ctr2_b'].reshape(1, d))
        res = feat
    return feat[:n]


# ----------------------------------------------------------------------------- Interactor
def interactor_forward(params, graph, subgraph, roi_feat):
    graph_input = interactor_stem(params, graph['ctrs'], graph['feats'])
    graph_feat = lane_pooling(params['roi2graph'],
                              roi_feat, subgraph['ctrs'], subgraph['pose'], subgraph['bid'],
                              graph_input, graph['ctrs'], graph['pose'], graph['bid'])
    graph_feat = global_graph_net(params['global'], graph_feat, graph['adj'])
    roi_out = lane_pooling(params['graph2roi'],
                           graph_feat, graph['ctrs'], graph['pose'], graph['bid'],
                           roi_feat, subgraph['ctrs'], subgraph['pose'], subgraph['bid'])
    return roi_out


# ----------------------------------------------------------------------- parameter init
def _weight(key, cin, cout):
    return (jax.random.normal(key, (cin, cout), jnp.float32) / np.sqrt(cin)).astype(jnp.float32)


def init_lane_pooling(key):
    d = N_MAP
    ks = jax.random.split(key, 6)
    ones = jnp.ones((d,), jnp.float32)
    zeros = jnp.zeros((d,), jnp.float32)
    return {
        'input_w': _weight(ks[0], d, d),
        'relpose_w': _weight(ks[1], 4, d), 'relpose_b': zeros,
        'ctx1_w': _weight(ks[2], 2 * d, d), 'ctx1_g': ones, 'ctx1_b': zeros,
        'ctx2_w': _weight(ks[3], d, d),
        'mlp1_w': _weight(ks[4], d, d), 'mlp1_g': ones, 'mlp1_b': zeros,
        'mlp2_w': _weight(ks[5], d, d), 'mlp2_g': ones, 'mlp2_b': zeros,
        'norm_g': ones, 'norm_b': zeros,
    }


def init_global(key):
    d = N_MAP
    ones = jnp.ones((d,), jnp.float32)
    zeros = jnp.zeros((d,), jnp.float32)
    layers = []
    for lkey in jax.random.split(key, 4):
        ks = jax.random.split(lkey, 4 + 2 * NUM_SCALES)
        p = {'ctr_w': _weight(ks[0], d, d),
             'ctr2_w': _weight(ks[1], d, d), 'ctr2_g': ones, 'ctr2_b': zeros,
             'left_w': _weight(ks[2], d, d), 'right_w': _weight(ks[3], d, d),
             'norm_g': ones, 'norm_b': zeros}
        for s in range(NUM_SCALES):
            p[f'pre{s}_w'] = _weight(ks[4 + 2 * s], d, d)
            p[f'suc{s}_w'] = _weight(ks[5 + 2 * s], d, d)
        layers.append(p)
    return layers


def init_params(key):
    d = N_MAP
    ks = jax.random.split(key, 7)
    ones = jnp.ones((d,), jnp.float32)
    zeros = jnp.zeros((d,), jnp.float32)
    return {
        'input1_w': _weight(ks[0], 2, d), 'input1_b': zeros,
        'input2_w': _weight(ks[1], d, d), 'input2_g': ones, 'input2_b': zeros,
        'seg1_w': _weight(ks[2], 2, d), 'seg1_b': zeros,
        'seg2_w': _weight(ks[3], d, d), 'seg2_g': ones, 'seg2_b': zeros,
        'roi2graph': init_lane_pooling(ks[4]),
        'graph2roi': init_lane_pooling(ks[5]),
        'global': init_global(ks[6]),
    }


# ------------------------------------------------------------------------- synthetic data
def build_graphs(key):
    graph_counts = [10, 14]        # lane-graph nodes per batch element
    roi_counts = [6, 6]            # ROI nodes per batch element
    n, m = sum(graph_counts), sum(roi_counts)
    ks = jax.random.split(key, 6)
    graph_ctrs = jax.random.uniform(ks[0], (n, 2), jnp.float32, 0.0, 8.0)
    graph_feats = jax.random.normal(ks[1], (n, 2), jnp.float32)
    graph_pose = jax.random.normal(ks[2], (n, 4), jnp.float32)
    sub_ctrs = jax.random.uniform(ks[3], (m, 2), jnp.float32, 0.0, 8.0)
    sub_pose = jax.random.normal(ks[4], (m, 4), jnp.float32)
    roi_feat = jax.random.normal(ks[5], (m, N_MAP), jnp.float32)

    graph_bid = jnp.asarray(np.repeat(np.arange(len(graph_counts)), graph_counts), jnp.int32)
    sub_bid = jnp.asarray(np.repeat(np.arange(len(roi_counts)), roi_counts), jnp.int32)

    # lane-graph connectivity as dense adjacency: A[u, v] += 1 <=> index_add_(0, u, f(feat[v]))
    adj = {}
    offsets = np.cumsum([0] + graph_counts[:-1])

    def add(mat, u, v):
        np.add.at(mat, (np.asarray(u, np.int64), np.asarray(v, np.int64)), 1.0)

    for s in range(NUM_SCALES):
        step = s + 1
        pre = np.zeros((n, n), np.float32)
        suc = np.zeros((n, n), np.float32)
        for off, cnt in zip(offsets, graph_counts):
            u = np.arange(step, cnt) + off
            v = np.arange(0, cnt - step) + off
            add(pre, u, v)
            add(suc, v, u)
        adj[f'pre{s}'] = jnp.asarray(pre)
        adj[f'suc{s}'] = jnp.asarray(suc)
    left = np.zeros((n, n), np.float32)
    right = np.zeros((n, n), np.float32)
    for off, cnt in zip(offsets, graph_counts):
        u = np.arange(0, cnt - 1, 2) + off
        v = u + 1
        add(left, u, v)
        add(right, v, u)
    adj['left'] = jnp.asarray(left)
    adj['right'] = jnp.asarray(right)

    graph = {'ctrs': graph_ctrs, 'feats': graph_feats, 'pose': graph_pose,
             'bid': graph_bid, 'adj': adj}
    subgraph = {'ctrs': sub_ctrs, 'pose': sub_pose, 'bid': sub_bid}
    return graph, subgraph, roi_feat


if __name__ == "__main__":
    key = jax.random.PRNGKey(0)
    kp, kd = jax.random.split(key)
    params = init_params(kp)
    graph, subgraph, roi_feat = build_graphs(kd)

    fwd = jax.jit(interactor_forward)
    out = fwd(params, graph, subgraph, roi_feat)
    out = jax.block_until_ready(out)

    assert out.shape == roi_feat.shape, out.shape
    assert bool(jnp.all(jnp.isfinite(out)))
    print("KERNEL_OK")
</pallas_src>

<mosaic_0001>
module attributes {stable_mosaic.version = 11 : i64} {
  func.func @_stem_kernel(%arg0: i32, %arg1: memref<24x8xf32, #tpu.memory_space<vmem>>, %arg2: memref<24x8xf32, #tpu.memory_space<vmem>>, %arg3: memref<8x128xf32, #tpu.memory_space<vmem>>, %arg4: memref<1x128xf32, #tpu.memory_space<vmem>>, %arg5: memref<128x128xf32, #tpu.memory_space<vmem>>, %arg6: memref<1x128xf32, #tpu.memory_space<vmem>>, %arg7: memref<1x128xf32, #tpu.memory_space<vmem>>, %arg8: memref<8x128xf32, #tpu.memory_space<vmem>>, %arg9: memref<1x128xf32, #tpu.memory_space<vmem>>, %arg10: memref<128x128xf32, #tpu.memory_space<vmem>>, %arg11: memref<1x128xf32, #tpu.memory_space<vmem>>, %arg12: memref<1x128xf32, #tpu.memory_space<vmem>>, %arg13: memref<24x128xf32, #tpu.memory_space<vmem>>) attributes {dimension_semantics = [#tpu.dimension_semantics<parallel>], iteration_bounds = array<i64: 1>, scalar_prefetch = 0 : i64, scratch_operands = 0 : i64, tpu.core_type = #tpu.core_type<tc>, window_params = [{transform_indices = @transform_0, window_bounds = array<i64: 24, 8>}, {transform_indices = @transform_1, window_bounds = array<i64: 24, 8>}, {pipeline_mode = #tpu.pipeline_mode<synchronous>, transform_indices = @transform_2, window_bounds = array<i64: 8, 128>}, {pipeline_mode = #tpu.pipeline_mode<synchronous>, transform_indices = @transform_3, window_bounds = array<i64: 1, 128>}, {pipeline_mode = #tpu.pipeline_mode<synchronous>, transform_indices = @transform_4, window_bounds = array<i64: 128, 128>}, {pipeline_mode = #tpu.pipeline_mode<synchronous>, transform_indices = @transform_5, window_bounds = array<i64: 1, 128>}, {pipeline_mode = #tpu.pipeline_mode<synchronous>, transform_indices = @transform_6, window_bounds = array<i64: 1, 128>}, {pipeline_mode = #tpu.pipeline_mode<synchronous>, transform_indices = @transform_7, window_bounds = array<i64: 8, 128>}, {pipeline_mode = #tpu.pipeline_mode<synchronous>, transform_indices = @transform_8, window_bounds = array<i64: 1, 128>}, {pipeline_mode = #tpu.pipeline_mode<synchronous>, transform_indices = @transform_9, window_bounds = array<i64: 128, 128>}, {pipeline_mode = #tpu.pipeline_mode<synchronous>, transform_indices = @transform_10, window_bounds = array<i64: 1, 128>}, {pipeline_mode = #tpu.pipeline_mode<synchronous>, transform_indices = @transform_11, window_bounds = array<i64: 1, 128>}, {transform_indices = @transform_12, window_bounds = array<i64: 24, 128>}]} {
    %c0 = arith.constant 0 : index
    %c0_0 = arith.constant 0 : index
    %0 = vector.load %arg1[%c0, %c0_0] : memref<24x8xf32, #tpu.memory_space<vmem>>, vector<24x8xf32>
    %c0_1 = arith.constant 0 : index
    %c0_2 = arith.constant 0 : index
    %1 = vector.load %arg3[%c0_1, %c0_2] : memref<8x128xf32, #tpu.memory_space<vmem>>, vector<8x128xf32>
    %2 = arith.truncf %0 : vector<24x8xf32> to vector<24x8xbf16>
    %3 = arith.truncf %1 : vector<8x128xf32> to vector<8x128xbf16>
    %cst = arith.constant dense<0.000000e+00> : vector<24x128xf32>
    %4 = tpu.matmul %2, %3, %cst {dimension_numbers = #tpu.dot_dimension_numbers<[1], [0], [0], [1], [0, 0, 1, 1], [], []>} : vector<24x8xbf16>, vector<8x128xbf16>, vector<24x128xf32> -> vector<24x128xf32>
    %c0_3 = arith.constant 0 : index
    %c0_4 = arith.constant 0 : index
    %5 = vector.load %arg4[%c0_3, %c0_4] : memref<1x128xf32, #tpu.memory_space<vmem>>, vector<1x128xf32>
    %6 = vector.broadcast %5 : vector<1x128xf32> to vector<24x128xf32>
    %7 = arith.addf %4, %6 : vector<24x128xf32>
    %cst_5 = arith.constant 0.000000e+00 : f32
    %8 = vector.broadcast %cst_5 : f32 to vector<24x128xf32>
    %9 = arith.maximumf %7, %8 : vector<24x128xf32>
    %c0_6 = arith.constant 0 : index
    %c0_7 = arith.constant 0 : index
    %10 = vector.load %arg5[%c0_6, %c0_7] : memref<128x128xf32, #tpu.memory_space<vmem>>, vector<128x128xf32>
    %11 = arith.truncf %9 : vector<24x128xf32> to vector<24x128xbf16>
    %12 = arith.truncf %10 : vector<128x128xf32> to vector<128x128xbf16>
    %cst_8 = arith.constant dense<0.000000e+00> : vector<24x128xf32>
    %13 = tpu.matmul %11, %12, %cst_8 {dimension_numbers = #tpu.dot_dimension_numbers<[1], [0], [0], [1], [0, 0, 1, 1], [], []>} : vector<24x128xbf16>, vector<128x128xbf16>, vector<24x128xf32> -> vector<24x128xf32>
    %c0_9 = arith.constant 0 : index
    %c0_10 = arith.constant 0 : index
    %14 = vector.load %arg6[%c0_9, %c0_10] : memref<1x128xf32, #tpu.memory_space<vmem>>, vector<1x128xf32>
    %c0_11 = arith.constant 0 : index
    %c0_12 = arith.constant 0 : index
    %15 = vector.load %arg7[%c0_11, %c0_12] : memref<1x128xf32, #tpu.memory_space<vmem>>, vector<1x128xf32>
    %cst_13 = arith.constant dense<0.000000e+00> : vector<24xf32>
    %16 = vector.multi_reduction <add>, %13, %cst_13 [1] : vector<24x128xf32> to vector<24xf32>
    %17 = vector.shape_cast %16 : vector<24xf32> to vector<24x1xf32>
    %cst_14 = arith.constant 1.280000e+02 : f32
    %18 = vector.broadcast %cst_14 : f32 to vector<24x1xf32>
    %19 = arith.divf %17, %18 : vector<24x1xf32>
    %20 = arith.mulf %13, %13 : vector<24x128xf32>
    %cst_15 = arith.constant dense<0.000000e+00> : vector<24xf32>
    %21 = vector.multi_reduction <add>, %20, %cst_15 [1] : vector<24x128xf32> to vector<24xf32>
    %22 = vector.shape_cast %21 : vector<24xf32> to vector<24x1xf32>
    %cst_16 = arith.constant 1.280000e+02 : f32
    %23 = vector.broadcast %cst_16 : f32 to vector<24x1xf32>
    %24 = arith.divf %22, %23 : vector<24x1xf32>
    %25 = arith.mulf %19, %19 : vector<24x1xf32>
    %26 = arith.subf %24, %25 : vector<24x1xf32>
    %cst_17 = arith.constant 0.000000e+00 : f32
    %27 = vector.broadcast %cst_17 : f32 to vector<24x1xf32>
    %28 = arith.maximumf %26, %27 : vector<24x1xf32>
    %29 = vector.broadcast %19 : vector<24x1xf32> to vector<24x128xf32>
    %30 = arith.subf %13, %29 : vector<24x128xf32>
    %cst_18 = arith.constant 9.99999974E-6 : f32
    %31 = vector.broadcast %cst_18 : f32 to vector<24x1xf32>
    %32 = arith.addf %28, %31 : vector<24x1xf32>
    %33 = math.rsqrt %32 : vector<24x1xf32>
    %34 = vector.broadcast %33 : vector<24x1xf32> to vector<24x128xf32>
    %35 = arith.mulf %30, %34 : vector<24x128xf32>
    %36 = vector.broadcast %14 : vector<1x128xf32> to vector<24x128xf32>
    %37 = arith.mulf %35, %36 : vector<24x128xf32>
    %38 = vector.broadcast %15 : vector<1x128xf32> to vector<24x128xf32>
    %39 = arith.addf %37, %38 : vector<24x128xf32>
    %c0_19 = arith.constant 0 : index
    %c0_20 = arith.constant 0 : index
    %40 = vector.load %arg2[%c0_19, %c0_20] : memref<24x8xf32, #tpu.memory_space<vmem>>, vector<24x8xf32>
    %c0_21 = arith.constant 0 : index
    %c0_22 = arith.constant 0 : index
    %41 = vector.load %arg8[%c0_21, %c0_22] : memref<8x128xf32, #tpu.memory_space<vmem>>, vector<8x128xf32>
    %42 = arith.truncf %40 : vector<24x8xf32> to vector<24x8xbf16>
    %43 = arith.truncf %41 : vector<8x128xf32> to vector<8x128xbf16>
    %cst_23 = arith.constant dense<0.000000e+00> : vector<24x128xf32>
    %44 = tpu.matmul %42, %43, %cst_23 {dimension_numbers = #tpu.dot_dimension_numbers<[1], [0], [0], [1], [0, 0, 1, 1], [], []>} : vector<24x8xbf16>, vector<8x128xbf16>, vector<24x128xf32> -> vector<24x128xf32>
    %c0_24 = arith.constant 0 : index
    %c0_25 = arith.constant 0 : index
    %45 = vector.load %arg9[%c0_24, %c0_25] : memref<1x128xf32, #tpu.memory_space<vmem>>, vector<1x128xf32>
    %46 = vector.broadcast %45 : vector<1x128xf32> to vector<24x128xf32>
    %47 = arith.addf %44, %46 : vector<24x128xf32>
    %cst_26 = arith.constant 0.000000e+00 : f32
    %48 = vector.broadcast %cst_26 : f32 to vector<24x128xf32>
    %49 = arith.maximumf %47, %48 : vector<24x128xf32>
    %c0_27 = arith.constant 0 : index
    %c0_28 = arith.constant 0 : index
    %50 = vector.load %arg10[%c0_27, %c0_28] : memref<128x128xf32, #tpu.memory_space<vmem>>, vector<128x128xf32>
    %51 = arith.truncf %49 : vector<24x128xf32> to vector<24x128xbf16>
    %52 = arith.truncf %50 : vector<128x128xf32> to vector<128x128xbf16>
    %cst_29 = arith.constant dense<0.000000e+00> : vector<24x128xf32>
    %53 = tpu.matmul %51, %52, %cst_29 {dimension_numbers = #tpu.dot_dimension_numbers<[1], [0], [0], [1], [0, 0, 1, 1], [], []>} : vector<24x128xbf16>, vector<128x128xbf16>, vector<24x128xf32> -> vector<24x128xf32>
    %c0_30 = arith.constant 0 : index
    %c0_31 = arith.constant 0 : index
    %54 = vector.load %arg11[%c0_30, %c0_31] : memref<1x128xf32, #tpu.memory_space<vmem>>, vector<1x128xf32>
    %c0_32 = arith.constant 0 : index
    %c0_33 = arith.constant 0 : index
    %55 = vector.load %arg12[%c0_32, %c0_33] : memref<1x128xf32, #tpu.memory_space<vmem>>, vector<1x128xf32>
    %cst_34 = arith.constant dense<0.000000e+00> : vector<24xf32>
    %56 = vector.multi_reduction <add>, %53, %cst_34 [1] : vector<24x128xf32> to vector<24xf32>
    %57 = vector.shape_cast %56 : vector<24xf32> to vector<24x1xf32>
    %cst_35 = arith.constant 1.280000e+02 : f32
    %58 = vector.broadcast %cst_35 : f32 to vector<24x1xf32>
    %59 = arith.divf %57, %58 : vector<24x1xf32>
    %60 = arith.mulf %53, %53 : vector<24x128xf32>
    %cst_36 = arith.constant dense<0.000000e+00> : vector<24xf32>
    %61 = vector.multi_reduction <add>, %60, %cst_36 [1] : vector<24x128xf32> to vector<24xf32>
    %62 = vector.shape_cast %61 : vector<24xf32> to vector<24x1xf32>
    %cst_37 = arith.constant 1.280000e+02 : f32
    %63 = vector.broadcast %cst_37 : f32 to vector<24x1xf32>
    %64 = arith.divf %62, %63 : vector<24x1xf32>
    %65 = arith.mulf %59, %59 : vector<24x1xf32>
    %66 = arith.subf %64, %65 : vector<24x1xf32>
    %cst_38 = arith.constant 0.000000e+00 : f32
    %67 = vector.broadcast %cst_38 : f32 to vector<24x1xf32>
    %68 = arith.maximumf %66, %67 : vector<24x1xf32>
    %69 = vector.broadcast %59 : vector<24x1xf32> to vector<24x128xf32>
    %70 = arith.subf %53, %69 : vector<24x128xf32>
    %cst_39 = arith.constant 9.99999974E-6 : f32
    %71 = vector.broadcast %cst_39 : f32 to vector<24x1xf32>
    %72 = arith.addf %68, %71 : vector<24x1xf32>
    %73 = math.rsqrt %72 : vector<24x1xf32>
    %74 = vector.broadcast %73 : vector<24x1xf32> to vector<24x128xf32>
    %75 = arith.mulf %70, %74 : vector<24x128xf32>
    %76 = vector.broadcast %54 : vector<1x128xf32> to vector<24x128xf32>
    %77 = arith.mulf %75, %76 : vector<24x128xf32>
    %78 = vector.broadcast %55 : vector<1x128xf32> to vector<24x128xf32>
    %79 = arith.addf %77, %78 : vector<24x128xf32>
    %80 = arith.addf %39, %79 : vector<24x128xf32>
    %cst_40 = arith.constant 0.000000e+00 : f32
    %81 = vector.broadcast %cst_40 : f32 to vector<24x128xf32>
    %82 = arith.maximumf %80, %81 : vector<24x128xf32>
    %c0_41 = arith.constant 0 : index
    %c0_42 = arith.constant 0 : index
    %83 = vector.load %arg13[%c0_41, %c0_42] : memref<24x128xf32, #tpu.memory_space<vmem>>, vector<24x128xf32>
    tpu.vector_store %arg13[%c0_41, %c0_42], %82 {strides = array<i32>} : memref<24x128xf32, #tpu.memory_space<vmem>>, vector<24x128xf32>,
    return
  }
  func.func @transform_0(%arg0: i32) -> (i32, i32) {
    %c0_i32 = arith.constant 0 : i32
    %c0_i32_0 = arith.constant 0 : i32
    return %arg0, %c0_i32 : i32, i32
  }
  func.func @transform_1(%arg0: i32) -> (i32, i32) {
    %c0_i32 = arith.constant 0 : i32
    %c0_i32_0 = arith.constant 0 : i32
    return %arg0, %c0_i32 : i32, i32
  }
  func.func @transform_2(%arg0: i32) -> (i32, i32) {
    %c0_i32 = arith.constant 0 : i32
    %c0_i32_0 = arith.constant 0 : i32
    %c0_i32_1 = arith.constant 0 : i32
    return %c0_i32, %c0_i32_0 : i32, i32
  }
  func.func @transform_3(%arg0: i32) -> (i32, i32) {
    %c0_i32 = arith.constant 0 : i32
    %c0_i32_0 = arith.constant 0 : i32
    %c0_i32_1 = arith.constant 0 : i32
    return %c0_i32, %c0_i32_0 : i32, i32
  }
  func.func @transform_4(%arg0: i32) -> (i32, i32) {
    %c0_i32 = arith.constant 0 : i32
    %c0_i32_0 = arith.constant 0 : i32
    %c0_i32_1 = arith.constant 0 : i32
    return %c0_i32, %c0_i32_0 : i32, i32
  }
  func.func @transform_5(%arg0: i32) -> (i32, i32) {
    %c0_i32 = arith.constant 0 : i32
    %c0_i32_0 = arith.constant 0 : i32
    %c0_i32_1 = arith.constant 0 : i32
    return %c0_i32, %c0_i32_0 : i32, i32
  }
  func.func @transform_6(%arg0: i32) -> (i32, i32) {
    %c0_i32 = arith.constant 0 : i32
    %c0_i32_0 = arith.constant 0 : i32
    %c0_i32_1 = arith.constant 0 : i32
    return %c0_i32, %c0_i32_0 : i32, i32
  }
  func.func @transform_7(%arg0: i32) -> (i32, i32) {
    %c0_i32 = arith.constant 0 : i32
    %c0_i32_0 = arith.constant 0 : i32
    %c0_i32_1 = arith.constant 0 : i32
    return %c0_i32, %c0_i32_0 : i32, i32
  }
  func.func @transform_8(%arg0: i32) -> (i32, i32) {
    %c0_i32 = arith.constant 0 : i32
    %c0_i32_0 = arith.constant 0 : i32
    %c0_i32_1 = arith.constant 0 : i32
    return %c0_i32, %c0_i32_0 : i32, i32
  }
  func.func @transform_9(%arg0: i32) -> (i32, i32) {
    %c0_i32 = arith.constant 0 : i32
    %c0_i32_0 = arith.constant 0 : i32
    %c0_i32_1 = arith.constant 0 : i32
    return %c0_i32, %c0_i32_0 : i32, i32
  }
  func.func @transform_10(%arg0: i32) -> (i32, i32) {
    %c0_i32 = arith.constant 0 : i32
    %c0_i32_0 = arith.constant 0 : i32
    %c0_i32_1 = arith.constant 0 : i32
    return %c0_i32, %c0_i32_0 : i32, i32
  }
  func.func @transform_11(%arg0: i32) -> (i32, i32) {
    %c0_i32 = arith.constant 0 : i32
    %c0_i32_0 = arith.constant 0 : i32
    %c0_i32_1 = arith.constant 0 : i32
    return %c0_i32, %c0_i32_0 : i32, i32
  }
  func.func @transform_12(%arg0: i32) -> (i32, i32) {
    %c0_i32 = arith.constant 0 : i32
    %c0_i32_0 = arith.constant 0 : i32
    return %arg0, %c0_i32 : i32, i32
  }
}

module attributes {stable_mosaic.version = 11 : i64} {
  func.func @_lane_tail_kernel(%arg0: i32, %arg1: memref<24x128xf32, #tpu.memory_space<vmem>>, %arg2: memref<24x128xf32, #tpu.memory_space<vmem>>, %arg3: memref<128x128xf32, #tpu.memory_space<vmem>>, %arg4: memref<128x128xf32, #tpu.memory_space<vmem>>, %arg5: memref<1x128xf32, #tpu.memory_space<vmem>>, %arg6: memref<1x128xf32, #tpu.memory_space<vmem>>, %arg7: memref<128x128xf32, #tpu.memory_space<vmem>>, %arg8: memref<1x128xf32, #tpu.memory_space<vmem>>, %arg9: memref<1x128xf32, #tpu.memory_space<vmem>>, %arg10: memref<128x128xf32, #tpu.memory_space<vmem>>, %arg11: memref<1x128xf32, #tpu.memory_space<vmem>>, %arg12: memref<1x128xf32, #tpu.memory_space<vmem>>, %arg13: memref<24x128xf32, #tpu.memory_space<vmem>>) attributes {dimension_semantics = [#tpu.dimension_semantics<parallel>], iteration_bounds = array<i64: 1>, scalar_prefetch = 0 : i64, scratch_operands = 0 : i64, tpu.core_type = #tpu.core_type<tc>, window_params = [{transform_indices = @transform_0, window_bounds = array<i64: 24, 128>}, {transform_indices = @transform_1, window_bounds = array<i64: 24, 128>}, {pipeline_mode = #tpu.pipeline_mode<synchronous>, transform_indices = @transform_2, window_bounds = array<i64: 128, 128>}, {pipeline_mode = #tpu.pipeline_mode<synchronous>, transform_indices = @transform_3, window_bounds = array<i64: 128, 128>}, {pipeline_mode = #tpu.pipeline_mode<synchronous>, transform_indices = @transform_4, window_bounds = array<i64: 1, 128>}, {pipeline_mode = #tpu.pipeline_mode<synchronous>, transform_indices = @transform_5, window_bounds = array<i64: 1, 128>}, {pipeline_mode = #tpu.pipeline_mode<synchronous>, transform_indices = @transform_6, window_bounds = array<i64: 128, 128>}, {pipeline_mode = #tpu.pipeline_mode<synchronous>, transform_indices = @transform_7, window_bounds = array<i64: 1, 128>}, {pipeline_mode = #tpu.pipeline_mode<synchronous>, transform_indices = @transform_8, window_bounds = array<i64: 1, 128>}, {pipeline_mode = #tpu.pipeline_mode<synchronous>, transform_indices = @transform_9, window_bounds = array<i64: 128, 128>}, {pipeline_mode = #tpu.pipeline_mode<synchronous>, transform_indices = @transform_10, window_bounds = array<i64: 1, 128>}, {pipeline_mode = #tpu.pipeline_mode<synchronous>, transform_indices = @transform_11, window_bounds = array<i64: 1, 128>}, {transform_indices = @transform_12, window_bounds = array<i64: 24, 128>}]} {
    %c0 = arith.constant 0 : index
    %c0_0 = arith.constant 0 : index
    %0 = vector.load %arg1[%c0, %c0_0] : memref<24x128xf32, #tpu.memory_space<vmem>>, vector<24x128xf32>
    %c0_1 = arith.constant 0 : index
    %c0_2 = arith.constant 0 : index
    %1 = vector.load %arg3[%c0_1, %c0_2] : memref<128x128xf32, #tpu.memory_space<vmem>>, vector<128x128xf32>
    %2 = arith.truncf %0 : vector<24x128xf32> to vector<24x128xbf16>
    %3 = arith.truncf %1 : vector<128x128xf32> to vector<128x128xbf16>
    %cst = arith.constant dense<0.000000e+00> : vector<24x128xf32>
    %4 = tpu.matmul %2, %3, %cst {dimension_numbers = #tpu.dot_dimension_numbers<[1], [0], [0], [1], [0, 0, 1, 1], [], []>} : vector<24x128xbf16>, vector<128x128xbf16>, vector<24x128xf32> -> vector<24x128xf32>
    %c0_3 = arith.constant 0 : index
    %c0_4 = arith.constant 0 : index
    %5 = vector.load %arg2[%c0_3, %c0_4] : memref<24x128xf32, #tpu.memory_space<vmem>>, vector<24x128xf32>
    %c0_5 = arith.constant 0 : index
    %c0_6 = arith.constant 0 : index
    %6 = vector.load %arg4[%c0_5, %c0_6] : memref<128x128xf32, #tpu.memory_space<vmem>>, vector<128x128xf32>
    %7 = arith.truncf %5 : vector<24x128xf32> to vector<24x128xbf16>
    %8 = arith.truncf %6 : vector<128x128xf32> to vector<128x128xbf16>
    %cst_7 = arith.constant dense<0.000000e+00> : vector<24x128xf32>
    %9 = tpu.matmul %7, %8, %cst_7 {dimension_numbers = #tpu.dot_dimension_numbers<[1], [0], [0], [1], [0, 0, 1, 1], [], []>} : vector<24x128xbf16>, vector<128x128xbf16>, vector<24x128xf32> -> vector<24x128xf32>
    %10 = arith.addf %4, %9 : vector<24x128xf32>
    %c0_8 = arith.constant 0 : index
    %c0_9 = arith.constant 0 : index
    %11 = vector.load %arg5[%c0_8, %c0_9] : memref<1x128xf32, #tpu.memory_space<vmem>>, vector<1x128xf32>
    %c0_10 = arith.constant 0 : index
    %c0_11 = arith.constant 0 : index
    %12 = vector.load %arg6[%c0_10, %c0_11] : memref<1x128xf32, #tpu.memory_space<vmem>>, vector<1x128xf32>
    %cst_12 = arith.constant dense<0.000000e+00> : vector<24xf32>
    %13 = vector.multi_reduction <add>, %10, %cst_12 [1] : vector<24x128xf32> to vector<24xf32>
    %14 = vector.shape_cast %13 : vector<24xf32> to vector<24x1xf32>
    %cst_13 = arith.constant 1.280000e+02 : f32
    %15 = vector.broadcast %cst_13 : f32 to vector<24x1xf32>
    %16 = arith.divf %14, %15 : vector<24x1xf32>
    %17 = arith.mulf %10, %10 : vector<24x128xf32>
    %cst_14 = arith.constant dense<0.000000e+00> : vector<24xf32>
    %18 = vector.multi_reduction <add>, %17, %cst_14 [1] : vector<24x128xf32> to vector<24xf32>
    %19 = vector.shape_cast %18 : vector<24xf32> to vector<24x1xf32>
    %cst_15 = arith.constant 1.280000e+02 : f32
    %20 = vector.broadcast %cst_15 : f32 to vector<24x1xf32>
    %21 = arith.divf %19, %20 : vector<24x1xf32>
    %22 = arith.mulf %16, %16 : vector<24x1xf32>
    %23 = arith.subf %21, %22 : vector<24x1xf32>
    %cst_16 = arith.constant 0.000000e+00 : f32
    %24 = vector.broadcast %cst_16 : f32 to vector<24x1xf32>
    %25 = arith.maximumf %23, %24 : vector<24x1xf32>
    %26 = vector.broadcast %16 : vector<24x1xf32> to vector<24x128xf32>
    %27 = arith.subf %10, %26 : vector<24x128xf32>
    %cst_17 = arith.constant 9.99999974E-6 : f32
    %28 = vector.broadcast %cst_17 : f32 to vector<24x1xf32>
    %29 = arith.addf %25, %28 : vector<24x1xf32>
    %30 = math.rsqrt %29 : vector<24x1xf32>
    %31 = vector.broadcast %30 : vector<24x1xf32> to vector<24x128xf32>
    %32 = arith.mulf %27, %31 : vector<24x128xf32>
    %33 = vector.broadcast %11 : vector<1x128xf32> to vector<24x128xf32>
    %34 = arith.mulf %32, %33 : vector<24x128xf32>
    %35 = vector.broadcast %12 : vector<1x128xf32> to vector<24x128xf32>
    %36 = arith.addf %34, %35 : vector<24x128xf32>
    %cst_18 = arith.constant 0.000000e+00 : f32
    %37 = vector.broadcast %cst_18 : f32 to vector<24x128xf32>
    %38 = arith.maximumf %36, %37 : vector<24x128xf32>
    %c0_19 = arith.constant 0 : index
    %c0_20 = arith.constant 0 : index
    %39 = vector.load %arg7[%c0_19, %c0_20] : memref<128x128xf32, #tpu.memory_space<vmem>>, vector<128x128xf32>
    %40 = arith.truncf %38 : vector<24x128xf32> to vector<24x128xbf16>
    %41 = arith.truncf %39 : vector<128x128xf32> to vector<128x128xbf16>
    %cst_21 = arith.constant dense<0.000000e+00> : vector<24x128xf32>
    %42 = tpu.matmul %40, %41, %cst_21 {dimension_numbers = #tpu.dot_dimension_numbers<[1], [0], [0], [1], [0, 0, 1, 1], [], []>} : vector<24x128xbf16>, vector<128x128xbf16>, vector<24x128xf32> -> vector<24x128xf32>
    %c0_22 = arith.constant 0 : index
    %c0_23 = arith.constant 0 : index
    %43 = vector.load %arg8[%c0_22, %c0_23] : memref<1x128xf32, #tpu.memory_space<vmem>>, vector<1x128xf32>
    %c0_24 = arith.constant 0 : index
    %c0_25 = arith.constant 0 : index
    %44 = vector.load %arg9[%c0_24, %c0_25] : memref<1x128xf32, #tpu.memory_space<vmem>>, vector<1x128xf32>
    %cst_26 = arith.constant dense<0.000000e+00> : vector<24xf32>
    %45 = vector.multi_reduction <add>, %42, %cst_26 [1] : vector<24x128xf32> to vector<24xf32>
    %46 = vector.shape_cast %45 : vector<24xf32> to vector<24x1xf32>
    %cst_27 = arith.constant 1.280000e+02 : f32
    %47 = vector.broadcast %cst_27 : f32 to vector<24x1xf32>
    %48 = arith.divf %46, %47 : vector<24x1xf32>
    %49 = arith.mulf %42, %42 : vector<24x128xf32>
    %cst_28 = arith.constant dense<0.000000e+00> : vector<24xf32>
    %50 = vector.multi_reduction <add>, %49, %cst_28 [1] : vector<24x128xf32> to vector<24xf32>
    %51 = vector.shape_cast %50 : vector<24xf32> to vector<24x1xf32>
    %cst_29 = arith.constant 1.280000e+02 : f32
    %52 = vector.broadcast %cst_29 : f32 to vector<24x1xf32>
    %53 = arith.divf %51, %52 : vector<24x1xf32>
    %54 = arith.mulf %48, %48 : vector<24x1xf32>
    %55 = arith.subf %53, %54 : vector<24x1xf32>
    %cst_30 = arith.constant 0.000000e+00 : f32
    %56 = vector.broadcast %cst_30 : f32 to vector<24x1xf32>
    %57 = arith.maximumf %55, %56 : vector<24x1xf32>
    %58 = vector.broadcast %48 : vector<24x1xf32> to vector<24x128xf32>
    %59 = arith.subf %42, %58 : vector<24x128xf32>
    %cst_31 = arith.constant 9.99999974E-6 : f32
    %60 = vector.broadcast %cst_31 : f32 to vector<24x1xf32>
    %61 = arith.addf %57, %60 : vector<24x1xf32>
    %62 = math.rsqrt %61 : vector<24x1xf32>
    %63 = vector.broadcast %62 : vector<24x1xf32> to vector<24x128xf32>
    %64 = arith.mulf %59, %63 : vector<24x128xf32>
    %65 = vector.broadcast %43 : vector<1x128xf32> to vector<24x128xf32>
    %66 = arith.mulf %64, %65 : vector<24x128xf32>
    %67 = vector.broadcast %44 : vector<1x128xf32> to vector<24x128xf32>
    %68 = arith.addf %66, %67 : vector<24x128xf32>
    %cst_32 = arith.constant 0.000000e+00 : f32
    %69 = vector.broadcast %cst_32 : f32 to vector<24x128xf32>
    %70 = arith.maximumf %68, %69 : vector<24x128xf32>
    %c0_33 = arith.constant 0 : index
    %c0_34 = arith.constant 0 : index
    %71 = vector.load %arg10[%c0_33, %c0_34] : memref<128x128xf32, #tpu.memory_space<vmem>>, vector<128x128xf32>
    %72 = arith.truncf %70 : vector<24x128xf32> to vector<24x128xbf16>
    %73 = arith.truncf %71 : vector<128x128xf32> to vector<128x128xbf16>
    %cst_35 = arith.constant dense<0.000000e+00> : vector<24x128xf32>
    %74 = tpu.matmul %72, %73, %cst_35 {dimension_numbers = #tpu.dot_dimension_numbers<[1], [0], [0], [1], [0, 0, 1, 1], [], []>} : vector<24x128xbf16>, vector<128x128xbf16>, vector<24x128xf32> -> vector<24x128xf32>
    %c0_36 = arith.constant 0 : index
    %c0_37 = arith.constant 0 : index
    %75 = vector.load %arg11[%c0_36, %c0_37] : memref<1x128xf32, #tpu.memory_space<vmem>>, vector<1x128xf32>
    %c0_38 = arith.constant 0 : index
    %c0_39 = arith.constant 0 : index
    %76 = vector.load %arg12[%c0_38, %c0_39] : memref<1x128xf32, #tpu.memory_space<vmem>>, vector<1x128xf32>
    %cst_40 = arith.constant dense<0.000000e+00> : vector<24xf32>
    %77 = vector.multi_reduction <add>, %74, %cst_40 [1] : vector<24x128xf32> to vector<24xf32>
    %78 = vector.shape_cast %77 : vector<24xf32> to vector<24x1xf32>
    %cst_41 = arith.constant 1.280000e+02 : f32
    %79 = vector.broadcast %cst_41 : f32 to vector<24x1xf32>
    %80 = arith.divf %78, %79 : vector<24x1xf32>
    %81 = arith.mulf %74, %74 : vector<24x128xf32>
    %cst_42 = arith.constant dense<0.000000e+00> : vector<24xf32>
    %82 = vector.multi_reduction <add>, %81, %cst_42 [1] : vector<24x128xf32> to vector<24xf32>
    %83 = vector.shape_cast %82 : vector<24xf32> to vector<24x1xf32>
    %cst_43 = arith.constant 1.280000e+02 : f32
    %84 = vector.broadcast %cst_43 : f32 to vector<24x1xf32>
    %85 = arith.divf %83, %84 : vector<24x1xf32>
    %86 = arith.mulf %80, %80 : vector<24x1xf32>
    %87 = arith.subf %85, %86 : vector<24x1xf32>
    %cst_44 = arith.constant 0.000000e+00 : f32
    %88 = vector.broadcast %cst_44 : f32 to vector<24x1xf32>
    %89 = arith.maximumf %87, %88 : vector<24x1xf32>
    %90 = vector.broadcast %80 : vector<24x1xf32> to vector<24x128xf32>
    %91 = arith.subf %74, %90 : vector<24x128xf32>
    %cst_45 = arith.constant 9.99999974E-6 : f32
    %92 = vector.broadcast %cst_45 : f32 to vector<24x1xf32>
    %93 = arith.addf %89, %92 : vector<24x1xf32>
    %94 = math.rsqrt %93 : vector<24x1xf32>
    %95 = vector.broadcast %94 : vector<24x1xf32> to vector<24x128xf32>
    %96 = arith.mulf %91, %95 : vector<24x128xf32>
    %97 = vector.broadcast %75 : vector<1x128xf32> to vector<24x128xf32>
    %98 = arith.mulf %96, %97 : vector<24x128xf32>
    %99 = vector.broadcast %76 : vector<1x128xf32> to vector<24x128xf32>
    %100 = arith.addf %98, %99 : vector<24x128xf32>
    %101 = arith.addf %100, %0 : vector<24x128xf32>
    %cst_46 = arith.constant 0.000000e+00 : f32
    %102 = vector.broadcast %cst_46 : f32 to vector<24x128xf32>
    %103 = arith.maximumf %101, %102 : vector<24x128xf32>
    %c0_47 = arith.constant 0 : index
    %c0_48 = arith.constant 0 : index
    %104 = vector.load %arg13[%c0_47, %c0_48] : memref<24x128xf32, #tpu.memory_space<vmem>>, vector<24x128xf32>
    tpu.vector_store %arg13[%c0_47, %c0_48], %103 {strides = array<i32>} : memref<24x128xf32, #tpu.memory_space<vmem>>, vector<24x128xf32>,
    return
  }
  func.func @transform_0(%arg0: i32) -> (i32, i32) {
    %c0_i32 = arith.constant 0 : i32
    %c0_i32_0 = arith.constant 0 : i32
    return %arg0, %c0_i32 : i32, i32
  }
  func.func @transform_1(%arg0: i32) -> (i32, i32) {
    %c0_i32 = arith.constant 0 : i32
    %c0_i32_0 = arith.constant 0 : i32
    return %arg0, %c0_i32 : i32, i32
  }
  func.func @transform_2(%arg0: i32) -> (i32, i32) {
    %c0_i32 = arith.constant 0 : i32
    %c0_i32_0 = arith.constant 0 : i32
    %c0_i32_1 = arith.constant 0 : i32
    return %c0_i32, %c0_i32_0 : i32, i32
  }
  func.func @transform_3(%arg0: i32) -> (i32, i32) {
    %c0_i32 = arith.constant 0 : i32
    %c0_i32_0 = arith.constant 0 : i32
    %c0_i32_1 = arith.constant 0 : i32
    return %c0_i32, %c0_i32_0 : i32, i32
  }
  func.func @transform_4(%arg0: i32) -> (i32, i32) {
    %c0_i32 = arith.constant 0 : i32
    %c0_i32_0 = arith.constant 0 : i32
    %c0_i32_1 = arith.constant 0 : i32
    return %c0_i32, %c0_i32_0 : i32, i32
  }
  func.func @transform_5(%arg0: i32) -> (i32, i32) {
    %c0_i32 = arith.constant 0 : i32
    %c0_i32_0 = arith.constant 0 : i32
    %c0_i32_1 = arith.constant 0 : i32
    return %c0_i32, %c0_i32_0 : i32, i32
  }
  func.func @transform_6(%arg0: i32) -> (i32, i32) {
    %c0_i32 = arith.constant 0 : i32
    %c0_i32_0 = arith.constant 0 : i32
    %c0_i32_1 = arith.constant 0 : i32
    return %c0_i32, %c0_i32_0 : i32, i32
  }
  func.func @transform_7(%arg0: i32) -> (i32, i32) {
    %c0_i32 = arith.constant 0 : i32
    %c0_i32_0 = arith.constant 0 : i32
    %c0_i32_1 = arith.constant 0 : i32
    return %c0_i32, %c0_i32_0 : i32, i32
  }
  func.func @transform_8(%arg0: i32) -> (i32, i32) {
    %c0_i32 = arith.constant 0 : i32
    %c0_i32_0 = arith.constant 0 : i32
    %c0_i32_1 = arith.constant 0 : i32
    return %c0_i32, %c0_i32_0 : i32, i32
  }
  func.func @transform_9(%arg0: i32) -> (i32, i32) {
    %c0_i32 = arith.constant 0 : i32
    %c0_i32_0 = arith.constant 0 : i32
    %c0_i32_1 = arith.constant 0 : i32
    return %c0_i32, %c0_i32_0 : i32, i32
  }
  func.func @transform_10(%arg0: i32) -> (i32, i32) {
    %c0_i32 = arith.constant 0 : i32
    %c0_i32_0 = arith.constant 0 : i32
    %c0_i32_1 = arith.constant 0 : i32
    return %c0_i32, %c0_i32_0 : i32, i32
  }
  func.func @transform_11(%arg0: i32) -> (i32, i32) {
    %c0_i32 = arith.constant 0 : i32
    %c0_i32_0 = arith.constant 0 : i32
    %c0_i32_1 = arith.constant 0 : i32
    return %c0_i32, %c0_i32_0 : i32, i32
  }
  func.func @transform_12(%arg0: i32) -> (i32, i32) {
    %c0_i32 = arith.constant 0 : i32
    %c0_i32_0 = arith.constant 0 : i32
    return %arg0, %c0_i32 : i32, i32
  }
}

module attributes {stable_mosaic.version = 11 : i64} {
  func.func @_pair_kernel(%arg0: i32, %arg1: i32, %arg2: memref<8x8xf32, #tpu.memory_space<vmem>>, %arg3: memref<24x8xf32, #tpu.memory_space<vmem>>, %arg4: memref<8x128xf32, #tpu.memory_space<vmem>>, %arg5: memref<1x24x8xf32, #tpu.memory_space<vmem>>, %arg6: memref<8x128xf32, #tpu.memory_space<vmem>>, %arg7: memref<1x128xf32, #tpu.memory_space<vmem>>, %arg8: memref<128x128xf32, #tpu.memory_space<vmem>>, %arg9: memref<128x128xf32, #tpu.memory_space<vmem>>, %arg10: memref<1x128xf32, #tpu.memory_space<vmem>>, %arg11: memref<1x128xf32, #tpu.memory_space<vmem>>, %arg12: memref<24x128xf32, #tpu.memory_space<vmem>>) attributes {dimension_semantics = [#tpu.dimension_semantics<parallel>, #tpu.dimension_semantics<arbitrary>], iteration_bounds = array<i64: 1, 2>, scalar_prefetch = 0 : i64, scratch_operands = 0 : i64, tpu.core_type = #tpu.core_type<tc>, window_params = [{transform_indices = @transform_0, window_bounds = array<i64: 8, 8>}, {transform_indices = @transform_1, window_bounds = array<i64: 24, 8>}, {transform_indices = @transform_2, window_bounds = array<i64: 8, 128>}, {transform_indices = @transform_3, window_bounds = array<i64: 1, 24, 8>}, {pipeline_mode = #tpu.pipeline_mode<synchronous>, transform_indices = @transform_4, window_bounds = array<i64: 8, 128>}, {pipeline_mode = #tpu.pipeline_mode<synchronous>, transform_indices = @transform_5, window_bounds = array<i64: 1, 128>}, {pipeline_mode = #tpu.pipeline_mode<synchronous>, transform_indices = @transform_6, window_bounds = array<i64: 128, 128>}, {pipeline_mode = #tpu.pipeline_mode<synchronous>, transform_indices = @transform_7, window_bounds = array<i64: 128, 128>}, {pipeline_mode = #tpu.pipeline_mode<synchronous>, transform_indices = @transform_8, window_bounds = array<i64: 1, 128>}, {pipeline_mode = #tpu.pipeline_mode<synchronous>, transform_indices = @transform_9, window_bounds = array<i64: 1, 128>}, {transform_indices = @transform_10, window_bounds = array<i64: 24, 128>}]} {
    %c0_i32 = arith.constant 0 : i32
    %0 = arith.cmpi eq, %arg1, %c0_i32 : i32
    %1 = arith.extui %0 : i1 to i32
    %c0_i32_0 = arith.constant 0 : i32
    %2 = arith.cmpi ne, %1, %c0_i32_0 : i32
    scf.if %2 {
      %cst_100 = arith.constant 0.000000e+00 : f32
      %346 = vector.broadcast %cst_100 : f32 to vector<24x128xf32>
      %c0_101 = arith.constant 0 : index
      %c0_102 = arith.constant 0 : index
      %347 = vector.load %arg12[%c0_101, %c0_102] : memref<24x128xf32, #tpu.memory_space<vmem>>, vector<24x128xf32>
      tpu.vector_store %arg12[%c0_101, %c0_102], %346 {strides = array<i32>} : memref<24x128xf32, #tpu.memory_space<vmem>>, vector<24x128xf32>,
    } else {
    }
    %c0 = arith.constant 0 : index
    %c0_1 = arith.constant 0 : index
    %3 = vector.load %arg6[%c0, %c0_1] : memref<8x128xf32, #tpu.memory_space<vmem>>, vector<8x128xf32>
    %c0_2 = arith.constant 0 : index
    %c0_3 = arith.constant 0 : index
    %4 = vector.load %arg2[%c0_2, %c0_3] : memref<8x8xf32, #tpu.memory_space<vmem>>, vector<8x8xf32>
    %cst = arith.constant dense<0.000000e+00> : vector<8x128xf32>
    %5 = tpu.matmul %4, %3, %cst {dimension_numbers = #tpu.dot_dimension_numbers<[1], [0], [0], [1], [0, 0, 1, 1], [], []>} : vector<8x8xf32>, vector<8x128xf32>, vector<8x128xf32> -> vector<8x128xf32>
    %c0_4 = arith.constant 0 : index
    %c0_5 = arith.constant 0 : index
    %6 = vector.load %arg7[%c0_4, %c0_5] : memref<1x128xf32, #tpu.memory_space<vmem>>, vector<1x128xf32>
    %7 = vector.broadcast %6 : vector<1x128xf32> to vector<8x128xf32>
    %8 = arith.addf %5, %7 : vector<8x128xf32>
    %c0_6 = arith.constant 0 : index
    %c0_7 = arith.constant 0 : index
    %9 = vector.load %arg3[%c0_6, %c0_7] : memref<24x8xf32, #tpu.memory_space<vmem>>, vector<24x8xf32>
    %cst_8 = arith.constant dense<0.000000e+00> : vector<24x128xf32>
    %10 = tpu.matmul %9, %3, %cst_8 {dimension_numbers = #tpu.dot_dimension_numbers<[1], [0], [0], [1], [0, 0, 1, 1], [], []>} : vector<24x8xf32>, vector<8x128xf32>, vector<24x128xf32> -> vector<24x128xf32>
    %c0_9 = arith.constant 0 : index
    %c0_10 = arith.constant 0 : index
    %11 = vector.load %arg4[%c0_9, %c0_10] : memref<8x128xf32, #tpu.memory_space<vmem>>, vector<8x128xf32>
    %c0_11 = arith.constant 0 : index
    %c0_12 = arith.constant 0 : index
    %12 = vector.load %arg8[%c0_11, %c0_12] : memref<128x128xf32, #tpu.memory_space<vmem>>, vector<128x128xf32>
    %13 = arith.truncf %11 : vector<8x128xf32> to vector<8x128xbf16>
    %14 = arith.truncf %12 : vector<128x128xf32> to vector<128x128xbf16>
    %cst_13 = arith.constant dense<0.000000e+00> : vector<8x128xf32>
    %15 = tpu.matmul %13, %14, %cst_13 {dimension_numbers = #tpu.dot_dimension_numbers<[1], [0], [0], [1], [0, 0, 1, 1], [], []>} : vector<8x128xbf16>, vector<128x128xbf16>, vector<8x128xf32> -> vector<8x128xf32>
    %c0_14 = arith.constant 0 : index
    %c0_15 = arith.constant 0 : index
    %16 = vector.load %arg9[%c0_14, %c0_15] : memref<128x128xf32, #tpu.memory_space<vmem>>, vector<128x128xf32>
    %17 = arith.truncf %16 : vector<128x128xf32> to vector<128x128xbf16>
    %c0_16 = arith.constant 0 : index
    %c0_17 = arith.constant 0 : index
    %18 = vector.load %arg10[%c0_16, %c0_17] : memref<1x128xf32, #tpu.memory_space<vmem>>, vector<1x128xf32>
    %c0_18 = arith.constant 0 : index
    %c0_19 = arith.constant 0 : index
    %19 = vector.load %arg11[%c0_18, %c0_19] : memref<1x128xf32, #tpu.memory_space<vmem>>, vector<1x128xf32>
    %c0_20 = arith.constant 0 : index
    %c0_21 = arith.constant 0 : index
    %c0_22 = arith.constant 0 : index
    %20 = vector.load %arg5[%c0_20, %c0_21, %c0_22] : memref<1x24x8xf32, #tpu.memory_space<vmem>>, vector<1x24x8xf32>
    %21 = vector.shape_cast %20 : vector<1x24x8xf32> to vector<24x8xf32>
    %cst_23 = arith.constant 0.000000e+00 : f32
    %22 = vector.broadcast %cst_23 : f32 to vector<24x128xf32>
    %23 = vector.extract_strided_slice %8 {offsets = [0, 0], sizes = [1, 128], strides = [1, 1]} : vector<8x128xf32> to vector<1x128xf32>
    %24 = vector.broadcast %23 : vector<1x128xf32> to vector<24x128xf32>
    %25 = arith.subf %24, %10 : vector<24x128xf32>
    %cst_24 = arith.constant 0.000000e+00 : f32
    %26 = vector.broadcast %cst_24 : f32 to vector<24x128xf32>
    %27 = arith.maximumf %25, %26 : vector<24x128xf32>
    %28 = arith.truncf %27 : vector<24x128xf32> to vector<24x128xbf16>
    %cst_25 = arith.constant dense<0.000000e+00> : vector<24x128xf32>
    %29 = tpu.matmul %28, %17, %cst_25 {dimension_numbers = #tpu.dot_dimension_numbers<[1], [0], [0], [1], [0, 0, 1, 1], [], []>} : vector<24x128xbf16>, vector<128x128xbf16>, vector<24x128xf32> -> vector<24x128xf32>
    %30 = vector.extract_strided_slice %15 {offsets = [0, 0], sizes = [1, 128], strides = [1, 1]} : vector<8x128xf32> to vector<1x128xf32>
    %31 = vector.broadcast %30 : vector<1x128xf32> to vector<24x128xf32>
    %32 = arith.addf %29, %31 : vector<24x128xf32>
    %cst_26 = arith.constant dense<0.000000e+00> : vector<24xf32>
    %33 = vector.multi_reduction <add>, %32, %cst_26 [1] : vector<24x128xf32> to vector<24xf32>
    %34 = vector.shape_cast %33 : vector<24xf32> to vector<24x1xf32>
    %cst_27 = arith.constant 1.280000e+02 : f32
    %35 = vector.broadcast %cst_27 : f32 to vector<24x1xf32>
    %36 = arith.divf %34, %35 : vector<24x1xf32>
    %37 = arith.mulf %32, %32 : vector<24x128xf32>
    %cst_28 = arith.constant dense<0.000000e+00> : vector<24xf32>
    %38 = vector.multi_reduction <add>, %37, %cst_28 [1] : vector<24x128xf32> to vector<24xf32>
    %39 = vector.shape_cast %38 : vector<24xf32> to vector<24x1xf32>
    %cst_29 = arith.constant 1.280000e+02 : f32
    %40 = vector.broadcast %cst_29 : f32 to vector<24x1xf32>
    %41 = arith.divf %39, %40 : vector<24x1xf32>
    %42 = arith.mulf %36, %36 : vector<24x1xf32>
    %43 = arith.subf %41, %42 : vector<24x1xf32>
    %cst_30 = arith.constant 0.000000e+00 : f32
    %44 = vector.broadcast %cst_30 : f32 to vector<24x1xf32>
    %45 = arith.maximumf %43, %44 : vector<24x1xf32>
    %46 = vector.broadcast %36 : vector<24x1xf32> to vector<24x128xf32>
    %47 = arith.subf %32, %46 : vector<24x128xf32>
    %cst_31 = arith.constant 9.99999974E-6 : f32
    %48 = vector.broadcast %cst_31 : f32 to vector<24x1xf32>
    %49 = arith.addf %45, %48 : vector<24x1xf32>
    %50 = math.rsqrt %49 : vector<24x1xf32>
    %51 = vector.broadcast %50 : vector<24x1xf32> to vector<24x128xf32>
    %52 = arith.mulf %47, %51 : vector<24x128xf32>
    %53 = vector.broadcast %18 : vector<1x128xf32> to vector<24x128xf32>
    %54 = arith.mulf %52, %53 : vector<24x128xf32>
    %55 = vector.broadcast %19 : vector<1x128xf32> to vector<24x128xf32>
    %56 = arith.addf %54, %55 : vector<24x128xf32>
    %cst_32 = arith.constant 0.000000e+00 : f32
    %57 = vector.broadcast %cst_32 : f32 to vector<24x128xf32>
    %58 = arith.maximumf %56, %57 : vector<24x128xf32>
    %59 = vector.extract_strided_slice %21 {offsets = [0, 0], sizes = [24, 1], strides = [1, 1]} : vector<24x8xf32> to vector<24x1xf32>
    %60 = vector.broadcast %59 : vector<24x1xf32> to vector<24x128xf32>
    %61 = arith.mulf %60, %58 : vector<24x128xf32>
    %62 = arith.addf %22, %61 : vector<24x128xf32>
    %63 = vector.extract_strided_slice %8 {offsets = [1, 0], sizes = [1, 128], strides = [1, 1]} : vector<8x128xf32> to vector<1x128xf32>
    %64 = vector.broadcast %63 : vector<1x128xf32> to vector<24x128xf32>
    %65 = arith.subf %64, %10 : vector<24x128xf32>
    %cst_33 = arith.constant 0.000000e+00 : f32
    %66 = vector.broadcast %cst_33 : f32 to vector<24x128xf32>
    %67 = arith.maximumf %65, %66 : vector<24x128xf32>
    %68 = arith.truncf %67 : vector<24x128xf32> to vector<24x128xbf16>
    %cst_34 = arith.constant dense<0.000000e+00> : vector<24x128xf32>
    %69 = tpu.matmul %68, %17, %cst_34 {dimension_numbers = #tpu.dot_dimension_numbers<[1], [0], [0], [1], [0, 0, 1, 1], [], []>} : vector<24x128xbf16>, vector<128x128xbf16>, vector<24x128xf32> -> vector<24x128xf32>
    %70 = vector.extract_strided_slice %15 {offsets = [1, 0], sizes = [1, 128], strides = [1, 1]} : vector<8x128xf32> to vector<1x128xf32>
    %71 = vector.broadcast %70 : vector<1x128xf32> to vector<24x128xf32>
    %72 = arith.addf %69, %71 : vector<24x128xf32>
    %cst_35 = arith.constant dense<0.000000e+00> : vector<24xf32>
    %73 = vector.multi_reduction <add>, %72, %cst_35 [1] : vector<24x128xf32> to vector<24xf32>
    %74 = vector.shape_cast %73 : vector<24xf32> to vector<24x1xf32>
    %cst_36 = arith.constant 1.280000e+02 : f32
    %75 = vector.broadcast %cst_36 : f32 to vector<24x1xf32>
    %76 = arith.divf %74, %75 : vector<24x1xf32>
    %77 = arith.mulf %72, %72 : vector<24x128xf32>
    %cst_37 = arith.constant dense<0.000000e+00> : vector<24xf32>
    %78 = vector.multi_reduction <add>, %77, %cst_37 [1] : vector<24x128xf32> to vector<24xf32>
    %79 = vector.shape_cast %78 : vector<24xf32> to vector<24x1xf32>
    %cst_38 = arith.constant 1.280000e+02 : f32
    %80 = vector.broadcast %cst_38 : f32 to vector<24x1xf32>
    %81 = arith.divf %79, %80 : vector<24x1xf32>
    %82 = arith.mulf %76, %76 : vector<24x1xf32>
    %83 = arith.subf %81, %82 : vector<24x1xf32>
    %cst_39 = arith.constant 0.000000e+00 : f32
    %84 = vector.broadcast %cst_39 : f32 to vector<24x1xf32>
    %85 = arith.maximumf %83, %84 : vector<24x1xf32>
    %86 = vector.broadcast %76 : vector<24x1xf32> to vector<24x128xf32>
    %87 = arith.subf %72, %86 : vector<24x128xf32>
    %cst_40 = arith.constant 9.99999974E-6 : f32
    %88 = vector.broadcast %cst_40 : f32 to vector<24x1xf32>
    %89 = arith.addf %85, %88 : vector<24x1xf32>
    %90 = math.rsqrt %89 : vector<24x1xf32>
    %91 = vector.broadcast %90 : vector<24x1xf32> to vector<24x128xf32>
    %92 = arith.mulf %87, %91 : vector<24x128xf32>
    %93 = vector.broadcast %18 : vector<1x128xf32> to vector<24x128xf32>
    %94 = arith.mulf %92, %93 : vector<24x128xf32>
    %95 = vector.broadcast %19 : vector<1x128xf32> to vector<24x128xf32>
    %96 = arith.addf %94, %95 : vector<24x128xf32>
    %cst_41 = arith.constant 0.000000e+00 : f32
    %97 = vector.broadcast %cst_41 : f32 to vector<24x128xf32>
    %98 = arith.maximumf %96, %97 : vector<24x128xf32>
    %99 = vector.extract_strided_slice %21 {offsets = [0, 1], sizes = [24, 1], strides = [1, 1]} : vector<24x8xf32> to vector<24x1xf32>
    %100 = vector.broadcast %99 : vector<24x1xf32> to vector<24x128xf32>
    %101 = arith.mulf %100, %98 : vector<24x128xf32>
    %102 = arith.addf %62, %101 : vector<24x128xf32>
    %103 = vector.extract_strided_slice %8 {offsets = [2, 0], sizes = [1, 128], strides = [1, 1]} : vector<8x128xf32> to vector<1x128xf32>
    %104 = vector.broadcast %103 : vector<1x128xf32> to vector<24x128xf32>
    %105 = arith.subf %104, %10 : vector<24x128xf32>
    %cst_42 = arith.constant 0.000000e+00 : f32
    %106 = vector.broadcast %cst_42 : f32 to vector<24x128xf32>
    %107 = arith.maximumf %105, %106 : vector<24x128xf32>
    %108 = arith.truncf %107 : vector<24x128xf32> to vector<24x128xbf16>
    %cst_43 = arith.constant dense<0.000000e+00> : vector<24x128xf32>
    %109 = tpu.matmul %108, %17, %cst_43 {dimension_numbers = #tpu.dot_dimension_numbers<[1], [0], [0], [1], [0, 0, 1, 1], [], []>} : vector<24x128xbf16>, vector<128x128xbf16>, vector<24x128xf32> -> vector<24x128xf32>
    %110 = vector.extract_strided_slice %15 {offsets = [2, 0], sizes = [1, 128], strides = [1, 1]} : vector<8x128xf32> to vector<1x128xf32>
    %111 = vector.broadcast %110 : vector<1x128xf32> to vector<24x128xf32>
    %112 = arith.addf %109, %111 : vector<24x128xf32>
    %cst_44 = arith.constant dense<0.000000e+00> : vector<24xf32>
    %113 = vector.multi_reduction <add>, %112, %cst_44 [1] : vector<24x128xf32> to vector<24xf32>
    %114 = vector.shape_cast %113 : vector<24xf32> to vector<24x1xf32>
    %cst_45 = arith.constant 1.280000e+02 : f32
    %115 = vector.broadcast %cst_45 : f32 to vector<24x1xf32>
    %116 = arith.divf %114, %115 : vector<24x1xf32>
    %117 = arith.mulf %112, %112 : vector<24x128xf32>
    %cst_46 = arith.constant dense<0.000000e+00> : vector<24xf32>
    %118 = vector.multi_reduction <add>, %117, %cst_46 [1] : vector<24x128xf32> to vector<24xf32>
    %119 = vector.shape_cast %118 : vector<24xf32> to vector<24x1xf32>
    %cst_47 = arith.constant 1.280000e+02 : f32
    %120 = vector.broadcast %cst_47 : f32 to vector<24x1xf32>
    %121 = arith.divf %119, %120 : vector<24x1xf32>
    %122 = arith.mulf %116, %116 : vector<24x1xf32>
    %123 = arith.subf %121, %122 : vector<24x1xf32>
    %cst_48 = arith.constant 0.000000e+00 : f32
    %124 = vector.broadcast %cst_48 : f32 to vector<24x1xf32>
    %125 = arith.maximumf %123, %124 : vector<24x1xf32>
    %126 = vector.broadcast %116 : vector<24x1xf32> to vector<24x128xf32>
    %127 = arith.subf %112, %126 : vector<24x128xf32>
    %cst_49 = arith.constant 9.99999974E-6 : f32
    %128 = vector.broadcast %cst_49 : f32 to vector<24x1xf32>
    %129 = arith.addf %125, %128 : vector<24x1xf32>
    %130 = math.rsqrt %129 : vector<24x1xf32>
    %131 = vector.broadcast %130 : vector<24x1xf32> to vector<24x128xf32>
    %132 = arith.mulf %127, %131 : vector<24x128xf32>
    %133 = vector.broadcast %18 : vector<1x128xf32> to vector<24x128xf32>
    %134 = arith.mulf %132, %133 : vector<24x128xf32>
    %135 = vector.broadcast %19 : vector<1x128xf32> to vector<24x128xf32>
    %136 = arith.addf %134, %135 : vector<24x128xf32>
    %cst_50 = arith.constant 0.000000e+00 : f32
    %137 = vector.broadcast %cst_50 : f32 to vector<24x128xf32>
    %138 = arith.maximumf %136, %137 : vector<24x128xf32>
    %139 = vector.extract_strided_slice %21 {offsets = [0, 2], sizes = [24, 1], strides = [1, 1]} : vector<24x8xf32> to vector<24x1xf32>
    %140 = vector.broadcast %139 : vector<24x1xf32> to vector<24x128xf32>
    %141 = arith.mulf %140, %138 : vector<24x128xf32>
    %142 = arith.addf %102, %141 : vector<24x128xf32>
    %143 = vector.extract_strided_slice %8 {offsets = [3, 0], sizes = [1, 128], strides = [1, 1]} : vector<8x128xf32> to vector<1x128xf32>
    %144 = vector.broadcast %143 : vector<1x128xf32> to vector<24x128xf32>
    %145 = arith.subf %144, %10 : vector<24x128xf32>
    %cst_51 = arith.constant 0.000000e+00 : f32
    %146 = vector.broadcast %cst_51 : f32 to vector<24x128xf32>
    %147 = arith.maximumf %145, %146 : vector<24x128xf32>
    %148 = arith.truncf %147 : vector<24x128xf32> to vector<24x128xbf16>
    %cst_52 = arith.constant dense<0.000000e+00> : vector<24x128xf32>
    %149 = tpu.matmul %148, %17, %cst_52 {dimension_numbers = #tpu.dot_dimension_numbers<[1], [0], [0], [1], [0, 0, 1, 1], [], []>} : vector<24x128xbf16>, vector<128x128xbf16>, vector<24x128xf32> -> vector<24x128xf32>
    %150 = vector.extract_strided_slice %15 {offsets = [3, 0], sizes = [1, 128], strides = [1, 1]} : vector<8x128xf32> to vector<1x128xf32>
    %151 = vector.broadcast %150 : vector<1x128xf32> to vector<24x128xf32>
    %152 = arith.addf %149, %151 : vector<24x128xf32>
    %cst_53 = arith.constant dense<0.000000e+00> : vector<24xf32>
    %153 = vector.multi_reduction <add>, %152, %cst_53 [1] : vector<24x128xf32> to vector<24xf32>
    %154 = vector.shape_cast %153 : vector<24xf32> to vector<24x1xf32>
    %cst_54 = arith.constant 1.280000e+02 : f32
    %155 = vector.broadcast %cst_54 : f32 to vector<24x1xf32>
    %156 = arith.divf %154, %155 : vector<24x1xf32>
    %157 = arith.mulf %152, %152 : vector<24x128xf32>
    %cst_55 = arith.constant dense<0.000000e+00> : vector<24xf32>
    %158 = vector.multi_reduction <add>, %157, %cst_55 [1] : vector<24x128xf32> to vector<24xf32>
    %159 = vector.shape_cast %158 : vector<24xf32> to vector<24x1xf32>
    %cst_56 = arith.constant 1.280000e+02 : f32
    %160 = vector.broadcast %cst_56 : f32 to vector<24x1xf32>
    %161 = arith.divf %159, %160 : vector<24x1xf32>
    %162 = arith.mulf %156, %156 : vector<24x1xf32>
    %163 = arith.subf %161, %162 : vector<24x1xf32>
    %cst_57 = arith.constant 0.000000e+00 : f32
    %164 = vector.broadcast %cst_57 : f32 to vector<24x1xf32>
    %165 = arith.maximumf %163, %164 : vector<24x1xf32>
    %166 = vector.broadcast %156 : vector<24x1xf32> to vector<24x128xf32>
    %167 = arith.subf %152, %166 : vector<24x128xf32>
    %cst_58 = arith.constant 9.99999974E-6 : f32
    %168 = vector.broadcast %cst_58 : f32 to vector<24x1xf32>
    %169 = arith.addf %165, %168 : vector<24x1xf32>
    %170 = math.rsqrt %169 : vector<24x1xf32>
    %171 = vector.broadcast %170 : vector<24x1xf32> to vector<24x128xf32>
    %172 = arith.mulf %167, %171 : vector<24x128xf32>
    %173 = vector.broadcast %18 : vector<1x128xf32> to vector<24x128xf32>
    %174 = arith.mulf %172, %173 : vector<24x128xf32>
    %175 = vector.broadcast %19 : vector<1x128xf32> to vector<24x128xf32>
    %176 = arith.addf %174, %175 : vector<24x128xf32>
    %cst_59 = arith.constant 0.000000e+00 : f32
    %177 = vector.broadcast %cst_59 : f32 to vector<24x128xf32>
    %178 = arith.maximumf %176, %177 : vector<24x128xf32>
    %179 = vector.extract_strided_slice %21 {offsets = [0, 3], sizes = [24, 1], strides = [1, 1]} : vector<24x8xf32> to vector<24x1xf32>
    %180 = vector.broadcast %179 : vector<24x1xf32> to vector<24x128xf32>
    %181 = arith.mulf %180, %178 : vector<24x128xf32>
    %182 = arith.addf %142, %181 : vector<24x128xf32>
    %183 = vector.extract_strided_slice %8 {offsets = [4, 0], sizes = [1, 128], strides = [1, 1]} : vector<8x128xf32> to vector<1x128xf32>
    %184 = vector.broadcast %183 : vector<1x128xf32> to vector<24x128xf32>
    %185 = arith.subf %184, %10 : vector<24x128xf32>
    %cst_60 = arith.constant 0.000000e+00 : f32
    %186 = vector.broadcast %cst_60 : f32 to vector<24x128xf32>
    %187 = arith.maximumf %185, %186 : vector<24x128xf32>
    %188 = arith.truncf %187 : vector<24x128xf32> to vector<24x128xbf16>
    %cst_61 = arith.constant dense<0.000000e+00> : vector<24x128xf32>
    %189 = tpu.matmul %188, %17, %cst_61 {dimension_numbers = #tpu.dot_dimension_numbers<[1], [0], [0], [1], [0, 0, 1, 1], [], []>} : vector<24x128xbf16>, vector<128x128xbf16>, vector<24x128xf32> -> vector<24x128xf32>
    %190 = vector.extract_strided_slice %15 {offsets = [4, 0], sizes = [1, 128], strides = [1, 1]} : vector<8x128xf32> to vector<1x128xf32>
    %191 = vector.broadcast %190 : vector<1x128xf32> to vector<24x128xf32>
    %192 = arith.addf %189, %191 : vector<24x128xf32>
    %cst_62 = arith.constant dense<0.000000e+00> : vector<24xf32>
    %193 = vector.multi_reduction <add>, %192, %cst_62 [1] : vector<24x128xf32> to vector<24xf32>
    %194 = vector.shape_cast %193 : vector<24xf32> to vector<24x1xf32>
    %cst_63 = arith.constant 1.280000e+02 : f32
    %195 = vector.broadcast %cst_63 : f32 to vector<24x1xf32>
    %196 = arith.divf %194, %195 : vector<24x1xf32>
    %197 = arith.mulf %192, %192 : vector<24x128xf32>
    %cst_64 = arith.constant dense<0.000000e+00> : vector<24xf32>
    %198 = vector.multi_reduction <add>, %197, %cst_64 [1] : vector<24x128xf32> to vector<24xf32>
    %199 = vector.shape_cast %198 : vector<24xf32> to vector<24x1xf32>
    %cst_65 = arith.constant 1.280000e+02 : f32
    %200 = vector.broadcast %cst_65 : f32 to vector<24x1xf32>
    %201 = arith.divf %199, %200 : vector<24x1xf32>
    %202 = arith.mulf %196, %196 : vector<24x1xf32>
    %203 = arith.subf %201, %202 : vector<24x1xf32>
    %cst_66 = arith.constant 0.000000e+00 : f32
    %204 = vector.broadcast %cst_66 : f32 to vector<24x1xf32>
    %205 = arith.maximumf %203, %204 : vector<24x1xf32>
    %206 = vector.broadcast %196 : vector<24x1xf32> to vector<24x128xf32>
    %207 = arith.subf %192, %206 : vector<24x128xf32>
    %cst_67 = arith.constant 9.99999974E-6 : f32
    %208 = vector.broadcast %cst_67 : f32 to vector<24x1xf32>
    %209 = arith.addf %205, %208 : vector<24x1xf32>
    %210 = math.rsqrt %209 : vector<24x1xf32>
    %211 = vector.broadcast %210 : vector<24x1xf32> to vector<24x128xf32>
    %212 = arith.mulf %207, %211 : vector<24x128xf32>
    %213 = vector.broadcast %18 : vector<1x128xf32> to vector<24x128xf32>
    %214 = arith.mulf %212, %213 : vector<24x128xf32>
    %215 = vector.broadcast %19 : vector<1x128xf32> to vector<24x128xf32>
    %216 = arith.addf %214, %215 : vector<24x128xf32>
    %cst_68 = arith.constant 0.000000e+00 : f32
    %217 = vector.broadcast %cst_68 : f32 to vector<24x128xf32>
    %218 = arith.maximumf %216, %217 : vector<24x128xf32>
    %219 = vector.extract_strided_slice %21 {offsets = [0, 4], sizes = [24, 1], strides = [1, 1]} : vector<24x8xf32> to vector<24x1xf32>
    %220 = vector.broadcast %219 : vector<24x1xf32> to vector<24x128xf32>
    %221 = arith.mulf %220, %218 : vector<24x128xf32>
    %222 = arith.addf %182, %221 : vector<24x128xf32>
    %223 = vector.extract_strided_slice %8 {offsets = [5, 0], sizes = [1, 128], strides = [1, 1]} : vector<8x128xf32> to vector<1x128xf32>
    %224 = vector.broadcast %223 : vector<1x128xf32> to vector<24x128xf32>
    %225 = arith.subf %224, %10 : vector<24x128xf32>
    %cst_69 = arith.constant 0.000000e+00 : f32
    %226 = vector.broadcast %cst_69 : f32 to vector<24x128xf32>
    %227 = arith.maximumf %225, %226 : vector<24x128xf32>
    %228 = arith.truncf %227 : vector<24x128xf32> to vector<24x128xbf16>
    %cst_70 = arith.constant dense<0.000000e+00> : vector<24x128xf32>
    %229 = tpu.matmul %228, %17, %cst_70 {dimension_numbers = #tpu.dot_dimension_numbers<[1], [0], [0], [1], [0, 0, 1, 1], [], []>} : vector<24x128xbf16>, vector<128x128xbf16>, vector<24x128xf32> -> vector<24x128xf32>
    %230 = vector.extract_strided_slice %15 {offsets = [5, 0], sizes = [1, 128], strides = [1, 1]} : vector<8x128xf32> to vector<1x128xf32>
    %231 = vector.broadcast %230 : vector<1x128xf32> to vector<24x128xf32>
    %232 = arith.addf %229, %231 : vector<24x128xf32>
    %cst_71 = arith.constant dense<0.000000e+00> : vector<24xf32>
    %233 = vector.multi_reduction <add>, %232, %cst_71 [1] : vector<24x128xf32> to vector<24xf32>
    %234 = vector.shape_cast %233 : vector<24xf32> to vector<24x1xf32>
    %cst_72 = arith.constant 1.280000e+02 : f32
    %235 = vector.broadcast %cst_72 : f32 to vector<24x1xf32>
    %236 = arith.divf %234, %235 : vector<24x1xf32>
    %237 = arith.mulf %232, %232 : vector<24x128xf32>
    %cst_73 = arith.constant dense<0.000000e+00> : vector<24xf32>
    %238 = vector.multi_reduction <add>, %237, %cst_73 [1] : vector<24x128xf32> to vector<24xf32>
    %239 = vector.shape_cast %238 : vector<24xf32> to vector<24x1xf32>
    %cst_74 = arith.constant 1.280000e+02 : f32
    %240 = vector.broadcast %cst_74 : f32 to vector<24x1xf32>
    %241 = arith.divf %239, %240 : vector<24x1xf32>
    %242 = arith.mulf %236, %236 : vector<24x1xf32>
    %243 = arith.subf %241, %242 : vector<24x1xf32>
    %cst_75 = arith.constant 0.000000e+00 : f32
    %244 = vector.broadcast %cst_75 : f32 to vector<24x1xf32>
    %245 = arith.maximumf %243, %244 : vector<24x1xf32>
    %246 = vector.broadcast %236 : vector<24x1xf32> to vector<24x128xf32>
    %247 = arith.subf %232, %246 : vector<24x128xf32>
    %cst_76 = arith.constant 9.99999974E-6 : f32
    %248 = vector.broadcast %cst_76 : f32 to vector<24x1xf32>
    %249 = arith.addf %245, %248 : vector<24x1xf32>
    %250 = math.rsqrt %249 : vector<24x1xf32>
    %251 = vector.broadcast %250 : vector<24x1xf32> to vector<24x128xf32>
    %252 = arith.mulf %247, %251 : vector<24x128xf32>
    %253 = vector.broadcast %18 : vector<1x128xf32> to vector<24x128xf32>
    %254 = arith.mulf %252, %253 : vector<24x128xf32>
    %255 = vector.broadcast %19 : vector<1x128xf32> to vector<24x128xf32>
    %256 = arith.addf %254, %255 : vector<24x128xf32>
    %cst_77 = arith.constant 0.000000e+00 : f32
    %257 = vector.broadcast %cst_77 : f32 to vector<24x128xf32>
    %258 = arith.maximumf %256, %257 : vector<24x128xf32>
    %259 = vector.extract_strided_slice %21 {offsets = [0, 5], sizes = [24, 1], strides = [1, 1]} : vector<24x8xf32> to vector<24x1xf32>
    %260 = vector.broadcast %259 : vector<24x1xf32> to vector<24x128xf32>
    %261 = arith.mulf %260, %258 : vector<24x128xf32>
    %262 = arith.addf %222, %261 : vector<24x128xf32>
    %263 = vector.extract_strided_slice %8 {offsets = [6, 0], sizes = [1, 128], strides = [1, 1]} : vector<8x128xf32> to vector<1x128xf32>
    %264 = vector.broadcast %263 : vector<1x128xf32> to vector<24x128xf32>
    %265 = arith.subf %264, %10 : vector<24x128xf32>
    %cst_78 = arith.constant 0.000000e+00 : f32
    %266 = vector.broadcast %cst_78 : f32 to vector<24x128xf32>
    %267 = arith.maximumf %265, %266 : vector<24x128xf32>
    %268 = arith.truncf %267 : vector<24x128xf32> to vector<24x128xbf16>
    %cst_79 = arith.constant dense<0.000000e+00> : vector<24x128xf32>
    %269 = tpu.matmul %268, %17, %cst_79 {dimension_numbers = #tpu.dot_dimension_numbers<[1], [0], [0], [1], [0, 0, 1, 1], [], []>} : vector<24x128xbf16>, vector<128x128xbf16>, vector<24x128xf32> -> vector<24x128xf32>
    %270 = vector.extract_strided_slice %15 {offsets = [6, 0], sizes = [1, 128], strides = [1, 1]} : vector<8x128xf32> to vector<1x128xf32>
    %271 = vector.broadcast %270 : vector<1x128xf32> to vector<24x128xf32>
    %272 = arith.addf %269, %271 : vector<24x128xf32>
    %cst_80 = arith.constant dense<0.000000e+00> : vector<24xf32>
    %273 = vector.multi_reduction <add>, %272, %cst_80 [1] : vector<24x128xf32> to vector<24xf32>
    %274 = vector.shape_cast %273 : vector<24xf32> to vector<24x1xf32>
    %cst_81 = arith.constant 1.280000e+02 : f32
    %275 = vector.broadcast %cst_81 : f32 to vector<24x1xf32>
    %276 = arith.divf %274, %275 : vector<24x1xf32>
    %277 = arith.mulf %272, %272 : vector<24x128xf32>
    %cst_82 = arith.constant dense<0.000000e+00> : vector<24xf32>
    %278 = vector.multi_reduction <add>, %277, %cst_82 [1] : vector<24x128xf32> to vector<24xf32>
    %279 = vector.shape_cast %278 : vector<24xf32> to vector<24x1xf32>
    %cst_83 = arith.constant 1.280000e+02 : f32
    %280 = vector.broadcast %cst_83 : f32 to vector<24x1xf32>
    %281 = arith.divf %279, %280 : vector<24x1xf32>
    %282 = arith.mulf %276, %276 : vector<24x1xf32>
    %283 = arith.subf %281, %282 : vector<24x1xf32>
    %cst_84 = arith.constant 0.000000e+00 : f32
    %284 = vector.broadcast %cst_84 : f32 to vector<24x1xf32>
    %285 = arith.maximumf %283, %284 : vector<24x1xf32>
    %286 = vector.broadcast %276 : vector<24x1xf32> to vector<24x128xf32>
    %287 = arith.subf %272, %286 : vector<24x128xf32>
    %cst_85 = arith.constant 9.99999974E-6 : f32
    %288 = vector.broadcast %cst_85 : f32 to vector<24x1xf32>
    %289 = arith.addf %285, %288 : vector<24x1xf32>
    %290 = math.rsqrt %289 : vector<24x1xf32>
    %291 = vector.broadcast %290 : vector<24x1xf32> to vector<24x128xf32>
    %292 = arith.mulf %287, %291 : vector<24x128xf32>
    %293 = vector.broadcast %18 : vector<1x128xf32> to vector<24x128xf32>
    %294 = arith.mulf %292, %293 : vector<24x128xf32>
    %295 = vector.broadcast %19 : vector<1x128xf32> to vector<24x128xf32>
    %296 = arith.addf %294, %295 : vector<24x128xf32>
    %cst_86 = arith.constant 0.000000e+00 : f32
    %297 = vector.broadcast %cst_86 : f32 to vector<24x128xf32>
    %298 = arith.maximumf %296, %297 : vector<24x128xf32>
    %299 = vector.extract_strided_slice %21 {offsets = [0, 6], sizes = [24, 1], strides = [1, 1]} : vector<24x8xf32> to vector<24x1xf32>
    %300 = vector.broadcast %299 : vector<24x1xf32> to vector<24x128xf32>
    %301 = arith.mulf %300, %298 : vector<24x128xf32>
    %302 = arith.addf %262, %301 : vector<24x128xf32>
    %303 = vector.extract_strided_slice %8 {offsets = [7, 0], sizes = [1, 128], strides = [1, 1]} : vector<8x128xf32> to vector<1x128xf32>
    %304 = vector.broadcast %303 : vector<1x128xf32> to vector<24x128xf32>
    %305 = arith.subf %304, %10 : vector<24x128xf32>
    %cst_87 = arith.constant 0.000000e+00 : f32
    %306 = vector.broadcast %cst_87 : f32 to vector<24x128xf32>
    %307 = arith.maximumf %305, %306 : vector<24x128xf32>
    %308 = arith.truncf %307 : vector<24x128xf32> to vector<24x128xbf16>
    %cst_88 = arith.constant dense<0.000000e+00> : vector<24x128xf32>
    %309 = tpu.matmul %308, %17, %cst_88 {dimension_numbers = #tpu.dot_dimension_numbers<[1], [0], [0], [1], [0, 0, 1, 1], [], []>} : vector<24x128xbf16>, vector<128x128xbf16>, vector<24x128xf32> -> vector<24x128xf32>
    %310 = vector.extract_strided_slice %15 {offsets = [7, 0], sizes = [1, 128], strides = [1, 1]} : vector<8x128xf32> to vector<1x128xf32>
    %311 = vector.broadcast %310 : vector<1x128xf32> to vector<24x128xf32>
    %312 = arith.addf %309, %311 : vector<24x128xf32>
    %cst_89 = arith.constant dense<0.000000e+00> : vector<24xf32>
    %313 = vector.multi_reduction <add>, %312, %cst_89 [1] : vector<24x128xf32> to vector<24xf32>
    %314 = vector.shape_cast %313 : vector<24xf32> to vector<24x1xf32>
    %cst_90 = arith.constant 1.280000e+02 : f32
    %315 = vector.broadcast %cst_90 : f32 to vector<24x1xf32>
    %316 = arith.divf %314, %315 : vector<24x1xf32>
    %317 = arith.mulf %312, %312 : vector<24x128xf32>
    %cst_91 = arith.constant dense<0.000000e+00> : vector<24xf32>
    %318 = vector.multi_reduction <add>, %317, %cst_91 [1] : vector<24x128xf32> to vector<24xf32>
    %319 = vector.shape_cast %318 : vector<24xf32> to vector<24x1xf32>
    %cst_92 = arith.constant 1.280000e+02 : f32
    %320 = vector.broadcast %cst_92 : f32 to vector<24x1xf32>
    %321 = arith.divf %319, %320 : vector<24x1xf32>
    %322 = arith.mulf %316, %316 : vector<24x1xf32>
    %323 = arith.subf %321, %322 : vector<24x1xf32>
    %cst_93 = arith.constant 0.000000e+00 : f32
    %324 = vector.broadcast %cst_93 : f32 to vector<24x1xf32>
    %325 = arith.maximumf %323, %324 : vector<24x1xf32>
    %326 = vector.broadcast %316 : vector<24x1xf32> to vector<24x128xf32>
    %327 = arith.subf %312, %326 : vector<24x128xf32>
    %cst_94 = arith.constant 9.99999974E-6 : f32
    %328 = vector.broadcast %cst_94 : f32 to vector<24x1xf32>
    %329 = arith.addf %325, %328 : vector<24x1xf32>
    %330 = math.rsqrt %329 : vector<24x1xf32>
    %331 = vector.broadcast %330 : vector<24x1xf32> to vector<24x128xf32>
    %332 = arith.mulf %327, %331 : vector<24x128xf32>
    %333 = vector.broadcast %18 : vector<1x128xf32> to vector<24x128xf32>
    %334 = arith.mulf %332, %333 : vector<24x128xf32>
    %335 = vector.broadcast %19 : vector<1x128xf32> to vector<24x128xf32>
    %336 = arith.addf %334, %335 : vector<24x128xf32>
    %cst_95 = arith.constant 0.000000e+00 : f32
    %337 = vector.broadcast %cst_95 : f32 to vector<24x128xf32>
    %338 = arith.maximumf %336, %337 : vector<24x128xf32>
    %339 = vector.extract_strided_slice %21 {offsets = [0, 7], sizes = [24, 1], strides = [1, 1]} : vector<24x8xf32> to vector<24x1xf32>
    %340 = vector.broadcast %339 : vector<24x1xf32> to vector<24x128xf32>
    %341 = arith.mulf %340, %338 : vector<24x128xf32>
    %342 = arith.addf %302, %341 : vector<24x128xf32>
    %c0_96 = arith.constant 0 : index
    %c0_97 = arith.constant 0 : index
    %343 = vector.load %arg12[%c0_96, %c0_97] : memref<24x128xf32, #tpu.memory_space<vmem>>, vector<24x128xf32>
    %344 = arith.addf %343, %342 : vector<24x128xf32>
    %c0_98 = arith.constant 0 : index
    %c0_99 = arith.constant 0 : index
    %345 = vector.load %arg12[%c0_98, %c0_99] : memref<24x128xf32, #tpu.memory_space<vmem>>, vector<24x128xf32>
    tpu.vector_store %arg12[%c0_98, %c0_99], %344 {strides = array<i32>} : memref<24x128xf32, #tpu.memory_space<vmem>>, vector<24x128xf32>,
    return
  }
  func.func @transform_0(%arg0: i32, %arg1: i32) -> (i32, i32) {
    %c0_i32 = arith.constant 0 : i32
    %c0_i32_0 = arith.constant 0 : i32
    return %arg1, %c0_i32 : i32, i32
  }
  func.func @transform_1(%arg0: i32, %arg1: i32) -> (i32, i32) {
    %c0_i32 = arith.constant 0 : i32
    %c0_i32_0 = arith.constant 0 : i32
    return %arg0, %c0_i32 : i32, i32
  }
  func.func @transform_2(%arg0: i32, %arg1: i32) -> (i32, i32) {
    %c0_i32 = arith.constant 0 : i32
    %c0_i32_0 = arith.constant 0 : i32
    return %arg1, %c0_i32 : i32, i32
  }
  func.func @transform_3(%arg0: i32, %arg1: i32) -> (i32, i32, i32) {
    %c0_i32 = arith.constant 0 : i32
    %c0_i32_0 = arith.constant 0 : i32
    return %arg1, %arg0, %c0_i32 : i32, i32, i32
  }
  func.func @transform_4(%arg0: i32, %arg1: i32) -> (i32, i32) {
    %c0_i32 = arith.constant 0 : i32
    %c0_i32_0 = arith.constant 0 : i32
    %c0_i32_1 = arith.constant 0 : i32
    return %c0_i32, %c0_i32_0 : i32, i32
  }
  func.func @transform_5(%arg0: i32, %arg1: i32) -> (i32, i32) {
    %c0_i32 = arith.constant 0 : i32
    %c0_i32_0 = arith.constant 0 : i32
    %c0_i32_1 = arith.constant 0 : i32
    return %c0_i32, %c0_i32_0 : i32, i32
  }
  func.func @transform_6(%arg0: i32, %arg1: i32) -> (i32, i32) {
    %c0_i32 = arith.constant 0 : i32
    %c0_i32_0 = arith.constant 0 : i32
    %c0_i32_1 = arith.constant 0 : i32
    return %c0_i32, %c0_i32_0 : i32, i32
  }
  func.func @transform_7(%arg0: i32, %arg1: i32) -> (i32, i32) {
    %c0_i32 = arith.constant 0 : i32
    %c0_i32_0 = arith.constant 0 : i32
    %c0_i32_1 = arith.constant 0 : i32
    return %c0_i32, %c0_i32_0 : i32, i32
  }
  func.func @transform_8(%arg0: i32, %arg1: i32) -> (i32, i32) {
    %c0_i32 = arith.constant 0 : i32
    %c0_i32_0 = arith.constant 0 : i32
    %c0_i32_1 = arith.constant 0 : i32
    return %c0_i32, %c0_i32_0 : i32, i32
  }
  func.func @transform_9(%arg0: i32, %arg1: i32) -> (i32, i32) {
    %c0_i32 = arith.constant 0 : i32
    %c0_i32_0 = arith.constant 0 : i32
    %c0_i32_1 = arith.constant 0 : i32
    return %c0_i32, %c0_i32_0 : i32, i32
  }
  func.func @transform_10(%arg0: i32, %arg1: i32) -> (i32, i32) {
    %c0_i32 = arith.constant 0 : i32
    %c0_i32_0 = arith.constant 0 : i32
    return %arg0, %c0_i32 : i32, i32
  }
}

module attributes {stable_mosaic.version = 11 : i64} {
  func.func @_msg_kernel(%arg0: i32, %arg1: memref<24x128xf32, #tpu.memory_space<vmem>>, %arg2: memref<128x768xf32, #tpu.memory_space<vmem>>, %arg3: memref<24x768xf32, #tpu.memory_space<vmem>>) attributes {dimension_semantics = [#tpu.dimension_semantics<parallel>], iteration_bounds = array<i64: 1>, scalar_prefetch = 0 : i64, scratch_operands = 0 : i64, tpu.core_type = #tpu.core_type<tc>, window_params = [{transform_indices = @transform_0, window_bounds = array<i64: 24, 128>}, {pipeline_mode = #tpu.pipeline_mode<synchronous>, transform_indices = @transform_1, window_bounds = array<i64: 128, 768>}, {transform_indices = @transform_2, window_bounds = array<i64: 24, 768>}]} {
    %c0 = arith.constant 0 : index
    %c0_0 = arith.constant 0 : index
    %0 = vector.load %arg1[%c0, %c0_0] : memref<24x128xf32, #tpu.memory_space<vmem>>, vector<24x128xf32>
    %c0_1 = arith.constant 0 : index
    %c0_2 = arith.constant 0 : index
    %1 = vector.load %arg2[%c0_1, %c0_2] : memref<128x768xf32, #tpu.memory_space<vmem>>, vector<128x768xf32>
    %2 = arith.truncf %0 : vector<24x128xf32> to vector<24x128xbf16>
    %3 = arith.truncf %1 : vector<128x768xf32> to vector<128x768xbf16>
    %cst = arith.constant dense<0.000000e+00> : vector<24x768xf32>
    %4 = tpu.matmul %2, %3, %cst {dimension_numbers = #tpu.dot_dimension_numbers<[1], [0], [0], [1], [0, 0, 1, 1], [], []>} : vector<24x128xbf16>, vector<128x768xbf16>, vector<24x768xf32> -> vector<24x768xf32>
    %c0_3 = arith.constant 0 : index
    %c0_4 = arith.constant 0 : index
    %5 = vector.load %arg3[%c0_3, %c0_4] : memref<24x768xf32, #tpu.memory_space<vmem>>, vector<24x768xf32>
    tpu.vector_store %arg3[%c0_3, %c0_4], %4 {strides = array<i32>} : memref<24x768xf32, #tpu.memory_space<vmem>>, vector<24x768xf32>,
    return
  }
  func.func @transform_0(%arg0: i32) -> (i32, i32) {
    %c0_i32 = arith.constant 0 : i32
    %c0_i32_0 = arith.constant 0 : i32
    return %arg0, %c0_i32 : i32, i32
  }
  func.func @transform_1(%arg0: i32) -> (i32, i32) {
    %c0_i32 = arith.constant 0 : i32
    %c0_i32_0 = arith.constant 0 : i32
    %c0_i32_1 = arith.constant 0 : i32
    return %c0_i32, %c0_i32_0 : i32, i32
  }
  func.func @transform_2(%arg0: i32) -> (i32, i32) {
    %c0_i32 = arith.constant 0 : i32
    %c0_i32_0 = arith.constant 0 : i32
    return %arg0, %c0_i32 : i32, i32
  }
}

module attributes {stable_mosaic.version = 11 : i64} {
  func.func @_gg_layer_kernel(%arg0: i32, %arg1: memref<24x128xf32, #tpu.memory_space<vmem>>, %arg2: memref<128x128xf32, #tpu.memory_space<vmem>>, %arg3: memref<24x768xf32, #tpu.memory_space<vmem>>, %arg4: memref<6x24x24xf32, #tpu.memory_space<vmem>>, %arg5: memref<24x128xf32, #tpu.memory_space<vmem>>, %arg6: memref<1x128xf32, #tpu.memory_space<vmem>>, %arg7: memref<1x128xf32, #tpu.memory_space<vmem>>, %arg8: memref<128x128xf32, #tpu.memory_space<vmem>>, %arg9: memref<1x128xf32, #tpu.memory_space<vmem>>, %arg10: memref<1x128xf32, #tpu.memory_space<vmem>>, %arg11: memref<24x128xf32, #tpu.memory_space<vmem>>) attributes {dimension_semantics = [#tpu.dimension_semantics<parallel>], iteration_bounds = array<i64: 1>, scalar_prefetch = 0 : i64, scratch_operands = 0 : i64, tpu.core_type = #tpu.core_type<tc>, window_params = [{transform_indices = @transform_0, window_bounds = array<i64: 24, 128>}, {pipeline_mode = #tpu.pipeline_mode<synchronous>, transform_indices = @transform_1, window_bounds = array<i64: 128, 128>}, {pipeline_mode = #tpu.pipeline_mode<synchronous>, transform_indices = @transform_2, window_bounds = array<i64: 24, 768>}, {transform_indices = @transform_3, window_bounds = array<i64: 6, 24, 24>}, {transform_indices = @transform_4, window_bounds = array<i64: 24, 128>}, {pipeline_mode = #tpu.pipeline_mode<synchronous>, transform_indices = @transform_5, window_bounds = array<i64: 1, 128>}, {pipeline_mode = #tpu.pipeline_mode<synchronous>, transform_indices = @transform_6, window_bounds = array<i64: 1, 128>}, {pipeline_mode = #tpu.pipeline_mode<synchronous>, transform_indices = @transform_7, window_bounds = array<i64: 128, 128>}, {pipeline_mode = #tpu.pipeline_mode<synchronous>, transform_indices = @transform_8, window_bounds = array<i64: 1, 128>}, {pipeline_mode = #tpu.pipeline_mode<synchronous>, transform_indices = @transform_9, window_bounds = array<i64: 1, 128>}, {transform_indices = @transform_10, window_bounds = array<i64: 24, 128>}]} {
    %c0 = arith.constant 0 : index
    %c0_0 = arith.constant 0 : index
    %0 = vector.load %arg1[%c0, %c0_0] : memref<24x128xf32, #tpu.memory_space<vmem>>, vector<24x128xf32>
    %c0_1 = arith.constant 0 : index
    %c0_2 = arith.constant 0 : index
    %1 = vector.load %arg2[%c0_1, %c0_2] : memref<128x128xf32, #tpu.memory_space<vmem>>, vector<128x128xf32>
    %2 = arith.truncf %0 : vector<24x128xf32> to vector<24x128xbf16>
    %3 = arith.truncf %1 : vector<128x128xf32> to vector<128x128xbf16>
    %cst = arith.constant dense<0.000000e+00> : vector<24x128xf32>
    %4 = tpu.matmul %2, %3, %cst {dimension_numbers = #tpu.dot_dimension_numbers<[1], [0], [0], [1], [0, 0, 1, 1], [], []>} : vector<24x128xbf16>, vector<128x128xbf16>, vector<24x128xf32> -> vector<24x128xf32>
    %c0_3 = arith.constant 0 : index
    %c0_4 = arith.constant 0 : index
    %c0_5 = arith.constant 0 : index
    %5 = vector.load %arg4[%c0_3, %c0_4, %c0_5] : memref<6x24x24xf32, #tpu.memory_space<vmem>>, vector<1x24x24xf32>
    %6 = vector.shape_cast %5 : vector<1x24x24xf32> to vector<24x24xf32>
    %c0_6 = arith.constant 0 : index
    %c0_7 = arith.constant 0 : index
    %7 = vector.load %arg3[%c0_6, %c0_7] : memref<24x768xf32, #tpu.memory_space<vmem>>, vector<24x128xf32>
    %8 = arith.truncf %6 : vector<24x24xf32> to vector<24x24xbf16>
    %9 = arith.truncf %7 : vector<24x128xf32> to vector<24x128xbf16>
    %cst_8 = arith.constant dense<0.000000e+00> : vector<24x128xf32>
    %10 = tpu.matmul %8, %9, %cst_8 {dimension_numbers = #tpu.dot_dimension_numbers<[1], [0], [0], [1], [0, 0, 1, 1], [], []>} : vector<24x24xbf16>, vector<24x128xbf16>, vector<24x128xf32> -> vector<24x128xf32>
    %11 = arith.addf %4, %10 : vector<24x128xf32>
    %c1 = arith.constant 1 : index
    %c0_9 = arith.constant 0 : index
    %c0_10 = arith.constant 0 : index
    %12 = vector.load %arg4[%c1, %c0_9, %c0_10] : memref<6x24x24xf32, #tpu.memory_space<vmem>>, vector<1x24x24xf32>
    %13 = vector.shape_cast %12 : vector<1x24x24xf32> to vector<24x24xf32>
    %c0_11 = arith.constant 0 : index
    %c128 = arith.constant 128 : index
    %14 = vector.load %arg3[%c0_11, %c128] : memref<24x768xf32, #tpu.memory_space<vmem>>, vector<24x128xf32>
    %15 = arith.truncf %13 : vector<24x24xf32> to vector<24x24xbf16>
    %16 = arith.truncf %14 : vector<24x128xf32> to vector<24x128xbf16>
    %cst_12 = arith.constant dense<0.000000e+00> : vector<24x128xf32>
    %17 = tpu.matmul %15, %16, %cst_12 {dimension_numbers = #tpu.dot_dimension_numbers<[1], [0], [0], [1], [0, 0, 1, 1], [], []>} : vector<24x24xbf16>, vector<24x128xbf16>, vector<24x128xf32> -> vector<24x128xf32>
    %18 = arith.addf %11, %17 : vector<24x128xf32>
    %c2 = arith.constant 2 : index
    %c0_13 = arith.constant 0 : index
    %c0_14 = arith.constant 0 : index
    %19 = vector.load %arg4[%c2, %c0_13, %c0_14] : memref<6x24x24xf32, #tpu.memory_space<vmem>>, vector<1x24x24xf32>
    %20 = vector.shape_cast %19 : vector<1x24x24xf32> to vector<24x24xf32>
    %c0_15 = arith.constant 0 : index
    %c256 = arith.constant 256 : index
    %21 = vector.load %arg3[%c0_15, %c256] : memref<24x768xf32, #tpu.memory_space<vmem>>, vector<24x128xf32>
    %22 = arith.truncf %20 : vector<24x24xf32> to vector<24x24xbf16>
    %23 = arith.truncf %21 : vector<24x128xf32> to vector<24x128xbf16>
    %cst_16 = arith.constant dense<0.000000e+00> : vector<24x128xf32>
    %24 = tpu.matmul %22, %23, %cst_16 {dimension_numbers = #tpu.dot_dimension_numbers<[1], [0], [0], [1], [0, 0, 1, 1], [], []>} : vector<24x24xbf16>, vector<24x128xbf16>, vector<24x128xf32> -> vector<24x128xf32>
    %25 = arith.addf %18, %24 : vector<24x128xf32>
    %c3 = arith.constant 3 : index
    %c0_17 = arith.constant 0 : index
    %c0_18 = arith.constant 0 : index
    %26 = vector.load %arg4[%c3, %c0_17, %c0_18] : memref<6x24x24xf32, #tpu.memory_space<vmem>>, vector<1x24x24xf32>
    %27 = vector.shape_cast %26 : vector<1x24x24xf32> to vector<24x24xf32>
    %c0_19 = arith.constant 0 : index
    %c384 = arith.constant 384 : index
    %28 = vector.load %arg3[%c0_19, %c384] : memref<24x768xf32, #tpu.memory_space<vmem>>, vector<24x128xf32>
    %29 = arith.truncf %27 : vector<24x24xf32> to vector<24x24xbf16>
    %30 = arith.truncf %28 : vector<24x128xf32> to vector<24x128xbf16>
    %cst_20 = arith.constant dense<0.000000e+00> : vector<24x128xf32>
    %31 = tpu.matmul %29, %30, %cst_20 {dimension_numbers = #tpu.dot_dimension_numbers<[1], [0], [0], [1], [0, 0, 1, 1], [], []>} : vector<24x24xbf16>, vector<24x128xbf16>, vector<24x128xf32> -> vector<24x128xf32>
    %32 = arith.addf %25, %31 : vector<24x128xf32>
    %c4 = arith.constant 4 : index
    %c0_21 = arith.constant 0 : index
    %c0_22 = arith.constant 0 : index
    %33 = vector.load %arg4[%c4, %c0_21, %c0_22] : memref<6x24x24xf32, #tpu.memory_space<vmem>>, vector<1x24x24xf32>
    %34 = vector.shape_cast %33 : vector<1x24x24xf32> to vector<24x24xf32>
    %c0_23 = arith.constant 0 : index
    %c512 = arith.constant 512 : index
    %35 = vector.load %arg3[%c0_23, %c512] : memref<24x768xf32, #tpu.memory_space<vmem>>, vector<24x128xf32>
    %36 = arith.truncf %34 : vector<24x24xf32> to vector<24x24xbf16>
    %37 = arith.truncf %35 : vector<24x128xf32> to vector<24x128xbf16>
    %cst_24 = arith.constant dense<0.000000e+00> : vector<24x128xf32>
    %38 = tpu.matmul %36, %37, %cst_24 {dimension_numbers = #tpu.dot_dimension_numbers<[1], [0], [0], [1], [0, 0, 1, 1], [], []>} : vector<24x24xbf16>, vector<24x128xbf16>, vector<24x128xf32> -> vector<24x128xf32>
    %39 = arith.addf %32, %38 : vector<24x128xf32>
    %c5 = arith.constant 5 : index
    %c0_25 = arith.constant 0 : index
    %c0_26 = arith.constant 0 : index
    %40 = vector.load %arg4[%c5, %c0_25, %c0_26] : memref<6x24x24xf32, #tpu.memory_space<vmem>>, vector<1x24x24xf32>
    %41 = vector.shape_cast %40 : vector<1x24x24xf32> to vector<24x24xf32>
    %c0_27 = arith.constant 0 : index
    %c640 = arith.constant 640 : index
    %42 = vector.load %arg3[%c0_27, %c640] : memref<24x768xf32, #tpu.memory_space<vmem>>, vector<24x128xf32>
    %43 = arith.truncf %41 : vector<24x24xf32> to vector<24x24xbf16>
    %44 = arith.truncf %42 : vector<24x128xf32> to vector<24x128xbf16>
    %cst_28 = arith.constant dense<0.000000e+00> : vector<24x128xf32>
    %45 = tpu.matmul %43, %44, %cst_28 {dimension_numbers = #tpu.dot_dimension_numbers<[1], [0], [0], [1], [0, 0, 1, 1], [], []>} : vector<24x24xbf16>, vector<24x128xbf16>, vector<24x128xf32> -> vector<24x128xf32>
    %46 = arith.addf %39, %45 : vector<24x128xf32>
    %c0_29 = arith.constant 0 : index
    %c0_30 = arith.constant 0 : index
    %47 = vector.load %arg6[%c0_29, %c0_30] : memref<1x128xf32, #tpu.memory_space<vmem>>, vector<1x128xf32>
    %c0_31 = arith.constant 0 : index
    %c0_32 = arith.constant 0 : index
    %48 = vector.load %arg7[%c0_31, %c0_32] : memref<1x128xf32, #tpu.memory_space<vmem>>, vector<1x128xf32>
    %cst_33 = arith.constant dense<0.000000e+00> : vector<24xf32>
    %49 = vector.multi_reduction <add>, %46, %cst_33 [1] : vector<24x128xf32> to vector<24xf32>
    %50 = vector.shape_cast %49 : vector<24xf32> to vector<24x1xf32>
    %cst_34 = arith.constant 1.280000e+02 : f32
    %51 = vector.broadcast %cst_34 : f32 to vector<24x1xf32>
    %52 = arith.divf %50, %51 : vector<24x1xf32>
    %53 = arith.mulf %46, %46 : vector<24x128xf32>
    %cst_35 = arith.constant dense<0.000000e+00> : vector<24xf32>
    %54 = vector.multi_reduction <add>, %53, %cst_35 [1] : vector<24x128xf32> to vector<24xf32>
    %55 = vector.shape_cast %54 : vector<24xf32> to vector<24x1xf32>
    %cst_36 = arith.constant 1.280000e+02 : f32
    %56 = vector.broadcast %cst_36 : f32 to vector<24x1xf32>
    %57 = arith.divf %55, %56 : vector<24x1xf32>
    %58 = arith.mulf %52, %52 : vector<24x1xf32>
    %59 = arith.subf %57, %58 : vector<24x1xf32>
    %cst_37 = arith.constant 0.000000e+00 : f32
    %60 = vector.broadcast %cst_37 : f32 to vector<24x1xf32>
    %61 = arith.maximumf %59, %60 : vector<24x1xf32>
    %62 = vector.broadcast %52 : vector<24x1xf32> to vector<24x128xf32>
    %63 = arith.subf %46, %62 : vector<24x128xf32>
    %cst_38 = arith.constant 9.99999974E-6 : f32
    %64 = vector.broadcast %cst_38 : f32 to vector<24x1xf32>
    %65 = arith.addf %61, %64 : vector<24x1xf32>
    %66 = math.rsqrt %65 : vector<24x1xf32>
    %67 = vector.broadcast %66 : vector<24x1xf32> to vector<24x128xf32>
    %68 = arith.mulf %63, %67 : vector<24x128xf32>
    %69 = vector.broadcast %47 : vector<1x128xf32> to vector<24x128xf32>
    %70 = arith.mulf %68, %69 : vector<24x128xf32>
    %71 = vector.broadcast %48 : vector<1x128xf32> to vector<24x128xf32>
    %72 = arith.addf %70, %71 : vector<24x128xf32>
    %cst_39 = arith.constant 0.000000e+00 : f32
    %73 = vector.broadcast %cst_39 : f32 to vector<24x128xf32>
    %74 = arith.maximumf %72, %73 : vector<24x128xf32>
    %c0_40 = arith.constant 0 : index
    %c0_41 = arith.constant 0 : index
    %75 = vector.load %arg8[%c0_40, %c0_41] : memref<128x128xf32, #tpu.memory_space<vmem>>, vector<128x128xf32>
    %76 = arith.truncf %74 : vector<24x128xf32> to vector<24x128xbf16>
    %77 = arith.truncf %75 : vector<128x128xf32> to vector<128x128xbf16>
    %cst_42 = arith.constant dense<0.000000e+00> : vector<24x128xf32>
    %78 = tpu.matmul %76, %77, %cst_42 {dimension_numbers = #tpu.dot_dimension_numbers<[1], [0], [0], [1], [0, 0, 1, 1], [], []>} : vector<24x128xbf16>, vector<128x128xbf16>, vector<24x128xf32> -> vector<24x128xf32>
    %c0_43 = arith.constant 0 : index
    %c0_44 = arith.constant 0 : index
    %79 = vector.load %arg9[%c0_43, %c0_44] : memref<1x128xf32, #tpu.memory_space<vmem>>, vector<1x128xf32>
    %c0_45 = arith.constant 0 : index
    %c0_46 = arith.constant 0 : index
    %80 = vector.load %arg10[%c0_45, %c0_46] : memref<1x128xf32, #tpu.memory_space<vmem>>, vector<1x128xf32>
    %cst_47 = arith.constant dense<0.000000e+00> : vector<24xf32>
    %81 = vector.multi_reduction <add>, %78, %cst_47 [1] : vector<24x128xf32> to vector<24xf32>
    %82 = vector.shape_cast %81 : vector<24xf32> to vector<24x1xf32>
    %cst_48 = arith.constant 1.280000e+02 : f32
    %83 = vector.broadcast %cst_48 : f32 to vector<24x1xf32>
    %84 = arith.divf %82, %83 : vector<24x1xf32>
    %85 = arith.mulf %78, %78 : vector<24x128xf32>
    %cst_49 = arith.constant dense<0.000000e+00> : vector<24xf32>
    %86 = vector.multi_reduction <add>, %85, %cst_49 [1] : vector<24x128xf32> to vector<24xf32>
    %87 = vector.shape_cast %86 : vector<24xf32> to vector<24x1xf32>
    %cst_50 = arith.constant 1.280000e+02 : f32
    %88 = vector.broadcast %cst_50 : f32 to vector<24x1xf32>
    %89 = arith.divf %87, %88 : vector<24x1xf32>
    %90 = arith.mulf %84, %84 : vector<24x1xf32>
    %91 = arith.subf %89, %90 : vector<24x1xf32>
    %cst_51 = arith.constant 0.000000e+00 : f32
    %92 = vector.broadcast %cst_51 : f32 to vector<24x1xf32>
    %93 = arith.maximumf %91, %92 : vector<24x1xf32>
    %94 = vector.broadcast %84 : vector<24x1xf32> to vector<24x128xf32>
    %95 = arith.subf %78, %94 : vector<24x128xf32>
    %cst_52 = arith.constant 9.99999974E-6 : f32
    %96 = vector.broadcast %cst_52 : f32 to vector<24x1xf32>
    %97 = arith.addf %93, %96 : vector<24x1xf32>
    %98 = math.rsqrt %97 : vector<24x1xf32>
    %99 = vector.broadcast %98 : vector<24x1xf32> to vector<24x128xf32>
    %100 = arith.mulf %95, %99 : vector<24x128xf32>
    %101 = vector.broadcast %79 : vector<1x128xf32> to vector<24x128xf32>
    %102 = arith.mulf %100, %101 : vector<24x128xf32>
    %103 = vector.broadcast %80 : vector<1x128xf32> to vector<24x128xf32>
    %104 = arith.addf %102, %103 : vector<24x128xf32>
    %c0_53 = arith.constant 0 : index
    %c0_54 = arith.constant 0 : index
    %105 = vector.load %arg5[%c0_53, %c0_54] : memref<24x128xf32, #tpu.memory_space<vmem>>, vector<24x128xf32>
    %106 = arith.addf %104, %105 : vector<24x128xf32>
    %cst_55 = arith.constant 0.000000e+00 : f32
    %107 = vector.broadcast %cst_55 : f32 to vector<24x128xf32>
    %108 = arith.maximumf %106, %107 : vector<24x128xf32>
    %c0_56 = arith.constant 0 : index
    %c0_57 = arith.constant 0 : index
    %109 = vector.load %arg11[%c0_56, %c0_57] : memref<24x128xf32, #tpu.memory_space<vmem>>, vector<24x128xf32>
    tpu.vector_store %arg11[%c0_56, %c0_57], %108 {strides = array<i32>} : memref<24x128xf32, #tpu.memory_space<vmem>>, vector<24x128xf32>,
    return
  }
  func.func @transform_0(%arg0: i32) -> (i32, i32) {
    %c0_i32 = arith.constant 0 : i32
    %c0_i32_0 = arith.constant 0 : i32
    return %arg0, %c0_i32 : i32, i32
  }
  func.func @transform_1(%arg0: i32) -> (i32, i32) {
    %c0_i32 = arith.constant 0 : i32
    %c0_i32_0 = arith.constant 0 : i32
    %c0_i32_1 = arith.constant 0 : i32
    return %c0_i32, %c0_i32_0 : i32, i32
  }
  func.func @transform_2(%arg0: i32) -> (i32, i32) {
    %c0_i32 = arith.constant 0 : i32
    %c0_i32_0 = arith.constant 0 : i32
    %c0_i32_1 = arith.constant 0 : i32
    return %c0_i32, %c0_i32_0 : i32, i32
  }
  func.func @transform_3(%arg0: i32) -> (i32, i32, i32) {
    %c0_i32 = arith.constant 0 : i32
    %c0_i32_0 = arith.constant 0 : i32
    %c0_i32_1 = arith.constant 0 : i32
    return %c0_i32, %arg0, %c0_i32_0 : i32, i32, i32
  }
  func.func @transform_4(%arg0: i32) -> (i32, i32) {
    %c0_i32 = arith.constant 0 : i32
    %c0_i32_0 = arith.constant 0 : i32
    return %arg0, %c0_i32 : i32, i32
  }
  func.func @transform_5(%arg0: i32) -> (i32, i32) {
    %c0_i32 = arith.constant 0 : i32
    %c0_i32_0 = arith.constant 0 : i32
    %c0_i32_1 = arith.constant 0 : i32
    return %c0_i32, %c0_i32_0 : i32, i32
  }
  func.func @transform_6(%arg0: i32) -> (i32, i32) {
    %c0_i32 = arith.constant 0 : i32
    %c0_i32_0 = arith.constant 0 : i32
    %c0_i32_1 = arith.constant 0 : i32
    return %c0_i32, %c0_i32_0 : i32, i32
  }
  func.func @transform_7(%arg0: i32) -> (i32, i32) {
    %c0_i32 = arith.constant 0 : i32
    %c0_i32_0 = arith.constant 0 : i32
    %c0_i32_1 = arith.constant 0 : i32
    return %c0_i32, %c0_i32_0 : i32, i32
  }
  func.func @transform_8(%arg0: i32) -> (i32, i32) {
    %c0_i32 = arith.constant 0 : i32
    %c0_i32_0 = arith.constant 0 : i32
    %c0_i32_1 = arith.constant 0 : i32
    return %c0_i32, %c0_i32_0 : i32, i32
  }
  func.func @transform_9(%arg0: i32) -> (i32, i32) {
    %c0_i32 = arith.constant 0 : i32
    %c0_i32_0 = arith.constant 0 : i32
    %c0_i32_1 = arith.constant 0 : i32
    return %c0_i32, %c0_i32_0 : i32, i32
  }
  func.func @transform_10(%arg0: i32) -> (i32, i32) {
    %c0_i32 = arith.constant 0 : i32
    %c0_i32_0 = arith.constant 0 : i32
    return %arg0, %c0_i32 : i32, i32
  }
}

module attributes {stable_mosaic.version = 11 : i64} {
  func.func @_lane_tail_kernel(%arg0: i32, %arg1: memref<16x128xf32, #tpu.memory_space<vmem>>, %arg2: memref<16x128xf32, #tpu.memory_space<vmem>>, %arg3: memref<128x128xf32, #tpu.memory_space<vmem>>, %arg4: memref<128x128xf32, #tpu.memory_space<vmem>>, %arg5: memref<1x128xf32, #tpu.memory_space<vmem>>, %arg6: memref<1x128xf32, #tpu.memory_space<vmem>>, %arg7: memref<128x128xf32, #tpu.memory_space<vmem>>, %arg8: memref<1x128xf32, #tpu.memory_space<vmem>>, %arg9: memref<1x128xf32, #tpu.memory_space<vmem>>, %arg10: memref<128x128xf32, #tpu.memory_space<vmem>>, %arg11: memref<1x128xf32, #tpu.memory_space<vmem>>, %arg12: memref<1x128xf32, #tpu.memory_space<vmem>>, %arg13: memref<16x128xf32, #tpu.memory_space<vmem>>) attributes {dimension_semantics = [#tpu.dimension_semantics<parallel>], iteration_bounds = array<i64: 1>, scalar_prefetch = 0 : i64, scratch_operands = 0 : i64, tpu.core_type = #tpu.core_type<tc>, window_params = [{transform_indices = @transform_0, window_bounds = array<i64: 16, 128>}, {transform_indices = @transform_1, window_bounds = array<i64: 16, 128>}, {pipeline_mode = #tpu.pipeline_mode<synchronous>, transform_indices = @transform_2, window_bounds = array<i64: 128, 128>}, {pipeline_mode = #tpu.pipeline_mode<synchronous>, transform_indices = @transform_3, window_bounds = array<i64: 128, 128>}, {pipeline_mode = #tpu.pipeline_mode<synchronous>, transform_indices = @transform_4, window_bounds = array<i64: 1, 128>}, {pipeline_mode = #tpu.pipeline_mode<synchronous>, transform_indices = @transform_5, window_bounds = array<i64: 1, 128>}, {pipeline_mode = #tpu.pipeline_mode<synchronous>, transform_indices = @transform_6, window_bounds = array<i64: 128, 128>}, {pipeline_mode = #tpu.pipeline_mode<synchronous>, transform_indices = @transform_7, window_bounds = array<i64: 1, 128>}, {pipeline_mode = #tpu.pipeline_mode<synchronous>, transform_indices = @transform_8, window_bounds = array<i64: 1, 128>}, {pipeline_mode = #tpu.pipeline_mode<synchronous>, transform_indices = @transform_9, window_bounds = array<i64: 128, 128>}, {pipeline_mode = #tpu.pipeline_mode<synchronous>, transform_indices = @transform_10, window_bounds = array<i64: 1, 128>}, {pipeline_mode = #tpu.pipeline_mode<synchronous>, transform_indices = @transform_11, window_bounds = array<i64: 1, 128>}, {transform_indices = @transform_12, window_bounds = array<i64: 16, 128>}]} {
    %c0 = arith.constant 0 : index
    %c0_0 = arith.constant 0 : index
    %0 = vector.load %arg1[%c0, %c0_0] : memref<16x128xf32, #tpu.memory_space<vmem>>, vector<16x128xf32>
    %c0_1 = arith.constant 0 : index
    %c0_2 = arith.constant 0 : index
    %1 = vector.load %arg3[%c0_1, %c0_2] : memref<128x128xf32, #tpu.memory_space<vmem>>, vector<128x128xf32>
    %2 = arith.truncf %0 : vector<16x128xf32> to vector<16x128xbf16>
    %3 = arith.truncf %1 : vector<128x128xf32> to vector<128x128xbf16>
    %cst = arith.constant dense<0.000000e+00> : vector<16x128xf32>
    %4 = tpu.matmul %2, %3, %cst {dimension_numbers = #tpu.dot_dimension_numbers<[1], [0], [0], [1], [0, 0, 1, 1], [], []>} : vector<16x128xbf16>, vector<128x128xbf16>, vector<16x128xf32> -> vector<16x128xf32>
    %c0_3 = arith.constant 0 : index
    %c0_4 = arith.constant 0 : index
    %5 = vector.load %arg2[%c0_3, %c0_4] : memref<16x128xf32, #tpu.memory_space<vmem>>, vector<16x128xf32>
    %c0_5 = arith.constant 0 : index
    %c0_6 = arith.constant 0 : index
    %6 = vector.load %arg4[%c0_5, %c0_6] : memref<128x128xf32, #tpu.memory_space<vmem>>, vector<128x128xf32>
    %7 = arith.truncf %5 : vector<16x128xf32> to vector<16x128xbf16>
    %8 = arith.truncf %6 : vector<128x128xf32> to vector<128x128xbf16>
    %cst_7 = arith.constant dense<0.000000e+00> : vector<16x128xf32>
    %9 = tpu.matmul %7, %8, %cst_7 {dimension_numbers = #tpu.dot_dimension_numbers<[1], [0], [0], [1], [0, 0, 1, 1], [], []>} : vector<16x128xbf16>, vector<128x128xbf16>, vector<16x128xf32> -> vector<16x128xf32>
    %10 = arith.addf %4, %9 : vector<16x128xf32>
    %c0_8 = arith.constant 0 : index
    %c0_9 = arith.constant 0 : index
    %11 = vector.load %arg5[%c0_8, %c0_9] : memref<1x128xf32, #tpu.memory_space<vmem>>, vector<1x128xf32>
    %c0_10 = arith.constant 0 : index
    %c0_11 = arith.constant 0 : index
    %12 = vector.load %arg6[%c0_10, %c0_11] : memref<1x128xf32, #tpu.memory_space<vmem>>, vector<1x128xf32>
    %cst_12 = arith.constant dense<0.000000e+00> : vector<16xf32>
    %13 = vector.multi_reduction <add>, %10, %cst_12 [1] : vector<16x128xf32> to vector<16xf32>
    %14 = vector.shape_cast %13 : vector<16xf32> to vector<16x1xf32>
    %cst_13 = arith.constant 1.280000e+02 : f32
    %15 = vector.broadcast %cst_13 : f32 to vector<16x1xf32>
    %16 = arith.divf %14, %15 : vector<16x1xf32>
    %17 = arith.mulf %10, %10 : vector<16x128xf32>
    %cst_14 = arith.constant dense<0.000000e+00> : vector<16xf32>
    %18 = vector.multi_reduction <add>, %17, %cst_14 [1] : vector<16x128xf32> to vector<16xf32>
    %19 = vector.shape_cast %18 : vector<16xf32> to vector<16x1xf32>
    %cst_15 = arith.constant 1.280000e+02 : f32
    %20 = vector.broadcast %cst_15 : f32 to vector<16x1xf32>
    %21 = arith.divf %19, %20 : vector<16x1xf32>
    %22 = arith.mulf %16, %16 : vector<16x1xf32>
    %23 = arith.subf %21, %22 : vector<16x1xf32>
    %cst_16 = arith.constant 0.000000e+00 : f32
    %24 = vector.broadcast %cst_16 : f32 to vector<16x1xf32>
    %25 = arith.maximumf %23, %24 : vector<16x1xf32>
    %26 = vector.broadcast %16 : vector<16x1xf32> to vector<16x128xf32>
    %27 = arith.subf %10, %26 : vector<16x128xf32>
    %cst_17 = arith.constant 9.99999974E-6 : f32
    %28 = vector.broadcast %cst_17 : f32 to vector<16x1xf32>
    %29 = arith.addf %25, %28 : vector<16x1xf32>
    %30 = math.rsqrt %29 : vector<16x1xf32>
    %31 = vector.broadcast %30 : vector<16x1xf32> to vector<16x128xf32>
    %32 = arith.mulf %27, %31 : vector<16x128xf32>
    %33 = vector.broadcast %11 : vector<1x128xf32> to vector<16x128xf32>
    %34 = arith.mulf %32, %33 : vector<16x128xf32>
    %35 = vector.broadcast %12 : vector<1x128xf32> to vector<16x128xf32>
    %36 = arith.addf %34, %35 : vector<16x128xf32>
    %cst_18 = arith.constant 0.000000e+00 : f32
    %37 = vector.broadcast %cst_18 : f32 to vector<16x128xf32>
    %38 = arith.maximumf %36, %37 : vector<16x128xf32>
    %c0_19 = arith.constant 0 : index
    %c0_20 = arith.constant 0 : index
    %39 = vector.load %arg7[%c0_19, %c0_20] : memref<128x128xf32, #tpu.memory_space<vmem>>, vector<128x128xf32>
    %40 = arith.truncf %38 : vector<16x128xf32> to vector<16x128xbf16>
    %41 = arith.truncf %39 : vector<128x128xf32> to vector<128x128xbf16>
    %cst_21 = arith.constant dense<0.000000e+00> : vector<16x128xf32>
    %42 = tpu.matmul %40, %41, %cst_21 {dimension_numbers = #tpu.dot_dimension_numbers<[1], [0], [0], [1], [0, 0, 1, 1], [], []>} : vector<16x128xbf16>, vector<128x128xbf16>, vector<16x128xf32> -> vector<16x128xf32>
    %c0_22 = arith.constant 0 : index
    %c0_23 = arith.constant 0 : index
    %43 = vector.load %arg8[%c0_22, %c0_23] : memref<1x128xf32, #tpu.memory_space<vmem>>, vector<1x128xf32>
    %c0_24 = arith.constant 0 : index
    %c0_25 = arith.constant 0 : index
    %44 = vector.load %arg9[%c0_24, %c0_25] : memref<1x128xf32, #tpu.memory_space<vmem>>, vector<1x128xf32>
    %cst_26 = arith.constant dense<0.000000e+00> : vector<16xf32>
    %45 = vector.multi_reduction <add>, %42, %cst_26 [1] : vector<16x128xf32> to vector<16xf32>
    %46 = vector.shape_cast %45 : vector<16xf32> to vector<16x1xf32>
    %cst_27 = arith.constant 1.280000e+02 : f32
    %47 = vector.broadcast %cst_27 : f32 to vector<16x1xf32>
    %48 = arith.divf %46, %47 : vector<16x1xf32>
    %49 = arith.mulf %42, %42 : vector<16x128xf32>
    %cst_28 = arith.constant dense<0.000000e+00> : vector<16xf32>
    %50 = vector.multi_reduction <add>, %49, %cst_28 [1] : vector<16x128xf32> to vector<16xf32>
    %51 = vector.shape_cast %50 : vector<16xf32> to vector<16x1xf32>
    %cst_29 = arith.constant 1.280000e+02 : f32
    %52 = vector.broadcast %cst_29 : f32 to vector<16x1xf32>
    %53 = arith.divf %51, %52 : vector<16x1xf32>
    %54 = arith.mulf %48, %48 : vector<16x1xf32>
    %55 = arith.subf %53, %54 : vector<16x1xf32>
    %cst_30 = arith.constant 0.000000e+00 : f32
    %56 = vector.broadcast %cst_30 : f32 to vector<16x1xf32>
    %57 = arith.maximumf %55, %56 : vector<16x1xf32>
    %58 = vector.broadcast %48 : vector<16x1xf32> to vector<16x128xf32>
    %59 = arith.subf %42, %58 : vector<16x128xf32>
    %cst_31 = arith.constant 9.99999974E-6 : f32
    %60 = vector.broadcast %cst_31 : f32 to vector<16x1xf32>
    %61 = arith.addf %57, %60 : vector<16x1xf32>
    %62 = math.rsqrt %61 : vector<16x1xf32>
    %63 = vector.broadcast %62 : vector<16x1xf32> to vector<16x128xf32>
    %64 = arith.mulf %59, %63 : vector<16x128xf32>
    %65 = vector.broadcast %43 : vector<1x128xf32> to vector<16x128xf32>
    %66 = arith.mulf %64, %65 : vector<16x128xf32>
    %67 = vector.broadcast %44 : vector<1x128xf32> to vector<16x128xf32>
    %68 = arith.addf %66, %67 : vector<16x128xf32>
    %cst_32 = arith.constant 0.000000e+00 : f32
    %69 = vector.broadcast %cst_32 : f32 to vector<16x128xf32>
    %70 = arith.maximumf %68, %69 : vector<16x128xf32>
    %c0_33 = arith.constant 0 : index
    %c0_34 = arith.constant 0 : index
    %71 = vector.load %arg10[%c0_33, %c0_34] : memref<128x128xf32, #tpu.memory_space<vmem>>, vector<128x128xf32>
    %72 = arith.truncf %70 : vector<16x128xf32> to vector<16x128xbf16>
    %73 = arith.truncf %71 : vector<128x128xf32> to vector<128x128xbf16>
    %cst_35 = arith.constant dense<0.000000e+00> : vector<16x128xf32>
    %74 = tpu.matmul %72, %73, %cst_35 {dimension_numbers = #tpu.dot_dimension_numbers<[1], [0], [0], [1], [0, 0, 1, 1], [], []>} : vector<16x128xbf16>, vector<128x128xbf16>, vector<16x128xf32> -> vector<16x128xf32>
    %c0_36 = arith.constant 0 : index
    %c0_37 = arith.constant 0 : index
    %75 = vector.load %arg11[%c0_36, %c0_37] : memref<1x128xf32, #tpu.memory_space<vmem>>, vector<1x128xf32>
    %c0_38 = arith.constant 0 : index
    %c0_39 = arith.constant 0 : index
    %76 = vector.load %arg12[%c0_38, %c0_39] : memref<1x128xf32, #tpu.memory_space<vmem>>, vector<1x128xf32>
    %cst_40 = arith.constant dense<0.000000e+00> : vector<16xf32>
    %77 = vector.multi_reduction <add>, %74, %cst_40 [1] : vector<16x128xf32> to vector<16xf32>
    %78 = vector.shape_cast %77 : vector<16xf32> to vector<16x1xf32>
    %cst_41 = arith.constant 1.280000e+02 : f32
    %79 = vector.broadcast %cst_41 : f32 to vector<16x1xf32>
    %80 = arith.divf %78, %79 : vector<16x1xf32>
    %81 = arith.mulf %74, %74 : vector<16x128xf32>
    %cst_42 = arith.constant dense<0.000000e+00> : vector<16xf32>
    %82 = vector.multi_reduction <add>, %81, %cst_42 [1] : vector<16x128xf32> to vector<16xf32>
    %83 = vector.shape_cast %82 : vector<16xf32> to vector<16x1xf32>
    %cst_43 = arith.constant 1.280000e+02 : f32
    %84 = vector.broadcast %cst_43 : f32 to vector<16x1xf32>
    %85 = arith.divf %83, %84 : vector<16x1xf32>
    %86 = arith.mulf %80, %80 : vector<16x1xf32>
    %87 = arith.subf %85, %86 : vector<16x1xf32>
    %cst_44 = arith.constant 0.000000e+00 : f32
    %88 = vector.broadcast %cst_44 : f32 to vector<16x1xf32>
    %89 = arith.maximumf %87, %88 : vector<16x1xf32>
    %90 = vector.broadcast %80 : vector<16x1xf32> to vector<16x128xf32>
    %91 = arith.subf %74, %90 : vector<16x128xf32>
    %cst_45 = arith.constant 9.99999974E-6 : f32
    %92 = vector.broadcast %cst_45 : f32 to vector<16x1xf32>
    %93 = arith.addf %89, %92 : vector<16x1xf32>
    %94 = math.rsqrt %93 : vector<16x1xf32>
    %95 = vector.broadcast %94 : vector<16x1xf32> to vector<16x128xf32>
    %96 = arith.mulf %91, %95 : vector<16x128xf32>
    %97 = vector.broadcast %75 : vector<1x128xf32> to vector<16x128xf32>
    %98 = arith.mulf %96, %97 : vector<16x128xf32>
    %99 = vector.broadcast %76 : vector<1x128xf32> to vector<16x128xf32>
    %100 = arith.addf %98, %99 : vector<16x128xf32>
    %101 = arith.addf %100, %0 : vector<16x128xf32>
    %cst_46 = arith.constant 0.000000e+00 : f32
    %102 = vector.broadcast %cst_46 : f32 to vector<16x128xf32>
    %103 = arith.maximumf %101, %102 : vector<16x128xf32>
    %c0_47 = arith.constant 0 : index
    %c0_48 = arith.constant 0 : index
    %104 = vector.load %arg13[%c0_47, %c0_48] : memref<16x128xf32, #tpu.memory_space<vmem>>, vector<16x128xf32>
    tpu.vector_store %arg13[%c0_47, %c0_48], %103 {strides = array<i32>} : memref<16x128xf32, #tpu.memory_space<vmem>>, vector<16x128xf32>,
    return
  }
  func.func @transform_0(%arg0: i32) -> (i32, i32) {
    %c0_i32 = arith.constant 0 : i32
    %c0_i32_0 = arith.constant 0 : i32
    return %arg0, %c0_i32 : i32, i32
  }
  func.func @transform_1(%arg0: i32) -> (i32, i32) {
    %c0_i32 = arith.constant 0 : i32
    %c0_i32_0 = arith.constant 0 : i32
    return %arg0, %c0_i32 : i32, i32
  }
  func.func @transform_2(%arg0: i32) -> (i32, i32) {
    %c0_i32 = arith.constant 0 : i32
    %c0_i32_0 = arith.constant 0 : i32
    %c0_i32_1 = arith.constant 0 : i32
    return %c0_i32, %c0_i32_0 : i32, i32
  }
  func.func @transform_3(%arg0: i32) -> (i32, i32) {
    %c0_i32 = arith.constant 0 : i32
    %c0_i32_0 = arith.constant 0 : i32
    %c0_i32_1 = arith.constant 0 : i32
    return %c0_i32, %c0_i32_0 : i32, i32
  }
  func.func @transform_4(%arg0: i32) -> (i32, i32) {
    %c0_i32 = arith.constant 0 : i32
    %c0_i32_0 = arith.constant 0 : i32
    %c0_i32_1 = arith.constant 0 : i32
    return %c0_i32, %c0_i32_0 : i32, i32
  }
  func.func @transform_5(%arg0: i32) -> (i32, i32) {
    %c0_i32 = arith.constant 0 : i32
    %c0_i32_0 = arith.constant 0 : i32
    %c0_i32_1 = arith.constant 0 : i32
    return %c0_i32, %c0_i32_0 : i32, i32
  }
  func.func @transform_6(%arg0: i32) -> (i32, i32) {
    %c0_i32 = arith.constant 0 : i32
    %c0_i32_0 = arith.constant 0 : i32
    %c0_i32_1 = arith.constant 0 : i32
    return %c0_i32, %c0_i32_0 : i32, i32
  }
  func.func @transform_7(%arg0: i32) -> (i32, i32) {
    %c0_i32 = arith.constant 0 : i32
    %c0_i32_0 = arith.constant 0 : i32
    %c0_i32_1 = arith.constant 0 : i32
    return %c0_i32, %c0_i32_0 : i32, i32
  }
  func.func @transform_8(%arg0: i32) -> (i32, i32) {
    %c0_i32 = arith.constant 0 : i32
    %c0_i32_0 = arith.constant 0 : i32
    %c0_i32_1 = arith.constant 0 : i32
    return %c0_i32, %c0_i32_0 : i32, i32
  }
  func.func @transform_9(%arg0: i32) -> (i32, i32) {
    %c0_i32 = arith.constant 0 : i32
    %c0_i32_0 = arith.constant 0 : i32
    %c0_i32_1 = arith.constant 0 : i32
    return %c0_i32, %c0_i32_0 : i32, i32
  }
  func.func @transform_10(%arg0: i32) -> (i32, i32) {
    %c0_i32 = arith.constant 0 : i32
    %c0_i32_0 = arith.constant 0 : i32
    %c0_i32_1 = arith.constant 0 : i32
    return %c0_i32, %c0_i32_0 : i32, i32
  }
  func.func @transform_11(%arg0: i32) -> (i32, i32) {
    %c0_i32 = arith.constant 0 : i32
    %c0_i32_0 = arith.constant 0 : i32
    %c0_i32_1 = arith.constant 0 : i32
    return %c0_i32, %c0_i32_0 : i32, i32
  }
  func.func @transform_12(%arg0: i32) -> (i32, i32) {
    %c0_i32 = arith.constant 0 : i32
    %c0_i32_0 = arith.constant 0 : i32
    return %arg0, %c0_i32 : i32, i32
  }
}

module attributes {stable_mosaic.version = 11 : i64} {
  func.func @_pair_kernel(%arg0: i32, %arg1: i32, %arg2: memref<8x8xf32, #tpu.memory_space<vmem>>, %arg3: memref<16x8xf32, #tpu.memory_space<vmem>>, %arg4: memref<8x128xf32, #tpu.memory_space<vmem>>, %arg5: memref<1x16x8xf32, #tpu.memory_space<vmem>>, %arg6: memref<8x128xf32, #tpu.memory_space<vmem>>, %arg7: memref<1x128xf32, #tpu.memory_space<vmem>>, %arg8: memref<128x128xf32, #tpu.memory_space<vmem>>, %arg9: memref<128x128xf32, #tpu.memory_space<vmem>>, %arg10: memref<1x128xf32, #tpu.memory_space<vmem>>, %arg11: memref<1x128xf32, #tpu.memory_space<vmem>>, %arg12: memref<16x128xf32, #tpu.memory_space<vmem>>) attributes {dimension_semantics = [#tpu.dimension_semantics<parallel>, #tpu.dimension_semantics<arbitrary>], iteration_bounds = array<i64: 1, 3>, scalar_prefetch = 0 : i64, scratch_operands = 0 : i64, tpu.core_type = #tpu.core_type<tc>, window_params = [{transform_indices = @transform_0, window_bounds = array<i64: 8, 8>}, {transform_indices = @transform_1, window_bounds = array<i64: 16, 8>}, {transform_indices = @transform_2, window_bounds = array<i64: 8, 128>}, {transform_indices = @transform_3, window_bounds = array<i64: 1, 16, 8>}, {pipeline_mode = #tpu.pipeline_mode<synchronous>, transform_indices = @transform_4, window_bounds = array<i64: 8, 128>}, {pipeline_mode = #tpu.pipeline_mode<synchronous>, transform_indices = @transform_5, window_bounds = array<i64: 1, 128>}, {pipeline_mode = #tpu.pipeline_mode<synchronous>, transform_indices = @transform_6, window_bounds = array<i64: 128, 128>}, {pipeline_mode = #tpu.pipeline_mode<synchronous>, transform_indices = @transform_7, window_bounds = array<i64: 128, 128>}, {pipeline_mode = #tpu.pipeline_mode<synchronous>, transform_indices = @transform_8, window_bounds = array<i64: 1, 128>}, {pipeline_mode = #tpu.pipeline_mode<synchronous>, transform_indices = @transform_9, window_bounds = array<i64: 1, 128>}, {transform_indices = @transform_10, window_bounds = array<i64: 16, 128>}]} {
    %c0_i32 = arith.constant 0 : i32
    %0 = arith.cmpi eq, %arg1, %c0_i32 : i32
    %1 = arith.extui %0 : i1 to i32
    %c0_i32_0 = arith.constant 0 : i32
    %2 = arith.cmpi ne, %1, %c0_i32_0 : i32
    scf.if %2 {
      %cst_100 = arith.constant 0.000000e+00 : f32
      %346 = vector.broadcast %cst_100 : f32 to vector<16x128xf32>
      %c0_101 = arith.constant 0 : index
      %c0_102 = arith.constant 0 : index
      %347 = vector.load %arg12[%c0_101, %c0_102] : memref<16x128xf32, #tpu.memory_space<vmem>>, vector<16x128xf32>
      tpu.vector_store %arg12[%c0_101, %c0_102], %346 {strides = array<i32>} : memref<16x128xf32, #tpu.memory_space<vmem>>, vector<16x128xf32>,
    } else {
    }
    %c0 = arith.constant 0 : index
    %c0_1 = arith.constant 0 : index
    %3 = vector.load %arg6[%c0, %c0_1] : memref<8x128xf32, #tpu.memory_space<vmem>>, vector<8x128xf32>
    %c0_2 = arith.constant 0 : index
    %c0_3 = arith.constant 0 : index
    %4 = vector.load %arg2[%c0_2, %c0_3] : memref<8x8xf32, #tpu.memory_space<vmem>>, vector<8x8xf32>
    %cst = arith.constant dense<0.000000e+00> : vector<8x128xf32>
    %5 = tpu.matmul %4, %3, %cst {dimension_numbers = #tpu.dot_dimension_numbers<[1], [0], [0], [1], [0, 0, 1, 1], [], []>} : vector<8x8xf32>, vector<8x128xf32>, vector<8x128xf32> -> vector<8x128xf32>
    %c0_4 = arith.constant 0 : index
    %c0_5 = arith.constant 0 : index
    %6 = vector.load %arg7[%c0_4, %c0_5] : memref<1x128xf32, #tpu.memory_space<vmem>>, vector<1x128xf32>
    %7 = vector.broadcast %6 : vector<1x128xf32> to vector<8x128xf32>
    %8 = arith.addf %5, %7 : vector<8x128xf32>
    %c0_6 = arith.constant 0 : index
    %c0_7 = arith.constant 0 : index
    %9 = vector.load %arg3[%c0_6, %c0_7] : memref<16x8xf32, #tpu.memory_space<vmem>>, vector<16x8xf32>
    %cst_8 = arith.constant dense<0.000000e+00> : vector<16x128xf32>
    %10 = tpu.matmul %9, %3, %cst_8 {dimension_numbers = #tpu.dot_dimension_numbers<[1], [0], [0], [1], [0, 0, 1, 1], [], []>} : vector<16x8xf32>, vector<8x128xf32>, vector<16x128xf32> -> vector<16x128xf32>
    %c0_9 = arith.constant 0 : index
    %c0_10 = arith.constant 0 : index
    %11 = vector.load %arg4[%c0_9, %c0_10] : memref<8x128xf32, #tpu.memory_space<vmem>>, vector<8x128xf32>
    %c0_11 = arith.constant 0 : index
    %c0_12 = arith.constant 0 : index
    %12 = vector.load %arg8[%c0_11, %c0_12] : memref<128x128xf32, #tpu.memory_space<vmem>>, vector<128x128xf32>
    %13 = arith.truncf %11 : vector<8x128xf32> to vector<8x128xbf16>
    %14 = arith.truncf %12 : vector<128x128xf32> to vector<128x128xbf16>
    %cst_13 = arith.constant dense<0.000000e+00> : vector<8x128xf32>
    %15 = tpu.matmul %13, %14, %cst_13 {dimension_numbers = #tpu.dot_dimension_numbers<[1], [0], [0], [1], [0, 0, 1, 1], [], []>} : vector<8x128xbf16>, vector<128x128xbf16>, vector<8x128xf32> -> vector<8x128xf32>
    %c0_14 = arith.constant 0 : index
    %c0_15 = arith.constant 0 : index
    %16 = vector.load %arg9[%c0_14, %c0_15] : memref<128x128xf32, #tpu.memory_space<vmem>>, vector<128x128xf32>
    %17 = arith.truncf %16 : vector<128x128xf32> to vector<128x128xbf16>
    %c0_16 = arith.constant 0 : index
    %c0_17 = arith.constant 0 : index
    %18 = vector.load %arg10[%c0_16, %c0_17] : memref<1x128xf32, #tpu.memory_space<vmem>>, vector<1x128xf32>
    %c0_18 = arith.constant 0 : index
    %c0_19 = arith.constant 0 : index
    %19 = vector.load %arg11[%c0_18, %c0_19] : memref<1x128xf32, #tpu.memory_space<vmem>>, vector<1x128xf32>
    %c0_20 = arith.constant 0 : index
    %c0_21 = arith.constant 0 : index
    %c0_22 = arith.constant 0 : index
    %20 = vector.load %arg5[%c0_20, %c0_21, %c0_22] : memref<1x16x8xf32, #tpu.memory_space<vmem>>, vector<1x16x8xf32>
    %21 = vector.shape_cast %20 : vector<1x16x8xf32> to vector<16x8xf32>
    %cst_23 = arith.constant 0.000000e+00 : f32
    %22 = vector.broadcast %cst_23 : f32 to vector<16x128xf32>
    %23 = vector.extract_strided_slice %8 {offsets = [0, 0], sizes = [1, 128], strides = [1, 1]} : vector<8x128xf32> to vector<1x128xf32>
    %24 = vector.broadcast %23 : vector<1x128xf32> to vector<16x128xf32>
    %25 = arith.subf %24, %10 : vector<16x128xf32>
    %cst_24 = arith.constant 0.000000e+00 : f32
    %26 = vector.broadcast %cst_24 : f32 to vector<16x128xf32>
    %27 = arith.maximumf %25, %26 : vector<16x128xf32>
    %28 = arith.truncf %27 : vector<16x128xf32> to vector<16x128xbf16>
    %cst_25 = arith.constant dense<0.000000e+00> : vector<16x128xf32>
    %29 = tpu.matmul %28, %17, %cst_25 {dimension_numbers = #tpu.dot_dimension_numbers<[1], [0], [0], [1], [0, 0, 1, 1], [], []>} : vector<16x128xbf16>, vector<128x128xbf16>, vector<16x128xf32> -> vector<16x128xf32>
    %30 = vector.extract_strided_slice %15 {offsets = [0, 0], sizes = [1, 128], strides = [1, 1]} : vector<8x128xf32> to vector<1x128xf32>
    %31 = vector.broadcast %30 : vector<1x128xf32> to vector<16x128xf32>
    %32 = arith.addf %29, %31 : vector<16x128xf32>
    %cst_26 = arith.constant dense<0.000000e+00> : vector<16xf32>
    %33 = vector.multi_reduction <add>, %32, %cst_26 [1] : vector<16x128xf32> to vector<16xf32>
    %34 = vector.shape_cast %33 : vector<16xf32> to vector<16x1xf32>
    %cst_27 = arith.constant 1.280000e+02 : f32
    %35 = vector.broadcast %cst_27 : f32 to vector<16x1xf32>
    %36 = arith.divf %34, %35 : vector<16x1xf32>
    %37 = arith.mulf %32, %32 : vector<16x128xf32>
    %cst_28 = arith.constant dense<0.000000e+00> : vector<16xf32>
    %38 = vector.multi_reduction <add>, %37, %cst_28 [1] : vector<16x128xf32> to vector<16xf32>
    %39 = vector.shape_cast %38 : vector<16xf32> to vector<16x1xf32>
    %cst_29 = arith.constant 1.280000e+02 : f32
    %40 = vector.broadcast %cst_29 : f32 to vector<16x1xf32>
    %41 = arith.divf %39, %40 : vector<16x1xf32>
    %42 = arith.mulf %36, %36 : vector<16x1xf32>
    %43 = arith.subf %41, %42 : vector<16x1xf32>
    %cst_30 = arith.constant 0.000000e+00 : f32
    %44 = vector.broadcast %cst_30 : f32 to vector<16x1xf32>
    %45 = arith.maximumf %43, %44 : vector<16x1xf32>
    %46 = vector.broadcast %36 : vector<16x1xf32> to vector<16x128xf32>
    %47 = arith.subf %32, %46 : vector<16x128xf32>
    %cst_31 = arith.constant 9.99999974E-6 : f32
    %48 = vector.broadcast %cst_31 : f32 to vector<16x1xf32>
    %49 = arith.addf %45, %48 : vector<16x1xf32>
    %50 = math.rsqrt %49 : vector<16x1xf32>
    %51 = vector.broadcast %50 : vector<16x1xf32> to vector<16x128xf32>
    %52 = arith.mulf %47, %51 : vector<16x128xf32>
    %53 = vector.broadcast %18 : vector<1x128xf32> to vector<16x128xf32>
    %54 = arith.mulf %52, %53 : vector<16x128xf32>
    %55 = vector.broadcast %19 : vector<1x128xf32> to vector<16x128xf32>
    %56 = arith.addf %54, %55 : vector<16x128xf32>
    %cst_32 = arith.constant 0.000000e+00 : f32
    %57 = vector.broadcast %cst_32 : f32 to vector<16x128xf32>
    %58 = arith.maximumf %56, %57 : vector<16x128xf32>
    %59 = vector.extract_strided_slice %21 {offsets = [0, 0], sizes = [16, 1], strides = [1, 1]} : vector<16x8xf32> to vector<16x1xf32>
    %60 = vector.broadcast %59 : vector<16x1xf32> to vector<16x128xf32>
    %61 = arith.mulf %60, %58 : vector<16x128xf32>
    %62 = arith.addf %22, %61 : vector<16x128xf32>
    %63 = vector.extract_strided_slice %8 {offsets = [1, 0], sizes = [1, 128], strides = [1, 1]} : vector<8x128xf32> to vector<1x128xf32>
    %64 = vector.broadcast %63 : vector<1x128xf32> to vector<16x128xf32>
    %65 = arith.subf %64, %10 : vector<16x128xf32>
    %cst_33 = arith.constant 0.000000e+00 : f32
    %66 = vector.broadcast %cst_33 : f32 to vector<16x128xf32>
    %67 = arith.maximumf %65, %66 : vector<16x128xf32>
    %68 = arith.truncf %67 : vector<16x128xf32> to vector<16x128xbf16>
    %cst_34 = arith.constant dense<0.000000e+00> : vector<16x128xf32>
    %69 = tpu.matmul %68, %17, %cst_34 {dimension_numbers = #tpu.dot_dimension_numbers<[1], [0], [0], [1], [0, 0, 1, 1], [], []>} : vector<16x128xbf16>, vector<128x128xbf16>, vector<16x128xf32> -> vector<16x128xf32>
    %70 = vector.extract_strided_slice %15 {offsets = [1, 0], sizes = [1, 128], strides = [1, 1]} : vector<8x128xf32> to vector<1x128xf32>
    %71 = vector.broadcast %70 : vector<1x128xf32> to vector<16x128xf32>
    %72 = arith.addf %69, %71 : vector<16x128xf32>
    %cst_35 = arith.constant dense<0.000000e+00> : vector<16xf32>
    %73 = vector.multi_reduction <add>, %72, %cst_35 [1] : vector<16x128xf32> to vector<16xf32>
    %74 = vector.shape_cast %73 : vector<16xf32> to vector<16x1xf32>
    %cst_36 = arith.constant 1.280000e+02 : f32
    %75 = vector.broadcast %cst_36 : f32 to vector<16x1xf32>
    %76 = arith.divf %74, %75 : vector<16x1xf32>
    %77 = arith.mulf %72, %72 : vector<16x128xf32>
    %cst_37 = arith.constant dense<0.000000e+00> : vector<16xf32>
    %78 = vector.multi_reduction <add>, %77, %cst_37 [1] : vector<16x128xf32> to vector<16xf32>
    %79 = vector.shape_cast %78 : vector<16xf32> to vector<16x1xf32>
    %cst_38 = arith.constant 1.280000e+02 : f32
    %80 = vector.broadcast %cst_38 : f32 to vector<16x1xf32>
    %81 = arith.divf %79, %80 : vector<16x1xf32>
    %82 = arith.mulf %76, %76 : vector<16x1xf32>
    %83 = arith.subf %81, %82 : vector<16x1xf32>
    %cst_39 = arith.constant 0.000000e+00 : f32
    %84 = vector.broadcast %cst_39 : f32 to vector<16x1xf32>
    %85 = arith.maximumf %83, %84 : vector<16x1xf32>
    %86 = vector.broadcast %76 : vector<16x1xf32> to vector<16x128xf32>
    %87 = arith.subf %72, %86 : vector<16x128xf32>
    %cst_40 = arith.constant 9.99999974E-6 : f32
    %88 = vector.broadcast %cst_40 : f32 to vector<16x1xf32>
    %89 = arith.addf %85, %88 : vector<16x1xf32>
    %90 = math.rsqrt %89 : vector<16x1xf32>
    %91 = vector.broadcast %90 : vector<16x1xf32> to vector<16x128xf32>
    %92 = arith.mulf %87, %91 : vector<16x128xf32>
    %93 = vector.broadcast %18 : vector<1x128xf32> to vector<16x128xf32>
    %94 = arith.mulf %92, %93 : vector<16x128xf32>
    %95 = vector.broadcast %19 : vector<1x128xf32> to vector<16x128xf32>
    %96 = arith.addf %94, %95 : vector<16x128xf32>
    %cst_41 = arith.constant 0.000000e+00 : f32
    %97 = vector.broadcast %cst_41 : f32 to vector<16x128xf32>
    %98 = arith.maximumf %96, %97 : vector<16x128xf32>
    %99 = vector.extract_strided_slice %21 {offsets = [0, 1], sizes = [16, 1], strides = [1, 1]} : vector<16x8xf32> to vector<16x1xf32>
    %100 = vector.broadcast %99 : vector<16x1xf32> to vector<16x128xf32>
    %101 = arith.mulf %100, %98 : vector<16x128xf32>
    %102 = arith.addf %62, %101 : vector<16x128xf32>
    %103 = vector.extract_strided_slice %8 {offsets = [2, 0], sizes = [1, 128], strides = [1, 1]} : vector<8x128xf32> to vector<1x128xf32>
    %104 = vector.broadcast %103 : vector<1x128xf32> to vector<16x128xf32>
    %105 = arith.subf %104, %10 : vector<16x128xf32>
    %cst_42 = arith.constant 0.000000e+00 : f32
    %106 = vector.broadcast %cst_42 : f32 to vector<16x128xf32>
    %107 = arith.maximumf %105, %106 : vector<16x128xf32>
    %108 = arith.truncf %107 : vector<16x128xf32> to vector<16x128xbf16>
    %cst_43 = arith.constant dense<0.000000e+00> : vector<16x128xf32>
    %109 = tpu.matmul %108, %17, %cst_43 {dimension_numbers = #tpu.dot_dimension_numbers<[1], [0], [0], [1], [0, 0, 1, 1], [], []>} : vector<16x128xbf16>, vector<128x128xbf16>, vector<16x128xf32> -> vector<16x128xf32>
    %110 = vector.extract_strided_slice %15 {offsets = [2, 0], sizes = [1, 128], strides = [1, 1]} : vector<8x128xf32> to vector<1x128xf32>
    %111 = vector.broadcast %110 : vector<1x128xf32> to vector<16x128xf32>
    %112 = arith.addf %109, %111 : vector<16x128xf32>
    %cst_44 = arith.constant dense<0.000000e+00> : vector<16xf32>
    %113 = vector.multi_reduction <add>, %112, %cst_44 [1] : vector<16x128xf32> to vector<16xf32>
    %114 = vector.shape_cast %113 : vector<16xf32> to vector<16x1xf32>
    %cst_45 = arith.constant 1.280000e+02 : f32
    %115 = vector.broadcast %cst_45 : f32 to vector<16x1xf32>
    %116 = arith.divf %114, %115 : vector<16x1xf32>
    %117 = arith.mulf %112, %112 : vector<16x128xf32>
    %cst_46 = arith.constant dense<0.000000e+00> : vector<16xf32>
    %118 = vector.multi_reduction <add>, %117, %cst_46 [1] : vector<16x128xf32> to vector<16xf32>
    %119 = vector.shape_cast %118 : vector<16xf32> to vector<16x1xf32>
    %cst_47 = arith.constant 1.280000e+02 : f32
    %120 = vector.broadcast %cst_47 : f32 to vector<16x1xf32>
    %121 = arith.divf %119, %120 : vector<16x1xf32>
    %122 = arith.mulf %116, %116 : vector<16x1xf32>
    %123 = arith.subf %121, %122 : vector<16x1xf32>
    %cst_48 = arith.constant 0.000000e+00 : f32
    %124 = vector.broadcast %cst_48 : f32 to vector<16x1xf32>
    %125 = arith.maximumf %123, %124 : vector<16x1xf32>
    %126 = vector.broadcast %116 : vector<16x1xf32> to vector<16x128xf32>
    %127 = arith.subf %112, %126 : vector<16x128xf32>
    %cst_49 = arith.constant 9.99999974E-6 : f32
    %128 = vector.broadcast %cst_49 : f32 to vector<16x1xf32>
    %129 = arith.addf %125, %128 : vector<16x1xf32>
    %130 = math.rsqrt %129 : vector<16x1xf32>
    %131 = vector.broadcast %130 : vector<16x1xf32> to vector<16x128xf32>
    %132 = arith.mulf %127, %131 : vector<16x128xf32>
    %133 = vector.broadcast %18 : vector<1x128xf32> to vector<16x128xf32>
    %134 = arith.mulf %132, %133 : vector<16x128xf32>
    %135 = vector.broadcast %19 : vector<1x128xf32> to vector<16x128xf32>
    %136 = arith.addf %134, %135 : vector<16x128xf32>
    %cst_50 = arith.constant 0.000000e+00 : f32
    %137 = vector.broadcast %cst_50 : f32 to vector<16x128xf32>
    %138 = arith.maximumf %136, %137 : vector<16x128xf32>
    %139 = vector.extract_strided_slice %21 {offsets = [0, 2], sizes = [16, 1], strides = [1, 1]} : vector<16x8xf32> to vector<16x1xf32>
    %140 = vector.broadcast %139 : vector<16x1xf32> to vector<16x128xf32>
    %141 = arith.mulf %140, %138 : vector<16x128xf32>
    %142 = arith.addf %102, %141 : vector<16x128xf32>
    %143 = vector.extract_strided_slice %8 {offsets = [3, 0], sizes = [1, 128], strides = [1, 1]} : vector<8x128xf32> to vector<1x128xf32>
    %144 = vector.broadcast %143 : vector<1x128xf32> to vector<16x128xf32>
    %145 = arith.subf %144, %10 : vector<16x128xf32>
    %cst_51 = arith.constant 0.000000e+00 : f32
    %146 = vector.broadcast %cst_51 : f32 to vector<16x128xf32>
    %147 = arith.maximumf %145, %146 : vector<16x128xf32>
    %148 = arith.truncf %147 : vector<16x128xf32> to vector<16x128xbf16>
    %cst_52 = arith.constant dense<0.000000e+00> : vector<16x128xf32>
    %149 = tpu.matmul %148, %17, %cst_52 {dimension_numbers = #tpu.dot_dimension_numbers<[1], [0], [0], [1], [0, 0, 1, 1], [], []>} : vector<16x128xbf16>, vector<128x128xbf16>, vector<16x128xf32> -> vector<16x128xf32>
    %150 = vector.extract_strided_slice %15 {offsets = [3, 0], sizes = [1, 128], strides = [1, 1]} : vector<8x128xf32> to vector<1x128xf32>
    %151 = vector.broadcast %150 : vector<1x128xf32> to vector<16x128xf32>
    %152 = arith.addf %149, %151 : vector<16x128xf32>
    %cst_53 = arith.constant dense<0.000000e+00> : vector<16xf32>
    %153 = vector.multi_reduction <add>, %152, %cst_53 [1] : vector<16x128xf32> to vector<16xf32>
    %154 = vector.shape_cast %153 : vector<16xf32> to vector<16x1xf32>
    %cst_54 = arith.constant 1.280000e+02 : f32
    %155 = vector.broadcast %cst_54 : f32 to vector<16x1xf32>
    %156 = arith.divf %154, %155 : vector<16x1xf32>
    %157 = arith.mulf %152, %152 : vector<16x128xf32>
    %cst_55 = arith.constant dense<0.000000e+00> : vector<16xf32>
    %158 = vector.multi_reduction <add>, %157, %cst_55 [1] : vector<16x128xf32> to vector<16xf32>
    %159 = vector.shape_cast %158 : vector<16xf32> to vector<16x1xf32>
    %cst_56 = arith.constant 1.280000e+02 : f32
    %160 = vector.broadcast %cst_56 : f32 to vector<16x1xf32>
    %161 = arith.divf %159, %160 : vector<16x1xf32>
    %162 = arith.mulf %156, %156 : vector<16x1xf32>
    %163 = arith.subf %161, %162 : vector<16x1xf32>
    %cst_57 = arith.constant 0.000000e+00 : f32
    %164 = vector.broadcast %cst_57 : f32 to vector<16x1xf32>
    %165 = arith.maximumf %163, %164 : vector<16x1xf32>
    %166 = vector.broadcast %156 : vector<16x1xf32> to vector<16x128xf32>
    %167 = arith.subf %152, %166 : vector<16x128xf32>
    %cst_58 = arith.constant 9.99999974E-6 : f32
    %168 = vector.broadcast %cst_58 : f32 to vector<16x1xf32>
    %169 = arith.addf %165, %168 : vector<16x1xf32>
    %170 = math.rsqrt %169 : vector<16x1xf32>
    %171 = vector.broadcast %170 : vector<16x1xf32> to vector<16x128xf32>
    %172 = arith.mulf %167, %171 : vector<16x128xf32>
    %173 = vector.broadcast %18 : vector<1x128xf32> to vector<16x128xf32>
    %174 = arith.mulf %172, %173 : vector<16x128xf32>
    %175 = vector.broadcast %19 : vector<1x128xf32> to vector<16x128xf32>
    %176 = arith.addf %174, %175 : vector<16x128xf32>
    %cst_59 = arith.constant 0.000000e+00 : f32
    %177 = vector.broadcast %cst_59 : f32 to vector<16x128xf32>
    %178 = arith.maximumf %176, %177 : vector<16x128xf32>
    %179 = vector.extract_strided_slice %21 {offsets = [0, 3], sizes = [16, 1], strides = [1, 1]} : vector<16x8xf32> to vector<16x1xf32>
    %180 = vector.broadcast %179 : vector<16x1xf32> to vector<16x128xf32>
    %181 = arith.mulf %180, %178 : vector<16x128xf32>
    %182 = arith.addf %142, %181 : vector<16x128xf32>
    %183 = vector.extract_strided_slice %8 {offsets = [4, 0], sizes = [1, 128], strides = [1, 1]} : vector<8x128xf32> to vector<1x128xf32>
    %184 = vector.broadcast %183 : vector<1x128xf32> to vector<16x128xf32>
    %185 = arith.subf %184, %10 : vector<16x128xf32>
    %cst_60 = arith.constant 0.000000e+00 : f32
    %186 = vector.broadcast %cst_60 : f32 to vector<16x128xf32>
    %187 = arith.maximumf %185, %186 : vector<16x128xf32>
    %188 = arith.truncf %187 : vector<16x128xf32> to vector<16x128xbf16>
    %cst_61 = arith.constant dense<0.000000e+00> : vector<16x128xf32>
    %189 = tpu.matmul %188, %17, %cst_61 {dimension_numbers = #tpu.dot_dimension_numbers<[1], [0], [0], [1], [0, 0, 1, 1], [], []>} : vector<16x128xbf16>, vector<128x128xbf16>, vector<16x128xf32> -> vector<16x128xf32>
    %190 = vector.extract_strided_slice %15 {offsets = [4, 0], sizes = [1, 128], strides = [1, 1]} : vector<8x128xf32> to vector<1x128xf32>
    %191 = vector.broadcast %190 : vector<1x128xf32> to vector<16x128xf32>
    %192 = arith.addf %189, %191 : vector<16x128xf32>
    %cst_62 = arith.constant dense<0.000000e+00> : vector<16xf32>
    %193 = vector.multi_reduction <add>, %192, %cst_62 [1] : vector<16x128xf32> to vector<16xf32>
    %194 = vector.shape_cast %193 : vector<16xf32> to vector<16x1xf32>
    %cst_63 = arith.constant 1.280000e+02 : f32
    %195 = vector.broadcast %cst_63 : f32 to vector<16x1xf32>
    %196 = arith.divf %194, %195 : vector<16x1xf32>
    %197 = arith.mulf %192, %192 : vector<16x128xf32>
    %cst_64 = arith.constant dense<0.000000e+00> : vector<16xf32>
    %198 = vector.multi_reduction <add>, %197, %cst_64 [1] : vector<16x128xf32> to vector<16xf32>
    %199 = vector.shape_cast %198 : vector<16xf32> to vector<16x1xf32>
    %cst_65 = arith.constant 1.280000e+02 : f32
    %200 = vector.broadcast %cst_65 : f32 to vector<16x1xf32>
    %201 = arith.divf %199, %200 : vector<16x1xf32>
    %202 = arith.mulf %196, %196 : vector<16x1xf32>
    %203 = arith.subf %201, %202 : vector<16x1xf32>
    %cst_66 = arith.constant 0.000000e+00 : f32
    %204 = vector.broadcast %cst_66 : f32 to vector<16x1xf32>
    %205 = arith.maximumf %203, %204 : vector<16x1xf32>
    %206 = vector.broadcast %196 : vector<16x1xf32> to vector<16x128xf32>
    %207 = arith.subf %192, %206 : vector<16x128xf32>
    %cst_67 = arith.constant 9.99999974E-6 : f32
    %208 = vector.broadcast %cst_67 : f32 to vector<16x1xf32>
    %209 = arith.addf %205, %208 : vector<16x1xf32>
    %210 = math.rsqrt %209 : vector<16x1xf32>
    %211 = vector.broadcast %210 : vector<16x1xf32> to vector<16x128xf32>
    %212 = arith.mulf %207, %211 : vector<16x128xf32>
    %213 = vector.broadcast %18 : vector<1x128xf32> to vector<16x128xf32>
    %214 = arith.mulf %212, %213 : vector<16x128xf32>
    %215 = vector.broadcast %19 : vector<1x128xf32> to vector<16x128xf32>
    %216 = arith.addf %214, %215 : vector<16x128xf32>
    %cst_68 = arith.constant 0.000000e+00 : f32
    %217 = vector.broadcast %cst_68 : f32 to vector<16x128xf32>
    %218 = arith.maximumf %216, %217 : vector<16x128xf32>
    %219 = vector.extract_strided_slice %21 {offsets = [0, 4], sizes = [16, 1], strides = [1, 1]} : vector<16x8xf32> to vector<16x1xf32>
    %220 = vector.broadcast %219 : vector<16x1xf32> to vector<16x128xf32>
    %221 = arith.mulf %220, %218 : vector<16x128xf32>
    %222 = arith.addf %182, %221 : vector<16x128xf32>
    %223 = vector.extract_strided_slice %8 {offsets = [5, 0], sizes = [1, 128], strides = [1, 1]} : vector<8x128xf32> to vector<1x128xf32>
    %224 = vector.broadcast %223 : vector<1x128xf32> to vector<16x128xf32>
    %225 = arith.subf %224, %10 : vector<16x128xf32>
    %cst_69 = arith.constant 0.000000e+00 : f32
    %226 = vector.broadcast %cst_69 : f32 to vector<16x128xf32>
    %227 = arith.maximumf %225, %226 : vector<16x128xf32>
    %228 = arith.truncf %227 : vector<16x128xf32> to vector<16x128xbf16>
    %cst_70 = arith.constant dense<0.000000e+00> : vector<16x128xf32>
    %229 = tpu.matmul %228, %17, %cst_70 {dimension_numbers = #tpu.dot_dimension_numbers<[1], [0], [0], [1], [0, 0, 1, 1], [], []>} : vector<16x128xbf16>, vector<128x128xbf16>, vector<16x128xf32> -> vector<16x128xf32>
    %230 = vector.extract_strided_slice %15 {offsets = [5, 0], sizes = [1, 128], strides = [1, 1]} : vector<8x128xf32> to vector<1x128xf32>
    %231 = vector.broadcast %230 : vector<1x128xf32> to vector<16x128xf32>
    %232 = arith.addf %229, %231 : vector<16x128xf32>
    %cst_71 = arith.constant dense<0.000000e+00> : vector<16xf32>
    %233 = vector.multi_reduction <add>, %232, %cst_71 [1] : vector<16x128xf32> to vector<16xf32>
    %234 = vector.shape_cast %233 : vector<16xf32> to vector<16x1xf32>
    %cst_72 = arith.constant 1.280000e+02 : f32
    %235 = vector.broadcast %cst_72 : f32 to vector<16x1xf32>
    %236 = arith.divf %234, %235 : vector<16x1xf32>
    %237 = arith.mulf %232, %232 : vector<16x128xf32>
    %cst_73 = arith.constant dense<0.000000e+00> : vector<16xf32>
    %238 = vector.multi_reduction <add>, %237, %cst_73 [1] : vector<16x128xf32> to vector<16xf32>
    %239 = vector.shape_cast %238 : vector<16xf32> to vector<16x1xf32>
    %cst_74 = arith.constant 1.280000e+02 : f32
    %240 = vector.broadcast %cst_74 : f32 to vector<16x1xf32>
    %241 = arith.divf %239, %240 : vector<16x1xf32>
    %242 = arith.mulf %236, %236 : vector<16x1xf32>
    %243 = arith.subf %241, %242 : vector<16x1xf32>
    %cst_75 = arith.constant 0.000000e+00 : f32
    %244 = vector.broadcast %cst_75 : f32 to vector<16x1xf32>
    %245 = arith.maximumf %243, %244 : vector<16x1xf32>
    %246 = vector.broadcast %236 : vector<16x1xf32> to vector<16x128xf32>
    %247 = arith.subf %232, %246 : vector<16x128xf32>
    %cst_76 = arith.constant 9.99999974E-6 : f32
    %248 = vector.broadcast %cst_76 : f32 to vector<16x1xf32>
    %249 = arith.addf %245, %248 : vector<16x1xf32>
    %250 = math.rsqrt %249 : vector<16x1xf32>
    %251 = vector.broadcast %250 : vector<16x1xf32> to vector<16x128xf32>
    %252 = arith.mulf %247, %251 : vector<16x128xf32>
    %253 = vector.broadcast %18 : vector<1x128xf32> to vector<16x128xf32>
    %254 = arith.mulf %252, %253 : vector<16x128xf32>
    %255 = vector.broadcast %19 : vector<1x128xf32> to vector<16x128xf32>
    %256 = arith.addf %254, %255 : vector<16x128xf32>
    %cst_77 = arith.constant 0.000000e+00 : f32
    %257 = vector.broadcast %cst_77 : f32 to vector<16x128xf32>
    %258 = arith.maximumf %256, %257 : vector<16x128xf32>
    %259 = vector.extract_strided_slice %21 {offsets = [0, 5], sizes = [16, 1], strides = [1, 1]} : vector<16x8xf32> to vector<16x1xf32>
    %260 = vector.broadcast %259 : vector<16x1xf32> to vector<16x128xf32>
    %261 = arith.mulf %260, %258 : vector<16x128xf32>
    %262 = arith.addf %222, %261 : vector<16x128xf32>
    %263 = vector.extract_strided_slice %8 {offsets = [6, 0], sizes = [1, 128], strides = [1, 1]} : vector<8x128xf32> to vector<1x128xf32>
    %264 = vector.broadcast %263 : vector<1x128xf32> to vector<16x128xf32>
    %265 = arith.subf %264, %10 : vector<16x128xf32>
    %cst_78 = arith.constant 0.000000e+00 : f32
    %266 = vector.broadcast %cst_78 : f32 to vector<16x128xf32>
    %267 = arith.maximumf %265, %266 : vector<16x128xf32>
    %268 = arith.truncf %267 : vector<16x128xf32> to vector<16x128xbf16>
    %cst_79 = arith.constant dense<0.000000e+00> : vector<16x128xf32>
    %269 = tpu.matmul %268, %17, %cst_79 {dimension_numbers = #tpu.dot_dimension_numbers<[1], [0], [0], [1], [0, 0, 1, 1], [], []>} : vector<16x128xbf16>, vector<128x128xbf16>, vector<16x128xf32> -> vector<16x128xf32>
    %270 = vector.extract_strided_slice %15 {offsets = [6, 0], sizes = [1, 128], strides = [1, 1]} : vector<8x128xf32> to vector<1x128xf32>
    %271 = vector.broadcast %270 : vector<1x128xf32> to vector<16x128xf32>
    %272 = arith.addf %269, %271 : vector<16x128xf32>
    %cst_80 = arith.constant dense<0.000000e+00> : vector<16xf32>
    %273 = vector.multi_reduction <add>, %272, %cst_80 [1] : vector<16x128xf32> to vector<16xf32>
    %274 = vector.shape_cast %273 : vector<16xf32> to vector<16x1xf32>
    %cst_81 = arith.constant 1.280000e+02 : f32
    %275 = vector.broadcast %cst_81 : f32 to vector<16x1xf32>
    %276 = arith.divf %274, %275 : vector<16x1xf32>
    %277 = arith.mulf %272, %272 : vector<16x128xf32>
    %cst_82 = arith.constant dense<0.000000e+00> : vector<16xf32>
    %278 = vector.multi_reduction <add>, %277, %cst_82 [1] : vector<16x128xf32> to vector<16xf32>
    %279 = vector.shape_cast %278 : vector<16xf32> to vector<16x1xf32>
    %cst_83 = arith.constant 1.280000e+02 : f32
    %280 = vector.broadcast %cst_83 : f32 to vector<16x1xf32>
    %281 = arith.divf %279, %280 : vector<16x1xf32>
    %282 = arith.mulf %276, %276 : vector<16x1xf32>
    %283 = arith.subf %281, %282 : vector<16x1xf32>
    %cst_84 = arith.constant 0.000000e+00 : f32
    %284 = vector.broadcast %cst_84 : f32 to vector<16x1xf32>
    %285 = arith.maximumf %283, %284 : vector<16x1xf32>
    %286 = vector.broadcast %276 : vector<16x1xf32> to vector<16x128xf32>
    %287 = arith.subf %272, %286 : vector<16x128xf32>
    %cst_85 = arith.constant 9.99999974E-6 : f32
    %288 = vector.broadcast %cst_85 : f32 to vector<16x1xf32>
    %289 = arith.addf %285, %288 : vector<16x1xf32>
    %290 = math.rsqrt %289 : vector<16x1xf32>
    %291 = vector.broadcast %290 : vector<16x1xf32> to vector<16x128xf32>
    %292 = arith.mulf %287, %291 : vector<16x128xf32>
    %293 = vector.broadcast %18 : vector<1x128xf32> to vector<16x128xf32>
    %294 = arith.mulf %292, %293 : vector<16x128xf32>
    %295 = vector.broadcast %19 : vector<1x128xf32> to vector<16x128xf32>
    %296 = arith.addf %294, %295 : vector<16x128xf32>
    %cst_86 = arith.constant 0.000000e+00 : f32
    %297 = vector.broadcast %cst_86 : f32 to vector<16x128xf32>
    %298 = arith.maximumf %296, %297 : vector<16x128xf32>
    %299 = vector.extract_strided_slice %21 {offsets = [0, 6], sizes = [16, 1], strides = [1, 1]} : vector<16x8xf32> to vector<16x1xf32>
    %300 = vector.broadcast %299 : vector<16x1xf32> to vector<16x128xf32>
    %301 = arith.mulf %300, %298 : vector<16x128xf32>
    %302 = arith.addf %262, %301 : vector<16x128xf32>
    %303 = vector.extract_strided_slice %8 {offsets = [7, 0], sizes = [1, 128], strides = [1, 1]} : vector<8x128xf32> to vector<1x128xf32>
    %304 = vector.broadcast %303 : vector<1x128xf32> to vector<16x128xf32>
    %305 = arith.subf %304, %10 : vector<16x128xf32>
    %cst_87 = arith.constant 0.000000e+00 : f32
    %306 = vector.broadcast %cst_87 : f32 to vector<16x128xf32>
    %307 = arith.maximumf %305, %306 : vector<16x128xf32>
    %308 = arith.truncf %307 : vector<16x128xf32> to vector<16x128xbf16>
    %cst_88 = arith.constant dense<0.000000e+00> : vector<16x128xf32>
    %309 = tpu.matmul %308, %17, %cst_88 {dimension_numbers = #tpu.dot_dimension_numbers<[1], [0], [0], [1], [0, 0, 1, 1], [], []>} : vector<16x128xbf16>, vector<128x128xbf16>, vector<16x128xf32> -> vector<16x128xf32>
    %310 = vector.extract_strided_slice %15 {offsets = [7, 0], sizes = [1, 128], strides = [1, 1]} : vector<8x128xf32> to vector<1x128xf32>
    %311 = vector.broadcast %310 : vector<1x128xf32> to vector<16x128xf32>
    %312 = arith.addf %309, %311 : vector<16x128xf32>
    %cst_89 = arith.constant dense<0.000000e+00> : vector<16xf32>
    %313 = vector.multi_reduction <add>, %312, %cst_89 [1] : vector<16x128xf32> to vector<16xf32>
    %314 = vector.shape_cast %313 : vector<16xf32> to vector<16x1xf32>
    %cst_90 = arith.constant 1.280000e+02 : f32
    %315 = vector.broadcast %cst_90 : f32 to vector<16x1xf32>
    %316 = arith.divf %314, %315 : vector<16x1xf32>
    %317 = arith.mulf %312, %312 : vector<16x128xf32>
    %cst_91 = arith.constant dense<0.000000e+00> : vector<16xf32>
    %318 = vector.multi_reduction <add>, %317, %cst_91 [1] : vector<16x128xf32> to vector<16xf32>
    %319 = vector.shape_cast %318 : vector<16xf32> to vector<16x1xf32>
    %cst_92 = arith.constant 1.280000e+02 : f32
    %320 = vector.broadcast %cst_92 : f32 to vector<16x1xf32>
    %321 = arith.divf %319, %320 : vector<16x1xf32>
    %322 = arith.mulf %316, %316 : vector<16x1xf32>
    %323 = arith.subf %321, %322 : vector<16x1xf32>
    %cst_93 = arith.constant 0.000000e+00 : f32
    %324 = vector.broadcast %cst_93 : f32 to vector<16x1xf32>
    %325 = arith.maximumf %323, %324 : vector<16x1xf32>
    %326 = vector.broadcast %316 : vector<16x1xf32> to vector<16x128xf32>
    %327 = arith.subf %312, %326 : vector<16x128xf32>
    %cst_94 = arith.constant 9.99999974E-6 : f32
    %328 = vector.broadcast %cst_94 : f32 to vector<16x1xf32>
    %329 = arith.addf %325, %328 : vector<16x1xf32>
    %330 = math.rsqrt %329 : vector<16x1xf32>
    %331 = vector.broadcast %330 : vector<16x1xf32> to vector<16x128xf32>
    %332 = arith.mulf %327, %331 : vector<16x128xf32>
    %333 = vector.broadcast %18 : vector<1x128xf32> to vector<16x128xf32>
    %334 = arith.mulf %332, %333 : vector<16x128xf32>
    %335 = vector.broadcast %19 : vector<1x128xf32> to vector<16x128xf32>
    %336 = arith.addf %334, %335 : vector<16x128xf32>
    %cst_95 = arith.constant 0.000000e+00 : f32
    %337 = vector.broadcast %cst_95 : f32 to vector<16x128xf32>
    %338 = arith.maximumf %336, %337 : vector<16x128xf32>
    %339 = vector.extract_strided_slice %21 {offsets = [0, 7], sizes = [16, 1], strides = [1, 1]} : vector<16x8xf32> to vector<16x1xf32>
    %340 = vector.broadcast %339 : vector<16x1xf32> to vector<16x128xf32>
    %341 = arith.mulf %340, %338 : vector<16x128xf32>
    %342 = arith.addf %302, %341 : vector<16x128xf32>
    %c0_96 = arith.constant 0 : index
    %c0_97 = arith.constant 0 : index
    %343 = vector.load %arg12[%c0_96, %c0_97] : memref<16x128xf32, #tpu.memory_space<vmem>>, vector<16x128xf32>
    %344 = arith.addf %343, %342 : vector<16x128xf32>
    %c0_98 = arith.constant 0 : index
    %c0_99 = arith.constant 0 : index
    %345 = vector.load %arg12[%c0_98, %c0_99] : memref<16x128xf32, #tpu.memory_space<vmem>>, vector<16x128xf32>
    tpu.vector_store %arg12[%c0_98, %c0_99], %344 {strides = array<i32>} : memref<16x128xf32, #tpu.memory_space<vmem>>, vector<16x128xf32>,
    return
  }
  func.func @transform_0(%arg0: i32, %arg1: i32) -> (i32, i32) {
    %c0_i32 = arith.constant 0 : i32
    %c0_i32_0 = arith.constant 0 : i32
    return %arg1, %c0_i32 : i32, i32
  }
  func.func @transform_1(%arg0: i32, %arg1: i32) -> (i32, i32) {
    %c0_i32 = arith.constant 0 : i32
    %c0_i32_0 = arith.constant 0 : i32
    return %arg0, %c0_i32 : i32, i32
  }
  func.func @transform_2(%arg0: i32, %arg1: i32) -> (i32, i32) {
    %c0_i32 = arith.constant 0 : i32
    %c0_i32_0 = arith.constant 0 : i32
    return %arg1, %c0_i32 : i32, i32
  }
  func.func @transform_3(%arg0: i32, %arg1: i32) -> (i32, i32, i32) {
    %c0_i32 = arith.constant 0 : i32
    %c0_i32_0 = arith.constant 0 : i32
    return %arg1, %arg0, %c0_i32 : i32, i32, i32
  }
  func.func @transform_4(%arg0: i32, %arg1: i32) -> (i32, i32) {
    %c0_i32 = arith.constant 0 : i32
    %c0_i32_0 = arith.constant 0 : i32
    %c0_i32_1 = arith.constant 0 : i32
    return %c0_i32, %c0_i32_0 : i32, i32
  }
  func.func @transform_5(%arg0: i32, %arg1: i32) -> (i32, i32) {
    %c0_i32 = arith.constant 0 : i32
    %c0_i32_0 = arith.constant 0 : i32
    %c0_i32_1 = arith.constant 0 : i32
    return %c0_i32, %c0_i32_0 : i32, i32
  }
  func.func @transform_6(%arg0: i32, %arg1: i32) -> (i32, i32) {
    %c0_i32 = arith.constant 0 : i32
    %c0_i32_0 = arith.constant 0 : i32
    %c0_i32_1 = arith.constant 0 : i32
    return %c0_i32, %c0_i32_0 : i32, i32
  }
  func.func @transform_7(%arg0: i32, %arg1: i32) -> (i32, i32) {
    %c0_i32 = arith.constant 0 : i32
    %c0_i32_0 = arith.constant 0 : i32
    %c0_i32_1 = arith.constant 0 : i32
    return %c0_i32, %c0_i32_0 : i32, i32
  }
  func.func @transform_8(%arg0: i32, %arg1: i32) -> (i32, i32) {
    %c0_i32 = arith.constant 0 : i32
    %c0_i32_0 = arith.constant 0 : i32
    %c0_i32_1 = arith.constant 0 : i32
    return %c0_i32, %c0_i32_0 : i32, i32
  }
  func.func @transform_9(%arg0: i32, %arg1: i32) -> (i32, i32) {
    %c0_i32 = arith.constant 0 : i32
    %c0_i32_0 = arith.constant 0 : i32
    %c0_i32_1 = arith.constant 0 : i32
    return %c0_i32, %c0_i32_0 : i32, i32
  }
  func.func @transform_10(%arg0: i32, %arg1: i32) -> (i32, i32) {
    %c0_i32 = arith.constant 0 : i32
    %c0_i32_0 = arith.constant 0 : i32
    return %arg0, %c0_i32 : i32, i32
  }
}

</mosaic_0001>

<bundles_post_ra>
// kernel: interactor_forward.13
= control target key start
LH: loop header
LB: loop body
LE: loop exit
PB: predicated region body
PF: predicated region fallthrough
CT: control target
= control target key end

     0   :  { %vm60_vm0 = vcmask 1043456   ;;  %vm53_vm1 = vcmask 64512   ;;  %s768_s2 = inlined_call_operand.vmem [shape: f32[8,128], index: 2, kind: input, shape index: {}]   ;;  %s769_s7 = inlined_call_operand.vmem [shape: f32[8,128], index: 7, kind: input, shape index: {}]   ;;  %s770_s0 = inlined_call_operand.vmem [shape: f32[24,8], index: 0, kind: input, shape index: {}]   ;;  %s771_s1 = inlined_call_operand.vmem [shape: f32[24,8], index: 1, kind: input, shape index: {}]   ;;  %s772_s4 = inlined_call_operand.vmem [shape: f32[128,128], index: 4, kind: input, shape index: {}]   ;;  %s773_s9 = inlined_call_operand.vmem [shape: f32[128,128], index: 9, kind: input, shape index: {}]   ;;  %s774_s3 = inlined_call_operand.vmem [shape: f32[1,128], index: 3, kind: input, shape index: {}]   ;;  %s775_s8 = inlined_call_operand.vmem [shape: f32[1,128], index: 8, kind: input, shape index: {}]   ;;  %s776_s5 = inlined_call_operand.vmem [shape: f32[1,128], index: 5, kind: input, shape index: {}]   ;;  %s777_s6 = inlined_call_operand.vmem [shape: f32[1,128], index: 6, kind: input, shape index: {}]   ;;  %s778_s10 = inlined_call_operand.vmem [shape: f32[1,128], index: 10, kind: input, shape index: {}]   ;;  %s779_s11 = inlined_call_operand.vmem [shape: f32[1,128], index: 11, kind: input, shape index: {}]   ;;  %s780_s12 = inlined_call_operand.vmem [shape: f32[24,128], index: 12, kind: output, shape index: {}]  }
   0x1   :  { %v45_v0 = vld [vmem:[%s768_s2] sm:$0xff]  ;;  %v43_v5 = vld [vmem:[%s770_s0 + $0x8] sm:$0xff]  ;;  %v99_v8 = vld [vmem:[%s772_s4 + $0x70] sm:$0xff] }
   0x2   :  { %v222_v1 = vld [vmem:[%s769_s7] sm:$0xff]  ;;  %v48_v3 = vpack.c.bf16 %v45_v0, %v45_v0  ;;  %v220_v7 = vld [vmem:[%s771_s1 + $0x8] sm:$0xff]  ;;  %v100_v13 = vld [vmem:[%s772_s4 + $0x78] sm:$0xff] }
   0x3   :  { %v42_v2 = vld [vmem:[%s770_s0] sm:$0xff]  ;;  %v225_v4 = vpack.c.bf16 %v222_v1, %v222_v1  ;;  %v98_v15 = vld [vmem:[%s772_s4 + $0x68] sm:$0xff]  ;;  %v110_v16 = vpack.c.bf16 %v100_v13, %v99_v8  ;;  %v274_v17 = vld [vmem:[%s773_s9 + $0x70] sm:$0xff] }
   0x4   :  { %v219_v6 = vld [vmem:[%s771_s1] sm:$0xff]  ;;  %v62_v9 = vsel %vm60_vm0, %v48_v3, 0  ;;  %v46_v11 = vpack.c.bf16 %v43_v5, %v42_v2  ;;  %v275_v18 = vld [vmem:[%s773_s9 + $0x78] sm:$0xff]  ;;  %v273_v21 = vld [vmem:[%s773_s9 + $0x68] sm:$0xff] }
   0x5   :  { %v237_v10 = vsel %vm60_vm0, %v225_v4, 0  ;;  %v223_v12 = vpack.c.bf16 %v220_v7, %v219_v6  ;;  %v97_v14 = vld [vmem:[%s772_s4 + $0x60] sm:$0xff]  ;;  %71 = vmatpush.bf16.msra.mxu0 %v62_v9  ;;  %v285_v19 = vpack.c.bf16 %v275_v18, %v274_v17  ;;  %404 = vmatpush.bf16.msra.mxu1 %v110_v16  ;;  %v95_v23 = vld [vmem:[%s772_s4 + $0x50] sm:$0xff]  ;;  %v96_v24 = vld [vmem:[%s772_s4 + $0x58] sm:$0xff] }
   0x6   :  { %246 = vmatpush.bf16.msra.mxu2 %v237_v10  ;;  %v272_v20 = vld [vmem:[%s773_s9 + $0x60] sm:$0xff]  ;;  %v109_v22 = vpack.c.bf16 %v98_v15, %v97_v14  ;;  %v270_v26 = vld [vmem:[%s773_s9 + $0x50] sm:$0xff]  ;;  %v271_v27 = vld [vmem:[%s773_s9 + $0x58] sm:$0xff]  ;;  %v108_v28 = vpack.c.bf16 %v96_v24, %v95_v23 }
   0x7   :  { %v284_v25 = vpack.c.bf16 %v273_v21, %v272_v20  ;;  %412 = vmatpush.bf16.msra.mxu3 %v285_v19  ;;  %v93_v29 = vld [vmem:[%s772_s4 + $0x40] sm:$0xff]  ;;  %v94_v30 = vld [vmem:[%s772_s4 + $0x48] sm:$0xff]  ;;  %v283_v31 = vpack.c.bf16 %v271_v27, %v270_v26  ;;  %v44_v33 = vld [vmem:[%s770_s0 + $0x10] sm:$0xff] }
   0x8   :  { %400 = vmatmul.msk.bf16.vlgmr.msra.gmra.mxu0 %vm53_vm1, %v46_v11  ;;  %v107_v32 = vpack.c.bf16 %v94_v30, %v93_v29  ;;  %v221_v34 = vld [vmem:[%s771_s1 + $0x10] sm:$0xff]  ;;  %v47_v35 = vpack.c.bf16 %v44_v33, %v44_v33  ;;  %v92_v38 = vld [vmem:[%s772_s4 + $0x38] sm:$0xff]  ;;  %v268_v40 = vld [vmem:[%s773_s9 + $0x40] sm:$0xff] }
   0x9   :  { %111 = vmatpush.bf16.msrb.mxu0 %v110_v16  ;;  %402 = vmatmul.msk.bf16.vlgmr.msra.gmra.mxu2 %vm53_vm1, %v223_v12  ;;  %v224_v36 = vpack.c.bf16 %v221_v34, %v221_v34  ;;  %v91_v37 = vld [vmem:[%s772_s4 + $0x30] sm:$0xff]  ;;  %v269_v41 = vld [vmem:[%s773_s9 + $0x48] sm:$0xff]  ;;  %v89_v43 = vld [vmem:[%s772_s4 + $0x20] sm:$0xff] }
   0xa   :  { %286 = vmatpush.bf16.msrb.mxu2 %v285_v19  ;;  %405 = vmatpush.bf16.msra.mxu1 %v109_v22  ;;  %v106_v39 = vpack.c.bf16 %v92_v38, %v91_v37  ;;  %v282_v42 = vpack.c.bf16 %v269_v41, %v268_v40  ;;  %v90_v44 = vld [vmem:[%s772_s4 + $0x28] sm:$0xff]  ;;  %v266_v46 = vld [vmem:[%s773_s9 + $0x30] sm:$0xff]  ;;  %v267_v47 = vld [vmem:[%s773_s9 + $0x38] sm:$0xff]  ;;  %v441_v40 = vmov 128.0  }
   0xb   :  { %413 = vmatpush.bf16.msra.mxu3 %v284_v25  ;;  %v105_v45 = vpack.c.bf16 %v90_v44, %v89_v43  ;;  %v281_v48 = vpack.c.bf16 %v267_v47, %v266_v46  ;;  %v87_v49 = vld [vmem:[%s772_s4 + $0x10] sm:$0xff]  ;;  %v88_v50 = vld [vmem:[%s772_s4 + $0x18] sm:$0xff]  ;;  %v264_v52 = vld [vmem:[%s773_s9 + $0x20] sm:$0xff]  ;;  %427 = vrcp.f32 %v441_v40 }
   0xc   :  { %v104_v51 = vpack.c.bf16 %v88_v50, %v87_v49  ;;  %v265_v53 = vld [vmem:[%s773_s9 + $0x28] sm:$0xff]  ;;  %v85_v55 = vld [vmem:[%s772_s4] sm:$0xff]  ;;  %v262_v58 = vld [vmem:[%s773_s9 + $0x10] sm:$0xff] }
   0xd   :  { %112 = vmatpush.bf16.msrb.mxu0 %v109_v22  ;;  %v280_v54 = vpack.c.bf16 %v265_v53, %v264_v52  ;;  %v86_v56 = vld [vmem:[%s772_s4 + $0x8] sm:$0xff]  ;;  %v263_v59 = vld [vmem:[%s773_s9 + $0x18] sm:$0xff]  ;;  %v260_v61 = vld [vmem:[%s773_s9] sm:$0xff] }
   0xe   :  { %287 = vmatpush.bf16.msrb.mxu2 %v284_v25  ;;  %406 = vmatpush.bf16.msra.mxu1 %v108_v28  ;;  %v103_v57 = vpack.c.bf16 %v86_v56, %v85_v55  ;;  %v279_v60 = vpack.c.bf16 %v263_v59, %v262_v58  ;;  %v261_v62 = vld [vmem:[%s773_s9 + $0x8] sm:$0xff]  ;;  %v421_v1 = vld [vmem:[%s774_s3] ss:$0 sm:$0xff] }
   0xf   :  { %414 = vmatpush.bf16.msra.mxu3 %v283_v31  ;;  %v278_v63 = vpack.c.bf16 %v261_v62, %v260_v61  ;;  %v422_v5 = vld [vmem:[%s775_s8] ss:$0 sm:$0xff] }
  0x11   :  { %113 = vmatpush.bf16.msrb.mxu0 %v108_v28  ;;  %v428_v41 = vpop.eup %427 }
  0x12   :  { %288 = vmatpush.bf16.msrb.mxu2 %v283_v31  ;;  %407 = vmatpush.bf16.msra.mxu1 %v107_v32  ;;  %vm142_vm2 = vweird.f32 %v428_v41 }
  0x13   :  { %415 = vmatpush.bf16.msra.mxu3 %v282_v42 }
  0x15   :  { %114 = vmatpush.bf16.msrb.mxu0 %v107_v32 }
  0x16   :  { %408 = vmatpush.bf16.msra.mxu1 %v106_v39  ;;  %289 = vmatpush.bf16.msrb.mxu2 %v282_v42  ;;  %v138_v42 = vmul.f32 128.0, %v428_v41 }
  0x17   :  { %416 = vmatpush.bf16.msra.mxu3 %v281_v48 }
  0x18   :  { %401 = vmatmul.msk.bf16.gmra.mxu0 %vm53_vm1, %v47_v35  ;;  %v139_v43 = vsub.f32 1.0, %v138_v42 }
  0x19   :  { %403 = vmatmul.msk.bf16.gmra.mxu2 %vm53_vm1, %v224_v36  ;;  %115 = vmatpush.bf16.msrb.mxu0 %v106_v39 }
  0x1a   :  { %409 = vmatpush.bf16.msra.mxu1 %v105_v45  ;;  %290 = vmatpush.bf16.msrb.mxu2 %v281_v48  ;;  %v140_v44 = vmul.f32 %v428_v41, %v139_v43 }
  0x1b   :  { %417 = vmatpush.bf16.msra.mxu3 %v280_v54 }
  0x1d   :  { %116 = vmatpush.bf16.msrb.mxu0 %v105_v45  ;;  %v141_v45 = vadd.f32 %v428_v41, %v140_v44 }
  0x1e   :  { %410 = vmatpush.bf16.msra.mxu1 %v104_v51  ;;  %291 = vmatpush.bf16.msrb.mxu2 %v280_v54 }
  0x1f   :  { %418 = vmatpush.bf16.msra.mxu3 %v279_v60  ;;  %v143_v47 = vsel %vm142_vm2, %v428_v41, %v141_v45 }
  0x21   :  { %117 = vmatpush.bf16.msrb.mxu0 %v104_v51 }
  0x22   :  { %411 = vmatpush.bf16.msra.mxu1 %v103_v57  ;;  %292 = vmatpush.bf16.msrb.mxu2 %v279_v60 }
  0x23   :  { %419 = vmatpush.bf16.msra.mxu3 %v278_v63 }
  0x25   :  { %118 = vmatpush.bf16.msrb.mxu0 %v103_v57 }
  0x26   :  { %293 = vmatpush.bf16.msrb.mxu2 %v278_v63 }
  0x85   :  { %v73_v0 = vpop.f32.mrf.mxu0 }
  0x86   :  { %v74_v3 = vadd.f32 %v421_v1, %v73_v0 }
  0x88   :  { %v82_v7 = vmax.f32 %v74_v3, 0.0 }
  0x8c   :  { %v248_v2 = vpop.f32.mrf.mxu2 }
  0x8d   :  { %v75_v4 = vpop.f32.mrf.mxu0  ;;  %v249_v9 = vadd.f32 %v422_v5, %v248_v2 }
  0x8e   :  { %v76_v6 = vadd.f32 %v421_v1, %v75_v4 }
  0x8f   :  { %v257_v14 = vmax.f32 %v249_v9, 0.0 }
  0x90   :  { %v83_v8 = vmax.f32 %v76_v6, 0.0 }
  0x92   :  { %v101_v10 = vpack.c.bf16 %v83_v8, %v82_v7 }
  0x94   :  { %v250_v11 = vpop.f32.mrf.mxu2  ;;  %119 = vmatmul.bf16.vlgmr.msrb.gmra.mxu0 %v101_v10 }
  0x95   :  { %v251_v12 = vadd.f32 %v422_v5, %v250_v11  ;;  %v78_v13 = vpop.f32.mrf.mxu0 }
  0x96   :  { %v79_v16 = vadd.f32 %v421_v1, %v78_v13 }
  0x97   :  { %v258_v15 = vmax.f32 %v251_v12, 0.0 }
  0x98   :  { %v84_v18 = vmax.f32 %v79_v16, 0.0 }
  0x99   :  { %v276_v17 = vpack.c.bf16 %v258_v15, %v257_v14 }
  0x9a   :  { %v102_v19 = vpack.c.bf16 %v84_v18, %v84_v18 }
  0x9b   :  { %294 = vmatmul.bf16.vlgmr.msrb.gmra.mxu2 %v276_v17 }
  0x9c   :  { %v253_v20 = vpop.f32.mrf.mxu2  ;;  %124 = vmatmul.bf16.vlgmr.msra.gmra.mxu1 %v102_v19 }
  0x9d   :  { %v254_v21 = vadd.f32 %v422_v5, %v253_v20  ;;  %v80_v22 = vpop.f32.mrf.mxu0 }
  0x9f   :  { %v259_v23 = vmax.f32 %v254_v21, 0.0 }
  0xa1   :  { %v277_v24 = vpack.c.bf16 %v259_v23, %v259_v23 }
  0xa3   :  { %299 = vmatmul.bf16.vlgmr.msra.gmra.mxu3 %v277_v24 }
  0xa4   :  { %v255_v25 = vpop.f32.mrf.mxu2 }
 0x111   :  { %v637_v26 = vpop.f32.mrf.mxu0 }
 0x112   :  { %131 = vadd.xlane.f32.xlu0 %v637_v26  ;;  %v147_v27 = vmul.f32 %v637_v26, %v637_v26 }
 0x119   :  { %v642_v28 = vpop.f32.mrf.mxu1  ;;  %v647_v30 = vpop.f32.mrf.mxu0 }
 0x11a   :  { %135 = vadd.xlane.f32.xlu1 %v642_v28  ;;  %150 = vadd.xlane.f32.xlu0 %v147_v27  ;;  %v149_v29 = vmul.f32 %v642_v28, %v642_v28  ;;  %v148_v32 = vmul.f32 %v647_v30, %v647_v30 }
 0x11c   :  { %154 = vadd.xlane.f32.xlu2 %v149_v29 }
 0x11e   :  { %v649_v31 = vpop.f32.mrf.mxu2 }
 0x11f   :  { %v315_v36 = vmul.f32 %v649_v31, %v649_v31 }
 0x121   :  { %v127_v33 = vpop.f32.mrf.mxu1 }
 0x122   :  { %133 = vadd.xlane.f32.xlu0 %v647_v30  ;;  %152 = vadd.xlane.f32.xlu1 %v148_v32 }
 0x126   :  { %v654_v34 = vpop.f32.mrf.mxu2  ;;  %v656_v35 = vpop.f32.mrf.mxu3 }
 0x127   :  { %308 = vadd.xlane.f32.xlu2 %v654_v34  ;;  %v316_v38 = vmul.f32 %v654_v34, %v654_v34  ;;  %v317_v39 = vmul.f32 %v656_v35, %v656_v35 }
 0x12a   :  { %318 = vadd.xlane.f32.xlu0 %v315_v36  ;;  %306 = vadd.xlane.f32.xlu1 %v649_v31 }
 0x12e   :  { %v302_v37 = vpop.f32.mrf.mxu3 }
 0x12f   :  { %310 = vadd.xlane.f32.xlu2 %v656_v35 }
 0x132   :  { %320 = vadd.xlane.f32.xlu1 %v316_v38 }
 0x137   :  { %322 = vadd.xlane.f32.xlu2 %v317_v39 }
 0x185   :  { %v132_v46 = vpop.xlane.xlu0 %131 }
 0x186   :  { %v667_v48 = vmul.f32 %v143_v47, %v132_v46 }
 0x188   :  { %v159_v51 = vmul.f32 %v667_v48, %v667_v48 }
 0x18d   :  { %v136_v49 = vpop.xlane.xlu1 %135  ;;  %v151_v50 = vpop.xlane.xlu0 %150 }
 0x18e   :  { %v671_v52 = vmul.f32 %v143_v47, %v136_v49  ;;  %v156_v53 = vmul.f32 %v151_v50, %v143_v47 }
 0x18f   :  { %v155_v54 = vpop.xlane.xlu2 %154 }
 0x190   :  { %v161_v55 = vmul.f32 %v671_v52, %v671_v52  ;;  %v162_v56 = vsub.f32 %v156_v53, %v159_v51  ;;  %v158_v57 = vmul.f32 %v155_v54, %v143_v47 }
 0x192   :  { %v165_v58 = vmax.f32 %v162_v56, 0.0  ;;  %v164_v59 = vsub.f32 %v158_v57, %v161_v55 }
 0x194   :  { %v171_v60 = vadd.f32 1e-05, %v165_v58  ;;  %v167_v0 = vmax.f32 %v164_v59, 0.0 }
 0x195   :  { %v134_v61 = vpop.xlane.xlu0 %133  ;;  %v153_v62 = vpop.xlane.xlu1 %152 }
 0x196   :  { %429 = vrsqrt.f32 %v171_v60  ;;  %v675_v63 = vmul.f32 %v143_v47, %v134_v61  ;;  %v157_v2 = vmul.f32 %v153_v62, %v143_v47  ;;  %v679_v5 = vadd.f32 1e-05, %v167_v0 }
 0x197   :  { %vm180_vm4 = vweird.f32 %v171_v60  ;;  %v168_v61 = vsub.f32 %v637_v26, %v667_v48 }
 0x198   :  { %v160_v1 = vmul.f32 %v675_v63, %v675_v63  ;;  %431 = vrsqrt.f32 %v679_v5  ;;  %vm200_vm13 = vweird.f32 %v679_v5 }
 0x19a   :  { %v309_v3 = vpop.xlane.xlu2 %308  ;;  %v163_v4 = vsub.f32 %v157_v2, %v160_v1  ;;  %v423_v2 = vld [vmem:[%s776_s5] ss:$0 sm:$0xff] }
 0x19b   :  { %v689_v16 = vmul.f32 %v309_v3, %v143_v47 }
 0x19c   :  { %v681_v6 = vpop.eup %429  ;;  %v166_v7 = vmax.f32 %v163_v4, 0.0 }
 0x19d   :  { %v319_v8 = vpop.xlane.xlu0 %318  ;;  %v307_v9 = vpop.xlane.xlu1 %306  ;;  %v175_v12 = vmul.f32 %v681_v6, %v171_v60  ;;  %v328_v23 = vmul.f32 %v689_v16, %v689_v16  ;;  %vm181_vm3 = vweird.f32 %v681_v6 }
 0x19e   :  { %v172_v10 = vadd.f32 1e-05, %v166_v7  ;;  %v683_v11 = vmul.f32 %v307_v9, %v143_v47  ;;  %v324_v13 = vmul.f32 %v319_v8, %v143_v47  ;;  %v692_v20 = vpop.eup %431  ;;  %vm182_vm5 = vmor %vm180_vm4, %vm181_vm3  ;;  %v425_v8 = vld [vmem:[%s778_s10] ss:$0 sm:$0xff] }
 0x19f   :  { %v176_v18 = vmul.f32 %v681_v6, %v175_v12  ;;  %v195_v33 = vmul.f32 %v692_v20, %v679_v5  ;;  %vm201_vm11 = vweird.f32 %v692_v20  ;;  %v337_v5 = vsub.f32 %v654_v34, %v689_v16 }
 0x1a0   :  { %433 = vrsqrt.f32 %v172_v10  ;;  %v327_v14 = vmul.f32 %v683_v11, %v683_v11  ;;  %vm190_vm8 = vweird.f32 %v172_v10  ;;  %v336_v9 = vsub.f32 %v649_v31, %v683_v11  ;;  %v426_v31 = vld [vmem:[%s779_s11] ss:$0 sm:$0xff]  ;;  %vm202_vm15 = vmor %vm200_vm13, %vm201_vm11 }
 0x1a1   :  { %v177_v29 = vmul.f32 0.5, %v176_v18  ;;  %v196_v43 = vmul.f32 %v692_v20, %v195_v33  ;;  %v169_v18 = vsub.f32 %v647_v30, %v675_v63  ;;  %v170_v63 = vsub.f32 %v642_v28, %v671_v52 }
 0x1a2   :  { %v311_v15 = vpop.xlane.xlu2 %310  ;;  %v330_v17 = vsub.f32 %v324_v13, %v327_v14 }
 0x1a3   :  { %v698_v25 = vmul.f32 %v311_v15, %v143_v47  ;;  %v178_v42 = vsub.f32 1.5, %v177_v29  ;;  %v197_v54 = vmul.f32 0.5, %v196_v43 }
 0x1a4   :  { %v333_v19 = vmax.f32 %v330_v17, 0.0  ;;  %v424_v17 = vld [vmem:[%s777_s6] ss:$0 sm:$0xff] }
 0x1a5   :  { %v321_v21 = vpop.xlane.xlu1 %320  ;;  %v329_v39 = vmul.f32 %v698_v25, %v698_v25  ;;  %v179_v51 = vmul.f32 %v681_v6, %v178_v42  ;;  %v198_v62 = vsub.f32 1.5, %v197_v54  ;;  %v338_v28 = vsub.f32 %v656_v35, %v698_v25 }
 0x1a6   :  { %v694_v22 = vpop.eup %433  ;;  %v339_v24 = vadd.f32 1e-05, %v333_v19  ;;  %v325_v27 = vmul.f32 %v321_v21, %v143_v47 }
 0x1a7   :  { %v185_v32 = vmul.f32 %v694_v22, %v172_v10  ;;  %v183_v57 = vsel %vm182_vm5, %v681_v6, %v179_v51  ;;  %vm191_vm6 = vweird.f32 %v694_v22  ;;  %v199_v7 = vmul.f32 %v692_v20, %v198_v62 }
 0x1a8   :  { %435 = vrsqrt.f32 %v339_v24  ;;  %v331_v36 = vsub.f32 %v325_v27, %v328_v23  ;;  %v204_v3 = vmul.f32 %v183_v57, %v168_v61  ;;  %vm724_vm9 = vmor %vm190_vm8, %vm191_vm6  ;;  %vm348_vm10 = vweird.f32 %v339_v24 }
 0x1a9   :  { %v186_v37 = vmul.f32 %v694_v22, %v185_v32 }
 0x1aa   :  { %v323_v38 = vpop.xlane.xlu2 %322  ;;  %v334_v40 = vmax.f32 %v331_v36, 0.0  ;;  %v210_v15 = vmul.f32 %v423_v2, %v204_v3 }
 0x1ab   :  { %v326_v41 = vmul.f32 %v323_v38, %v143_v47  ;;  %v187_v46 = vmul.f32 0.5, %v186_v37 }
 0x1ac   :  { %v707_v44 = vadd.f32 1e-05, %v334_v40  ;;  %v216_v29 = vadd.f32 %v424_v17, %v210_v15 }
 0x1ad   :  { %v332_v45 = vsub.f32 %v326_v41, %v329_v39  ;;  %v188_v47 = vsub.f32 1.5, %v187_v46 }
 0x1ae   :  { %v436_v49 = vpop.eup %435  ;;  %437 = vrsqrt.f32 %v707_v44  ;;  %vm358_vm0 = vweird.f32 %v707_v44 }
 0x1af   :  { %v335_v50 = vmax.f32 %v332_v45, 0.0  ;;  %v343_v53 = vmul.f32 %v436_v49, %v339_v24  ;;  %v189_v0 = vmul.f32 %v694_v22, %v188_v47  ;;  %vm349_vm7 = vweird.f32 %v436_v49 }
 0x1b0   :  { %vm350_vm12 = vmor %vm348_vm10, %vm349_vm7  ;;  %v203_v24 = vsel %vm202_vm15, %v692_v20, %v199_v7 }
 0x1b1   :  { %v712_v55 = vadd.f32 1e-05, %v335_v50  ;;  %v344_v56 = vmul.f32 %v436_v49, %v343_v53  ;;  %v193_v10 = vsel %vm724_vm9, %v694_v22, %v189_v0  ;;  %v206_v37 = vmul.f32 %v203_v24, %v170_v63 }
 0x1b2   :  { %v205_v22 = vmul.f32 %v193_v10, %v169_v18 }
 0x1b3   :  { %439 = vrsqrt.f32 %v712_v55  ;;  %v345_v58 = vmul.f32 0.5, %v344_v56  ;;  %vm368_vm3 = vweird.f32 %v712_v55  ;;  %v212_v16 = vmul.f32 %v423_v2, %v206_v37 }
 0x1b4   :  { %v438_v59 = vpop.eup %437  ;;  %v211_v38 = vmul.f32 %v423_v2, %v205_v22 }
 0x1b5   :  { %v346_v1 = vsub.f32 1.5, %v345_v58  ;;  %v353_v60 = vmul.f32 %v438_v59, %v707_v44  ;;  %vm359_vm14 = vweird.f32 %v438_v59 }
 0x1b6   :  { %vm360_vm1 = vmor %vm358_vm0, %vm359_vm14  ;;  %v217_v42 = vadd.f32 %v424_v17, %v211_v38 }
 0x1b7   :  { %v347_v26 = vmul.f32 %v436_v49, %v346_v1  ;;  %v354_v48 = vmul.f32 %v438_v59, %v353_v60 }
 0x1b9   :  { %v440_v6 = vpop.eup %439  ;;  %v351_v12 = vsel %vm350_vm12, %v436_v49, %v347_v26  ;;  %v355_v13 = vmul.f32 0.5, %v354_v48  ;;  %v218_v49 = vadd.f32 %v424_v17, %v212_v16 }
 0x1ba   :  { %v363_v14 = vmul.f32 %v440_v6, %v712_v55  ;;  %v372_v11 = vmul.f32 %v351_v12, %v336_v9  ;;  %vm369_vm2 = vweird.f32 %v440_v6 }
 0x1bb   :  { %v356_v19 = vsub.f32 1.5, %v355_v13  ;;  %vm370_vm4 = vmor %vm368_vm3, %vm369_vm2 }
 0x1bc   :  { %v364_v21 = vmul.f32 %v440_v6, %v363_v14  ;;  %v378_v23 = vmul.f32 %v425_v8, %v372_v11 }
 0x1bd   :  { %v357_v27 = vmul.f32 %v438_v59, %v356_v19 }
 0x1be   :  { %v365_v30 = vmul.f32 0.5, %v364_v21  ;;  %v384_v32 = vadd.f32 %v426_v31, %v378_v23 }
 0x1bf   :  { %v361_v33 = vsel %vm360_vm1, %v438_v59, %v357_v27 }
 0x1c0   :  { %v366_v36 = vsub.f32 1.5, %v365_v30  ;;  %v387_v39 = vadd.f32 %v384_v32, %v216_v29  ;;  %v373_v20 = vmul.f32 %v361_v33, %v337_v5 }
 0x1c2   :  { %v367_v40 = vmul.f32 %v440_v6, %v366_v36  ;;  %v390_v41 = vmax.f32 %v387_v39, 0.0  ;;  %v379_v52 = vmul.f32 %v425_v8, %v373_v20 }
 0x1c4   :  { %v371_v34 = vsel %vm370_vm4, %v440_v6, %v367_v40  ;;  %393 = vst [vmem:[%s780_s12] sm:$0xff] %v390_v41  ;;  %v385_v43 = vadd.f32 %v426_v31, %v379_v52 }
 0x1c5   :  { %v374_v44 = vmul.f32 %v371_v34, %v338_v28 }
 0x1c6   :  { %v388_v45 = vadd.f32 %v385_v43, %v217_v42 }
 0x1c7   :  { %v380_v46 = vmul.f32 %v425_v8, %v374_v44 }
 0x1c8   :  { %v391_v50 = vmax.f32 %v388_v45, 0.0 }
 0x1c9   :  { %v386_v51 = vadd.f32 %v426_v31, %v380_v46 }
 0x1ca   :  { %394 = vst [vmem:[%s780_s12 + $0x8] sm:$0xff] %v391_v50 }
 0x1cb   :  { %v389_v35 = vadd.f32 %v386_v51, %v218_v49 }
 0x1cd   :  { %v392_v25 = vmax.f32 %v389_v35, 0.0 }
 0x1cf   :  { %395 = vst [vmem:[%s780_s12 + $0x10] sm:$0xff] %v392_v25 }

// kernel: interactor_forward.15
= control target key start
LH: loop header
LB: loop body
LE: loop exit
PB: predicated region body
PF: predicated region fallthrough
CT: control target
= control target key end

     0   :  { %17 = vsyncpa [#allocation3], 0  ;;  %s571_s24 = smov [#allocation2]   ;;  %s572_s26 = smov 128   ;;  %s913_s0 = inlined_call_operand.vmem [shape: f32[24,128], index: 0, kind: input, shape index: {}]   ;;  %s914_s1 = inlined_call_operand.vmem [shape: f32[24,128], index: 1, kind: input, shape index: {}]   ;;  %s915_s2 = inlined_call_operand.vmem [shape: f32[128,128], index: 2, kind: input, shape index: {}]   ;;  %s916_s3 = inlined_call_operand.vmem [shape: f32[128,128], index: 3, kind: input, shape index: {}]   ;;  %s917_s4 = inlined_call_operand.vmem [shape: f32[1,128], index: 4, kind: input, shape index: {}]   ;;  %s918_s5 = inlined_call_operand.vmem [shape: f32[1,128], index: 5, kind: input, shape index: {}]   ;;  %s919_s6 = inlined_call_operand.vmem [shape: f32[128,128], index: 6, kind: input, shape index: {}]   ;;  %s920_s7 = inlined_call_operand.vmem [shape: f32[1,128], index: 7, kind: input, shape index: {}]   ;;  %s921_s8 = inlined_call_operand.vmem [shape: f32[1,128], index: 8, kind: input, shape index: {}]   ;;  %s922_s9 = inlined_call_operand.hbm [shape: f32[128,128], index: 9, kind: input, shape index: {}]   ;;  %s923_s10 = inlined_call_operand.vmem [shape: f32[1,128], index: 10, kind: input, shape index: {}]   ;;  %s924_s11 = inlined_call_operand.vmem [shape: f32[1,128], index: 11, kind: input, shape index: {}]   ;;  %s925_s12 = inlined_call_operand.vmem [shape: f32[24,128], index: 12, kind: output, shape index: {}]  }
   0x1   :  { %s40_s23 = sshll.u32 %s922_s9, 4  ;;  %s42_s25 = sshll.u32 %s571_s24, 4  ;;  %s41_s23 = int_to_ptr.hbm [resolvable:$true] %s40_s23  ;;  %s43_s25 = int_to_ptr.vmem [resolvable:$true] %s42_s25 }
   0x2   :  { %s573_s27 = smov 8  }
   0x3   :  { %48 = dma.hbm_to_vmem [thread:$0]  %s41_s23, 2048, %s43_s25, [#allocation3], %s572_s26, %s572_s26, %s573_s27  }
   0x4   :  { %569 = dma.done.wait [#allocation3], 2048  }
   0x5   :  { %570 = vsyncadd [#allocation3], 4294965248  ;;  %v103_v0 = vld [vmem:[%s916_s3 + $0x70] sm:$0xff]  ;;  %v104_v1 = vld [vmem:[%s916_s3 + $0x78] sm:$0xff] }
   0x6   :  { %v74_v2 = vld [vmem:[%s915_s2 + $0x70] sm:$0xff]  ;;  %v114_v3 = vpack.c.bf16 %v104_v1, %v103_v0  ;;  %v75_v4 = vld [vmem:[%s915_s2 + $0x78] sm:$0xff]  ;;  %v101_v5 = vld [vmem:[%s916_s3 + $0x60] sm:$0xff] }
   0x7   :  { %v102_v6 = vld [vmem:[%s916_s3 + $0x68] sm:$0xff]  ;;  %v85_v7 = vpack.c.bf16 %v75_v4, %v74_v2  ;;  %v72_v8 = vld [vmem:[%s915_s2 + $0x60] sm:$0xff]  ;;  %v99_v12 = vld [vmem:[%s916_s3 + $0x50] sm:$0xff] }
   0x8   :  { %v73_v9 = vld [vmem:[%s915_s2 + $0x68] sm:$0xff]  ;;  %115 = vmatpush.bf16.msra.mxu0 %v114_v3  ;;  %v113_v10 = vpack.c.bf16 %v102_v6, %v101_v5  ;;  %v100_v13 = vld [vmem:[%s916_s3 + $0x58] sm:$0xff]  ;;  %v70_v14 = vld [vmem:[%s915_s2 + $0x50] sm:$0xff] }
   0x9   :  { %133 = vmatpush.bf16.msra.mxu1 %v85_v7  ;;  %v84_v11 = vpack.c.bf16 %v73_v9, %v72_v8  ;;  %v71_v15 = vld [vmem:[%s915_s2 + $0x58] sm:$0xff]  ;;  %v112_v16 = vpack.c.bf16 %v100_v13, %v99_v12  ;;  %v97_v18 = vld [vmem:[%s916_s3 + $0x40] sm:$0xff]  ;;  %v98_v19 = vld [vmem:[%s916_s3 + $0x48] sm:$0xff]  ;;  %v574_v8 = vmov 128.0  }
   0xa   :  { %v83_v17 = vpack.c.bf16 %v71_v15, %v70_v14  ;;  %v68_v20 = vld [vmem:[%s915_s2 + $0x40] sm:$0xff]  ;;  %v69_v21 = vld [vmem:[%s915_s2 + $0x48] sm:$0xff]  ;;  %v111_v22 = vpack.c.bf16 %v98_v19, %v97_v18  ;;  %v95_v23 = vld [vmem:[%s916_s3 + $0x30] sm:$0xff]  ;;  %525 = vrcp.f32 %v574_v8 }
   0xb   :  { %v96_v24 = vld [vmem:[%s916_s3 + $0x38] sm:$0xff]  ;;  %v66_v25 = vld [vmem:[%s915_s2 + $0x30] sm:$0xff]  ;;  %v82_v26 = vpack.c.bf16 %v69_v21, %v68_v20  ;;  %v93_v30 = vld [vmem:[%s916_s3 + $0x20] sm:$0xff] }
   0xc   :  { %116 = vmatpush.bf16.msra.mxu0 %v113_v10  ;;  %v67_v27 = vld [vmem:[%s915_s2 + $0x38] sm:$0xff]  ;;  %v110_v28 = vpack.c.bf16 %v96_v24, %v95_v23  ;;  %v94_v31 = vld [vmem:[%s916_s3 + $0x28] sm:$0xff]  ;;  %v64_v32 = vld [vmem:[%s915_s2 + $0x20] sm:$0xff] }
   0xd   :  { %134 = vmatpush.bf16.msra.mxu1 %v84_v11  ;;  %v81_v29 = vpack.c.bf16 %v67_v27, %v66_v25  ;;  %v65_v33 = vld [vmem:[%s915_s2 + $0x28] sm:$0xff]  ;;  %v109_v34 = vpack.c.bf16 %v94_v31, %v93_v30  ;;  %v91_v36 = vld [vmem:[%s916_s3 + $0x10] sm:$0xff]  ;;  %v92_v37 = vld [vmem:[%s916_s3 + $0x18] sm:$0xff] }
   0xe   :  { %v80_v35 = vpack.c.bf16 %v65_v33, %v64_v32  ;;  %v62_v38 = vld [vmem:[%s915_s2 + $0x10] sm:$0xff]  ;;  %v63_v39 = vld [vmem:[%s915_s2 + $0x18] sm:$0xff]  ;;  %v108_v40 = vpack.c.bf16 %v92_v37, %v91_v36  ;;  %v89_v42 = vld [vmem:[%s916_s3] sm:$0xff] }
   0xf   :  { %v79_v41 = vpack.c.bf16 %v63_v39, %v62_v38  ;;  %v90_v43 = vld [vmem:[%s916_s3 + $0x8] sm:$0xff]  ;;  %v60_v44 = vld [vmem:[%s915_s2] sm:$0xff]  ;;  %v88_v54 = vld [vmem:[%s914_s1 + $0x10] sm:$0xff] }
  0x10   :  { %117 = vmatpush.bf16.msra.mxu0 %v112_v16  ;;  %v61_v45 = vld [vmem:[%s915_s2 + $0x8] sm:$0xff]  ;;  %v107_v46 = vpack.c.bf16 %v90_v43, %v89_v42  ;;  %v86_v47 = vld [vmem:[%s914_s1] sm:$0xff]  ;;  %v763_v55 = vld [vmem:[%s913_s0 + $0x10] sm:$0xff]  ;;  %v106_v56 = vpack.c.bf16 %v88_v54, %v88_v54  ;;  %v526_v9 = vpop.eup %525 }
  0x11   :  { %135 = vmatpush.bf16.msra.mxu1 %v83_v17  ;;  %v87_v48 = vld [vmem:[%s914_s1 + $0x8] sm:$0xff]  ;;  %v78_v49 = vpack.c.bf16 %v61_v45, %v60_v44  ;;  %v748_v50 = vld [vmem:[%s913_s0] sm:$0xff]  ;;  %v77_v57 = vpack.c.bf16 %v763_v55, %v763_v55  ;;  %v160_v10 = vmul.f32 128.0, %v526_v9  ;;  %v258_v11 = vld [vmem:[%s919_s6 + $0x70] sm:$0xff]  ;;  %vm164_vm0 = vweird.f32 %v526_v9 }
  0x12   :  { %v753_v51 = vld [vmem:[%s913_s0 + $0x8] sm:$0xff]  ;;  %v105_v52 = vpack.c.bf16 %v87_v48, %v86_v47  ;;  %v259_v12 = vld [vmem:[%s919_s6 + $0x78] sm:$0xff]  ;;  %v256_v15 = vld [vmem:[%s919_s6 + $0x60] sm:$0xff] }
  0x13   :  { %v76_v53 = vpack.c.bf16 %v753_v51, %v748_v50  ;;  %v269_v13 = vpack.c.bf16 %v259_v12, %v258_v11  ;;  %v161_v14 = vsub.f32 1.0, %v160_v10  ;;  %v257_v16 = vld [vmem:[%s919_s6 + $0x68] sm:$0xff]  ;;  %v254_v19 = vld [vmem:[%s919_s6 + $0x50] sm:$0xff]  ;;  %v255_v20 = vld [vmem:[%s919_s6 + $0x58] sm:$0xff] }
  0x14   :  { %118 = vmatpush.bf16.msra.mxu0 %v111_v22  ;;  %v268_v17 = vpack.c.bf16 %v257_v16, %v256_v15  ;;  %v267_v21 = vpack.c.bf16 %v255_v20, %v254_v19  ;;  %v252_v23 = vld [vmem:[%s919_s6 + $0x40] sm:$0xff]  ;;  %v253_v24 = vld [vmem:[%s919_s6 + $0x48] sm:$0xff]  ;;  %v250_v27 = vld [vmem:[%s919_s6 + $0x30] sm:$0xff] }
  0x15   :  { %136 = vmatpush.bf16.msra.mxu1 %v82_v26  ;;  %270 = vmatpush.bf16.msra.mxu2 %v269_v13  ;;  %v162_v18 = vmul.f32 %v526_v9, %v161_v14  ;;  %v266_v25 = vpack.c.bf16 %v253_v24, %v252_v23  ;;  %v248_v33 = vld [vmem:[%s919_s6 + $0x20] sm:$0xff]  ;;  %v246_v39 = vld [vmem:[%s919_s6 + $0x10] sm:$0xff]  ;;  %v245_v48 = vld [vmem:[%s919_s6 + $0x8] sm:$0xff] }
  0x16   :  { %v244_v47 = vld [vmem:[%s919_s6] sm:$0xff] }
  0x17   :  { %v163_v22 = vadd.f32 %v526_v9, %v162_v18  ;;  %v519_v18 = vld [vmem:[%s917_s4] ss:$0 sm:$0xff] }
  0x18   :  { %119 = vmatpush.bf16.msra.mxu0 %v110_v28  ;;  %v251_v28 = vld [vmem:[%s919_s6 + $0x38] sm:$0xff] }
  0x19   :  { %137 = vmatpush.bf16.msra.mxu1 %v81_v29  ;;  %271 = vmatpush.bf16.msra.mxu2 %v268_v17  ;;  %v806_v26 = vsel %vm164_vm0, %v526_v9, %v163_v22  ;;  %v265_v29 = vpack.c.bf16 %v251_v28, %v250_v27 }
  0x1c   :  { %120 = vmatpush.bf16.msra.mxu0 %v109_v34  ;;  %v249_v34 = vld [vmem:[%s919_s6 + $0x28] sm:$0xff] }
  0x1d   :  { %138 = vmatpush.bf16.msra.mxu1 %v80_v35  ;;  %272 = vmatpush.bf16.msra.mxu2 %v267_v21  ;;  %v264_v37 = vpack.c.bf16 %v249_v34, %v248_v33 }
  0x20   :  { %121 = vmatpush.bf16.msra.mxu0 %v108_v40  ;;  %v247_v40 = vld [vmem:[%s919_s6 + $0x18] sm:$0xff] }
  0x21   :  { %139 = vmatpush.bf16.msra.mxu1 %v79_v41  ;;  %273 = vmatpush.bf16.msra.mxu2 %v266_v25  ;;  %v263_v42 = vpack.c.bf16 %v247_v40, %v246_v39 }
  0x24   :  { %122 = vmatpush.bf16.msra.mxu0 %v107_v46 }
  0x25   :  { %140 = vmatpush.bf16.msra.mxu1 %v78_v49  ;;  %274 = vmatpush.bf16.msra.mxu2 %v265_v29 }
  0x27   :  { %123 = vmatmul.bf16.vlgmr.msra.gmra.mxu0 %v105_v52 }
  0x28   :  { %141 = vmatmul.bf16.vlgmr.msra.gmra.mxu1 %v76_v53  ;;  %v262_v53 = vpack.c.bf16 %v245_v48, %v244_v47 }
  0x29   :  { %275 = vmatpush.bf16.msra.mxu2 %v264_v37 }
  0x2d   :  { %276 = vmatpush.bf16.msra.mxu2 %v263_v42 }
  0x31   :  { %277 = vmatpush.bf16.msra.mxu2 %v262_v53  ;;  %v389_v53 = vld [vmem:[#allocation2 + $0x78] sm:$0xff] }
  0x37   :  { %128 = vmatmul.bf16.gmra.mxu0 %v106_v56 }
  0x38   :  { %146 = vmatmul.bf16.gmra.mxu1 %v77_v57 }
  0xa4   :  { %v124_v58 = vpop.f32.mrf.mxu0 }
  0xa5   :  { %v142_v59 = vpop.f32.mrf.mxu1 }
  0xa6   :  { %v767_v60 = vadd.f32 %v142_v59, %v124_v58 }
  0xa8   :  { %153 = vadd.xlane.f32.xlu0 %v767_v60  ;;  %v169_v61 = vmul.f32 %v767_v60, %v767_v60 }
  0xaa   :  { %172 = vadd.xlane.f32.xlu1 %v169_v61 }
  0xac   :  { %v126_v62 = vpop.f32.mrf.mxu0 }
  0xad   :  { %v144_v63 = vpop.f32.mrf.mxu1 }
  0xae   :  { %v772_v0 = vadd.f32 %v144_v63, %v126_v62 }
  0xb0   :  { %155 = vadd.xlane.f32.xlu0 %v772_v0  ;;  %v170_v1 = vmul.f32 %v772_v0, %v772_v0 }
  0xb2   :  { %174 = vadd.xlane.f32.xlu1 %v170_v1 }
  0xb4   :  { %v129_v2 = vpop.f32.mrf.mxu0 }
  0xb5   :  { %v147_v3 = vpop.f32.mrf.mxu1 }
  0xb6   :  { %v777_v4 = vadd.f32 %v147_v3, %v129_v2 }
  0xb8   :  { %157 = vadd.xlane.f32.xlu2 %v777_v4  ;;  %v171_v6 = vmul.f32 %v777_v4, %v777_v4 }
  0xbc   :  { %v131_v5 = vpop.f32.mrf.mxu0 }
  0xbd   :  { %v149_v7 = vpop.f32.mrf.mxu1 }
  0xc0   :  { %176 = vadd.xlane.f32.xlu2 %v171_v6 }
 0x11b   :  { %v154_v30 = vpop.xlane.xlu0 %153 }
 0x11c   :  { %v166_v31 = vmul.f32 %v806_v26, %v154_v30 }
 0x11d   :  { %v173_v32 = vpop.xlane.xlu1 %172 }
 0x11e   :  { %v181_v35 = vmul.f32 %v166_v31, %v166_v31  ;;  %v178_v36 = vmul.f32 %v173_v32, %v806_v26  ;;  %v190_v14 = vsub.f32 %v767_v60, %v166_v31  ;;  %v520_v60 = vld [vmem:[%s918_s5] ss:$0 sm:$0xff] }
 0x120   :  { %v184_v38 = vsub.f32 %v178_v36, %v181_v35 }
 0x122   :  { %v187_v41 = vmax.f32 %v184_v38, 0.0 }
 0x123   :  { %v156_v43 = vpop.xlane.xlu0 %155 }
 0x124   :  { %v193_v44 = vadd.f32 1e-05, %v187_v41  ;;  %v167_v45 = vmul.f32 %v806_v26, %v156_v43 }
 0x125   :  { %v175_v46 = vpop.xlane.xlu1 %174 }
 0x126   :  { %527 = vrsqrt.f32 %v193_v44  ;;  %v182_v49 = vmul.f32 %v167_v45, %v167_v45  ;;  %v179_v52 = vmul.f32 %v175_v46, %v806_v26  ;;  %vm202_vm2 = vweird.f32 %v193_v44 }
 0x127   :  { %v191_v21 = vsub.f32 %v772_v0, %v167_v45 }
 0x128   :  { %v185_v54 = vsub.f32 %v179_v52, %v182_v49  ;;  %v388_v52 = vld [vmem:[#allocation2 + $0x70] sm:$0xff] }
 0x12a   :  { %v188_v56 = vmax.f32 %v185_v54, 0.0  ;;  %v399_v54 = vpack.c.bf16 %v389_v53, %v388_v52 }
 0x12b   :  { %v158_v57 = vpop.xlane.xlu2 %157 }
 0x12c   :  { %v528_v58 = vpop.eup %527  ;;  %v194_v61 = vadd.f32 1e-05, %v188_v56  ;;  %v168_v63 = vmul.f32 %v806_v26, %v158_v57  ;;  %400 = vmatpush.bf16.msra.mxu3 %v399_v54  ;;  %v386_v56 = vld [vmem:[#allocation2 + $0x60] sm:$0xff]  ;;  %v387_v57 = vld [vmem:[#allocation2 + $0x68] sm:$0xff] }
 0x12d   :  { %v197_v59 = vmul.f32 %v528_v58, %v193_v44  ;;  %vm203_vm1 = vweird.f32 %v528_v58 }
 0x12e   :  { %529 = vrsqrt.f32 %v194_v61  ;;  %v183_v2 = vmul.f32 %v168_v63, %v168_v63  ;;  %vm204_vm3 = vmor %vm202_vm2, %vm203_vm1  ;;  %vm212_vm5 = vweird.f32 %v194_v61  ;;  %v192_v37 = vsub.f32 %v777_v4, %v168_v63  ;;  %v382_v63 = vld [vmem:[#allocation2 + $0x40] sm:$0xff] }
 0x12f   :  { %v198_v62 = vmul.f32 %v528_v58, %v197_v59  ;;  %v384_v59 = vld [vmem:[#allocation2 + $0x50] sm:$0xff] }
 0x131   :  { %v199_v1 = vmul.f32 0.5, %v198_v62 }
 0x133   :  { %v200_v3 = vsub.f32 1.5, %v199_v1  ;;  %v177_v5 = vpop.xlane.xlu2 %176  ;;  %v383_v1 = vld [vmem:[#allocation2 + $0x48] sm:$0xff] }
 0x134   :  { %v180_v6 = vmul.f32 %v177_v5, %v806_v26  ;;  %v530_v7 = vpop.eup %529  ;;  %v381_v5 = vld [vmem:[#allocation2 + $0x38] sm:$0xff] }
 0x135   :  { %v201_v8 = vmul.f32 %v528_v58, %v200_v3  ;;  %v207_v9 = vmul.f32 %v530_v7, %v194_v61  ;;  %vm213_vm4 = vweird.f32 %v530_v7  ;;  %v385_v61 = vld [vmem:[#allocation2 + $0x58] sm:$0xff]  ;;  %v380_v3 = vld [vmem:[#allocation2 + $0x30] sm:$0xff] }
 0x136   :  { %v186_v10 = vsub.f32 %v180_v6, %v183_v2  ;;  %vm214_vm6 = vmor %vm212_vm5, %vm213_vm4  ;;  %v397_v62 = vpack.c.bf16 %v385_v61, %v384_v59  ;;  %v396_v2 = vpack.c.bf16 %v383_v1, %v382_v63  ;;  %v395_v6 = vpack.c.bf16 %v381_v5, %v380_v3 }
 0x137   :  { %v208_v11 = vmul.f32 %v530_v7, %v207_v9  ;;  %v205_v13 = vsel %vm204_vm3, %v528_v58, %v201_v8  ;;  %v398_v58 = vpack.c.bf16 %v387_v57, %v386_v56  ;;  %v521_v57 = vld [vmem:[%s920_s7] ss:$0 sm:$0xff] }
 0x138   :  { %v189_v12 = vmax.f32 %v186_v10, 0.0  ;;  %v226_v17 = vmul.f32 %v205_v13, %v190_v14  ;;  %v378_v10 = vld [vmem:[#allocation2 + $0x20] sm:$0xff] }
 0x139   :  { %v209_v15 = vmul.f32 0.5, %v208_v11  ;;  %401 = vmatpush.bf16.msra.mxu3 %v398_v58  ;;  %v379_v11 = vld [vmem:[#allocation2 + $0x28] sm:$0xff] }
 0x13a   :  { %v195_v16 = vadd.f32 1e-05, %v189_v12  ;;  %v232_v22 = vmul.f32 %v519_v18, %v226_v17  ;;  %v394_v14 = vpack.c.bf16 %v379_v11, %v378_v10  ;;  %v377_v17 = vld [vmem:[#allocation2 + $0x18] sm:$0xff] }
 0x13b   :  { %v210_v19 = vsub.f32 1.5, %v209_v15 }
 0x13c   :  { %531 = vrsqrt.f32 %v195_v16  ;;  %v238_v29 = vadd.f32 %v520_v60, %v232_v22  ;;  %vm222_vm8 = vweird.f32 %v195_v16  ;;  %v375_v22 = vld [vmem:[#allocation2 + $0x8] sm:$0xff] }
 0x13d   :  { %v211_v20 = vmul.f32 %v530_v7, %v210_v19  ;;  %402 = vmatpush.bf16.msra.mxu3 %v397_v62 }
 0x13e   :  { %v241_v33 = vmax.f32 %v238_v29, 0.0 }
 0x13f   :  { %v215_v23 = vsel %vm214_vm6, %v530_v7, %v211_v20 }
 0x140   :  { %v227_v24 = vmul.f32 %v215_v23, %v191_v21  ;;  %v374_v21 = vld [vmem:[#allocation2] sm:$0xff] }
 0x141   :  { %403 = vmatpush.bf16.msra.mxu3 %v396_v2 }
 0x142   :  { %v532_v25 = vpop.eup %531  ;;  %v233_v28 = vmul.f32 %v519_v18, %v227_v24  ;;  %v392_v24 = vpack.c.bf16 %v375_v22, %v374_v21 }
 0x143   :  { %v217_v27 = vmul.f32 %v532_v25, %v195_v16  ;;  %vm223_vm7 = vweird.f32 %v532_v25  ;;  %v376_v16 = vld [vmem:[#allocation2 + $0x10] sm:$0xff] }
 0x144   :  { %v239_v31 = vadd.f32 %v520_v60, %v233_v28  ;;  %vm224_vm9 = vmor %vm222_vm8, %vm223_vm7  ;;  %v393_v19 = vpack.c.bf16 %v377_v17, %v376_v16 }
 0x145   :  { %v218_v30 = vmul.f32 %v532_v25, %v217_v27  ;;  %404 = vmatpush.bf16.msra.mxu3 %v395_v6 }
 0x146   :  { %v242_v34 = vmax.f32 %v239_v31, 0.0 }
 0x147   :  { %v219_v32 = vmul.f32 0.5, %v218_v30 }
 0x148   :  { %v260_v0 = vpack.c.bf16 %v242_v34, %v241_v33 }
 0x149   :  { %v220_v35 = vsub.f32 1.5, %v219_v32  ;;  %405 = vmatpush.bf16.msra.mxu3 %v394_v14 }
 0x14a   :  { %278 = vmatmul.bf16.vlgmr.msra.gmra.mxu2 %v260_v0 }
 0x14b   :  { %v221_v36 = vmul.f32 %v532_v25, %v220_v35 }
 0x14d   :  { %v225_v38 = vsel %vm224_vm9, %v532_v25, %v221_v36  ;;  %406 = vmatpush.bf16.msra.mxu3 %v393_v19 }
 0x14e   :  { %v228_v39 = vmul.f32 %v225_v38, %v192_v37 }
 0x150   :  { %v234_v40 = vmul.f32 %v519_v18, %v228_v39 }
 0x151   :  { %407 = vmatpush.bf16.msra.mxu3 %v392_v24 }
 0x152   :  { %v240_v41 = vadd.f32 %v520_v60, %v234_v40 }
 0x154   :  { %v243_v42 = vmax.f32 %v240_v41, 0.0 }
 0x156   :  { %v261_v43 = vpack.c.bf16 %v243_v42, %v243_v42 }
 0x15a   :  { %283 = vmatmul.bf16.gmra.mxu2 %v261_v43 }
 0x1cd   :  { %v847_v44 = vpop.f32.mrf.mxu2 }
 0x1ce   :  { %290 = vadd.xlane.f32.xlu0 %v847_v44  ;;  %v299_v45 = vmul.f32 %v847_v44, %v847_v44 }
 0x1d0   :  { %302 = vadd.xlane.f32.xlu2 %v299_v45 }
 0x1d5   :  { %v852_v46 = vpop.f32.mrf.mxu2 }
 0x1d6   :  { %292 = vadd.xlane.f32.xlu1 %v852_v46  ;;  %v300_v4 = vmul.f32 %v852_v46, %v852_v46 }
 0x1d8   :  { %304 = vadd.xlane.f32.xlu0 %v300_v4 }
 0x1dd   :  { %v857_v47 = vpop.f32.mrf.mxu2 }
 0x1de   :  { %294 = vadd.xlane.f32.xlu1 %v857_v47  ;;  %v301_v48 = vmul.f32 %v857_v47, %v857_v47 }
 0x1e0   :  { %306 = vadd.xlane.f32.xlu2 %v301_v48 }
 0x1e5   :  { %v286_v49 = vpop.f32.mrf.mxu2 }
 0x241   :  { %v291_v7 = vpop.xlane.xlu0 %290 }
 0x242   :  { %v296_v8 = vmul.f32 %v291_v7, %v806_v26 }
 0x243   :  { %v303_v9 = vpop.xlane.xlu2 %302 }
 0x244   :  { %v311_v12 = vmul.f32 %v296_v8, %v296_v8  ;;  %v308_v13 = vmul.f32 %v303_v9, %v806_v26  ;;  %v320_v53 = vsub.f32 %v847_v44, %v296_v8  ;;  %v522_v44 = vld [vmem:[%s921_s8] ss:$0 sm:$0xff] }
 0x246   :  { %v314_v15 = vsub.f32 %v308_v13, %v311_v12 }
 0x248   :  { %v317_v18 = vmax.f32 %v314_v15, 0.0 }
 0x249   :  { %v293_v20 = vpop.xlane.xlu1 %292 }
 0x24a   :  { %v323_v60 = vadd.f32 1e-05, %v317_v18  ;;  %v297_v23 = vmul.f32 %v293_v20, %v806_v26 }
 0x24b   :  { %v305_v25 = vpop.xlane.xlu0 %304 }
 0x24c   :  { %533 = vrsqrt.f32 %v323_v60  ;;  %v312_v27 = vmul.f32 %v297_v23, %v297_v23  ;;  %v309_v28 = vmul.f32 %v305_v25, %v806_v26  ;;  %vm332_vm11 = vweird.f32 %v323_v60 }
 0x24d   :  { %v321_v63 = vsub.f32 %v852_v46, %v297_v23 }
 0x24e   :  { %v315_v29 = vsub.f32 %v309_v28, %v312_v27 }
 0x250   :  { %v318_v30 = vmax.f32 %v315_v29, 0.0 }
 0x251   :  { %v295_v31 = vpop.xlane.xlu1 %294 }
 0x252   :  { %v534_v32 = vpop.eup %533  ;;  %v298_v33 = vmul.f32 %v295_v31, %v806_v26  ;;  %v324_v35 = vadd.f32 1e-05, %v318_v30 }
 0x253   :  { %v327_v34 = vmul.f32 %v534_v32, %v323_v60  ;;  %v307_v0 = vpop.xlane.xlu2 %306  ;;  %vm333_vm10 = vweird.f32 %v534_v32 }
 0x254   :  { %v313_v36 = vmul.f32 %v298_v33, %v298_v33  ;;  %v310_v37 = vmul.f32 %v307_v0, %v806_v26  ;;  %535 = vrsqrt.f32 %v324_v35  ;;  %vm334_vm12 = vmor %vm332_vm11, %vm333_vm10  ;;  %vm342_vm14 = vweird.f32 %v324_v35 }
 0x255   :  { %v328_v38 = vmul.f32 %v534_v32, %v327_v34  ;;  %v322_v46 = vsub.f32 %v857_v47, %v298_v33 }
 0x256   :  { %v316_v39 = vsub.f32 %v310_v37, %v313_v36 }
 0x257   :  { %v329_v40 = vmul.f32 0.5, %v328_v38 }
 0x258   :  { %v319_v41 = vmax.f32 %v316_v39, 0.0 }
 0x259   :  { %v330_v42 = vsub.f32 1.5, %v329_v40 }
 0x25a   :  { %v325_v43 = vadd.f32 1e-05, %v319_v41  ;;  %v536_v45 = vpop.eup %535 }
 0x25b   :  { %v331_v4 = vmul.f32 %v534_v32, %v330_v42  ;;  %v337_v48 = vmul.f32 %v536_v45, %v324_v35  ;;  %vm343_vm13 = vweird.f32 %v536_v45 }
 0x25c   :  { %537 = vrsqrt.f32 %v325_v43  ;;  %vm344_vm15 = vmor %vm342_vm14, %vm343_vm13  ;;  %vm352_vm1 = vweird.f32 %v325_v43 }
 0x25d   :  { %v338_v49 = vmul.f32 %v536_v45, %v337_v48  ;;  %v335_v52 = vsel %vm334_vm12, %v534_v32, %v331_v4 }
 0x25e   :  { %v356_v56 = vmul.f32 %v335_v52, %v320_v53 }
 0x25f   :  { %v339_v54 = vmul.f32 0.5, %v338_v49 }
 0x260   :  { %v362_v2 = vmul.f32 %v521_v57, %v356_v56 }
 0x261   :  { %v340_v59 = vsub.f32 1.5, %v339_v54 }
 0x262   :  { %v538_v58 = vpop.eup %537  ;;  %v368_v9 = vadd.f32 %v522_v44, %v362_v2  ;;  %v523_v2 = vld [vmem:[%s923_s10] ss:$0 sm:$0xff] }
 0x263   :  { %v347_v61 = vmul.f32 %v538_v58, %v325_v43  ;;  %v341_v62 = vmul.f32 %v536_v45, %v340_v59  ;;  %vm353_vm0 = vweird.f32 %v538_v58 }
 0x264   :  { %vm354_vm2 = vmor %vm352_vm1, %vm353_vm0  ;;  %v371_v12 = vmax.f32 %v368_v9, 0.0 }
 0x265   :  { %v348_v1 = vmul.f32 %v538_v58, %v347_v61  ;;  %v345_v3 = vsel %vm344_vm15, %v536_v45, %v341_v62 }
 0x266   :  { %v357_v6 = vmul.f32 %v345_v3, %v321_v63  ;;  %v524_v3 = vld [vmem:[%s924_s11] ss:$0 sm:$0xff] }
 0x267   :  { %v349_v5 = vmul.f32 0.5, %v348_v1 }
 0x268   :  { %v363_v8 = vmul.f32 %v521_v57, %v357_v6 }
 0x269   :  { %v350_v7 = vsub.f32 1.5, %v349_v5 }
 0x26a   :  { %v369_v10 = vadd.f32 %v522_v44, %v363_v8 }
 0x26b   :  { %v351_v11 = vmul.f32 %v538_v58, %v350_v7 }
 0x26c   :  { %v372_v13 = vmax.f32 %v369_v10, 0.0 }
 0x26d   :  { %v355_v14 = vsel %vm354_vm2, %v538_v58, %v351_v11 }
 0x26e   :  { %v390_v15 = vpack.c.bf16 %v372_v13, %v371_v12  ;;  %v358_v16 = vmul.f32 %v355_v14, %v322_v46 }
 0x270   :  { %408 = vmatmul.bf16.vlgmr.msra.gmra.mxu3 %v390_v15  ;;  %v364_v17 = vmul.f32 %v521_v57, %v358_v16 }
 0x272   :  { %v370_v18 = vadd.f32 %v522_v44, %v364_v17 }
 0x274   :  { %v373_v19 = vmax.f32 %v370_v18, 0.0 }
 0x276   :  { %v391_v20 = vpack.c.bf16 %v373_v19, %v373_v19 }
 0x280   :  { %413 = vmatmul.bf16.gmra.mxu3 %v391_v20 }
 0x2f3   :  { %v409_v21 = vpop.f32.mrf.mxu3 }
 0x2f4   :  { %420 = vadd.xlane.f32.xlu0 %v409_v21  ;;  %v429_v22 = vmul.f32 %v409_v21, %v409_v21 }
 0x2fb   :  { %v877_v60 = vpop.f32.mrf.mxu3 }
 0x2fc   :  { %432 = vadd.xlane.f32.xlu0 %v429_v22  ;;  %422 = vadd.xlane.f32.xlu1 %v877_v60  ;;  %v430_v47 = vmul.f32 %v877_v60, %v877_v60 }
 0x303   :  { %v882_v23 = vpop.f32.mrf.mxu3 }
 0x304   :  { %434 = vadd.xlane.f32.xlu1 %v430_v47  ;;  %424 = vadd.xlane.f32.xlu2 %v882_v23  ;;  %v431_v24 = vmul.f32 %v882_v23, %v882_v23 }
 0x30b   :  { %v416_v25 = vpop.f32.mrf.mxu3 }
 0x30c   :  { %436 = vadd.xlane.f32.xlu2 %v431_v24 }
 0x367   :  { %v421_v27 = vpop.xlane.xlu0 %420 }
 0x368   :  { %v426_v28 = vmul.f32 %v421_v27, %v806_v26 }
 0x36a   :  { %v441_v31 = vmul.f32 %v426_v28, %v426_v28  ;;  %v450_v1 = vsub.f32 %v409_v21, %v426_v28 }
 0x36f   :  { %v433_v29 = vpop.xlane.xlu0 %432  ;;  %v423_v30 = vpop.xlane.xlu1 %422 }
 0x370   :  { %v438_v32 = vmul.f32 %v433_v29, %v806_v26  ;;  %v427_v35 = vmul.f32 %v423_v30, %v806_v26 }
 0x372   :  { %v444_v33 = vsub.f32 %v438_v32, %v441_v31  ;;  %v442_v38 = vmul.f32 %v427_v35, %v427_v35  ;;  %v451_v13 = vsub.f32 %v877_v60, %v427_v35 }
 0x374   :  { %v447_v34 = vmax.f32 %v444_v33, 0.0 }
 0x376   :  { %v453_v0 = vadd.f32 1e-05, %v447_v34 }
 0x377   :  { %v435_v36 = vpop.xlane.xlu1 %434  ;;  %v425_v37 = vpop.xlane.xlu2 %424 }
 0x378   :  { %539 = vrsqrt.f32 %v453_v0  ;;  %v439_v39 = vmul.f32 %v435_v36, %v806_v26  ;;  %v428_v42 = vmul.f32 %v425_v37, %v806_v26  ;;  %vm462_vm4 = vweird.f32 %v453_v0 }
 0x37a   :  { %v445_v40 = vsub.f32 %v439_v39, %v442_v38  ;;  %v443_v49 = vmul.f32 %v428_v42, %v428_v42  ;;  %v452_v60 = vsub.f32 %v882_v23, %v428_v42 }
 0x37c   :  { %v448_v41 = vmax.f32 %v445_v40, 0.0 }
 0x37e   :  { %v540_v43 = vpop.eup %539  ;;  %v454_v45 = vadd.f32 1e-05, %v448_v41 }
 0x37f   :  { %v457_v4 = vmul.f32 %v540_v43, %v453_v0  ;;  %v437_v48 = vpop.xlane.xlu2 %436  ;;  %vm463_vm3 = vweird.f32 %v540_v43 }
 0x380   :  { %541 = vrsqrt.f32 %v454_v45  ;;  %v440_v52 = vmul.f32 %v437_v48, %v806_v26  ;;  %vm464_vm5 = vmor %vm462_vm4, %vm463_vm3  ;;  %vm472_vm7 = vweird.f32 %v454_v45 }
 0x381   :  { %v458_v53 = vmul.f32 %v540_v43, %v457_v4 }
 0x382   :  { %v446_v54 = vsub.f32 %v440_v52, %v443_v49 }
 0x383   :  { %v459_v56 = vmul.f32 0.5, %v458_v53 }
 0x384   :  { %v449_v57 = vmax.f32 %v446_v54, 0.0 }
 0x385   :  { %v460_v58 = vsub.f32 1.5, %v459_v56 }
 0x386   :  { %v542_v59 = vpop.eup %541  ;;  %v455_v61 = vadd.f32 1e-05, %v449_v57 }
 0x387   :  { %v461_v62 = vmul.f32 %v540_v43, %v460_v58  ;;  %v467_v63 = vmul.f32 %v542_v59, %v454_v45  ;;  %vm473_vm6 = vweird.f32 %v542_v59 }
 0x388   :  { %543 = vrsqrt.f32 %v455_v61  ;;  %vm474_vm8 = vmor %vm472_vm7, %vm473_vm6  ;;  %vm482_vm10 = vweird.f32 %v455_v61 }
 0x389   :  { %v465_v44 = vsel %vm464_vm5, %v540_v43, %v461_v62  ;;  %v468_v26 = vmul.f32 %v542_v59, %v467_v63 }
 0x38a   :  { %v486_v5 = vmul.f32 %v465_v44, %v450_v1 }
 0x38b   :  { %v469_v6 = vmul.f32 0.5, %v468_v26 }
 0x38c   :  { %v492_v7 = vmul.f32 %v523_v2, %v486_v5 }
 0x38d   :  { %v470_v8 = vsub.f32 1.5, %v469_v6 }
 0x38e   :  { %v544_v9 = vpop.eup %543  ;;  %v498_v10 = vadd.f32 %v524_v3, %v492_v7 }
 0x38f   :  { %v471_v11 = vmul.f32 %v542_v59, %v470_v8  ;;  %v477_v46 = vmul.f32 %v544_v9, %v455_v61  ;;  %vm483_vm9 = vweird.f32 %v544_v9 }
 0x390   :  { %v501_v12 = vadd.f32 %v498_v10, %v748_v50  ;;  %vm484_vm11 = vmor %vm482_vm10, %vm483_vm9 }
 0x391   :  { %v475_v14 = vsel %vm474_vm8, %v542_v59, %v471_v11  ;;  %v478_v15 = vmul.f32 %v544_v9, %v477_v46 }
 0x392   :  { %v504_v16 = vmax.f32 %v501_v12, 0.0  ;;  %v487_v17 = vmul.f32 %v475_v14, %v451_v13 }
 0x393   :  { %v479_v18 = vmul.f32 0.5, %v478_v15 }
 0x394   :  { %507 = vst [vmem:[%s925_s12] sm:$0xff] %v504_v16  ;;  %v493_v19 = vmul.f32 %v523_v2, %v487_v17 }
 0x395   :  { %v480_v20 = vsub.f32 1.5, %v479_v18 }
 0x396   :  { %v499_v21 = vadd.f32 %v524_v3, %v493_v19 }
 0x397   :  { %v481_v22 = vmul.f32 %v544_v9, %v480_v20 }
 0x398   :  { %v502_v50 = vadd.f32 %v499_v21, %v753_v51 }
 0x399   :  { %v485_v47 = vsel %vm484_vm11, %v544_v9, %v481_v22 }
 0x39a   :  { %v505_v24 = vmax.f32 %v502_v50, 0.0  ;;  %v488_v25 = vmul.f32 %v485_v47, %v452_v60 }
 0x39c   :  { %508 = vst [vmem:[%s925_s12 + $0x8] sm:$0xff] %v505_v24  ;;  %v494_v27 = vmul.f32 %v523_v2, %v488_v25 }
 0x39e   :  { %v500_v28 = vadd.f32 %v524_v3, %v494_v27 }
 0x3a0   :  { %v503_v29 = vadd.f32 %v500_v28, %v763_v55 }
 0x3a2   :  { %v506_v30 = vmax.f32 %v503_v29, 0.0 }
 0x3a4   :  { %509 = vst [vmem:[%s925_s12 + $0x10] sm:$0xff] %v506_v30 }
 0x3a5   :  { %514 = vsyncpa [#allocation3], 1 }

// kernel: interactor_forward.16
= control target key start
LH: loop header
LB: loop body
LE: loop exit
PB: predicated region body
PF: predicated region fallthrough
CT: control target
= control target key end

     0   :  { %s680_s1 = inlined_call_operand.vmem [shape: f32[128,768], index: 1, kind: input, shape index: {}]   ;;  %s681_s0 = inlined_call_operand.vmem [shape: f32[24,128], index: 0, kind: input, shape index: {}]   ;;  %s682_s2 = inlined_call_operand.vmem [shape: f32[24,768], index: 2, kind: output, shape index: {}]  }
   0x1   :  { %v98_v0 = vld [vmem:[%s680_s1 + $0x2a0] sm:$0xff]  ;;  %v104_v1 = vld [vmem:[%s680_s1 + $0x2d0] sm:$0xff]  ;;  %v99_v2 = vld [vmem:[%s680_s1 + $0x2a8] sm:$0xff] }
   0x2   :  { %v154_v3 = vpack.c.bf16 %v104_v1, %v98_v0  ;;  %v105_v4 = vld [vmem:[%s680_s1 + $0x2d8] sm:$0xff]  ;;  %v100_v5 = vld [vmem:[%s680_s1 + $0x2b0] sm:$0xff]  ;;  %v106_v6 = vld [vmem:[%s680_s1 + $0x2e0] sm:$0xff] }
   0x3   :  { %v155_v7 = vpack.c.bf16 %v105_v4, %v99_v2  ;;  %v156_v8 = vpack.c.bf16 %v106_v6, %v100_v5  ;;  %v101_v9 = vld [vmem:[%s680_s1 + $0x2b8] sm:$0xff]  ;;  %v107_v10 = vld [vmem:[%s680_s1 + $0x2e8] sm:$0xff]  ;;  %v86_v11 = vld [vmem:[%s680_s1 + $0x240] sm:$0xff] }
   0x4   :  { %160 = vmatpush.bf16.msra.mxu0 %v154_v3  ;;  %v157_v12 = vpack.c.bf16 %v107_v10, %v101_v9  ;;  %v92_v13 = vld [vmem:[%s680_s1 + $0x270] sm:$0xff]  ;;  %v87_v14 = vld [vmem:[%s680_s1 + $0x248] sm:$0xff]  ;;  %v93_v15 = vld [vmem:[%s680_s1 + $0x278] sm:$0xff] }
   0x5   :  { %178 = vmatpush.bf16.msra.mxu1 %v155_v7  ;;  %196 = vmatpush.bf16.msra.mxu2 %v156_v8  ;;  %v148_v16 = vpack.c.bf16 %v92_v13, %v86_v11  ;;  %v149_v17 = vpack.c.bf16 %v93_v15, %v87_v14  ;;  %v88_v18 = vld [vmem:[%s680_s1 + $0x250] sm:$0xff]  ;;  %v94_v19 = vld [vmem:[%s680_s1 + $0x280] sm:$0xff]  ;;  %v89_v20 = vld [vmem:[%s680_s1 + $0x258] sm:$0xff] }
   0x6   :  { %214 = vmatpush.bf16.msra.mxu3 %v157_v12  ;;  %v150_v21 = vpack.c.bf16 %v94_v19, %v88_v18  ;;  %v95_v22 = vld [vmem:[%s680_s1 + $0x288] sm:$0xff]  ;;  %v74_v23 = vld [vmem:[%s680_s1 + $0x1e0] sm:$0xff]  ;;  %v80_v24 = vld [vmem:[%s680_s1 + $0x210] sm:$0xff] }
   0x7   :  { %v151_v25 = vpack.c.bf16 %v95_v22, %v89_v20  ;;  %v75_v26 = vld [vmem:[%s680_s1 + $0x1e8] sm:$0xff]  ;;  %v81_v27 = vld [vmem:[%s680_s1 + $0x218] sm:$0xff]  ;;  %v76_v28 = vld [vmem:[%s680_s1 + $0x1f0] sm:$0xff]  ;;  %v142_v29 = vpack.c.bf16 %v80_v24, %v74_v23 }
   0x8   :  { %161 = vmatpush.bf16.msra.mxu0 %v148_v16  ;;  %v82_v30 = vld [vmem:[%s680_s1 + $0x220] sm:$0xff]  ;;  %v77_v31 = vld [vmem:[%s680_s1 + $0x1f8] sm:$0xff]  ;;  %v83_v32 = vld [vmem:[%s680_s1 + $0x228] sm:$0xff]  ;;  %v143_v33 = vpack.c.bf16 %v81_v27, %v75_v26 }
   0x9   :  { %179 = vmatpush.bf16.msra.mxu1 %v149_v17  ;;  %197 = vmatpush.bf16.msra.mxu2 %v150_v21  ;;  %v144_v34 = vpack.c.bf16 %v82_v30, %v76_v28  ;;  %v62_v35 = vld [vmem:[%s680_s1 + $0x180] sm:$0xff]  ;;  %v68_v36 = vld [vmem:[%s680_s1 + $0x1b0] sm:$0xff]  ;;  %v63_v37 = vld [vmem:[%s680_s1 + $0x188] sm:$0xff]  ;;  %v145_v38 = vpack.c.bf16 %v83_v32, %v77_v31 }
   0xa   :  { %215 = vmatpush.bf16.msra.mxu3 %v151_v25  ;;  %v69_v39 = vld [vmem:[%s680_s1 + $0x1b8] sm:$0xff]  ;;  %v64_v40 = vld [vmem:[%s680_s1 + $0x190] sm:$0xff]  ;;  %v70_v41 = vld [vmem:[%s680_s1 + $0x1c0] sm:$0xff]  ;;  %v136_v44 = vpack.c.bf16 %v68_v36, %v62_v35 }
   0xb   :  { %v65_v42 = vld [vmem:[%s680_s1 + $0x198] sm:$0xff]  ;;  %v71_v43 = vld [vmem:[%s680_s1 + $0x1c8] sm:$0xff]  ;;  %v137_v45 = vpack.c.bf16 %v69_v39, %v63_v37  ;;  %v138_v46 = vpack.c.bf16 %v70_v41, %v64_v40  ;;  %v50_v47 = vld [vmem:[%s680_s1 + $0x120] sm:$0xff] }
   0xc   :  { %162 = vmatpush.bf16.msra.mxu0 %v142_v29  ;;  %v56_v48 = vld [vmem:[%s680_s1 + $0x150] sm:$0xff]  ;;  %v51_v49 = vld [vmem:[%s680_s1 + $0x128] sm:$0xff]  ;;  %v139_v50 = vpack.c.bf16 %v71_v43, %v65_v42  ;;  %v57_v51 = vld [vmem:[%s680_s1 + $0x158] sm:$0xff] }
   0xd   :  { %180 = vmatpush.bf16.msra.mxu1 %v143_v33  ;;  %198 = vmatpush.bf16.msra.mxu2 %v144_v34  ;;  %v52_v52 = vld [vmem:[%s680_s1 + $0x130] sm:$0xff]  ;;  %v58_v53 = vld [vmem:[%s680_s1 + $0x160] sm:$0xff]  ;;  %v53_v54 = vld [vmem:[%s680_s1 + $0x138] sm:$0xff]  ;;  %v130_v56 = vpack.c.bf16 %v56_v48, %v50_v47  ;;  %v131_v57 = vpack.c.bf16 %v57_v51, %v51_v49 }
   0xe   :  { %216 = vmatpush.bf16.msra.mxu3 %v145_v38  ;;  %v59_v55 = vld [vmem:[%s680_s1 + $0x168] sm:$0xff]  ;;  %v132_v58 = vpack.c.bf16 %v58_v53, %v52_v52  ;;  %v38_v59 = vld [vmem:[%s680_s1 + $0xc0] sm:$0xff]  ;;  %v44_v60 = vld [vmem:[%s680_s1 + $0xf0] sm:$0xff] }
   0xf   :  { %v39_v61 = vld [vmem:[%s680_s1 + $0xc8] sm:$0xff]  ;;  %v133_v62 = vpack.c.bf16 %v59_v55, %v53_v54  ;;  %v45_v63 = vld [vmem:[%s680_s1 + $0xf8] sm:$0xff]  ;;  %v40_v0 = vld [vmem:[%s680_s1 + $0xd0] sm:$0xff]  ;;  %v124_v4 = vpack.c.bf16 %v44_v60, %v38_v59 }
  0x10   :  { %163 = vmatpush.bf16.msra.mxu0 %v136_v44  ;;  %v46_v1 = vld [vmem:[%s680_s1 + $0x100] sm:$0xff]  ;;  %v41_v2 = vld [vmem:[%s680_s1 + $0xd8] sm:$0xff]  ;;  %v47_v3 = vld [vmem:[%s680_s1 + $0x108] sm:$0xff]  ;;  %v125_v5 = vpack.c.bf16 %v45_v63, %v39_v61 }
  0x11   :  { %181 = vmatpush.bf16.msra.mxu1 %v137_v45  ;;  %199 = vmatpush.bf16.msra.mxu2 %v138_v46  ;;  %v126_v6 = vpack.c.bf16 %v46_v1, %v40_v0  ;;  %v26_v7 = vld [vmem:[%s680_s1 + $0x60] sm:$0xff]  ;;  %v32_v8 = vld [vmem:[%s680_s1 + $0x90] sm:$0xff]  ;;  %v27_v9 = vld [vmem:[%s680_s1 + $0x68] sm:$0xff]  ;;  %v127_v10 = vpack.c.bf16 %v47_v3, %v41_v2 }
  0x12   :  { %217 = vmatpush.bf16.msra.mxu3 %v139_v50  ;;  %v33_v11 = vld [vmem:[%s680_s1 + $0x98] sm:$0xff]  ;;  %v28_v12 = vld [vmem:[%s680_s1 + $0x70] sm:$0xff]  ;;  %v34_v13 = vld [vmem:[%s680_s1 + $0xa0] sm:$0xff]  ;;  %v118_v16 = vpack.c.bf16 %v32_v8, %v26_v7 }
  0x13   :  { %v29_v14 = vld [vmem:[%s680_s1 + $0x78] sm:$0xff]  ;;  %v35_v15 = vld [vmem:[%s680_s1 + $0xa8] sm:$0xff]  ;;  %v14_v17 = vld [vmem:[%s680_s1] sm:$0xff]  ;;  %v119_v19 = vpack.c.bf16 %v33_v11, %v27_v9  ;;  %v120_v20 = vpack.c.bf16 %v34_v13, %v28_v12 }
  0x14   :  { %164 = vmatpush.bf16.msra.mxu0 %v130_v56  ;;  %v20_v18 = vld [vmem:[%s680_s1 + $0x30] sm:$0xff]  ;;  %v15_v21 = vld [vmem:[%s680_s1 + $0x8] sm:$0xff]  ;;  %v21_v22 = vld [vmem:[%s680_s1 + $0x38] sm:$0xff]  ;;  %v121_v24 = vpack.c.bf16 %v35_v15, %v29_v14 }
  0x15   :  { %182 = vmatpush.bf16.msra.mxu1 %v131_v57  ;;  %200 = vmatpush.bf16.msra.mxu2 %v132_v58  ;;  %v16_v23 = vld [vmem:[%s680_s1 + $0x10] sm:$0xff]  ;;  %v22_v25 = vld [vmem:[%s680_s1 + $0x40] sm:$0xff]  ;;  %v17_v26 = vld [vmem:[%s680_s1 + $0x18] sm:$0xff]  ;;  %v112_v31 = vpack.c.bf16 %v20_v18, %v14_v17  ;;  %v113_v35 = vpack.c.bf16 %v21_v22, %v15_v21 }
  0x16   :  { %218 = vmatpush.bf16.msra.mxu3 %v133_v62  ;;  %v23_v27 = vld [vmem:[%s680_s1 + $0x48] sm:$0xff]  ;;  %v11_v28 = vld [vmem:[%s681_s0] sm:$0xff]  ;;  %v108_v30 = vld [vmem:[%s680_s1 + $0x2f0] sm:$0xff]  ;;  %v114_v36 = vpack.c.bf16 %v22_v25, %v16_v23 }
  0x17   :  { %v102_v29 = vld [vmem:[%s680_s1 + $0x2c0] sm:$0xff]  ;;  %v12_v32 = vld [vmem:[%s681_s0 + $0x8] sm:$0xff]  ;;  %v109_v34 = vld [vmem:[%s680_s1 + $0x2f8] sm:$0xff]  ;;  %v115_v37 = vpack.c.bf16 %v23_v27, %v17_v26 }
  0x18   :  { %165 = vmatpush.bf16.msra.mxu0 %v124_v4  ;;  %v103_v33 = vld [vmem:[%s680_s1 + $0x2c8] sm:$0xff]  ;;  %v158_v38 = vpack.c.bf16 %v108_v30, %v102_v29  ;;  %v531_v39 = vpack.c.bf16 %v12_v32, %v11_v28  ;;  %v90_v41 = vld [vmem:[%s680_s1 + $0x260] sm:$0xff]  ;;  %v96_v42 = vld [vmem:[%s680_s1 + $0x290] sm:$0xff] }
  0x19   :  { %183 = vmatpush.bf16.msra.mxu1 %v125_v5  ;;  %201 = vmatpush.bf16.msra.mxu2 %v126_v6  ;;  %v159_v40 = vpack.c.bf16 %v109_v34, %v103_v33  ;;  %v91_v43 = vld [vmem:[%s680_s1 + $0x268] sm:$0xff]  ;;  %v97_v44 = vld [vmem:[%s680_s1 + $0x298] sm:$0xff]  ;;  %v152_v45 = vpack.c.bf16 %v96_v42, %v90_v41  ;;  %v78_v47 = vld [vmem:[%s680_s1 + $0x200] sm:$0xff] }
  0x1a   :  { %219 = vmatpush.bf16.msra.mxu3 %v127_v10  ;;  %v153_v46 = vpack.c.bf16 %v97_v44, %v91_v43  ;;  %v84_v48 = vld [vmem:[%s680_s1 + $0x230] sm:$0xff]  ;;  %v79_v49 = vld [vmem:[%s680_s1 + $0x208] sm:$0xff]  ;;  %v85_v50 = vld [vmem:[%s680_s1 + $0x238] sm:$0xff] }
  0x1b   :  { %v146_v51 = vpack.c.bf16 %v84_v48, %v78_v47  ;;  %v147_v52 = vpack.c.bf16 %v85_v50, %v79_v49  ;;  %v66_v53 = vld [vmem:[%s680_s1 + $0x1a0] sm:$0xff]  ;;  %v72_v54 = vld [vmem:[%s680_s1 + $0x1d0] sm:$0xff]  ;;  %v67_v55 = vld [vmem:[%s680_s1 + $0x1a8] sm:$0xff] }
  0x1c   :  { %166 = vmatpush.bf16.msra.mxu0 %v118_v16  ;;  %v73_v56 = vld [vmem:[%s680_s1 + $0x1d8] sm:$0xff]  ;;  %v140_v57 = vpack.c.bf16 %v72_v54, %v66_v53  ;;  %v54_v59 = vld [vmem:[%s680_s1 + $0x140] sm:$0xff]  ;;  %v60_v60 = vld [vmem:[%s680_s1 + $0x170] sm:$0xff] }
  0x1d   :  { %184 = vmatpush.bf16.msra.mxu1 %v119_v19  ;;  %202 = vmatpush.bf16.msra.mxu2 %v120_v20  ;;  %v141_v58 = vpack.c.bf16 %v73_v56, %v67_v55  ;;  %v13_v61 = vld [vmem:[%s681_s0 + $0x10] sm:$0xff]  ;;  %v55_v62 = vld [vmem:[%s680_s1 + $0x148] sm:$0xff]  ;;  %v61_v63 = vld [vmem:[%s680_s1 + $0x178] sm:$0xff]  ;;  %v134_v0 = vpack.c.bf16 %v60_v60, %v54_v59 }
  0x1e   :  { %220 = vmatpush.bf16.msra.mxu3 %v121_v24  ;;  %v111_v1 = vpack.c.bf16 %v13_v61, %v13_v61  ;;  %v135_v2 = vpack.c.bf16 %v61_v63, %v55_v62  ;;  %v42_v3 = vld [vmem:[%s680_s1 + $0xe0] sm:$0xff]  ;;  %v48_v4 = vld [vmem:[%s680_s1 + $0x110] sm:$0xff]  ;;  %v43_v5 = vld [vmem:[%s680_s1 + $0xe8] sm:$0xff] }
  0x1f   :  { %v49_v6 = vld [vmem:[%s680_s1 + $0x118] sm:$0xff]  ;;  %v128_v7 = vpack.c.bf16 %v48_v4, %v42_v3  ;;  %v30_v9 = vld [vmem:[%s680_s1 + $0x80] sm:$0xff]  ;;  %v36_v10 = vld [vmem:[%s680_s1 + $0xb0] sm:$0xff] }
  0x20   :  { %167 = vmatpush.bf16.msra.mxu0 %v112_v31  ;;  %v129_v8 = vpack.c.bf16 %v49_v6, %v43_v5  ;;  %v31_v11 = vld [vmem:[%s680_s1 + $0x88] sm:$0xff]  ;;  %v37_v12 = vld [vmem:[%s680_s1 + $0xb8] sm:$0xff]  ;;  %v122_v13 = vpack.c.bf16 %v36_v10, %v30_v9  ;;  %v18_v15 = vld [vmem:[%s680_s1 + $0x20] sm:$0xff] }
  0x21   :  { %185 = vmatpush.bf16.msra.mxu1 %v113_v35  ;;  %203 = vmatpush.bf16.msra.mxu2 %v114_v36  ;;  %v123_v14 = vpack.c.bf16 %v37_v12, %v31_v11  ;;  %v24_v16 = vld [vmem:[%s680_s1 + $0x50] sm:$0xff]  ;;  %v19_v17 = vld [vmem:[%s680_s1 + $0x28] sm:$0xff]  ;;  %v25_v18 = vld [vmem:[%s680_s1 + $0x58] sm:$0xff] }
  0x22   :  { %221 = vmatpush.bf16.msra.mxu3 %v115_v37  ;;  %v116_v19 = vpack.c.bf16 %v24_v16, %v18_v15  ;;  %v117_v20 = vpack.c.bf16 %v25_v18, %v19_v17 }
  0x23   :  { %168 = vmatmul.bf16.vlgmr.msra.gmra.mxu0 %v531_v39 }
  0x24   :  { %186 = vmatmul.bf16.vlgmr.msra.gmra.mxu1 %v531_v39  ;;  %204 = vmatmul.bf16.vlgmr.msra.gmra.mxu2 %v531_v39 }
  0x25   :  { %290 = vmatpush.bf16.msrb.mxu2 %v158_v38  ;;  %222 = vmatmul.bf16.vlgmr.msra.gmra.mxu3 %v531_v39 }
  0x26   :  { %298 = vmatpush.bf16.msrb.mxu3 %v159_v40  ;;  %232 = vmatpush.bf16.msrb.mxu0 %v158_v38 }
  0x27   :  { %250 = vmatpush.bf16.msrb.mxu1 %v159_v40 }
  0x29   :  { %291 = vmatpush.bf16.msrb.mxu2 %v152_v45 }
  0x2a   :  { %299 = vmatpush.bf16.msrb.mxu3 %v153_v46  ;;  %233 = vmatpush.bf16.msrb.mxu0 %v152_v45 }
  0x2b   :  { %251 = vmatpush.bf16.msrb.mxu1 %v153_v46 }
  0x2d   :  { %292 = vmatpush.bf16.msrb.mxu2 %v146_v51 }
  0x2e   :  { %300 = vmatpush.bf16.msrb.mxu3 %v147_v52  ;;  %234 = vmatpush.bf16.msrb.mxu0 %v146_v51 }
  0x2f   :  { %252 = vmatpush.bf16.msrb.mxu1 %v147_v52 }
  0x31   :  { %293 = vmatpush.bf16.msrb.mxu2 %v140_v57 }
  0x32   :  { %301 = vmatpush.bf16.msrb.mxu3 %v141_v58  ;;  %235 = vmatpush.bf16.msrb.mxu0 %v140_v57 }
  0x33   :  { %253 = vmatpush.bf16.msrb.mxu1 %v141_v58  ;;  %173 = vmatmul.bf16.gmra.mxu0 %v111_v1 }
  0x34   :  { %191 = vmatmul.bf16.gmra.mxu1 %v111_v1  ;;  %209 = vmatmul.bf16.gmra.mxu2 %v111_v1 }
  0x35   :  { %294 = vmatpush.bf16.msrb.mxu2 %v134_v0  ;;  %227 = vmatmul.bf16.gmra.mxu3 %v111_v1 }
  0x36   :  { %302 = vmatpush.bf16.msrb.mxu3 %v135_v2  ;;  %236 = vmatpush.bf16.msrb.mxu0 %v134_v0 }
  0x37   :  { %254 = vmatpush.bf16.msrb.mxu1 %v135_v2 }
  0x39   :  { %295 = vmatpush.bf16.msrb.mxu2 %v128_v7 }
  0x3a   :  { %303 = vmatpush.bf16.msrb.mxu3 %v129_v8  ;;  %237 = vmatpush.bf16.msrb.mxu0 %v128_v7 }
  0x3b   :  { %255 = vmatpush.bf16.msrb.mxu1 %v129_v8 }
  0x3d   :  { %296 = vmatpush.bf16.msrb.mxu2 %v122_v13 }
  0x3e   :  { %304 = vmatpush.bf16.msrb.mxu3 %v123_v14  ;;  %238 = vmatpush.bf16.msrb.mxu0 %v122_v13 }
  0x3f   :  { %256 = vmatpush.bf16.msrb.mxu1 %v123_v14 }
  0x41   :  { %297 = vmatpush.bf16.msrb.mxu2 %v116_v19 }
  0x42   :  { %305 = vmatpush.bf16.msrb.mxu3 %v117_v20  ;;  %239 = vmatpush.bf16.msrb.mxu0 %v116_v19 }
  0x43   :  { %257 = vmatpush.bf16.msrb.mxu1 %v117_v20 }
  0x44   :  { %245 = vmatmul.bf16.vlgmr.msrb.gmra.mxu2 %v111_v1 }
  0x45   :  { %240 = vmatmul.bf16.vlgmr.msrb.gmra.mxu0 %v531_v39  ;;  %263 = vmatmul.bf16.vlgmr.msrb.gmra.mxu3 %v111_v1 }
  0x46   :  { %258 = vmatmul.bf16.vlgmr.msrb.gmra.mxu1 %v531_v39 }
  0xa0   :  { %v169_v21 = vpop.f32.mrf.mxu0 }
  0xa1   :  { %268 = vst [vmem:[%s682_s2] sm:$0xff] %v169_v21  ;;  %v187_v22 = vpop.f32.mrf.mxu1 }
  0xa2   :  { %269 = vst [vmem:[%s682_s2 + $0x8] sm:$0xff] %v187_v22 }
  0xa7   :  { %v205_v23 = vpop.f32.mrf.mxu2 }
  0xa8   :  { %270 = vst [vmem:[%s682_s2 + $0x10] sm:$0xff] %v205_v23  ;;  %v223_v24 = vpop.f32.mrf.mxu3  ;;  %v171_v25 = vpop.f32.mrf.mxu0 }
  0xa9   :  { %271 = vst [vmem:[%s682_s2 + $0x18] sm:$0xff] %v223_v24  ;;  %v189_v26 = vpop.f32.mrf.mxu1 }
  0xaa   :  { %274 = vst [vmem:[%s682_s2 + $0x30] sm:$0xff] %v171_v25 }
  0xab   :  { %275 = vst [vmem:[%s682_s2 + $0x38] sm:$0xff] %v189_v26 }
  0xaf   :  { %v207_v27 = vpop.f32.mrf.mxu2 }
  0xb0   :  { %276 = vst [vmem:[%s682_s2 + $0x40] sm:$0xff] %v207_v27  ;;  %v225_v28 = vpop.f32.mrf.mxu3  ;;  %v174_v29 = vpop.f32.mrf.mxu0 }
  0xb1   :  { %277 = vst [vmem:[%s682_s2 + $0x48] sm:$0xff] %v225_v28  ;;  %v192_v30 = vpop.f32.mrf.mxu1 }
  0xb2   :  { %280 = vst [vmem:[%s682_s2 + $0x60] sm:$0xff] %v174_v29 }
  0xb3   :  { %281 = vst [vmem:[%s682_s2 + $0x68] sm:$0xff] %v192_v30 }
  0xb7   :  { %v210_v31 = vpop.f32.mrf.mxu2 }
  0xb8   :  { %282 = vst [vmem:[%s682_s2 + $0x70] sm:$0xff] %v210_v31  ;;  %v228_v32 = vpop.f32.mrf.mxu3  ;;  %v176_v33 = vpop.f32.mrf.mxu0 }
  0xb9   :  { %283 = vst [vmem:[%s682_s2 + $0x78] sm:$0xff] %v228_v32  ;;  %v194_v34 = vpop.f32.mrf.mxu1 }
  0xbf   :  { %v212_v35 = vpop.f32.mrf.mxu2 }
  0xc0   :  { %v230_v36 = vpop.f32.mrf.mxu3 }
  0xc2   :  { %v241_v37 = vpop.f32.mrf.mxu0 }
  0xc3   :  { %272 = vst [vmem:[%s682_s2 + $0x20] sm:$0xff] %v241_v37  ;;  %v259_v38 = vpop.f32.mrf.mxu1 }
  0xc4   :  { %273 = vst [vmem:[%s682_s2 + $0x28] sm:$0xff] %v259_v38 }
  0xc7   :  { %v246_v39 = vpop.f32.mrf.mxu2 }
  0xc8   :  { %284 = vst [vmem:[%s682_s2 + $0x80] sm:$0xff] %v246_v39  ;;  %v264_v40 = vpop.f32.mrf.mxu3 }
  0xc9   :  { %285 = vst [vmem:[%s682_s2 + $0x88] sm:$0xff] %v264_v40 }
  0xca   :  { %v243_v41 = vpop.f32.mrf.mxu0 }
  0xcb   :  { %278 = vst [vmem:[%s682_s2 + $0x50] sm:$0xff] %v243_v41  ;;  %v261_v42 = vpop.f32.mrf.mxu1 }
  0xcc   :  { %279 = vst [vmem:[%s682_s2 + $0x58] sm:$0xff] %v261_v42 }
  0xcf   :  { %v248_v43 = vpop.f32.mrf.mxu2 }
  0xd0   :  { %v266_v44 = vpop.f32.mrf.mxu3 }

// kernel: interactor_forward.14
= control target key start
LH: loop header
LB: loop body
LE: loop exit
PB: predicated region body
PF: predicated region fallthrough
CT: control target
= control target key end

     0   :  { %s1943_s13 = smov 0   ;;  %s1945_s14 = smov 0   ;;  %s2904_s0 = inlined_call_operand.vmem [shape: f32[16,8], index: 0, kind: input, shape index: {}]   ;;  %s2905_s1 = inlined_call_operand.vmem [shape: f32[24,8], index: 1, kind: input, shape index: {}]   ;;  %s2906_s2 = inlined_call_operand.vmem [shape: f32[16,128], index: 2, kind: input, shape index: {}]   ;;  %s2907_s3 = inlined_call_operand.vmem [shape: f32[2,24,8], index: 3, kind: input, shape index: {}]   ;;  %s2908_s4 = inlined_call_operand.vmem [shape: f32[8,128], index: 4, kind: input, shape index: {}]   ;;  %s2909_s5 = inlined_call_operand.vmem [shape: f32[1,128], index: 5, kind: input, shape index: {}]   ;;  %s2910_s6 = inlined_call_operand.vmem [shape: f32[128,128], index: 6, kind: input, shape index: {}]   ;;  %s2911_s7 = inlined_call_operand.vmem [shape: f32[128,128], index: 7, kind: input, shape index: {}]   ;;  %s2912_s8 = inlined_call_operand.vmem [shape: f32[1,128], index: 8, kind: input, shape index: {}]   ;;  %s2913_s9 = inlined_call_operand.vmem [shape: f32[1,128], index: 9, kind: input, shape index: {}]   ;;  %s2914_s10 = inlined_call_operand.vmem [shape: f32[24,128], index: 10, kind: output, shape index: {}]  }
   0x1   :  { %s1947_s15 = smov 0  }
   0x2 LB: > { %s29_s16 = sadd.s32 1, %s1872_s14  ;;  %p1716_p0 = scmp.ge.s32.totalorder %s1876_s15, 1  ;;  %s1876_s15 = sphi %s1947_s15, %s20_s15   ;;  %s1872_s14 = sphi %s1945_s14, %s2953_s14   ;;  %s1868_s13 = sphi %s1943_s13, %s2952_s13  }
   0x3   : > { %p30_p1 = scmp.ge.s32.totalorder %s29_s16, 2  ;;  %p360_p2 = scmp.lt.s32.totalorder %s1876_s15, 3 }
   0x5   : > { %s2955_s16 = smov (%p30_p1, %s29_s16), 0  ;;  %p361_p3 = pnand %p1716_p0, %p360_p2 }
   0x7   : > { %364 = sbr.rel (%p361_p3) target bundleno = 726 (0x2d6), region = 60 }
   0xc   : > { %p415_p4 = scmp.lt.s32.totalorder %s1868_s13, 1  ;;  %p1720_p5 = scmp.ne.s32.totalorder %s1868_s13, 0 }
   0xe   : > { %s416_s17 = scalar_select %p415_p4, %s1868_s13, 1 }
   0xf   : > { %448 = sbr.rel (%p1720_p5) target bundleno = 24 (0x18), region = 64 }
  0x10   : > { %s1717_s18 = sshll.u32 %s416_s17, 3  ;;  %s1737_s19 = smul.u32 24, %s416_s17 }
  0x11   : > { %s418_s22 = scalar_lea.vmem %s2904_s0, %s1717_s18  ;;  %s1967_s25 = scalar_lea.vmem %s2906_s2, %s1717_s18 }
  0x12   : > { %s1972_s28 = scalar_lea.vmem %s2907_s3, %s1737_s19 }
  0x14   : > { %v1878_v0 = vmov 0.0  }
  0x15   : > { %449 = vst [vmem:[%s2914_s10] sm:$0xff] %v1878_v0 }
  0x16   : > { %450 = vst [vmem:[%s2914_s10 + $0x8] sm:$0xff] %v1878_v0 }
  0x17   : > { %451 = vst [vmem:[%s2914_s10 + $0x10] sm:$0xff] %v1878_v0 }
  0x18 PF: > { %v452_v1 = vld [vmem:[%s2908_s4] sm:$0xff]  ;;  %vm458_vm0 = vcmask 64512   ;;  %v535_v4 = vld [vmem:[%s2910_s6 + $0x70] sm:$0xff]  ;;  %v536_v5 = vld [vmem:[%s2910_s6 + $0x78] sm:$0xff] }
  0x19   : > { %v453_v2 = vld [vmem:[%s418_s22] sm:$0xff]  ;;  %477 = vmatpush.msra.mxu0 %v452_v1  ;;  %509 = vmatpush.msra.mxu1 %v452_v1  ;;  %v534_v7 = vld [vmem:[%s2910_s6 + $0x68] sm:$0xff]  ;;  %v545_v8 = vpack.c.bf16 %v536_v5, %v535_v4  ;;  %v531_v11 = vld [vmem:[%s2910_s6 + $0x50] sm:$0xff] }
  0x1a   : > { %v482_v3 = vld [vmem:[%s2905_s1] sm:$0xff]  ;;  %1721 = vmatmul.msk.f32.vlgmr.msra.gmra.mxu0 %vm458_vm0, %v453_v2  ;;  %v483_v10 = vld [vmem:[%s2905_s1 + $0x8] sm:$0xff]  ;;  %v532_v12 = vld [vmem:[%s2910_s6 + $0x58] sm:$0xff] }
  0x1b   : > { %1722 = vmatmul.msk.f32.vlgmr.msra.gmra.mxu1 %vm458_vm0, %v482_v3  ;;  %v533_v6 = vld [vmem:[%s2910_s6 + $0x60] sm:$0xff]  ;;  %546 = vmatpush.bf16.msra.mxu2 %v545_v8  ;;  %v573_v13 = vld [vmem:[%s2911_s7 + $0x70] sm:$0xff]  ;;  %v574_v14 = vld [vmem:[%s2911_s7 + $0x78] sm:$0xff]  ;;  %v543_v18 = vpack.c.bf16 %v532_v12, %v531_v11 }
  0x1c   : > { %v544_v9 = vpack.c.bf16 %v534_v7, %v533_v6  ;;  %v571_v15 = vld [vmem:[%s2911_s7 + $0x60] sm:$0xff]  ;;  %v2021_v16 = vpack.c.bf16 %v574_v14, %v573_v13  ;;  %v572_v17 = vld [vmem:[%s2911_s7 + $0x68] sm:$0xff]  ;;  %v569_v22 = vld [vmem:[%s2911_s7 + $0x50] sm:$0xff] }
  0x1d   : > { %v529_v19 = vld [vmem:[%s2910_s6 + $0x40] sm:$0xff]  ;;  %v530_v20 = vld [vmem:[%s2910_s6 + $0x48] sm:$0xff]  ;;  %v2034_v21 = vpack.c.bf16 %v572_v17, %v571_v15  ;;  %v570_v23 = vld [vmem:[%s2911_s7 + $0x58] sm:$0xff] }
  0x1e   : > { %598 = vmatpush.bf16.msra.mxu3 %v2021_v16  ;;  %738 = vmatpush.bf16.msrb.mxu0 %v2021_v16  ;;  %v542_v24 = vpack.c.bf16 %v530_v20, %v529_v19  ;;  %v527_v25 = vld [vmem:[%s2910_s6 + $0x30] sm:$0xff]  ;;  %v528_v26 = vld [vmem:[%s2910_s6 + $0x38] sm:$0xff]  ;;  %v2051_v27 = vpack.c.bf16 %v570_v23, %v569_v22  ;;  %v567_v29 = vld [vmem:[%s2911_s7 + $0x40] sm:$0xff] }
  0x1f   : > { %547 = vmatpush.bf16.msra.mxu2 %v544_v9  ;;  %862 = vmatpush.bf16.msrb.mxu1 %v2021_v16  ;;  %v484_v28 = vld [vmem:[%s2905_s1 + $0x10] sm:$0xff]  ;;  %v568_v30 = vld [vmem:[%s2911_s7 + $0x48] sm:$0xff]  ;;  %v541_v31 = vpack.c.bf16 %v528_v26, %v527_v25  ;;  %v525_v32 = vld [vmem:[%s2910_s6 + $0x20] sm:$0xff] }
  0x20   : > { %v526_v33 = vld [vmem:[%s2910_s6 + $0x28] sm:$0xff]  ;;  %v2072_v34 = vpack.c.bf16 %v568_v30, %v567_v29  ;;  %v523_v36 = vld [vmem:[%s2910_s6 + $0x10] sm:$0xff]  ;;  %v524_v37 = vld [vmem:[%s2910_s6 + $0x18] sm:$0xff] }
  0x21   : > { %v540_v35 = vpack.c.bf16 %v526_v33, %v525_v32  ;;  %v539_v38 = vpack.c.bf16 %v524_v37, %v523_v36  ;;  %v521_v39 = vld [vmem:[%s2910_s6] sm:$0xff]  ;;  %v522_v40 = vld [vmem:[%s2910_s6 + $0x8] sm:$0xff]  ;;  %v565_v44 = vld [vmem:[%s2911_s7 + $0x30] sm:$0xff] }
  0x22   : > { %599 = vmatpush.bf16.msra.mxu3 %v2034_v21  ;;  %739 = vmatpush.bf16.msrb.mxu0 %v2034_v21  ;;  %v538_v41 = vpack.c.bf16 %v522_v40, %v521_v39  ;;  %v520_v42 = vld [vmem:[%s1967_s25] sm:$0xff]  ;;  %v566_v45 = vld [vmem:[%s2911_s7 + $0x38] sm:$0xff]  ;;  %v564_v48 = vld [vmem:[%s2911_s7 + $0x28] sm:$0xff] }
  0x23   : > { %1723 = vmatmul.msk.f32.gmra.mxu1 %vm458_vm0, %v483_v10  ;;  %548 = vmatpush.bf16.msra.mxu2 %v543_v18  ;;  %v537_v43 = vpack.c.bf16 %v520_v42, %v520_v42  ;;  %v2102_v46 = vpack.c.bf16 %v566_v45, %v565_v44  ;;  %v563_v47 = vld [vmem:[%s2911_s7 + $0x20] sm:$0xff]  ;;  %v561_v50 = vld [vmem:[%s2911_s7 + $0x10] sm:$0xff]  ;;  %v562_v51 = vld [vmem:[%s2911_s7 + $0x18] sm:$0xff] }
  0x24   : > { %863 = vmatpush.bf16.msrb.mxu1 %v2034_v21  ;;  %v2114_v49 = vpack.c.bf16 %v564_v48, %v563_v47  ;;  %v2126_v52 = vpack.c.bf16 %v562_v51, %v561_v50  ;;  %v559_v53 = vld [vmem:[%s2911_s7] sm:$0xff]  ;;  %v560_v54 = vld [vmem:[%s2911_s7 + $0x8] sm:$0xff]  ;;  %v2211_v37 = vld [vmem:[%s1972_s28 + $0x10] sm:$0xff] }
  0x25   : > { %v2138_v55 = vpack.c.bf16 %v560_v54, %v559_v53  ;;  %v1796_v56 = vld [vmem:[%s2909_s5] ss:$0 sm:$0xff] }
  0x26   : > { %600 = vmatpush.bf16.msra.mxu3 %v2051_v27  ;;  %740 = vmatpush.bf16.msrb.mxu0 %v2051_v27 }
  0x27   : > { %549 = vmatpush.bf16.msra.mxu2 %v542_v24 }
  0x28   : > { %864 = vmatpush.bf16.msrb.mxu1 %v2051_v27 }
  0x2a   : > { %601 = vmatpush.bf16.msra.mxu3 %v2072_v34  ;;  %741 = vmatpush.bf16.msrb.mxu0 %v2072_v34 }
  0x2b   : > { %1724 = vmatmul.msk.f32.gmra.mxu1 %vm458_vm0, %v484_v28  ;;  %550 = vmatpush.bf16.msra.mxu2 %v541_v31 }
  0x2c   : > { %865 = vmatpush.bf16.msrb.mxu1 %v2072_v34 }
  0x2e   : > { %602 = vmatpush.bf16.msra.mxu3 %v2102_v46  ;;  %742 = vmatpush.bf16.msrb.mxu0 %v2102_v46 }
  0x2f   : > { %551 = vmatpush.bf16.msra.mxu2 %v540_v35 }
  0x30   : > { %866 = vmatpush.bf16.msrb.mxu1 %v2102_v46 }
  0x32   : > { %603 = vmatpush.bf16.msra.mxu3 %v2114_v49  ;;  %743 = vmatpush.bf16.msrb.mxu0 %v2114_v49 }
  0x33   : > { %552 = vmatpush.bf16.msra.mxu2 %v539_v38  ;;  %v1879_v38 = vmov 0  }
  0x34   : > { %867 = vmatpush.bf16.msrb.mxu1 %v2114_v49  ;;  %1773 = vset.pattern.permute.xlu1 %v1879_v38 }
  0x35   : > { %1774 = vset.pattern.permute.xlu2 %v1879_v38  ;;  %1772 = vset.pattern.permute.xlu0 %v1879_v38 }
  0x36   : > { %604 = vmatpush.bf16.msra.mxu3 %v2126_v52  ;;  %744 = vmatpush.bf16.msrb.mxu0 %v2126_v52 }
  0x37   : > { %553 = vmatpush.bf16.msra.mxu2 %v538_v41  ;;  %719 = vperm.xlu2 %1774, %v2211_v37  }
  0x38   : > { %868 = vmatpush.bf16.msrb.mxu1 %v2126_v52 }
  0x3a   : > { %554 = vmatmul.bf16.vlgmr.msra.gmra.mxu2 %v537_v43  ;;  %605 = vmatpush.bf16.msra.mxu3 %v2138_v55 }
  0x3b   : > { %986 = vmatpush.bf16.msrb.mxu2 %v2021_v16  ;;  %745 = vmatpush.bf16.msrb.mxu0 %v2138_v55 }
  0x3c   : > { %869 = vmatpush.bf16.msrb.mxu1 %v2138_v55 }
  0x3e   : > { %1110 = vmatpush.bf16.msrb.mxu3 %v2021_v16 }
  0x3f   : > { %987 = vmatpush.bf16.msrb.mxu2 %v2034_v21  ;;  %1234 = vmatpush.bf16.msra.mxu0 %v2021_v16 }
  0x40   : > { %1358 = vmatpush.bf16.msra.mxu1 %v2021_v16 }
  0x42   : > { %1111 = vmatpush.bf16.msrb.mxu3 %v2034_v21 }
  0x43   : > { %988 = vmatpush.bf16.msrb.mxu2 %v2051_v27  ;;  %1235 = vmatpush.bf16.msra.mxu0 %v2034_v21 }
  0x44   : > { %1359 = vmatpush.bf16.msra.mxu1 %v2034_v21 }
  0x46   : > { %1112 = vmatpush.bf16.msrb.mxu3 %v2051_v27 }
  0x47   : > { %989 = vmatpush.bf16.msrb.mxu2 %v2072_v34  ;;  %1236 = vmatpush.bf16.msra.mxu0 %v2051_v27 }
  0x48   : > { %1360 = vmatpush.bf16.msra.mxu1 %v2051_v27 }
  0x4a   : > { %1113 = vmatpush.bf16.msrb.mxu3 %v2072_v34 }
  0x4b   : > { %990 = vmatpush.bf16.msrb.mxu2 %v2102_v46  ;;  %1237 = vmatpush.bf16.msra.mxu0 %v2072_v34 }
  0x4c   : > { %1361 = vmatpush.bf16.msra.mxu1 %v2072_v34 }
  0x4e   : > { %1114 = vmatpush.bf16.msrb.mxu3 %v2102_v46 }
  0x4f   : > { %991 = vmatpush.bf16.msrb.mxu2 %v2114_v49  ;;  %1238 = vmatpush.bf16.msra.mxu0 %v2102_v46 }
  0x50   : > { %1362 = vmatpush.bf16.msra.mxu1 %v2102_v46 }
  0x52   : > { %1115 = vmatpush.bf16.msrb.mxu3 %v2114_v49 }
  0x53   : > { %992 = vmatpush.bf16.msrb.mxu2 %v2126_v52  ;;  %1239 = vmatpush.bf16.msra.mxu0 %v2114_v49 }
  0x54   : > { %1363 = vmatpush.bf16.msra.mxu1 %v2114_v49 }
  0x56   : > { %1116 = vmatpush.bf16.msrb.mxu3 %v2126_v52 }
  0x57   : > { %993 = vmatpush.bf16.msrb.mxu2 %v2138_v55  ;;  %1240 = vmatpush.bf16.msra.mxu0 %v2126_v52 }
  0x58   : > { %1364 = vmatpush.bf16.msra.mxu1 %v2126_v52 }
  0x5a   : > { %1117 = vmatpush.bf16.msrb.mxu3 %v2138_v55 }
  0x5b   : > { %1482 = vmatpush.bf16.msra.mxu2 %v2021_v16  ;;  %1241 = vmatpush.bf16.msra.mxu0 %v2138_v55 }
  0x5c   : > { %1365 = vmatpush.bf16.msra.mxu1 %v2138_v55 }
  0x5f   : > { %1483 = vmatpush.bf16.msra.mxu2 %v2034_v21 }
  0x63   : > { %1484 = vmatpush.bf16.msra.mxu2 %v2051_v27 }
  0x67   : > { %1485 = vmatpush.bf16.msra.mxu2 %v2072_v34 }
  0x6b   : > { %1486 = vmatpush.bf16.msra.mxu2 %v2102_v46 }
  0x6f   : > { %1487 = vmatpush.bf16.msra.mxu2 %v2114_v49 }
  0x73   : > { %1488 = vmatpush.bf16.msra.mxu2 %v2126_v52 }
  0x77   : > { %1489 = vmatpush.bf16.msra.mxu2 %v2138_v55 }
  0x97   : > { %v479_v57 = vpop.f32.mrf.mxu0 }
  0x98   : > { %v2167_v58 = vpop.f32.mrf.mxu1  ;;  %v2169_v59 = vadd.f32 %v1796_v56, %v479_v57 }
  0x9a   : > { %v588_v60 = vperm.slane %v2169_v59, 0  ;;  %v728_v61 = vperm.slane %v2169_v59, 1  ;;  %v852_v62 = vperm.slane %v2169_v59, 2  ;;  %v976_v63 = vperm.slane %v2169_v59, 3 }
  0x9b   : > { %v1348_v39 = vperm.slane %v2169_v59, 6  ;;  %v2220_v40 = vperm.slane %v2169_v59, 7 }
  0x9c   : > { %v589_v0 = vsub.f32 %v588_v60, %v2167_v58  ;;  %v729_v1 = vsub.f32 %v728_v61, %v2167_v58  ;;  %v853_v2 = vsub.f32 %v852_v62, %v2167_v58  ;;  %v977_v3 = vsub.f32 %v976_v63, %v2167_v58 }
  0x9d   : > { %v1349_v47 = vsub.f32 %v1348_v39, %v2167_v58  ;;  %v1473_v48 = vsub.f32 %v2220_v40, %v2167_v58 }
  0x9e   : > { %v592_v9 = vmax.f32 %v589_v0, 0.0  ;;  %v732_v10 = vmax.f32 %v729_v1, 0.0  ;;  %v856_v11 = vmax.f32 %v853_v2, 0.0  ;;  %v980_v12 = vmax.f32 %v977_v3, 0.0 }
  0x9f   : > { %v1352_v57 = vmax.f32 %v1349_v47, 0.0 }
  0xa0   : > { %v2187_v4 = vpop.f32.mrf.mxu1 }
  0xa1   : > { %v590_v5 = vsub.f32 %v588_v60, %v2187_v4  ;;  %v730_v6 = vsub.f32 %v728_v61, %v2187_v4  ;;  %v854_v7 = vsub.f32 %v852_v62, %v2187_v4  ;;  %v978_v8 = vsub.f32 %v976_v63, %v2187_v4 }
  0xa2   : > { %v1350_v43 = vsub.f32 %v1348_v39, %v2187_v4  ;;  %v1474_v44 = vsub.f32 %v2220_v40, %v2187_v4 }
  0xa3   : > { %v593_v13 = vmax.f32 %v590_v5, 0.0  ;;  %v733_v14 = vmax.f32 %v730_v6, 0.0  ;;  %v857_v15 = vmax.f32 %v854_v7, 0.0  ;;  %v981_v17 = vmax.f32 %v978_v8, 0.0 }
  0xa4   : > { %v1477_v53 = vmax.f32 %v1474_v44, 0.0  ;;  %v1881_v7 = vmov 2  }
  0xa5   : > { %v595_v18 = vpack.c.bf16 %v593_v13, %v592_v9  ;;  %v735_v19 = vpack.c.bf16 %v733_v14, %v732_v10  ;;  %v859_v20 = vpack.c.bf16 %v857_v15, %v856_v11  ;;  %v983_v22 = vpack.c.bf16 %v981_v17, %v980_v12 }
  0xa6   : > { %v1882_v11 = vmov 3  }
  0xa7   : > { %606 = vmatmul.bf16.vlgmr.msra.gmra.mxu3 %v595_v18  ;;  %746 = vmatmul.bf16.vlgmr.msrb.gmra.mxu0 %v735_v19 }
  0xa8   : > { %870 = vmatmul.bf16.vlgmr.msrb.gmra.mxu1 %v859_v20  ;;  %994 = vmatmul.bf16.vlgmr.msrb.gmra.mxu2 %v983_v22  ;;  %v2198_v23 = vpop.f32.mrf.mxu1 }
  0xa9   : > { %1729 = vmatpush.bf16.msra.mxu3 %v2021_v16  ;;  %v591_v24 = vsub.f32 %v588_v60, %v2198_v23  ;;  %v731_v25 = vsub.f32 %v728_v61, %v2198_v23  ;;  %v855_v26 = vsub.f32 %v852_v62, %v2198_v23  ;;  %v979_v28 = vsub.f32 %v976_v63, %v2198_v23 }
  0xaa   : > { %v1351_v2 = vsub.f32 %v1348_v39, %v2198_v23  ;;  %v1475_v12 = vsub.f32 %v2220_v40, %v2198_v23 }
  0xab   : > { %v594_v29 = vmax.f32 %v591_v24, 0.0  ;;  %v734_v30 = vmax.f32 %v731_v25, 0.0  ;;  %v858_v31 = vmax.f32 %v855_v26, 0.0  ;;  %v982_v16 = vmax.f32 %v979_v28, 0.0 }
  0xac   : > { %v1354_v6 = vmax.f32 %v1351_v2, 0.0  ;;  %v1478_v13 = vmax.f32 %v1475_v12, 0.0 }
  0xad   : > { %1730 = vmatpush.bf16.msra.mxu3 %v2034_v21  ;;  %v596_v32 = vpack.c.bf16 %v594_v29, %v594_v29  ;;  %v736_v33 = vpack.c.bf16 %v734_v30, %v734_v30  ;;  %v860_v35 = vpack.c.bf16 %v858_v31, %v858_v31  ;;  %v984_v36 = vpack.c.bf16 %v982_v16, %v982_v16  ;;  %v2208_v21 = vld [vmem:[%s1972_s28 + $0x8] sm:$0xff] }
  0xae   : > { %714 = vperm.xlu1 %1773, %v2208_v21   ;;  %v1356_v10 = vpack.c.bf16 %v1354_v6, %v1354_v6  ;;  %v1480_v14 = vpack.c.bf16 %v1478_v13, %v1478_v13 }
  0xb1   : > { %1731 = vmatpush.bf16.msra.mxu3 %v2051_v27  ;;  %v1100_v27 = vperm.slane %v2169_v59, 4 }
  0xb3   : > { %v1102_v41 = vsub.f32 %v1100_v27, %v2187_v4  ;;  %v1101_v45 = vsub.f32 %v1100_v27, %v2167_v58 }
  0xb5   : > { %1732 = vmatpush.bf16.msra.mxu3 %v2072_v34  ;;  %v1224_v34 = vperm.slane %v2169_v59, 5  ;;  %v1105_v50 = vmax.f32 %v1102_v41, 0.0  ;;  %v1104_v54 = vmax.f32 %v1101_v45, 0.0  ;;  %v1476_v59 = vmax.f32 %v1473_v48, 0.0 }
  0xb7   : > { %611 = vmatmul.bf16.gmra.mxu3 %v596_v32  ;;  %751 = vmatmul.bf16.gmra.mxu0 %v736_v33  ;;  %v1226_v42 = vsub.f32 %v1224_v34, %v2187_v4  ;;  %v1107_v60 = vpack.c.bf16 %v1105_v50, %v1104_v54  ;;  %v1479_v63 = vpack.c.bf16 %v1477_v53, %v1476_v59 }
  0xb8   : > { %875 = vmatmul.bf16.gmra.mxu1 %v860_v35  ;;  %999 = vmatmul.bf16.gmra.mxu2 %v984_v36  ;;  %v1227_v1 = vsub.f32 %v1224_v34, %v2198_v23 }
  0xb9   : > { %1733 = vmatpush.bf16.msra.mxu3 %v2102_v46  ;;  %v1225_v46 = vsub.f32 %v1224_v34, %v2167_v58  ;;  %v1229_v51 = vmax.f32 %v1226_v42, 0.0  ;;  %v2236_v58 = vld [vmem:[%s1972_s28] sm:$0xff] }
  0xba   : > { %709 = vperm.xlu0 %1772, %v2236_v58   ;;  %v1230_v5 = vmax.f32 %v1227_v1, 0.0 }
  0xbb   : > { %v1228_v56 = vmax.f32 %v1225_v46, 0.0 }
  0xbc   : > { %v1232_v9 = vpack.c.bf16 %v1230_v5, %v1230_v5 }
  0xbd   : > { %1734 = vmatpush.bf16.msra.mxu3 %v2114_v49  ;;  %v1353_v49 = vmax.f32 %v1350_v43, 0.0  ;;  %v1231_v61 = vpack.c.bf16 %v1229_v51, %v1228_v56  ;;  %v2238_v0 = vpop.f32.mrf.mxu2 }
  0xbe   : > { %v737_v15 = vperm.slane %v2238_v0, 1  ;;  %v861_v17 = vperm.slane %v2238_v0, 2  ;;  %v985_v32 = vperm.slane %v2238_v0, 3  ;;  %v1233_v50 = vperm.slane %v2238_v0, 5 }
  0xbf   : > { %v1355_v62 = vpack.c.bf16 %v1353_v49, %v1352_v57  ;;  %v1357_v49 = vperm.slane %v2238_v0, 6 }
  0xc1   : > { %1735 = vmatpush.bf16.msra.mxu3 %v2126_v52  ;;  %v1880_v52 = vmov 1  }
  0xc2   : > { %1775 = vset.pattern.permute.xlu1 %v1880_v52  ;;  %1776 = vset.pattern.permute.xlu2 %v1880_v52 }
  0xc3   : > { %835 = vperm.xlu1 %1775, %v2236_v58   ;;  %839 = vperm.xlu2 %1776, %v2208_v21  }
  0xc4   : > { %1777 = vset.pattern.permute.xlu0 %v1880_v52 }
  0xc5   : > { %1736 = vmatpush.bf16.msra.mxu3 %v2138_v55  ;;  %v1103_v55 = vsub.f32 %v1100_v27, %v2198_v23  ;;  %v557_v3 = vpop.f32.mrf.mxu2  ;;  %843 = vperm.xlu0 %1777, %v2211_v37   ;;  %v2263_v23 = vperm.slane %v2238_v0, 0 }
  0xc7   : > { %1118 = vmatmul.bf16.vlgmr.msrb.gmra.mxu3 %v1107_v60  ;;  %1242 = vmatmul.bf16.vlgmr.msra.gmra.mxu0 %v1231_v61  ;;  %v1106_v4 = vmax.f32 %v1103_v55, 0.0 }
  0xc8   : > { %1366 = vmatmul.bf16.vlgmr.msra.gmra.mxu1 %v1355_v62  ;;  %1490 = vmatmul.bf16.vlgmr.msra.gmra.mxu2 %v1479_v63 }
  0xc9   : > { %v1108_v8 = vpack.c.bf16 %v1106_v4, %v1106_v4 }
  0xcb   : > { %1779 = vset.pattern.permute.xlu1 %v1881_v7  ;;  %1778 = vset.pattern.permute.xlu2 %v1881_v7 }
  0xcc   : > { %963 = vperm.xlu1 %1779, %v2208_v21   ;;  %959 = vperm.xlu2 %1778, %v2236_v58  }
  0xcd   : > { %1780 = vset.pattern.permute.xlu0 %v1881_v7 }
  0xce   : > { %967 = vperm.xlu0 %1780, %v2211_v37  }
  0xd4   : > { %1781 = vset.pattern.permute.xlu1 %v1882_v11  ;;  %1782 = vset.pattern.permute.xlu2 %v1882_v11 }
  0xd5   : > { %1083 = vperm.xlu1 %1781, %v2236_v58   ;;  %1087 = vperm.xlu2 %1782, %v2208_v21  }
  0xd6   : > { %1783 = vset.pattern.permute.xlu0 %v1882_v11 }
  0xd7   : > { %1123 = vmatmul.bf16.gmra.mxu3 %v1108_v8  ;;  %1247 = vmatmul.bf16.gmra.mxu0 %v1232_v9 }
  0xd8   : > { %1371 = vmatmul.bf16.gmra.mxu1 %v1356_v10 }
  0xe7   : > { %1495 = vmatmul.bf16.vlgmr.msra.gmra.mxu3 %v1480_v14 }
 0x124   : > { %v747_v18 = vpop.f32.mrf.mxu0 }
 0x125   : > { %v2256_v19 = vadd.f32 %v747_v18, %v737_v15  ;;  %v871_v20 = vpop.f32.mrf.mxu1 }
 0x126   : > { %v2258_v22 = vadd.f32 %v871_v20, %v861_v17  ;;  %v2337_v20 = vperm.slane %v2238_v0, 7 }
 0x127   : > { %756 = vadd.xlane.f32.xlu2 %v2256_v19  ;;  %v765_v30 = vmul.f32 %v2256_v19, %v2256_v19 }
 0x128   : > { %880 = vadd.xlane.f32.xlu1 %v2258_v22  ;;  %v889_v31 = vmul.f32 %v2258_v22, %v2258_v22  ;;  %2929 = vst [vmem:[#allocation7_spill] sm:$0xff] %v2337_v20 }
 0x12a   : > { %v607_v24 = vpop.f32.mrf.mxu3 }
 0x12b   : > { %v2266_v25 = vadd.f32 %v607_v24, %v2263_v23  ;;  %v995_v26 = vpop.f32.mrf.mxu2 }
 0x12c   : > { %v749_v28 = vpop.f32.mrf.mxu0  ;;  %v2277_v38 = vadd.f32 %v995_v26, %v985_v32 }
 0x12d   : > { %v873_v29 = vpop.f32.mrf.mxu1  ;;  %616 = vadd.xlane.f32.xlu0 %v2266_v25  ;;  %v632_v34 = vmul.f32 %v2266_v25, %v2266_v25  ;;  %v2288_v45 = vadd.f32 %v749_v28, %v737_v15  ;;  %v1109_v28 = vperm.slane %v2238_v0, 4 }
 0x12e   : > { %v2285_v43 = vadd.f32 %v873_v29, %v861_v17  ;;  %v1013_v56 = vmul.f32 %v2277_v38, %v2277_v38 }
 0x12f   : > { %768 = vadd.xlane.f32.xlu2 %v765_v30  ;;  %v766_v59 = vmul.f32 %v2288_v45, %v2288_v45 }
 0x130   : > { %892 = vadd.xlane.f32.xlu1 %v889_v31  ;;  %v890_v55 = vmul.f32 %v2285_v43, %v2285_v43 }
 0x132   : > { %v609_v16 = vpop.f32.mrf.mxu3 }
 0x133   : > { %v2275_v33 = vadd.f32 %v609_v16, %v2263_v23  ;;  %v997_v35 = vpop.f32.mrf.mxu2  ;;  %v2348_v16 = vpop.permute.xlu2 %719 }
 0x134   : > { %v752_v36 = vpop.f32.mrf.mxu0  ;;  %v2312_v1 = vadd.f32 %v997_v35, %v985_v32  ;;  %v2352_v35 = vpop.permute.xlu1 %714 }
 0x135   : > { %v876_v27 = vpop.f32.mrf.mxu1  ;;  %618 = vadd.xlane.f32.xlu0 %v2275_v33  ;;  %v2283_v40 = vadd.f32 %v752_v36, %v737_v15  ;;  %v633_v7 = vmul.f32 %v2275_v33, %v2275_v33 }
 0x136   : > { %v2292_v47 = vadd.f32 %v876_v27, %v861_v17  ;;  %v1014_v9 = vmul.f32 %v2312_v1, %v2312_v1 }
 0x137   : > { %1004 = vadd.xlane.f32.xlu2 %v2277_v38  ;;  %v767_v13 = vmul.f32 %v2283_v40, %v2283_v40 }
 0x138   : > { %635 = vadd.xlane.f32.xlu1 %v632_v34  ;;  %v891_v14 = vmul.f32 %v2292_v47, %v2292_v47 }
 0x13a   : > { %v612_v39 = vpop.f32.mrf.mxu3 }
 0x13b   : > { %v1000_v41 = vpop.f32.mrf.mxu2  ;;  %v2330_v15 = vadd.f32 %v612_v39, %v2263_v23  ;;  %v1883_v23 = vmov 4   ;;  %v2361_v34 = vpop.permute.xlu2 %839 }
 0x13c   : > { %v754_v42 = vpop.f32.mrf.mxu0  ;;  %v2305_v61 = vadd.f32 %v1000_v41, %v985_v32  ;;  %1784 = vset.pattern.permute.xlu2 %v1883_v23  ;;  %1785 = vset.pattern.permute.xlu1 %v1883_v23  ;;  %v2365_v41 = vpop.permute.xlu1 %835 }
 0x13d   : > { %v878_v44 = vpop.f32.mrf.mxu1  ;;  %760 = vadd.xlane.f32.xlu0 %v2283_v40  ;;  %v634_v18 = vmul.f32 %v2330_v15, %v2330_v15  ;;  %v1884_v42 = vmov 128.0  }
 0x13e   : > { %v1015_v29 = vmul.f32 %v2305_v61, %v2305_v61  ;;  %1799 = vrcp.f32 %v1884_v42  ;;  %v2367_v44 = vpop.permute.xlu0 %709 }
 0x13f   : > { %882 = vadd.xlane.f32.xlu2 %v2285_v43 }
 0x140   : > { %758 = vadd.xlane.f32.xlu1 %v2288_v45 }
 0x142   : > { %v614_v46 = vpop.f32.mrf.mxu3 }
 0x143   : > { %v1002_v48 = vpop.f32.mrf.mxu2  ;;  %v2369_v46 = vpop.permute.xlu2 %959 }
 0x144   : > { %v1243_v51 = vpop.f32.mrf.mxu0  ;;  %v1800_v48 = vpop.eup %1799 }
 0x145   : > { %v2296_v53 = vadd.f32 %v1243_v51, %v1233_v50  ;;  %v1367_v54 = vpop.f32.mrf.mxu1  ;;  %884 = vadd.xlane.f32.xlu0 %v2292_v47  ;;  %v623_v51 = vmul.f32 128.0, %v1800_v48  ;;  %vm627_vm1 = vweird.f32 %v1800_v48 }
 0x146   : > { %v2301_v57 = vadd.f32 %v1367_v54, %v1357_v49  ;;  %v2374_v54 = vpop.permute.xlu0 %843 }
 0x147   : > { %2924 = vst [vmem:[#allocation2_spill] sm:$0xff] %v2296_v53  ;;  %1016 = vadd.xlane.f32.xlu2 %v1013_v56 }
 0x148   : > { %2925 = vst [vmem:[#allocation3_spill] sm:$0xff] %v2301_v57  ;;  %770 = vadd.xlane.f32.xlu1 %v766_v59 }
 0x14a   : > { %v1119_v60 = vpop.f32.mrf.mxu3 }
 0x14b   : > { %v2345_v30 = vadd.f32 %v1119_v60, %v1109_v28  ;;  %v2376_v56 = vpop.permute.xlu2 %1087 }
 0x14c   : > { %v1245_v62 = vpop.f32.mrf.mxu0 }
 0x14d   : > { %v2307_v63 = vadd.f32 %v1245_v62, %v1233_v50  ;;  %v1369_v52 = vpop.f32.mrf.mxu1  ;;  %1008 = vadd.xlane.f32.xlu0 %v2305_v61  ;;  %v1137_v0 = vmul.f32 %v2345_v30, %v2345_v30 }
 0x14e   : > { %v2314_v2 = vadd.f32 %v1369_v52, %v1357_v49 }
 0x14f   : > { %2926 = vst [vmem:[#allocation4_spill] sm:$0xff] %v2307_v63  ;;  %894 = vadd.xlane.f32.xlu2 %v890_v55  ;;  %v2382_v55 = vpop.permute.xlu0 %967 }
 0x150   : > { %2927 = vst [vmem:[#allocation5_spill] sm:$0xff] %v2314_v2  ;;  %1006 = vadd.xlane.f32.xlu1 %v2312_v1 }
 0x152   : > { %v1121_v3 = vpop.f32.mrf.mxu3 }
 0x153   : > { %v2350_v32 = vadd.f32 %v1121_v3, %v1109_v28 }
 0x154   : > { %v1248_v4 = vpop.f32.mrf.mxu0 }
 0x155   : > { %v2317_v5 = vadd.f32 %v1248_v4, %v1233_v50  ;;  %v1372_v6 = vpop.f32.mrf.mxu1  ;;  %v1138_v27 = vmul.f32 %v2350_v32, %v2350_v32  ;;  %v2371_v50 = vpop.permute.xlu1 %963 }
 0x156   : > { %v2321_v8 = vadd.f32 %v1372_v6, %v1357_v49  ;;  %v624_v49 = vsub.f32 1.0, %v623_v51 }
 0x157   : > { %2928 = vst [vmem:[#allocation6_spill] sm:$0xff] %v2317_v5  ;;  %637 = vadd.xlane.f32.xlu2 %v633_v7 }
 0x158   : > { %1018 = vadd.xlane.f32.xlu1 %v1014_v9  ;;  %v625_v60 = vmul.f32 %v1800_v48, %v624_v49 }
 0x15a   : > { %v1124_v10 = vpop.f32.mrf.mxu3  ;;  %v626_v62 = vadd.f32 %v1800_v48, %v625_v60 }
 0x15b   : > { %v2357_v36 = vadd.f32 %v1124_v10, %v1109_v28 }
 0x15c   : > { %v1250_v11 = vpop.f32.mrf.mxu0  ;;  %v2384_v4 = vsel %vm627_vm1, %v1800_v48, %v626_v62 }
 0x15d   : > { %v1374_v12 = vpop.f32.mrf.mxu1  ;;  %2931 = vst [vmem:[#allocation9_spill] sm:$0xff] %v2357_v36  ;;  %v1139_v39 = vmul.f32 %v2357_v36, %v2357_v36  ;;  %v2378_v59 = vpop.permute.xlu1 %1083 }
 0x15f   : > { %772 = vadd.xlane.f32.xlu2 %v767_v13 }
 0x160   : > { %896 = vadd.xlane.f32.xlu1 %v891_v14 }
 0x161   : > { %1091 = vperm.xlu0 %1783, %v2211_v37  }
 0x162   : > { %v1126_v17 = vpop.f32.mrf.mxu3 }
 0x167   : > { %639 = vadd.xlane.f32.xlu2 %v634_v18 }
 0x168   : > { %620 = vadd.xlane.f32.xlu1 %v2330_v15 }
 0x169   : > { %1786 = vset.pattern.permute.xlu0 %v1883_v23 }
 0x16a   : > { %v1496_v24 = vpop.f32.mrf.mxu3 }
 0x16b   : > { %v2340_v26 = vadd.f32 %v1496_v24, %v2337_v20 }
 0x16d   : > { %2930 = vst [vmem:[#allocation8_spill] sm:$0xff] %v2340_v26 }
 0x16f   : > { %1020 = vadd.xlane.f32.xlu2 %v1015_v29 }
 0x170   : > { %1128 = vadd.xlane.f32.xlu1 %v2345_v30 }
 0x172   : > { %v1498_v31 = vpop.f32.mrf.mxu3 }
 0x177   : > { %1130 = vadd.xlane.f32.xlu2 %v2350_v32 }
 0x178   : > { %1140 = vadd.xlane.f32.xlu1 %v1137_v0 }
 0x17f   : > { %1142 = vadd.xlane.f32.xlu2 %v1138_v27 }
 0x180   : > { %1144 = vadd.xlane.f32.xlu1 %v1139_v39 }
 0x18b   : > { %1132 = vadd.xlane.f32.xlu0 %v2357_v36 }
 0x197   : > { %1207 = vperm.xlu2 %1784, %v2236_v58  }
 0x199   : > { %1211 = vperm.xlu1 %1785, %v2208_v21  }
 0x19a   : > { %v757_v52 = vpop.xlane.xlu2 %756 }
 0x19b   : > { %v881_v3 = vpop.xlane.xlu1 %880  ;;  %v2387_v6 = vmul.f32 %v757_v52, %v2384_v4 }
 0x19c   : > { %v2391_v7 = vmul.f32 %v881_v3, %v2384_v4 }
 0x19d   : > { %v777_v10 = vmul.f32 %v2387_v6, %v2387_v6 }
 0x19e   : > { %v901_v13 = vmul.f32 %v2391_v7, %v2391_v7 }
 0x19f   : > { %1215 = vperm.xlu0 %1786, %v2211_v37  }
 0x1a0   : > { %v617_v17 = vpop.xlane.xlu0 %616 }
 0x1a1   : > { %v2400_v23 = vmul.f32 %v2384_v4, %v617_v17 }
 0x1a2   : > { %v769_v9 = vpop.xlane.xlu2 %768 }
 0x1a3   : > { %v893_v11 = vpop.xlane.xlu1 %892  ;;  %v774_v12 = vmul.f32 %v769_v9, %v2384_v4  ;;  %v644_v42 = vmul.f32 %v2400_v23, %v2400_v23 }
 0x1a4   : > { %v898_v14 = vmul.f32 %v893_v11, %v2384_v4 }
 0x1a5   : > { %v780_v18 = vsub.f32 %v774_v12, %v777_v10 }
 0x1a6   : > { %v904_v24 = vsub.f32 %v898_v14, %v901_v13 }
 0x1a7   : > { %v783_v28 = vmax.f32 %v780_v18, 0.0 }
 0x1a8   : > { %v907_v29 = vmax.f32 %v904_v24, 0.0 }
 0x1a9   : > { %v789_v31 = vadd.f32 1e-05, %v783_v28  ;;  %v619_v28 = vpop.xlane.xlu0 %618 }
 0x1aa   : > { %v913_v0 = vadd.f32 1e-05, %v907_v29  ;;  %v1005_v27 = vpop.xlane.xlu2 %1004 }
 0x1ab   : > { %1801 = vrsqrt.f32 %v789_v31  ;;  %v636_v39 = vpop.xlane.xlu1 %635  ;;  %v2409_v18 = vmul.f32 %v1005_v27, %v2384_v4  ;;  %vm798_vm4 = vweird.f32 %v789_v31 }
 0x1ac   : > { %1803 = vrsqrt.f32 %v913_v0  ;;  %v641_v48 = vmul.f32 %v636_v39, %v2384_v4  ;;  %vm922_vm5 = vweird.f32 %v913_v0 }
 0x1ae   : > { %v647_v51 = vsub.f32 %v641_v48, %v644_v42  ;;  %v910_v48 = vsub.f32 %v2258_v22, %v2391_v7 }
 0x1b0   : > { %v650_v49 = vmax.f32 %v647_v51, 0.0  ;;  %v786_v51 = vsub.f32 %v2256_v19, %v2387_v6 }
 0x1b1   : > { %v1802_v60 = vpop.eup %1801 }
 0x1b2   : > { %v1804_v62 = vpop.eup %1803  ;;  %v793_v52 = vmul.f32 %v1802_v60, %v789_v31  ;;  %v2405_v3 = vadd.f32 1e-05, %v650_v49  ;;  %v883_v9 = vpop.xlane.xlu2 %882  ;;  %vm799_vm2 = vweird.f32 %v1802_v60 }
 0x1b3   : > { %v917_v10 = vmul.f32 %v1804_v62, %v913_v0  ;;  %v759_v11 = vpop.xlane.xlu1 %758  ;;  %vm923_vm3 = vweird.f32 %v1804_v62  ;;  %vm800_vm6 = vmor %vm798_vm4, %vm799_vm2 }
 0x1b4   : > { %v794_v12 = vmul.f32 %v1802_v60, %v793_v52  ;;  %1805 = vrsqrt.f32 %v2405_v3  ;;  %v2412_v29 = vmul.f32 %v759_v11, %v2384_v4  ;;  %vm924_vm7 = vmor %vm922_vm5, %vm923_vm3  ;;  %vm665_vm9 = vweird.f32 %v2405_v3 }
 0x1b5   : > { %v918_v13 = vmul.f32 %v1804_v62, %v917_v10  ;;  %v1025_v10 = vmul.f32 %v2409_v18, %v2409_v18 }
 0x1b6   : > { %v795_v14 = vmul.f32 0.5, %v794_v12  ;;  %v778_v22 = vmul.f32 %v2412_v29, %v2412_v29 }
 0x1b7   : > { %v919_v17 = vmul.f32 0.5, %v918_v13 }
 0x1b8   : > { %v796_v24 = vsub.f32 1.5, %v795_v14 }
 0x1b9   : > { %v920_v39 = vsub.f32 1.5, %v919_v17 }
 0x1ba   : > { %v1806_v42 = vpop.eup %1805  ;;  %v797_v49 = vmul.f32 %v1802_v60, %v796_v24  ;;  %v1017_v52 = vpop.xlane.xlu2 %1016 }
 0x1bb   : > { %v921_v27 = vmul.f32 %v1804_v62, %v920_v39  ;;  %v660_v11 = vmul.f32 %v1806_v42, %v2405_v3  ;;  %v771_v12 = vpop.xlane.xlu1 %770  ;;  %v1022_v7 = vmul.f32 %v1017_v52, %v2384_v4  ;;  %v2428_v39 = vld [vmem:[%s2912_s8] ss:$0 sm:$0xff]  ;;  %vm666_vm8 = vweird.f32 %v1806_v42 }
 0x1bc   : > { %v801_v13 = vsel %vm800_vm6, %v1802_v60, %v797_v49  ;;  %v775_v19 = vmul.f32 %v771_v12, %v2384_v4  ;;  %v2431_v60 = vmul.f32 %v883_v9, %v2384_v4  ;;  %v1885_v49 = vmov 5   ;;  %v2447_v3 = vld [vmem:[%s2913_s9] ss:$0 sm:$0xff]  ;;  %vm667_vm10 = vmor %vm665_vm9, %vm666_vm8 }
 0x1bd   : > { %v925_v6 = vsel %vm924_vm7, %v1804_v62, %v921_v27  ;;  %v822_v31 = vmul.f32 %v801_v13, %v786_v51  ;;  %v661_v14 = vmul.f32 %v1806_v42, %v660_v11  ;;  %v1028_v17 = vsub.f32 %v1022_v7, %v1025_v10  ;;  %1789 = vset.pattern.permute.xlu0 %v1885_v49 }
 0x1be   : > { %v946_v0 = vmul.f32 %v925_v6, %v910_v48  ;;  %v781_v24 = vsub.f32 %v775_v19, %v778_v22  ;;  %1788 = vset.pattern.permute.xlu1 %v1885_v49  ;;  %1787 = vset.pattern.permute.xlu2 %v1885_v49  ;;  %v761_v48 = vpop.xlane.xlu0 %760  ;;  %v902_v13 = vmul.f32 %v2431_v60, %v2431_v60 }
 0x1bf   : > { %v662_v26 = vmul.f32 0.5, %v661_v14  ;;  %v1031_v52 = vmax.f32 %v1028_v17, 0.0  ;;  %v825_v9 = vmul.f32 %v2428_v39, %v822_v31  ;;  %v653_v7 = vsub.f32 %v2266_v25, %v2400_v23 }
 0x1c0   : > { %v784_v12 = vmax.f32 %v781_v24, 0.0  ;;  %1252 = vadd.xlane.f32.xlu2 %v2296_v53  ;;  %v949_v31 = vmul.f32 %v2428_v39, %v946_v0  ;;  %v2456_v14 = vmul.f32 %v2384_v4, %v619_v28  ;;  %v1261_v24 = vmul.f32 %v2296_v53, %v2296_v53 }
 0x1c1   : > { %v663_v62 = vsub.f32 1.5, %v662_v26  ;;  %v2435_v51 = vadd.f32 1e-05, %v1031_v52  ;;  %v828_v25 = vadd.f32 %v2447_v3, %v825_v9  ;;  %v1263_v28 = vmul.f32 %v2317_v5, %v2317_v5 }
 0x1c2   : > { %v2437_v27 = vadd.f32 1e-05, %v784_v12  ;;  %v895_v10 = vpop.xlane.xlu2 %894  ;;  %v952_v12 = vadd.f32 %v2447_v3, %v949_v31 }
 0x1c3   : > { %v664_v11 = vmul.f32 %v1806_v42, %v663_v62  ;;  %v899_v22 = vmul.f32 %v895_v10, %v2384_v4  ;;  %1254 = vadd.xlane.f32.xlu1 %v2307_v63  ;;  %v1007_v26 = vpop.xlane.xlu1 %1006  ;;  %1807 = vrsqrt.f32 %v2435_v51  ;;  %v645_v10 = vmul.f32 %v2456_v14, %v2456_v14 }
 0x1c4   : > { %1809 = vrsqrt.f32 %v2437_v27  ;;  %v2463_v52 = vmul.f32 %v1007_v26, %v2384_v4  ;;  %vm1046_vm11 = vweird.f32 %v2435_v51  ;;  %vm808_vm15 = vweird.f32 %v2437_v27 }
 0x1c5   : > { %v668_v19 = vsel %vm667_vm10, %v1806_v42, %v664_v11  ;;  %v905_v6 = vsub.f32 %v899_v22, %v902_v13  ;;  %v2466_v42 = vmul.f32 %v761_v48, %v2384_v4  ;;  %v1262_v11 = vmul.f32 %v2307_v63, %v2307_v63 }
 0x1c6   : > { %v689_v17 = vmul.f32 %v668_v19, %v653_v7  ;;  %v1034_v22 = vsub.f32 %v2277_v38, %v2409_v18  ;;  %v831_v19 = vmax.f32 %v828_v25, 0.0 }
 0x1c7   : > { %v908_v49 = vmax.f32 %v905_v6, 0.0  ;;  %v885_v6 = vpop.xlane.xlu0 %884  ;;  %v779_v38 = vmul.f32 %v2466_v42, %v2466_v42 }
 0x1c8   : > { %v695_v23 = vmul.f32 %v2428_v39, %v689_v17  ;;  %1264 = vadd.xlane.f32.xlu2 %v1261_v24  ;;  %v1026_v17 = vmul.f32 %v2463_v52, %v2463_v52  ;;  %v2493_v20 = vmul.f32 %v885_v6, %v2384_v4 }
 0x1c9   : > { %v2468_v0 = vadd.f32 1e-05, %v908_v49  ;;  %1256 = vadd.xlane.f32.xlu0 %v2317_v5  ;;  %v1808_v62 = vpop.eup %1807 }
 0x1ca   : > { %v638_v9 = vpop.xlane.xlu2 %637  ;;  %v701_v48 = vadd.f32 %v2447_v3, %v695_v23  ;;  %v1810_v13 = vpop.eup %1809  ;;  %v1041_v26 = vmul.f32 %v1808_v62, %v2435_v51  ;;  %v955_v23 = vmax.f32 %v952_v12, 0.0  ;;  %vm1047_vm12 = vweird.f32 %v1808_v62 }
 0x1cb   : > { %1811 = vrsqrt.f32 %v2468_v0  ;;  %1268 = vadd.xlane.f32.xlu1 %v1263_v28  ;;  %v1019_v7 = vpop.xlane.xlu1 %1018  ;;  %v803_v31 = vmul.f32 %v1810_v13, %v2437_v27  ;;  %v642_v24 = vmul.f32 %v638_v9, %v2384_v4  ;;  %v787_v28 = vsub.f32 %v2288_v45, %v2412_v29  ;;  %vm1048_vm14 = vmor %vm1046_vm11, %vm1047_vm12 }
 0x1cc   : > { %v1023_v49 = vmul.f32 %v1019_v7, %v2384_v4  ;;  %v1042_v18 = vmul.f32 %v1808_v62, %v1041_v26  ;;  %v704_v5 = vmax.f32 %v701_v48, 0.0  ;;  %v846_v9 = vmul.f32 %v2365_v41, %v831_v19 }
 0x1cd   : > { %v804_v25 = vmul.f32 %v1810_v13, %v803_v31  ;;  %v648_v63 = vsub.f32 %v642_v24, %v645_v10  ;;  %v970_v45 = vmul.f32 %v2369_v46, %v955_v23  ;;  %vm809_vm13 = vweird.f32 %v1810_v13 }
 0x1ce   : > { %v1029_v53 = vsub.f32 %v1023_v49, %v1026_v17  ;;  %v1043_v36 = vmul.f32 0.5, %v1042_v18  ;;  %v722_v7 = vmul.f32 %v2367_v44, %v704_v5  ;;  %v903_v46 = vmul.f32 %v2493_v20, %v2493_v20  ;;  %vm810_vm0 = vmor %vm808_vm15, %vm809_vm13 }
 0x1cf   : > { %v805_v57 = vmul.f32 0.5, %v804_v25  ;;  %v651_v26 = vmax.f32 %v648_v63, 0.0  ;;  %vm932_vm2 = vweird.f32 %v2468_v0 }
 0x1d0   : > { %v1032_v12 = vmax.f32 %v1029_v53, 0.0  ;;  %1266 = vadd.xlane.f32.xlu2 %v1262_v11  ;;  %v1044_v2 = vsub.f32 1.5, %v1043_v36  ;;  %v849_v29 = vadd.f32 %v846_v9, %v722_v7  ;;  %v1009_v7 = vpop.xlane.xlu0 %1008 }
 0x1d1   : > { %v1812_v48 = vpop.eup %1811  ;;  %v806_v10 = vsub.f32 1.5, %v805_v57  ;;  %v2500_v31 = vadd.f32 1e-05, %v651_v26 }
 0x1d2   : > { %v927_v6 = vmul.f32 %v1812_v48, %v2468_v0  ;;  %v773_v41 = vpop.xlane.xlu2 %772  ;;  %v1045_v5 = vmul.f32 %v1808_v62, %v1044_v2  ;;  %v2502_v44 = vadd.f32 1e-05, %v1032_v12  ;;  %v973_v11 = vadd.f32 %v970_v45, %v849_v29 }
 0x1d3   : > { %v776_v63 = vmul.f32 %v773_v41, %v2384_v4  ;;  %v897_v53 = vpop.xlane.xlu1 %896  ;;  %v807_v36 = vmul.f32 %v1810_v13, %v806_v10  ;;  %1813 = vrsqrt.f32 %v2500_v31  ;;  %vm933_vm1 = vweird.f32 %v1812_v48 }
 0x1d4   : > { %v928_v57 = vmul.f32 %v1812_v48, %v927_v6  ;;  %v1049_v19 = vsel %vm1048_vm14, %v1808_v62, %v1045_v5  ;;  %1815 = vrsqrt.f32 %v2502_v44  ;;  %v900_v51 = vmul.f32 %v897_v53, %v2384_v4  ;;  %vm934_vm3 = vmor %vm932_vm2, %vm933_vm1 }
 0x1d5   : > { %v782_v2 = vsub.f32 %v776_v63, %v779_v38  ;;  %v1070_v17 = vmul.f32 %v1049_v19, %v1034_v22  ;;  %v811_v24 = vsel %vm810_vm0, %v1810_v13, %v807_v36  ;;  %v2524_v6 = vmul.f32 %v1009_v7, %v2384_v4 }
 0x1d6   : > { %v929_v49 = vmul.f32 0.5, %v928_v57  ;;  %v823_v18 = vmul.f32 %v811_v24, %v787_v28  ;;  %v906_v25 = vsub.f32 %v900_v51, %v903_v46  ;;  %v911_v28 = vsub.f32 %v2285_v43, %v2431_v60 }
 0x1d7   : > { %v785_v23 = vmax.f32 %v782_v2, 0.0  ;;  %v1073_v9 = vmul.f32 %v2428_v39, %v1070_v17  ;;  %v654_v19 = vsub.f32 %v2275_v33, %v2456_v14  ;;  %v1027_v2 = vmul.f32 %v2524_v6, %v2524_v6 }
 0x1d8   : > { %v930_v27 = vsub.f32 1.5, %v929_v49  ;;  %v909_v38 = vmax.f32 %v906_v25, 0.0  ;;  %v826_v49 = vmul.f32 %v2428_v39, %v823_v18  ;;  %vm675_vm6 = vweird.f32 %v2500_v31 }
 0x1d9   : > { %v2515_v26 = vadd.f32 1e-05, %v785_v23  ;;  %v1814_v62 = vpop.eup %1813  ;;  %v1076_v13 = vadd.f32 %v2447_v3, %v1073_v9  ;;  %v1035_v18 = vsub.f32 %v2312_v1, %v2463_v52  ;;  %vm1056_vm8 = vweird.f32 %v2502_v44 }
 0x1da   : > { %v931_v12 = vmul.f32 %v1812_v48, %v930_v27  ;;  %v640_v22 = vpop.xlane.xlu2 %639  ;;  %v1816_v45 = vpop.eup %1815  ;;  %v670_v29 = vmul.f32 %v1814_v62, %v2500_v31  ;;  %v2527_v5 = vadd.f32 1e-05, %v909_v38  ;;  %vm676_vm4 = vweird.f32 %v1814_v62 }
 0x1db   : > { %1817 = vrsqrt.f32 %v2515_v26  ;;  %v621_v10 = vpop.xlane.xlu1 %620  ;;  %v1051_v0 = vmul.f32 %v1816_v45, %v2502_v44  ;;  %v1079_v60 = vmax.f32 %v1076_v13, 0.0  ;;  %v643_v46 = vmul.f32 %v640_v22, %v2384_v4  ;;  %vm677_vm7 = vmor %vm675_vm6, %vm676_vm4 }
 0x1dc   : > { %v935_v41 = vsel %vm934_vm3, %v1812_v48, %v931_v12  ;;  %v671_v53 = vmul.f32 %v1814_v62, %v670_v29  ;;  %v2530_v36 = vmul.f32 %v2384_v4, %v621_v10  ;;  %1819 = vrsqrt.f32 %v2527_v5 }
 0x1dd   : > { %v947_v63 = vmul.f32 %v935_v41, %v911_v28  ;;  %1339 = vperm.xlu0 %1789, %v2211_v37   ;;  %v1052_v43 = vmul.f32 %v1816_v45, %v1051_v0  ;;  %v1094_v24 = vmul.f32 %v2378_v59, %v1079_v60  ;;  %vm1057_vm5 = vweird.f32 %v1816_v45 }
 0x1de   : > { %v672_v57 = vmul.f32 0.5, %v671_v53  ;;  %v646_v48 = vmul.f32 %v2530_v36, %v2530_v36  ;;  %vm1058_vm9 = vmor %vm1056_vm8, %vm1057_vm5  ;;  %v829_v29 = vadd.f32 %v2447_v3, %v826_v49  ;;  %vm818_vm11 = vweird.f32 %v2515_v26 }
 0x1df   : > { %v1053_v17 = vmul.f32 0.5, %v1052_v43  ;;  %v2547_v33 = vadd.f32 %v1094_v24, %v973_v11  ;;  %v788_v49 = vsub.f32 %v2283_v40, %v2466_v42  ;;  %vm942_vm14 = vweird.f32 %v2527_v5 }
 0x1e0   : > { %v673_v51 = vsub.f32 1.5, %v672_v57  ;;  %v649_v23 = vsub.f32 %v643_v46, %v646_v48  ;;  %v832_v24 = vmax.f32 %v829_v29, 0.0  ;;  %v912_v42 = vsub.f32 %v2292_v47, %v2493_v20 }
 0x1e1   : > { %v2542_v37 = vpop.eup %1817  ;;  %v1054_v27 = vsub.f32 1.5, %v1053_v17 }
 0x1e2   : > { %v813_v25 = vmul.f32 %v2542_v37, %v2515_v26  ;;  %v1021_v9 = vpop.xlane.xlu2 %1020  ;;  %v674_v14 = vmul.f32 %v1814_v62, %v673_v51  ;;  %v652_v7 = vmax.f32 %v649_v23, 0.0  ;;  %v2551_v38 = vpop.eup %1819  ;;  %vm819_vm10 = vweird.f32 %v2542_v37 }
 0x1e3   : > { %v1024_v59 = vmul.f32 %v1021_v9, %v2384_v4  ;;  %v1129_v12 = vpop.xlane.xlu1 %1128  ;;  %v1055_v22 = vmul.f32 %v1816_v45, %v1054_v27  ;;  %v937_v31 = vmul.f32 %v2551_v38, %v2527_v5  ;;  %vm943_vm12 = vweird.f32 %v2551_v38  ;;  %vm2583_vm13 = vmor %vm818_vm11, %vm819_vm10 }
 0x1e4   : > { %v814_v13 = vmul.f32 %v2542_v37, %v813_v25  ;;  %1335 = vperm.xlu1 %1788, %v2208_v21   ;;  %v678_v11 = vsel %vm677_vm7, %v1814_v62, %v674_v14  ;;  %v2561_v28 = vadd.f32 1e-05, %v652_v7  ;;  %v950_v21 = vmul.f32 %v2428_v39, %v947_v63  ;;  %vm944_vm15 = vmor %vm942_vm14, %vm943_vm12 }
 0x1e5   : > { %v690_v10 = vmul.f32 %v678_v11, %v654_v19  ;;  %v1059_v1 = vsel %vm1058_vm9, %v1816_v45, %v1055_v22  ;;  %v1030_v41 = vsub.f32 %v1024_v59, %v1027_v2  ;;  %v938_v44 = vmul.f32 %v2551_v38, %v937_v31 }
 0x1e6   : > { %v815_v52 = vmul.f32 0.5, %v814_v13  ;;  %v1071_v0 = vmul.f32 %v1059_v1, %v1035_v18  ;;  %1821 = vrsqrt.f32 %v2561_v28  ;;  %v2569_v60 = vmul.f32 %v1129_v12, %v2384_v4 }
 0x1e7   : > { %v696_v62 = vmul.f32 %v2428_v39, %v690_v10  ;;  %v1033_v43 = vmax.f32 %v1030_v41, 0.0  ;;  %v939_v45 = vmul.f32 0.5, %v938_v44  ;;  %v847_v18 = vmul.f32 %v2361_v34, %v832_v24 }
 0x1e8   : > { %v816_v53 = vsub.f32 1.5, %v815_v52  ;;  %1331 = vperm.xlu2 %1787, %v2236_v58   ;;  %v1074_v57 = vmul.f32 %v2428_v39, %v1071_v0  ;;  %v953_v58 = vadd.f32 %v2447_v3, %v950_v21  ;;  %v1149_v26 = vmul.f32 %v2569_v60, %v2569_v60 }
 0x1e9   : > { %v2576_v48 = vadd.f32 1e-05, %v1033_v43  ;;  %v702_v19 = vadd.f32 %v2447_v3, %v696_v62  ;;  %v940_v2 = vsub.f32 1.5, %v939_v45  ;;  %v2617_v62 = vpop.permute.xlu0 %1091  ;;  %vm685_vm1 = vweird.f32 %v2561_v28 }
 0x1ea   : > { %v817_v46 = vmul.f32 %v2542_v37, %v816_v53  ;;  %v1131_v63 = vpop.xlane.xlu2 %1130  ;;  %v1077_v40 = vadd.f32 %v2447_v3, %v1074_v57  ;;  %v956_v5 = vmax.f32 %v953_v58, 0.0 }
 0x1eb   : > { %v1141_v17 = vpop.xlane.xlu1 %1140  ;;  %1823 = vrsqrt.f32 %v2576_v48  ;;  %v941_v9 = vmul.f32 %v2551_v38, %v940_v2  ;;  %v705_v59 = vmax.f32 %v702_v19, 0.0  ;;  %vm1066_vm4 = vweird.f32 %v2576_v48 }
 0x1ec   : > { %v1146_v23 = vmul.f32 %v1141_v17, %v2384_v4  ;;  %v1822_v27 = vpop.eup %1821  ;;  %v821_v25 = vsel %vm2583_vm13, %v2542_v37, %v817_v46  ;;  %v2604_v37 = vmul.f32 %v1131_v63, %v2384_v4  ;;  %v1080_v20 = vmax.f32 %v1077_v40, 0.0 }
 0x1ed   : > { %v680_v14 = vmul.f32 %v1822_v27, %v2561_v28  ;;  %v945_v12 = vsel %vm944_vm15, %v2551_v38, %v941_v9  ;;  %v824_v22 = vmul.f32 %v821_v25, %v788_v49  ;;  %v723_v47 = vmul.f32 %v2352_v35, %v705_v59 }
 0x1ee   : > { %v1152_v7 = vsub.f32 %v1146_v23, %v1149_v26  ;;  %v948_v29 = vmul.f32 %v945_v12, %v912_v42  ;;  %v1150_v0 = vmul.f32 %v2604_v37, %v2604_v37  ;;  %v971_v44 = vmul.f32 %v2371_v50, %v956_v5 }
 0x1ef   : > { %v681_v13 = vmul.f32 %v1822_v27, %v680_v14  ;;  %v850_v41 = vadd.f32 %v847_v18, %v723_v47  ;;  %vm686_vm0 = vweird.f32 %v1822_v27  ;;  %v827_v35 = vmul.f32 %v2428_v39, %v824_v22 }
 0x1f0   : > { %v1155_v11 = vmax.f32 %v1152_v7, 0.0  ;;  %v951_v57 = vmul.f32 %v2428_v39, %v948_v29  ;;  %v1095_v63 = vmul.f32 %v2376_v56, %v1080_v20  ;;  %v655_v50 = vsub.f32 %v2330_v15, %v2530_v36  ;;  %vm687_vm2 = vmor %vm685_vm1, %vm686_vm0 }
 0x1f1   : > { %v1824_v31 = vpop.eup %1823  ;;  %v682_v10 = vmul.f32 0.5, %v681_v13  ;;  %v974_v46 = vadd.f32 %v971_v44, %v850_v41  ;;  %v830_v24 = vadd.f32 %v2447_v3, %v827_v35 }
 0x1f2   : > { %v2608_v1 = vadd.f32 1e-05, %v1155_v11  ;;  %v1143_v52 = vpop.xlane.xlu2 %1142  ;;  %v1061_v38 = vmul.f32 %v1824_v31, %v2576_v48  ;;  %vm1067_vm3 = vweird.f32 %v1824_v31  ;;  %v954_v23 = vadd.f32 %v2447_v3, %v951_v57 }
 0x1f3   : > { %v1147_v34 = vmul.f32 %v1143_v52, %v2384_v4  ;;  %v683_v21 = vsub.f32 1.5, %v682_v10  ;;  %v2625_v58 = vadd.f32 %v1095_v63, %v974_v46  ;;  %v833_v15 = vmax.f32 %v830_v24, 0.0  ;;  %vm1068_vm5 = vmor %vm1066_vm4, %vm1067_vm3  ;;  %v1145_v42 = vpop.xlane.xlu1 %1144 }
 0x1f4   : > { %1825 = vrsqrt.f32 %v2608_v1  ;;  %v1062_v53 = vmul.f32 %v1824_v31, %v1061_v38  ;;  %v957_v7 = vmax.f32 %v954_v23, 0.0  ;;  %v1148_v48 = vmul.f32 %v1145_v42, %v2384_v4  ;;  %v2935_v23 = vld [vmem:[#allocation3_spill] sm:$0xff]  ;;  %v1491_v42 = vpop.f32.mrf.mxu2 }
 0x1f5   : > { %v1153_v43 = vsub.f32 %v1147_v34, %v1150_v0  ;;  %v684_v45 = vmul.f32 %v1822_v27, %v683_v21  ;;  %v848_v13 = vmul.f32 %v2374_v54, %v833_v15  ;;  %vm1170_vm7 = vweird.f32 %v2608_v1 }
 0x1f6   : > { %v1063_v19 = vmul.f32 0.5, %v1062_v53  ;;  %v972_v29 = vmul.f32 %v2382_v55, %v957_v7  ;;  %v1158_v54 = vsub.f32 %v2345_v30, %v2569_v60  ;;  %v1159_v46 = vsub.f32 %v2350_v32, %v2604_v37 }
 0x1f7   : > { %v1156_v2 = vmax.f32 %v1153_v43, 0.0  ;;  %v688_v17 = vsel %vm687_vm2, %v1822_v27, %v684_v45  ;;  %v1036_v27 = vsub.f32 %v2305_v61, %v2524_v6 }
 0x1f8   : > { %v691_v28 = vmul.f32 %v688_v17, %v655_v50  ;;  %v1064_v49 = vsub.f32 1.5, %v1063_v19  ;;  %v2934_v17 = vld [vmem:[#allocation5_spill] sm:$0xff] }
 0x1f9   : > { %v1162_v51 = vadd.f32 1e-05, %v1156_v2  ;;  %v1386_v15 = vmul.f32 %v2934_v17, %v2934_v17 }
 0x1fa   : > { %v1826_v26 = vpop.eup %1825  ;;  %v697_v56 = vmul.f32 %v2428_v39, %v691_v28  ;;  %v1065_v36 = vmul.f32 %v1824_v31, %v1064_v49 }
 0x1fb   : > { %v1165_v25 = vmul.f32 %v1826_v26, %v2608_v1  ;;  %1827 = vrsqrt.f32 %v1162_v51  ;;  %vm1171_vm6 = vweird.f32 %v1826_v26  ;;  %vm1180_vm10 = vweird.f32 %v1162_v51 }
 0x1fc   : > { %v703_v9 = vadd.f32 %v2447_v3, %v697_v56  ;;  %v1069_v14 = vsel %vm1068_vm5, %v1824_v31, %v1065_v36  ;;  %vm1172_vm8 = vmor %vm1170_vm7, %vm1171_vm6 }
 0x1fd   : > { %v1166_v40 = vmul.f32 %v1826_v26, %v1165_v25  ;;  %v1072_v5 = vmul.f32 %v1069_v14, %v1036_v27  ;;  %v2936_v14 = vld [vmem:[#allocation9_spill] sm:$0xff] }
 0x1fe   : > { %v1133_v59 = vpop.xlane.xlu0 %1132  ;;  %v706_v12 = vmax.f32 %v703_v9, 0.0  ;;  %v1385_v9 = vmul.f32 %v2935_v23, %v2935_v23 }
 0x1ff   : > { %v1167_v18 = vmul.f32 0.5, %v1166_v40  ;;  %v2635_v22 = vmul.f32 %v1133_v59, %v2384_v4  ;;  %v1075_v11 = vmul.f32 %v2428_v39, %v1072_v5  ;;  %v2672_v5 = vld [vmem:[%s1972_s28 + $0x8] sm:$0xff] }
 0x200   : > { %v724_v47 = vmul.f32 %v2348_v16, %v706_v12  ;;  %v1886_v12 = vmov 6  }
 0x201   : > { %v1828_v61 = vpop.eup %1827  ;;  %v1168_v6 = vsub.f32 1.5, %v1167_v18  ;;  %v1151_v20 = vmul.f32 %v2635_v22, %v2635_v22  ;;  %v1078_v10 = vadd.f32 %v2447_v3, %v1075_v11  ;;  %v1160_v7 = vsub.f32 %v2936_v14, %v2635_v22  ;;  %1791 = vset.pattern.permute.xlu0 %v1886_v12  ;;  %1790 = vset.pattern.permute.xlu1 %v1886_v12 }
 0x202   : > { %v1175_v31 = vmul.f32 %v1828_v61, %v1162_v51  ;;  %v851_v52 = vadd.f32 %v848_v13, %v724_v47  ;;  %vm1181_vm9 = vweird.f32 %v1828_v61  ;;  %1792 = vset.pattern.permute.xlu2 %v1886_v12  ;;  %v1387_v22 = vmul.f32 %v2321_v8, %v2321_v8 }
 0x203   : > { %v1169_v41 = vmul.f32 %v1826_v26, %v1168_v6  ;;  %v1154_v38 = vsub.f32 %v1148_v48, %v1151_v20  ;;  %v1081_v16 = vmax.f32 %v1078_v10, 0.0  ;;  %vm1182_vm11 = vmor %vm1180_vm10, %vm1181_vm9  ;;  %v1493_v20 = vpop.f32.mrf.mxu2 }
 0x204   : > { %v1176_v0 = vmul.f32 %v1828_v61, %v1175_v31  ;;  %v975_v34 = vadd.f32 %v972_v29, %v851_v52  ;;  %v2938_v29 = vld [vmem:[#allocation8_spill] sm:$0xff] }
 0x205   : > { %v1173_v44 = vsel %vm1172_vm8, %v1826_v26, %v1169_v41  ;;  %v1157_v21 = vmax.f32 %v1154_v38, 0.0  ;;  %v1096_v53 = vmul.f32 %v2617_v62, %v1081_v16  ;;  %v1208_v62 = vpop.permute.xlu2 %1207 }
 0x206   : > { %v1177_v35 = vmul.f32 0.5, %v1176_v0  ;;  %v1194_v1 = vmul.f32 %v1173_v44, %v1158_v54  ;;  %v1887_v54 = vmov 7   ;;  %v1511_v0 = vmul.f32 %v2938_v29, %v2938_v29 }
 0x207   : > { %v1163_v55 = vadd.f32 1e-05, %v1157_v21  ;;  %1380 = vadd.xlane.f32.xlu0 %v2321_v8  ;;  %v1099_v57 = vadd.f32 %v1096_v53, %v975_v34 }
 0x208   : > { %v1178_v43 = vsub.f32 1.5, %v1177_v35  ;;  %v1197_v45 = vmul.f32 %v2428_v39, %v1194_v1 }
 0x209   : > { %1829 = vrsqrt.f32 %v1163_v55  ;;  %vm1190_vm13 = vweird.f32 %v1163_v55 }
 0x20a   : > { %v1200_v30 = vadd.f32 %v2447_v3, %v1197_v45  ;;  %v1179_v60 = vmul.f32 %v1828_v61, %v1178_v43 }
 0x20b   : > { %v1212_v25 = vpop.permute.xlu1 %1211 }
 0x20c   : > { %v1203_v63 = vmax.f32 %v1200_v30, 0.0  ;;  %v1183_v50 = vsel %vm1182_vm11, %v1828_v61, %v1179_v60 }
 0x20d   : > { %v1195_v19 = vmul.f32 %v1183_v50, %v1159_v46  ;;  %v1850_v46 = vld [vmem:[%s1972_s28] sm:$0xff] }
 0x20e   : > { %v1218_v2 = vmul.f32 %v1208_v62, %v1203_v63  ;;  %1378 = vadd.xlane.f32.xlu1 %v2934_v17 }
 0x20f   : > { %v1830_v24 = vpop.eup %1829  ;;  %v1198_v28 = vmul.f32 %v2428_v39, %v1195_v19 }
 0x210   : > { %v2658_v49 = vadd.f32 %v1218_v2, %v2547_v33  ;;  %v1185_v51 = vmul.f32 %v1830_v24, %v1163_v55  ;;  %vm1191_vm12 = vweird.f32 %v1830_v24 }
 0x211   : > { %v1201_v26 = vadd.f32 %v2447_v3, %v1198_v28  ;;  %1376 = vadd.xlane.f32.xlu2 %v2935_v23  ;;  %vm1192_vm14 = vmor %vm1190_vm13, %vm1191_vm12  ;;  %v1216_v6 = vpop.permute.xlu0 %1215 }
 0x212   : > { %v1186_v32 = vmul.f32 %v1830_v24, %v1185_v51  ;;  %v1851_v51 = vld [vmem:[%s1972_s28 + $0x10] sm:$0xff] }
 0x213   : > { %v1204_v37 = vmax.f32 %v1201_v26, 0.0 }
 0x214   : > { %v1187_v56 = vmul.f32 0.5, %v1186_v32 }
 0x215   : > { %v1219_v36 = vmul.f32 %v1212_v25, %v1204_v37 }
 0x216   : > { %v1188_v27 = vsub.f32 1.5, %v1187_v56  ;;  %1390 = vadd.xlane.f32.xlu1 %v1386_v15  ;;  %v2939_v56 = vld [vmem:[#allocation2_spill] sm:$0xff] }
 0x217   : > { %v2665_v33 = vadd.f32 %v1219_v36, %v2625_v58  ;;  %v2937_v58 = vld [vmem:[#allocation7_spill] sm:$0xff] }
 0x218   : > { %v1189_v40 = vmul.f32 %v1830_v24, %v1188_v27  ;;  %v2676_v48 = vadd.f32 %v1491_v42, %v2937_v58  ;;  %v2687_v10 = vadd.f32 %v1493_v20, %v2937_v58 }
 0x219   : > { %1388 = vadd.xlane.f32.xlu2 %v1385_v9 }
 0x21a   : > { %v1193_v59 = vsel %vm1192_vm14, %v1830_v24, %v1189_v40  ;;  %v1510_v52 = vmul.f32 %v2687_v10, %v2687_v10  ;;  %v1509_v41 = vmul.f32 %v2676_v48, %v2676_v48 }
 0x21b   : > { %v1196_v18 = vmul.f32 %v1193_v59, %v1160_v7  ;;  %1459 = vperm.xlu0 %1791, %v2672_v5   ;;  %v2940_v59 = vld [vmem:[#allocation4_spill] sm:$0xff] }
 0x21d   : > { %v1199_v13 = vmul.f32 %v2428_v39, %v1196_v18 }
 0x21e   : > { %1500 = vadd.xlane.f32.xlu1 %v2676_v48 }
 0x21f   : > { %v1202_v61 = vadd.f32 %v2447_v3, %v1199_v13 }
 0x221   : > { %1392 = vadd.xlane.f32.xlu2 %v1387_v22  ;;  %v1205_v11 = vmax.f32 %v1202_v61, 0.0 }
 0x223   : > { %v1220_v47 = vmul.f32 %v1216_v6, %v1205_v11  ;;  %1795 = vset.pattern.permute.xlu0 %v1887_v54 }
 0x225   : > { %v2683_v31 = vadd.f32 %v1220_v47, %v1099_v57 }
 0x226   : > { %1504 = vadd.xlane.f32.xlu1 %v2938_v29 }
 0x229   : > { %1502 = vadd.xlane.f32.xlu2 %v2687_v10 }
 0x22e   : > { %1514 = vadd.xlane.f32.xlu1 %v1510_v52 }
 0x231   : > { %1512 = vadd.xlane.f32.xlu2 %v1509_v41 }
 0x233   : > { %v1253_v38 = vpop.xlane.xlu2 %1252 }
 0x234   : > { %v1258_v16 = vmul.f32 %v1253_v38, %v2384_v4 }
 0x236   : > { %v1273_v44 = vmul.f32 %v1258_v16, %v1258_v16  ;;  %v1255_v35 = vpop.xlane.xlu1 %1254  ;;  %v1282_v25 = vsub.f32 %v2939_v56, %v1258_v16 }
 0x237   : > { %v1259_v53 = vmul.f32 %v1255_v35, %v2384_v4 }
 0x239   : > { %1516 = vadd.xlane.f32.xlu2 %v1511_v0  ;;  %v1274_v57 = vmul.f32 %v1259_v53, %v1259_v53  ;;  %v1283_v12 = vsub.f32 %v2940_v59, %v1259_v53 }
 0x23b   : > { %v1265_v34 = vpop.xlane.xlu2 %1264 }
 0x23c   : > { %v1270_v21 = vmul.f32 %v1265_v34, %v2384_v4 }
 0x23e   : > { %v1276_v1 = vsub.f32 %v1270_v21, %v1273_v44  ;;  %v1269_v58 = vpop.xlane.xlu1 %1268 }
 0x240   : > { %v1279_v55 = vmax.f32 %v1276_v1, 0.0 }
 0x242   : > { %v1285_v43 = vadd.f32 1e-05, %v1279_v55 }
 0x243   : > { %v1267_v45 = vpop.xlane.xlu2 %1266 }
 0x244   : > { %1831 = vrsqrt.f32 %v1285_v43  ;;  %v1271_v30 = vmul.f32 %v1267_v45, %v2384_v4  ;;  %vm1294_vm0 = vweird.f32 %v1285_v43 }
 0x246   : > { %v1277_v60 = vsub.f32 %v1271_v30, %v1274_v57 }
 0x247   : > { %1455 = vperm.xlu1 %1790, %v1850_v46  }
 0x248   : > { %v1280_v63 = vmax.f32 %v1277_v60, 0.0 }
 0x24a   : > { %v1832_v50 = vpop.eup %1831  ;;  %v1286_v62 = vadd.f32 1e-05, %v1280_v63 }
 0x24b   : > { %v1289_v19 = vmul.f32 %v1832_v50, %v1285_v43  ;;  %vm1295_vm15 = vweird.f32 %v1832_v50  ;;  %v1332_v13 = vpop.permute.xlu2 %1331 }
 0x24c   : > { %1833 = vrsqrt.f32 %v1286_v62  ;;  %vm1296_vm1 = vmor %vm1294_vm0, %vm1295_vm15  ;;  %vm1304_vm3 = vweird.f32 %v1286_v62 }
 0x24d   : > { %v1290_v2 = vmul.f32 %v1832_v50, %v1289_v19 }
 0x24f   : > { %v1291_v24 = vmul.f32 0.5, %v1290_v2  ;;  %1793 = vset.pattern.permute.xlu1 %v1887_v54 }
 0x250   : > { %1579 = vperm.xlu1 %1793, %v1850_v46  }
 0x251   : > { %v1292_v28 = vsub.f32 1.5, %v1291_v24  ;;  %1463 = vperm.xlu2 %1792, %v1851_v51  }
 0x252   : > { %v1834_v26 = vpop.eup %1833 }
 0x253   : > { %v1299_v32 = vmul.f32 %v1834_v26, %v1286_v62  ;;  %v1293_v37 = vmul.f32 %v1832_v50, %v1292_v28  ;;  %vm1305_vm2 = vweird.f32 %v1834_v26 }
 0x254   : > { %vm1306_vm4 = vmor %vm1304_vm3, %vm1305_vm2 }
 0x255   : > { %v1300_v15 = vmul.f32 %v1834_v26, %v1299_v32  ;;  %v1297_v36 = vsel %vm1296_vm1, %v1832_v50, %v1293_v37 }
 0x256   : > { %v1318_v27 = vmul.f32 %v1297_v36, %v1282_v25 }
 0x257   : > { %v1301_v9 = vmul.f32 0.5, %v1300_v15 }
 0x258   : > { %v1321_v40 = vmul.f32 %v2428_v39, %v1318_v27  ;;  %1587 = vperm.xlu1 %1793, %v1851_v51  }
 0x259   : > { %v1302_v42 = vsub.f32 1.5, %v1301_v9  ;;  %1794 = vset.pattern.permute.xlu2 %v1887_v54  ;;  %v1257_v54 = vpop.xlane.xlu0 %1256 }
 0x25a   : > { %v1324_v14 = vadd.f32 %v2447_v3, %v1321_v40  ;;  %1583 = vperm.xlu2 %1794, %v2672_v5   ;;  %v1336_v5 = vpop.permute.xlu1 %1335  ;;  %v2716_v16 = vmul.f32 %v1257_v54, %v2384_v4 }
 0x25b   : > { %v1303_v7 = vmul.f32 %v1834_v26, %v1302_v42 }
 0x25c   : > { %v1327_v18 = vmax.f32 %v1324_v14, 0.0 }
 0x25d   : > { %v1307_v22 = vsel %vm1306_vm4, %v1834_v26, %v1303_v7 }
 0x25e   : > { %v1342_v61 = vmul.f32 %v1332_v13, %v1327_v18  ;;  %v1319_v6 = vmul.f32 %v1307_v22, %v1283_v12 }
 0x260   : > { %v2708_v11 = vadd.f32 %v1342_v61, %v2658_v49  ;;  %v1322_v47 = vmul.f32 %v2428_v39, %v1319_v6  ;;  %v1275_v39 = vmul.f32 %v2716_v16, %v2716_v16 }
 0x261   : > { %v2718_v44 = vpop.permute.xlu0 %1339 }
 0x262   : > { %v1325_v20 = vadd.f32 %v2447_v3, %v1322_v47  ;;  %v1272_v3 = vmul.f32 %v1269_v58, %v2384_v4 }
 0x264   : > { %v1328_v52 = vmax.f32 %v1325_v20, 0.0  ;;  %v1278_v53 = vsub.f32 %v1272_v3, %v1275_v39 }
 0x266   : > { %v1343_v41 = vmul.f32 %v1336_v5, %v1328_v52  ;;  %v1281_v46 = vmax.f32 %v1278_v53, 0.0 }
 0x268   : > { %v2713_v38 = vadd.f32 %v1343_v41, %v2665_v33  ;;  %v2738_v24 = vadd.f32 1e-05, %v1281_v46 }
 0x26a   : > { %vm1314_vm12 = vweird.f32 %v2738_v24 }
 0x27a   : > { %v1381_v30 = vpop.xlane.xlu0 %1380 }
 0x27b   : > { %v2736_v62 = vmul.f32 %v1381_v30, %v2384_v4 }
 0x27d   : > { %v1399_v26 = vmul.f32 %v2736_v62, %v2736_v62 }
 0x281   : > { %v1379_v0 = vpop.xlane.xlu1 %1378 }
 0x282   : > { %v2721_v49 = vmul.f32 %v1379_v0, %v2384_v4 }
 0x284   : > { %v1377_v34 = vpop.xlane.xlu2 %1376  ;;  %v1398_v35 = vmul.f32 %v2721_v49, %v2721_v49 }
 0x285   : > { %v2727_v21 = vmul.f32 %v1377_v34, %v2384_v4 }
 0x287   : > { %v1397_v45 = vmul.f32 %v2727_v21, %v2727_v21 }
 0x289   : > { %v1391_v33 = vpop.xlane.xlu1 %1390 }
 0x28a   : > { %v1395_v1 = vmul.f32 %v1391_v33, %v2384_v4 }
 0x28c   : > { %v1401_v55 = vsub.f32 %v1395_v1, %v1398_v35  ;;  %v1389_v43 = vpop.xlane.xlu2 %1388 }
 0x28d   : > { %v1394_v57 = vmul.f32 %v1389_v43, %v2384_v4 }
 0x28e   : > { %v1404_v60 = vmax.f32 %v1401_v55, 0.0 }
 0x28f   : > { %v1400_v63 = vsub.f32 %v1394_v57, %v1397_v45 }
 0x290   : > { %v1410_v50 = vadd.f32 1e-05, %v1404_v60 }
 0x291   : > { %v1403_v19 = vmax.f32 %v1400_v63, 0.0  ;;  %v1501_v2 = vpop.xlane.xlu1 %1500 }
 0x292   : > { %1835 = vrsqrt.f32 %v1410_v50  ;;  %v2762_v18 = vmul.f32 %v1501_v2, %v2384_v4  ;;  %vm1428_vm6 = vweird.f32 %v1410_v50 }
 0x293   : > { %v2740_v28 = vadd.f32 1e-05, %v1403_v19 }
 0x294   : > { %v1393_v51 = vpop.xlane.xlu2 %1392  ;;  %v1521_v54 = vmul.f32 %v2762_v18, %v2762_v18 }
 0x295   : > { %1837 = vrsqrt.f32 %v2740_v28  ;;  %v1396_v32 = vmul.f32 %v1393_v51, %v2384_v4  ;;  %vm1418_vm10 = vweird.f32 %v2740_v28 }
 0x296   : > { %1839 = vrsqrt.f32 %v2738_v24 }
 0x297   : > { %v1402_v37 = vsub.f32 %v1396_v32, %v1399_v26 }
 0x298   : > { %v1836_v56 = vpop.eup %1835 }
 0x299   : > { %v1405_v25 = vmax.f32 %v1402_v37, 0.0  ;;  %v1505_v15 = vpop.xlane.xlu1 %1504  ;;  %v1423_v36 = vmul.f32 %v1836_v56, %v1410_v50  ;;  %vm1429_vm5 = vweird.f32 %v1836_v56  ;;  %v1407_v50 = vsub.f32 %v2934_v17, %v2721_v49 }
 0x29a   : > { %v2778_v55 = vmul.f32 %v1505_v15, %v2384_v4  ;;  %vm2782_vm7 = vmor %vm1428_vm6, %vm1429_vm5  ;;  %v1406_v17 = vsub.f32 %v2935_v23, %v2727_v21 }
 0x29b   : > { %v2747_v27 = vpop.eup %1837  ;;  %v2749_v9 = vadd.f32 1e-05, %v1405_v25  ;;  %v1424_v14 = vmul.f32 %v1836_v56, %v1423_v36 }
 0x29c   : > { %v1503_v40 = vpop.xlane.xlu2 %1502  ;;  %v2751_v42 = vpop.eup %1839  ;;  %v1413_v7 = vmul.f32 %v2747_v27, %v2740_v28  ;;  %v1523_v2 = vmul.f32 %v2778_v55, %v2778_v55  ;;  %vm1419_vm8 = vweird.f32 %v2747_v27 }
 0x29d   : > { %1841 = vrsqrt.f32 %v2749_v9  ;;  %v2757_v59 = vmul.f32 %v1503_v40, %v2384_v4  ;;  %v1309_v12 = vmul.f32 %v2751_v42, %v2738_v24  ;;  %v1425_v13 = vmul.f32 0.5, %v1424_v14  ;;  %vm2799_vm11 = vmor %vm1418_vm10, %vm1419_vm8 }
 0x29e   : > { %v1414_v22 = vmul.f32 %v2747_v27, %v1413_v7  ;;  %vm1315_vm9 = vweird.f32 %v2751_v42  ;;  %vm1438_vm15 = vweird.f32 %v2749_v9 }
 0x29f   : > { %v1522_v61 = vmul.f32 %v2757_v59, %v2757_v59  ;;  %v1310_v20 = vmul.f32 %v2751_v42, %v1309_v12  ;;  %v1426_v34 = vsub.f32 1.5, %v1425_v13  ;;  %vm2809_vm13 = vmor %vm1314_vm12, %vm1315_vm9 }
 0x2a0   : > { %v1415_v39 = vmul.f32 0.5, %v1414_v22 }
 0x2a1   : > { %v1515_v58 = vpop.xlane.xlu1 %1514  ;;  %v1311_v1 = vmul.f32 0.5, %v1310_v20  ;;  %v1427_v57 = vmul.f32 %v1836_v56, %v1426_v34 }
 0x2a2   : > { %v1519_v6 = vmul.f32 %v1515_v58, %v2384_v4  ;;  %v1416_v45 = vsub.f32 1.5, %v1415_v39 }
 0x2a3   : > { %v2768_v47 = vpop.eup %1841  ;;  %v1312_v46 = vsub.f32 1.5, %v1311_v1  ;;  %v1431_v26 = vsel %vm2782_vm7, %v1836_v56, %v1427_v57 }
 0x2a4   : > { %v1433_v52 = vmul.f32 %v2768_v47, %v2749_v9  ;;  %v1525_v5 = vsub.f32 %v1519_v6, %v1522_v61  ;;  %v1513_v41 = vpop.xlane.xlu2 %1512  ;;  %v1417_v32 = vmul.f32 %v2747_v27, %v1416_v45  ;;  %v1443_v56 = vmul.f32 %v1431_v26, %v1407_v50  ;;  %v2947_v6 = vld [vmem:[#allocation6_spill] sm:$0xff] }
 0x2a5   : > { %v1518_v0 = vmul.f32 %v1513_v41, %v2384_v4  ;;  %v1313_v36 = vmul.f32 %v2751_v42, %v1312_v46  ;;  %vm1439_vm14 = vweird.f32 %v2768_v47  ;;  %v1284_v20 = vsub.f32 %v2947_v6, %v2716_v16  ;;  %v2843_v16 = vld [vmem:[%s2913_s9] ss:$0 sm:$0xff] }
 0x2a6   : > { %v1528_v3 = vmax.f32 %v1525_v5, 0.0  ;;  %v1434_v33 = vmul.f32 %v2768_v47, %v1433_v52  ;;  %v1421_v49 = vsel %vm2799_vm11, %v2747_v27, %v1417_v32  ;;  %v2825_v27 = vld [vmem:[%s2912_s8] ss:$0 sm:$0xff]  ;;  %vm2831_vm0 = vmor %vm1438_vm15, %vm1439_vm14  ;;  %v1530_v46 = vsub.f32 %v2676_v48, %v2762_v18 }
 0x2a7   : > { %v1524_v35 = vsub.f32 %v1518_v0, %v1521_v54  ;;  %v1317_v23 = vsel %vm2809_vm13, %v2751_v42, %v1313_v36  ;;  %v1446_v22 = vmul.f32 %v2825_v27, %v1443_v56  ;;  %v1442_v61 = vmul.f32 %v1421_v49, %v1406_v17 }
 0x2a8   : > { %v1534_v53 = vadd.f32 1e-05, %v1528_v3  ;;  %v1435_v30 = vmul.f32 0.5, %v1434_v33  ;;  %v1320_v41 = vmul.f32 %v1317_v23, %v1284_v20  ;;  %v1408_v54 = vsub.f32 %v2321_v8, %v2736_v62 }
 0x2a9   : > { %v1527_v43 = vmax.f32 %v1524_v35, 0.0  ;;  %v1449_v34 = vadd.f32 %v2843_v16, %v1446_v22  ;;  %v1445_v39 = vmul.f32 %v2825_v27, %v1442_v61  ;;  %v1597_v22 = vld [vmem:[%s2914_s10 + $0x8] sm:$0xff] }
 0x2aa   : > { %1843 = vrsqrt.f32 %v1534_v53  ;;  %v1436_v37 = vsub.f32 1.5, %v1435_v30  ;;  %vm1552_vm2 = vweird.f32 %v1534_v53  ;;  %v1323_v45 = vmul.f32 %v2825_v27, %v1320_v41 }
 0x2ab   : > { %v2780_v60 = vadd.f32 1e-05, %v1527_v43  ;;  %v1448_v19 = vadd.f32 %v2843_v16, %v1445_v39 }
 0x2ac   : > { %v1517_v63 = vpop.xlane.xlu2 %1516  ;;  %v1437_v13 = vmul.f32 %v2768_v47, %v1436_v37 }
 0x2ad   : > { %1845 = vrsqrt.f32 %v2780_v60  ;;  %v1520_v51 = vmul.f32 %v1517_v63, %v2384_v4  ;;  %vm1542_vm5 = vweird.f32 %v2780_v60  ;;  %v1452_v63 = vmax.f32 %v1449_v34, 0.0 }
 0x2ae   : > { %v1441_v5 = vsel %vm2831_vm0, %v2768_v47, %v1437_v13 }
 0x2af   : > { %v1526_v25 = vsub.f32 %v1520_v51, %v1523_v2  ;;  %v1444_v8 = vmul.f32 %v1441_v5, %v1408_v54  ;;  %v1460_v51 = vpop.permute.xlu0 %1459 }
 0x2b0   : > { %v1844_v15 = vpop.eup %1843 }
 0x2b1   : > { %v1547_v40 = vmul.f32 %v1844_v15, %v1534_v53  ;;  %v1529_v14 = vmax.f32 %v1526_v25, 0.0  ;;  %vm1553_vm1 = vweird.f32 %v1844_v15  ;;  %v1531_v53 = vsub.f32 %v2687_v10, %v2757_v59 }
 0x2b2   : > { %vm2847_vm3 = vmor %vm1552_vm2, %vm1553_vm1  ;;  %v1447_v59 = vmul.f32 %v2825_v27, %v1444_v8  ;;  %v1467_v25 = vmul.f32 %v1460_v51, %v1452_v63 }
 0x2b3   : > { %v1846_v7 = vpop.eup %1845  ;;  %v1548_v28 = vmul.f32 %v1844_v15, %v1547_v40  ;;  %v2814_v58 = vadd.f32 1e-05, %v1529_v14 }
 0x2b4   : > { %v1537_v21 = vmul.f32 %v1846_v7, %v2780_v60  ;;  %vm1543_vm4 = vweird.f32 %v1846_v7  ;;  %v1464_v35 = vpop.permute.xlu2 %1463  ;;  %v1326_v60 = vadd.f32 %v2843_v16, %v1323_v45  ;;  %v1450_v4 = vadd.f32 %v2843_v16, %v1447_v59 }
 0x2b5   : > { %v1549_v24 = vmul.f32 0.5, %v1548_v28  ;;  %1847 = vrsqrt.f32 %v2814_v58  ;;  %vm1544_vm6 = vmor %vm1542_vm5, %vm1543_vm4  ;;  %vm1562_vm8 = vweird.f32 %v2814_v58  ;;  %v1532_v28 = vsub.f32 %v2938_v29, %v2778_v55  ;;  %v1596_v29 = vld [vmem:[%s2914_s10] sm:$0xff] }
 0x2b6   : > { %v1538_v9 = vmul.f32 %v1846_v7, %v1537_v21  ;;  %v1329_v49 = vmax.f32 %v1326_v60, 0.0  ;;  %v1470_v13 = vadd.f32 %v1467_v25, %v2713_v38 }
 0x2b7   : > { %v1550_v52 = vsub.f32 1.5, %v1549_v24  ;;  %v1453_v24 = vmax.f32 %v1450_v4, 0.0 }
 0x2b8   : > { %v1539_v0 = vmul.f32 0.5, %v1538_v9  ;;  %v1344_v38 = vmul.f32 %v2718_v44, %v1329_v49 }
 0x2b9   : > { %v1551_v3 = vmul.f32 %v1844_v15, %v1550_v52  ;;  %v1456_v62 = vpop.permute.xlu1 %1455  ;;  %v1468_v5 = vmul.f32 %v1464_v35, %v1453_v24 }
 0x2ba   : > { %v1540_v47 = vsub.f32 1.5, %v1539_v0  ;;  %v1347_v54 = vadd.f32 %v1344_v38, %v2683_v31 }
 0x2bb   : > { %v1848_v1 = vpop.eup %1847  ;;  %v1555_v43 = vsel %vm2847_vm3, %v1844_v15, %v1551_v3  ;;  %v1451_v15 = vmax.f32 %v1448_v19, 0.0 }
 0x2bc   : > { %v1557_v57 = vmul.f32 %v1848_v1, %v2814_v58  ;;  %v1541_v30 = vmul.f32 %v1846_v7, %v1540_v47  ;;  %v1567_v2 = vmul.f32 %v1555_v43, %v1531_v53  ;;  %vm1563_vm7 = vweird.f32 %v1848_v1  ;;  %v1584_v40 = vpop.permute.xlu2 %1583 }
 0x2bd   : > { %v1466_v56 = vmul.f32 %v1456_v62, %v1451_v15  ;;  %vm1564_vm9 = vmor %vm1562_vm8, %vm1563_vm7  ;;  %v1471_v34 = vadd.f32 %v1468_v5, %v1347_v54 }
 0x2be   : > { %v1558_v10 = vmul.f32 %v1848_v1, %v1557_v57  ;;  %v1545_v26 = vsel %vm1544_vm6, %v1846_v7, %v1541_v30  ;;  %v1570_v50 = vmul.f32 %v2825_v27, %v1567_v2 }
 0x2bf   : > { %v1566_v32 = vmul.f32 %v1545_v26, %v1530_v46  ;;  %v1469_v6 = vadd.f32 %v1466_v56, %v2708_v11 }
 0x2c0   : > { %v1559_v37 = vmul.f32 0.5, %v1558_v10  ;;  %v1573_v18 = vadd.f32 %v2843_v16, %v1570_v50 }
 0x2c1   : > { %v1569_v48 = vmul.f32 %v2825_v27, %v1566_v32 }
 0x2c2   : > { %v1560_v36 = vsub.f32 1.5, %v1559_v37  ;;  %v1576_v17 = vmax.f32 %v1573_v18, 0.0  ;;  %v1580_v7 = vpop.permute.xlu1 %1579 }
 0x2c3   : > { %v1572_v14 = vadd.f32 %v2843_v16, %v1569_v48 }
 0x2c4   : > { %v1561_v12 = vmul.f32 %v1848_v1, %v1560_v36  ;;  %v1591_v21 = vmul.f32 %v1584_v40, %v1576_v17 }
 0x2c5   : > { %v1575_v23 = vmax.f32 %v1572_v14, 0.0 }
 0x2c6   : > { %v1565_v61 = vsel %vm1564_vm9, %v1848_v1, %v1561_v12  ;;  %v1594_v58 = vadd.f32 %v1591_v21, %v1470_v13 }
 0x2c7   : > { %v1590_v20 = vmul.f32 %v1580_v7, %v1575_v23  ;;  %v1568_v42 = vmul.f32 %v1565_v61, %v1532_v28 }
 0x2c8   : > { %v1600_v9 = vadd.f32 %v1597_v22, %v1594_v58 }
 0x2c9   : > { %v1593_v55 = vadd.f32 %v1590_v20, %v1469_v6  ;;  %v1571_v52 = vmul.f32 %v2825_v27, %v1568_v42  ;;  %v1598_v27 = vld [vmem:[%s2914_s10 + $0x10] sm:$0xff] }
 0x2ca   : > { %1603 = vst [vmem:[%s2914_s10 + $0x8] sm:$0xff] %v1600_v9  ;;  %v1588_v44 = vpop.permute.xlu1 %1587 }
 0x2cb   : > { %v1599_v41 = vadd.f32 %v1596_v29, %v1593_v55  ;;  %v1574_v11 = vadd.f32 %v2843_v16, %v1571_v52 }
 0x2cd   : > { %1602 = vst [vmem:[%s2914_s10] sm:$0xff] %v1599_v41  ;;  %v1577_v0 = vmax.f32 %v1574_v11, 0.0 }
 0x2cf   : > { %v1592_v39 = vmul.f32 %v1588_v44, %v1577_v0 }
 0x2d1   : > { %v1595_v3 = vadd.f32 %v1592_v39, %v1471_v34 }
 0x2d3   : > { %v1601_v33 = vadd.f32 %v1598_v27, %v1595_v3 }
 0x2d5   : > { %1604 = vst [vmem:[%s2914_s10 + $0x10] sm:$0xff] %v1601_v33 }
 0x2d6 PF: > { %s20_s15 = sadd.s32 1, %s1876_s15   ;;  %s2952_s13 = smov %s1872_s14 }
 0x2d7   : > { %p17_p6 = scmp.ge.s32.totalorder %s20_s15, 4   ;;  %s2953_s14 = smov %s2955_s16 }
 0x2d9   :  { %19 = sbr.rel (!%p17_p6) target bundleno = 2 (0x2), region = 103 }

// kernel: interactor_forward.17
= control target key start
LH: loop header
LB: loop body
LE: loop exit
PB: predicated region body
PF: predicated region fallthrough
CT: control target
= control target key end

     0   :  { %vm82_vm0 = vcmask 1043456   ;;  %vm75_vm1 = vcmask 195584   ;;  %s978_s1 = inlined_call_operand.vmem [shape: f32[128,128], index: 1, kind: input, shape index: {}]   ;;  %s979_s2 = inlined_call_operand.vmem [shape: f32[24,768], index: 2, kind: input, shape index: {}]   ;;  %s980_s3 = inlined_call_operand.vmem [shape: f32[6,24,24], index: 3, kind: input, shape index: {}]   ;;  %s981_s0 = inlined_call_operand.vmem [shape: f32[24,128], index: 0, kind: input, shape index: {}, may-alias: {0,4}]   ;;  %s982_s5 = inlined_call_operand.vmem [shape: f32[1,128], index: 5, kind: input, shape index: {}]   ;;  %s983_s6 = inlined_call_operand.vmem [shape: f32[1,128], index: 6, kind: input, shape index: {}]   ;;  %s984_s7 = inlined_call_operand.vmem [shape: f32[128,128], index: 7, kind: input, shape index: {}]   ;;  %s985_s8 = inlined_call_operand.vmem [shape: f32[1,128], index: 8, kind: input, shape index: {}]   ;;  %s986_s9 = inlined_call_operand.vmem [shape: f32[1,128], index: 9, kind: input, shape index: {}]   ;;  %s987_s4 = inlined_call_operand.vmem [shape: f32[24,128], index: 4, kind: input, shape index: {}, may-alias: {0,4}]   ;;  %s988_s10 = inlined_call_operand.vmem [shape: f32[24,128], index: 10, kind: output, shape index: {}]  }
   0x1   :  { %v53_v0 = vld [vmem:[%s978_s1 + $0x70] sm:$0xff]  ;;  %v54_v1 = vld [vmem:[%s978_s1 + $0x78] sm:$0xff]  ;;  %v70_v2 = vld [vmem:[%s979_s2 + $0x60] sm:$0xff] }
   0x2   :  { %v64_v3 = vpack.c.bf16 %v54_v1, %v53_v0  ;;  %v74_v4 = vpack.c.bf16 %v70_v2, %v70_v2  ;;  %v128_v5 = vld [vmem:[%s979_s2 + $0x68] sm:$0xff]  ;;  %v169_v6 = vld [vmem:[%s979_s2 + $0x70] sm:$0xff]  ;;  %v51_v7 = vld [vmem:[%s978_s1 + $0x60] sm:$0xff] }
   0x3   :  { %v132_v8 = vpack.c.bf16 %v128_v5, %v128_v5  ;;  %v173_v9 = vpack.c.bf16 %v169_v6, %v169_v6  ;;  %v52_v10 = vld [vmem:[%s978_s1 + $0x68] sm:$0xff]  ;;  %v68_v11 = vld [vmem:[%s979_s2] sm:$0xff]  ;;  %v69_v12 = vld [vmem:[%s979_s2 + $0x30] sm:$0xff] }
   0x4   :  { %104 = vmatpush.bf16.msra.mxu1 %v64_v3  ;;  %v84_v13 = vsel %vm82_vm0, %v74_v4, 0  ;;  %v63_v14 = vpack.c.bf16 %v52_v10, %v51_v7  ;;  %v126_v15 = vld [vmem:[%s979_s2 + $0x8] sm:$0xff]  ;;  %v127_v16 = vld [vmem:[%s979_s2 + $0x38] sm:$0xff]  ;;  %v167_v17 = vld [vmem:[%s979_s2 + $0x10] sm:$0xff]  ;;  %v73_v20 = vpack.c.bf16 %v69_v12, %v68_v11 }
   0x5   :  { %92 = vmatpush.bf16.msra.mxu0 %v84_v13  ;;  %v140_v18 = vsel %vm82_vm0, %v132_v8, 0  ;;  %v181_v19 = vsel %vm82_vm0, %v173_v9, 0  ;;  %v168_v21 = vld [vmem:[%s979_s2 + $0x40] sm:$0xff]  ;;  %v66_v23 = vld [vmem:[%s980_s3 + $0x8] sm:$0xff]  ;;  %v131_v24 = vpack.c.bf16 %v127_v16, %v126_v15  ;;  %v49_v26 = vld [vmem:[%s978_s1 + $0x50] sm:$0xff] }
   0x6   :  { %v65_v22 = vld [vmem:[%s980_s3] sm:$0xff]  ;;  %148 = vmatpush.bf16.msra.mxu2 %v140_v18  ;;  %189 = vmatpush.bf16.msra.mxu3 %v181_v19  ;;  %v172_v25 = vpack.c.bf16 %v168_v21, %v167_v17  ;;  %v50_v27 = vld [vmem:[%s978_s1 + $0x58] sm:$0xff]  ;;  %v570_v30 = vld [vmem:[%s980_s3 + $0x30] sm:$0xff] }
   0x7   :  { %v565_v28 = vld [vmem:[%s980_s3 + $0x18] sm:$0xff]  ;;  %v566_v29 = vld [vmem:[%s980_s3 + $0x20] sm:$0xff]  ;;  %v71_v32 = vpack.c.bf16 %v66_v23, %v65_v22  ;;  %v62_v33 = vpack.c.bf16 %v50_v27, %v49_v26  ;;  %v292_v35 = vld [vmem:[%s979_s2 + $0x88] sm:$0xff] }
   0x8   :  { %v571_v31 = vld [vmem:[%s980_s3 + $0x38] sm:$0xff]  ;;  %105 = vmatpush.bf16.msra.mxu1 %v63_v14  ;;  %v251_v34 = vld [vmem:[%s979_s2 + $0x80] sm:$0xff]  ;;  %v129_v36 = vpack.c.bf16 %v566_v29, %v565_v28  ;;  %v296_v39 = vpack.c.bf16 %v292_v35, %v292_v35  ;;  %v48_v41 = vld [vmem:[%s978_s1 + $0x48] sm:$0xff] }
   0x9   :  { %93 = vmatpush.bf16.msra.mxu0 %v73_v20  ;;  %v170_v37 = vpack.c.bf16 %v571_v31, %v570_v30  ;;  %v255_v38 = vpack.c.bf16 %v251_v34, %v251_v34  ;;  %v47_v40 = vld [vmem:[%s978_s1 + $0x40] sm:$0xff]  ;;  %v210_v42 = vld [vmem:[%s979_s2 + $0x78] sm:$0xff]  ;;  %v45_v48 = vld [vmem:[%s978_s1 + $0x30] sm:$0xff] }
   0xa   :  { %149 = vmatpush.bf16.msra.mxu2 %v131_v24  ;;  %190 = vmatpush.bf16.msra.mxu3 %v172_v25  ;;  %v214_v43 = vpack.c.bf16 %v210_v42, %v210_v42  ;;  %v304_v45 = vsel %vm82_vm0, %v296_v39, 0  ;;  %v61_v46 = vpack.c.bf16 %v48_v41, %v47_v40  ;;  %v46_v49 = vld [vmem:[%s978_s1 + $0x38] sm:$0xff]  ;;  %v249_v50 = vld [vmem:[%s979_s2 + $0x20] sm:$0xff]  ;;  %v250_v51 = vld [vmem:[%s979_s2 + $0x50] sm:$0xff] }
   0xb   :  { %v263_v44 = vsel %vm82_vm0, %v255_v38, 0  ;;  %v290_v52 = vld [vmem:[%s979_s2 + $0x28] sm:$0xff]  ;;  %v291_v53 = vld [vmem:[%s979_s2 + $0x58] sm:$0xff]  ;;  %v254_v54 = vpack.c.bf16 %v250_v51, %v249_v50  ;;  %v60_v58 = vpack.c.bf16 %v46_v49, %v45_v48  ;;  %v43_v60 = vld [vmem:[%s978_s1 + $0x20] sm:$0xff] }
   0xc   :  { %563 = vmatmul.msk.bf16.vlgmr.msra.gmra.mxu0 %vm75_vm1, %v71_v32  ;;  %106 = vmatpush.bf16.msra.mxu1 %v62_v33  ;;  %v222_v47 = vsel %vm82_vm0, %v214_v43, 0  ;;  %v295_v55 = vpack.c.bf16 %v291_v53, %v290_v52  ;;  %v208_v56 = vld [vmem:[%s979_s2 + $0x18] sm:$0xff]  ;;  %v209_v57 = vld [vmem:[%s979_s2 + $0x48] sm:$0xff]  ;;  %v67_v63 = vld [vmem:[%s980_s3 + $0x10] sm:$0xff] }
   0xd   :  { %568 = vmatmul.msk.bf16.vlgmr.msra.gmra.mxu2 %vm75_vm1, %v129_v36  ;;  %573 = vmatmul.msk.bf16.vlgmr.msra.gmra.mxu3 %vm75_vm1, %v170_v37  ;;  %v213_v59 = vpack.c.bf16 %v209_v57, %v208_v56  ;;  %v44_v61 = vld [vmem:[%s978_s1 + $0x28] sm:$0xff]  ;;  %v41_v0 = vld [vmem:[%s978_s1 + $0x10] sm:$0xff]  ;;  %v42_v1 = vld [vmem:[%s978_s1 + $0x18] sm:$0xff]  ;;  %v72_v4 = vpack.c.bf16 %v67_v63, %v67_v63 }
   0xe   :  { %271 = vmatpush.bf16.msrb.mxu2 %v263_v44  ;;  %312 = vmatpush.bf16.msrb.mxu3 %v304_v45  ;;  %v59_v62 = vpack.c.bf16 %v44_v61, %v43_v60  ;;  %v567_v2 = vld [vmem:[%s980_s3 + $0x28] sm:$0xff]  ;;  %v572_v3 = vld [vmem:[%s980_s3 + $0x40] sm:$0xff]  ;;  %v58_v5 = vpack.c.bf16 %v42_v1, %v41_v0  ;;  %v576_v15 = vld [vmem:[%s980_s3 + $0x50] sm:$0xff] }
   0xf   :  { %230 = vmatpush.bf16.msrb.mxu0 %v222_v47  ;;  %v130_v6 = vpack.c.bf16 %v567_v2, %v567_v2  ;;  %v171_v7 = vpack.c.bf16 %v572_v3, %v572_v3  ;;  %v39_v8 = vld [vmem:[%s978_s1] sm:$0xff]  ;;  %v40_v9 = vld [vmem:[%s978_s1 + $0x8] sm:$0xff]  ;;  %v585_v18 = vld [vmem:[%s980_s3 + $0x78] sm:$0xff] }
  0x10   :  { %107 = vmatpush.bf16.msra.mxu1 %v61_v46  ;;  %v57_v10 = vpack.c.bf16 %v40_v9, %v39_v8  ;;  %v36_v11 = vld [vmem:[%s981_s0] sm:$0xff]  ;;  %v37_v12 = vld [vmem:[%s981_s0 + $0x8] sm:$0xff]  ;;  %v38_v23 = vld [vmem:[%s981_s0 + $0x10] sm:$0xff] }
  0x11   :  { %v55_v13 = vpack.c.bf16 %v37_v12, %v36_v11  ;;  %v575_v14 = vld [vmem:[%s980_s3 + $0x48] sm:$0xff]  ;;  %v580_v16 = vld [vmem:[%s980_s3 + $0x60] sm:$0xff]  ;;  %v56_v24 = vpack.c.bf16 %v38_v23, %v38_v23  ;;  %v577_v25 = vld [vmem:[%s980_s3 + $0x58] sm:$0xff] }
  0x12   :  { %272 = vmatpush.bf16.msrb.mxu2 %v254_v54  ;;  %313 = vmatpush.bf16.msrb.mxu3 %v295_v55  ;;  %v581_v17 = vld [vmem:[%s980_s3 + $0x68] sm:$0xff]  ;;  %v586_v19 = vld [vmem:[%s980_s3 + $0x80] sm:$0xff]  ;;  %v211_v20 = vpack.c.bf16 %v576_v15, %v575_v14  ;;  %v582_v26 = vld [vmem:[%s980_s3 + $0x70] sm:$0xff]  ;;  %v212_v28 = vpack.c.bf16 %v577_v25, %v577_v25 }
  0x13   :  { %231 = vmatpush.bf16.msrb.mxu0 %v213_v59  ;;  %v252_v21 = vpack.c.bf16 %v581_v17, %v580_v16  ;;  %v293_v22 = vpack.c.bf16 %v586_v19, %v585_v18  ;;  %v587_v27 = vld [vmem:[%s980_s3 + $0x88] sm:$0xff]  ;;  %v253_v29 = vpack.c.bf16 %v582_v26, %v582_v26  ;;  %v617_v16 = vmov 128.0   ;;  %v434_v19 = vld [vmem:[%s984_s7 + $0x70] sm:$0xff]  ;;  %v432_v23 = vld [vmem:[%s984_s7 + $0x60] sm:$0xff] }
  0x14   :  { %108 = vmatpush.bf16.msra.mxu1 %v60_v58  ;;  %v294_v30 = vpack.c.bf16 %v587_v27, %v587_v27  ;;  %603 = vrcp.f32 %v617_v16  ;;  %v430_v27 = vld [vmem:[%s984_s7 + $0x50] sm:$0xff] }
  0x18   :  { %109 = vmatpush.bf16.msra.mxu1 %v59_v62 }
  0x1a   :  { %v604_v17 = vpop.eup %603 }
  0x1b   :  { %v336_v18 = vmul.f32 128.0, %v604_v17  ;;  %vm340_vm2 = vweird.f32 %v604_v17 }
  0x1c   :  { %564 = vmatmul.msk.bf16.gmra.mxu0 %vm75_vm1, %v72_v4  ;;  %110 = vmatpush.bf16.msra.mxu1 %v58_v5 }
  0x1d   :  { %569 = vmatmul.msk.bf16.gmra.mxu2 %vm75_vm1, %v130_v6  ;;  %574 = vmatmul.msk.bf16.gmra.mxu3 %vm75_vm1, %v171_v7 }
  0x20   :  { %111 = vmatpush.bf16.msra.mxu1 %v57_v10 }
  0x23   :  { %112 = vmatmul.bf16.vlgmr.msra.gmra.mxu1 %v55_v13 }
  0x2c   :  { %578 = vmatmul.msk.bf16.vlgmr.msrb.gmra.mxu0 %vm75_vm1, %v211_v20  ;;  %v435_v20 = vld [vmem:[%s984_s7 + $0x78] sm:$0xff] }
  0x2d   :  { %583 = vmatmul.msk.bf16.vlgmr.msrb.gmra.mxu2 %vm75_vm1, %v252_v21  ;;  %588 = vmatmul.msk.bf16.vlgmr.msrb.gmra.mxu3 %vm75_vm1, %v293_v22  ;;  %v445_v21 = vpack.c.bf16 %v435_v20, %v434_v19  ;;  %v337_v22 = vsub.f32 1.0, %v336_v18 }
  0x2f   :  { %446 = vmatpush.bf16.msra.mxu0 %v445_v21  ;;  %590 = vmatpush.bf16.msrb.mxu1 %v445_v21  ;;  %v338_v26 = vmul.f32 %v604_v17, %v337_v22 }
  0x33   :  { %117 = vmatmul.bf16.gmra.mxu1 %v56_v24  ;;  %v433_v24 = vld [vmem:[%s984_s7 + $0x68] sm:$0xff] }
  0x34   :  { %v444_v25 = vpack.c.bf16 %v433_v24, %v432_v23  ;;  %v599_v23 = vld [vmem:[%s982_s5] ss:$0 sm:$0xff] }
  0x36   :  { %447 = vmatpush.bf16.msra.mxu0 %v444_v25  ;;  %591 = vmatpush.bf16.msrb.mxu1 %v444_v25 }
  0x3c   :  { %579 = vmatmul.msk.bf16.gmra.mxu0 %vm75_vm1, %v212_v28  ;;  %v431_v28 = vld [vmem:[%s984_s7 + $0x58] sm:$0xff] }
  0x3d   :  { %584 = vmatmul.msk.bf16.gmra.mxu2 %vm75_vm1, %v253_v29  ;;  %589 = vmatmul.msk.bf16.gmra.mxu3 %vm75_vm1, %v294_v30  ;;  %v443_v29 = vpack.c.bf16 %v431_v28, %v430_v27  ;;  %v339_v30 = vadd.f32 %v604_v17, %v338_v26 }
  0x3f   :  { %448 = vmatpush.bf16.msra.mxu0 %v443_v29  ;;  %592 = vmatpush.bf16.msrb.mxu1 %v443_v29 }
  0x89   :  { %v95_v31 = vpop.f32.mrf.mxu0 }
  0x90   :  { %v151_v32 = vpop.f32.mrf.mxu2  ;;  %v192_v33 = vpop.f32.mrf.mxu3 }
  0x91   :  { %v97_v34 = vpop.f32.mrf.mxu0 }
  0x98   :  { %v153_v35 = vpop.f32.mrf.mxu2  ;;  %v194_v36 = vpop.f32.mrf.mxu3 }
  0x99   :  { %v100_v37 = vpop.f32.mrf.mxu0 }
  0xa0   :  { %v156_v38 = vpop.f32.mrf.mxu2  ;;  %v197_v39 = vpop.f32.mrf.mxu3 }
  0xa1   :  { %v113_v40 = vpop.f32.mrf.mxu1  ;;  %v102_v41 = vpop.f32.mrf.mxu0 }
  0xa2   :  { %v114_v42 = vadd.f32 %v113_v40, %v95_v31  ;;  %v428_v31 = vld [vmem:[%s984_s7 + $0x40] sm:$0xff] }
  0xa3   :  { %v424_v41 = vld [vmem:[%s984_s7 + $0x20] sm:$0xff] }
  0xa4   :  { %v160_v45 = vadd.f32 %v151_v32, %v114_v42  ;;  %v429_v32 = vld [vmem:[%s984_s7 + $0x48] sm:$0xff] }
  0xa5   :  { %v425_v42 = vld [vmem:[%s984_s7 + $0x28] sm:$0xff] }
  0xa6   :  { %v201_v49 = vadd.f32 %v192_v33, %v160_v45  ;;  %v442_v33 = vpack.c.bf16 %v429_v32, %v428_v31  ;;  %v440_v45 = vpack.c.bf16 %v425_v42, %v424_v41 }
  0xa8   :  { %v158_v43 = vpop.f32.mrf.mxu2  ;;  %v199_v44 = vpop.f32.mrf.mxu3  ;;  %449 = vmatpush.bf16.msra.mxu0 %v442_v33  ;;  %593 = vmatpush.bf16.msrb.mxu1 %v442_v33 }
  0xa9   :  { %v115_v46 = vpop.f32.mrf.mxu1  ;;  %v233_v47 = vpop.f32.mrf.mxu0 }
  0xaa   :  { %v116_v48 = vadd.f32 %v115_v46, %v97_v34  ;;  %v242_v50 = vadd.f32 %v233_v47, %v201_v49  ;;  %v895_v34 = vsel %vm340_vm2, %v604_v17, %v339_v30  ;;  %v422_v47 = vld [vmem:[%s984_s7 + $0x10] sm:$0xff] }
  0xac   :  { %v161_v53 = vadd.f32 %v153_v35, %v116_v48  ;;  %v426_v35 = vld [vmem:[%s984_s7 + $0x30] sm:$0xff]  ;;  %v423_v48 = vld [vmem:[%s984_s7 + $0x18] sm:$0xff] }
  0xae   :  { %v202_v59 = vadd.f32 %v194_v36, %v161_v53  ;;  %v427_v36 = vld [vmem:[%s984_s7 + $0x38] sm:$0xff] }
  0xb0   :  { %v274_v51 = vpop.f32.mrf.mxu2  ;;  %v315_v52 = vpop.f32.mrf.mxu3 }
  0xb1   :  { %v283_v54 = vadd.f32 %v274_v51, %v242_v50  ;;  %v118_v55 = vpop.f32.mrf.mxu1  ;;  %v235_v56 = vpop.f32.mrf.mxu0  ;;  %v439_v50 = vpack.c.bf16 %v423_v48, %v422_v47 }
  0xb2   :  { %v119_v58 = vadd.f32 %v118_v55, %v100_v37  ;;  %v243_v61 = vadd.f32 %v235_v56, %v202_v59  ;;  %v441_v37 = vpack.c.bf16 %v427_v36, %v426_v35  ;;  %v420_v55 = vld [vmem:[%s984_s7] sm:$0xff]  ;;  %v421_v56 = vld [vmem:[%s984_s7 + $0x8] sm:$0xff] }
  0xb3   :  { %v856_v57 = vadd.f32 %v315_v52, %v283_v54 }
  0xb4   :  { %v162_v0 = vadd.f32 %v156_v38, %v119_v58  ;;  %450 = vmatpush.bf16.msra.mxu0 %v441_v37  ;;  %594 = vmatpush.bf16.msrb.mxu1 %v441_v37 }
  0xb5   :  { %329 = vadd.xlane.f32.xlu0 %v856_v57  ;;  %v345_v60 = vmul.f32 %v856_v57, %v856_v57 }
  0xb6   :  { %v203_v5 = vadd.f32 %v197_v39, %v162_v0 }
  0xb7   :  { %348 = vadd.xlane.f32.xlu1 %v345_v60  ;;  %v438_v60 = vpack.c.bf16 %v421_v56, %v420_v55 }
  0xb8   :  { %v276_v62 = vpop.f32.mrf.mxu2  ;;  %v317_v63 = vpop.f32.mrf.mxu3  ;;  %451 = vmatpush.bf16.msra.mxu0 %v440_v45  ;;  %595 = vmatpush.bf16.msrb.mxu1 %v440_v45 }
  0xb9   :  { %v284_v1 = vadd.f32 %v276_v62, %v243_v61  ;;  %v120_v2 = vpop.f32.mrf.mxu1  ;;  %v238_v3 = vpop.f32.mrf.mxu0 }
  0xba   :  { %v244_v7 = vadd.f32 %v238_v3, %v203_v5 }
  0xbb   :  { %v861_v4 = vadd.f32 %v317_v63, %v284_v1 }
  0xbc   :  { %452 = vmatpush.bf16.msra.mxu0 %v439_v50  ;;  %596 = vmatpush.bf16.msrb.mxu1 %v439_v50 }
  0xbd   :  { %331 = vadd.xlane.f32.xlu0 %v861_v4  ;;  %v346_v6 = vmul.f32 %v861_v4, %v861_v4 }
  0xbf   :  { %350 = vadd.xlane.f32.xlu1 %v346_v6 }
  0xc0   :  { %v279_v8 = vpop.f32.mrf.mxu2  ;;  %v320_v9 = vpop.f32.mrf.mxu3  ;;  %453 = vmatpush.bf16.msra.mxu0 %v438_v60  ;;  %597 = vmatpush.bf16.msrb.mxu1 %v438_v60 }
  0xc1   :  { %v285_v10 = vadd.f32 %v279_v8, %v244_v7  ;;  %v240_v11 = vpop.f32.mrf.mxu0 }
  0xc3   :  { %v866_v12 = vadd.f32 %v320_v9, %v285_v10 }
  0xc5   :  { %333 = vadd.xlane.f32.xlu2 %v866_v12  ;;  %v347_v15 = vmul.f32 %v866_v12, %v866_v12 }
  0xc8   :  { %v281_v13 = vpop.f32.mrf.mxu2  ;;  %v322_v14 = vpop.f32.mrf.mxu3 }
  0xcd   :  { %352 = vadd.xlane.f32.xlu2 %v347_v15 }
 0x128   :  { %v330_v38 = vpop.xlane.xlu0 %329 }
 0x129   :  { %v342_v39 = vmul.f32 %v895_v34, %v330_v38 }
 0x12a   :  { %v349_v40 = vpop.xlane.xlu1 %348 }
 0x12b   :  { %v357_v43 = vmul.f32 %v342_v39, %v342_v39  ;;  %v354_v44 = vmul.f32 %v349_v40, %v895_v34  ;;  %v366_v19 = vsub.f32 %v856_v57, %v342_v39  ;;  %v600_v57 = vld [vmem:[%s983_s6] ss:$0 sm:$0xff] }
 0x12d   :  { %v360_v46 = vsub.f32 %v354_v44, %v357_v43 }
 0x12f   :  { %v363_v49 = vmax.f32 %v360_v46, 0.0 }
 0x130   :  { %v332_v51 = vpop.xlane.xlu0 %331 }
 0x131   :  { %v369_v52 = vadd.f32 1e-05, %v363_v49  ;;  %v343_v53 = vmul.f32 %v895_v34, %v332_v51 }
 0x132   :  { %v351_v54 = vpop.xlane.xlu1 %350 }
 0x133   :  { %605 = vrsqrt.f32 %v369_v52  ;;  %v358_v58 = vmul.f32 %v343_v53, %v343_v53  ;;  %v355_v59 = vmul.f32 %v351_v54, %v895_v34  ;;  %vm378_vm4 = vweird.f32 %v369_v52 }
 0x134   :  { %v367_v26 = vsub.f32 %v861_v4, %v343_v53 }
 0x135   :  { %v361_v61 = vsub.f32 %v355_v59, %v358_v58 }
 0x137   :  { %v364_v62 = vmax.f32 %v361_v61, 0.0 }
 0x138   :  { %v334_v63 = vpop.xlane.xlu2 %333 }
 0x139   :  { %v606_v0 = vpop.eup %605  ;;  %v370_v2 = vadd.f32 1e-05, %v364_v62  ;;  %v344_v5 = vmul.f32 %v895_v34, %v334_v63 }
 0x13a   :  { %v373_v1 = vmul.f32 %v606_v0, %v369_v52  ;;  %vm379_vm3 = vweird.f32 %v606_v0 }
 0x13b   :  { %607 = vrsqrt.f32 %v370_v2  ;;  %v359_v9 = vmul.f32 %v344_v5, %v344_v5  ;;  %vm380_vm5 = vmor %vm378_vm4, %vm379_vm3  ;;  %vm388_vm7 = vweird.f32 %v370_v2  ;;  %v368_v42 = vsub.f32 %v866_v12, %v344_v5 }
 0x13c   :  { %v374_v3 = vmul.f32 %v606_v0, %v373_v1 }
 0x13e   :  { %v375_v6 = vmul.f32 0.5, %v374_v3 }
 0x140   :  { %v376_v7 = vsub.f32 1.5, %v375_v6  ;;  %v353_v8 = vpop.xlane.xlu2 %352 }
 0x141   :  { %v356_v10 = vmul.f32 %v353_v8, %v895_v34  ;;  %v608_v11 = vpop.eup %607 }
 0x142   :  { %v377_v13 = vmul.f32 %v606_v0, %v376_v7  ;;  %v383_v14 = vmul.f32 %v608_v11, %v370_v2  ;;  %vm389_vm6 = vweird.f32 %v608_v11 }
 0x143   :  { %v362_v15 = vsub.f32 %v356_v10, %v359_v9  ;;  %vm390_vm8 = vmor %vm388_vm7, %vm389_vm6 }
 0x144   :  { %v381_v16 = vsel %vm380_vm5, %v606_v0, %v377_v13  ;;  %v384_v17 = vmul.f32 %v608_v11, %v383_v14 }
 0x145   :  { %v365_v18 = vmax.f32 %v362_v15, 0.0  ;;  %v402_v22 = vmul.f32 %v381_v16, %v366_v19 }
 0x146   :  { %v385_v20 = vmul.f32 0.5, %v384_v17 }
 0x147   :  { %v371_v21 = vadd.f32 1e-05, %v365_v18  ;;  %v408_v27 = vmul.f32 %v599_v23, %v402_v22 }
 0x148   :  { %v386_v24 = vsub.f32 1.5, %v385_v20 }
 0x149   :  { %609 = vrsqrt.f32 %v371_v21  ;;  %v414_v33 = vadd.f32 %v600_v57, %v408_v27  ;;  %vm398_vm10 = vweird.f32 %v371_v21 }
 0x14a   :  { %v387_v25 = vmul.f32 %v608_v11, %v386_v24 }
 0x14b   :  { %v417_v38 = vmax.f32 %v414_v33, 0.0 }
 0x14c   :  { %v391_v28 = vsel %vm390_vm8, %v608_v11, %v387_v25 }
 0x14d   :  { %v403_v29 = vmul.f32 %v391_v28, %v367_v26  ;;  %v602_v28 = vld [vmem:[%s986_s9] ss:$0 sm:$0xff] }
 0x14f   :  { %v610_v30 = vpop.eup %609  ;;  %v409_v32 = vmul.f32 %v599_v23, %v403_v29 }
 0x150   :  { %v393_v31 = vmul.f32 %v610_v30, %v371_v21  ;;  %vm399_vm9 = vweird.f32 %v610_v30 }
 0x151   :  { %v415_v36 = vadd.f32 %v600_v57, %v409_v32  ;;  %vm400_vm11 = vmor %vm398_vm10, %vm399_vm9 }
 0x152   :  { %v394_v35 = vmul.f32 %v610_v30, %v393_v31 }
 0x153   :  { %v418_v39 = vmax.f32 %v415_v36, 0.0 }
 0x154   :  { %v395_v37 = vmul.f32 0.5, %v394_v35  ;;  %v547_v35 = vld [vmem:[%s987_s4] sm:$0xff] }
 0x155   :  { %v436_v4 = vpack.c.bf16 %v418_v39, %v417_v38 }
 0x156   :  { %v396_v40 = vsub.f32 1.5, %v395_v37 }
 0x157   :  { %454 = vmatmul.bf16.vlgmr.msra.gmra.mxu0 %v436_v4 }
 0x158   :  { %v397_v41 = vmul.f32 %v610_v30, %v396_v40 }
 0x15a   :  { %v401_v43 = vsel %vm400_vm11, %v610_v30, %v397_v41 }
 0x15b   :  { %v404_v44 = vmul.f32 %v401_v43, %v368_v42 }
 0x15d   :  { %v410_v45 = vmul.f32 %v599_v23, %v404_v44 }
 0x15f   :  { %v416_v46 = vadd.f32 %v600_v57, %v410_v45 }
 0x161   :  { %v419_v47 = vmax.f32 %v416_v46, 0.0 }
 0x163   :  { %v437_v48 = vpack.c.bf16 %v419_v47, %v419_v47 }
 0x165   :  { %459 = vmatmul.bf16.vlgmr.msrb.gmra.mxu1 %v437_v48 }
 0x1d4   :  { %v455_v49 = vpop.f32.mrf.mxu0 }
 0x1d5   :  { %466 = vadd.xlane.f32.xlu0 %v455_v49  ;;  %v475_v50 = vmul.f32 %v455_v49, %v455_v49 }
 0x1dc   :  { %v936_v51 = vpop.f32.mrf.mxu0 }
 0x1dd   :  { %478 = vadd.xlane.f32.xlu0 %v475_v50  ;;  %468 = vadd.xlane.f32.xlu1 %v936_v51  ;;  %v476_v12 = vmul.f32 %v936_v51, %v936_v51 }
 0x1e2   :  { %v939_v52 = vpop.f32.mrf.mxu1 }
 0x1e3   :  { %470 = vadd.xlane.f32.xlu2 %v939_v52  ;;  %v477_v53 = vmul.f32 %v939_v52, %v939_v52 }
 0x1e5   :  { %480 = vadd.xlane.f32.xlu1 %v476_v12 }
 0x1ea   :  { %v462_v54 = vpop.f32.mrf.mxu1 }
 0x1eb   :  { %482 = vadd.xlane.f32.xlu2 %v477_v53 }
 0x248   :  { %v467_v55 = vpop.xlane.xlu0 %466 }
 0x249   :  { %v472_v56 = vmul.f32 %v467_v55, %v895_v34 }
 0x24b   :  { %v487_v60 = vmul.f32 %v472_v56, %v472_v56  ;;  %v496_v26 = vsub.f32 %v455_v49, %v472_v56  ;;  %v548_v49 = vld [vmem:[%s987_s4 + $0x8] sm:$0xff]  ;;  %v549_v56 = vld [vmem:[%s987_s4 + $0x10] sm:$0xff] }
 0x250   :  { %v479_v58 = vpop.xlane.xlu0 %478  ;;  %v469_v59 = vpop.xlane.xlu1 %468 }
 0x251   :  { %v484_v61 = vmul.f32 %v479_v58, %v895_v34  ;;  %v473_v0 = vmul.f32 %v469_v59, %v895_v34 }
 0x253   :  { %v490_v62 = vsub.f32 %v484_v61, %v487_v60  ;;  %v488_v5 = vmul.f32 %v473_v0, %v473_v0  ;;  %v497_v4 = vsub.f32 %v936_v51, %v473_v0 }
 0x255   :  { %v493_v63 = vmax.f32 %v490_v62, 0.0 }
 0x256   :  { %v471_v1 = vpop.xlane.xlu2 %470 }
 0x257   :  { %v499_v2 = vadd.f32 1e-05, %v493_v63  ;;  %v474_v7 = vmul.f32 %v471_v1, %v895_v34 }
 0x258   :  { %v481_v3 = vpop.xlane.xlu1 %480 }
 0x259   :  { %611 = vrsqrt.f32 %v499_v2  ;;  %v485_v6 = vmul.f32 %v481_v3, %v895_v34  ;;  %v489_v11 = vmul.f32 %v474_v7, %v474_v7  ;;  %vm508_vm13 = vweird.f32 %v499_v2 }
 0x25a   :  { %v498_v48 = vsub.f32 %v939_v52, %v474_v7 }
 0x25b   :  { %v491_v8 = vsub.f32 %v485_v6, %v488_v5 }
 0x25d   :  { %v494_v9 = vmax.f32 %v491_v8, 0.0 }
 0x25e   :  { %v483_v10 = vpop.xlane.xlu2 %482 }
 0x25f   :  { %v486_v13 = vmul.f32 %v483_v10, %v895_v34  ;;  %v612_v14 = vpop.eup %611  ;;  %v500_v15 = vadd.f32 1e-05, %v494_v9  ;;  %v601_v34 = vld [vmem:[%s985_s8] ss:$0 sm:$0xff] }
 0x260   :  { %v503_v16 = vmul.f32 %v612_v14, %v499_v2  ;;  %vm509_vm12 = vweird.f32 %v612_v14 }
 0x261   :  { %v492_v17 = vsub.f32 %v486_v13, %v489_v11  ;;  %613 = vrsqrt.f32 %v500_v15  ;;  %vm510_vm14 = vmor %vm508_vm13, %vm509_vm12  ;;  %vm518_vm0 = vweird.f32 %v500_v15 }
 0x262   :  { %v504_v18 = vmul.f32 %v612_v14, %v503_v16 }
 0x263   :  { %v495_v19 = vmax.f32 %v492_v17, 0.0 }
 0x264   :  { %v505_v20 = vmul.f32 0.5, %v504_v18 }
 0x265   :  { %v501_v21 = vadd.f32 1e-05, %v495_v19 }
 0x266   :  { %v506_v22 = vsub.f32 1.5, %v505_v20 }
 0x267   :  { %615 = vrsqrt.f32 %v501_v21  ;;  %v614_v23 = vpop.eup %613  ;;  %vm528_vm3 = vweird.f32 %v501_v21 }
 0x268   :  { %v507_v24 = vmul.f32 %v612_v14, %v506_v22  ;;  %v513_v25 = vmul.f32 %v614_v23, %v500_v15  ;;  %vm519_vm15 = vweird.f32 %v614_v23 }
 0x269   :  { %vm520_vm1 = vmor %vm518_vm0, %vm519_vm15 }
 0x26a   :  { %v511_v27 = vsel %vm510_vm14, %v612_v14, %v507_v24  ;;  %v514_v57 = vmul.f32 %v614_v23, %v513_v25 }
 0x26b   :  { %v532_v29 = vmul.f32 %v511_v27, %v496_v26 }
 0x26c   :  { %v515_v31 = vmul.f32 0.5, %v514_v57 }
 0x26d   :  { %v616_v30 = vpop.eup %615  ;;  %v538_v32 = vmul.f32 %v601_v34, %v532_v29 }
 0x26e   :  { %v523_v33 = vmul.f32 %v616_v30, %v501_v21  ;;  %v516_v36 = vsub.f32 1.5, %v515_v31  ;;  %vm529_vm2 = vweird.f32 %v616_v30 }
 0x26f   :  { %v544_v37 = vadd.f32 %v602_v28, %v538_v32  ;;  %vm530_vm4 = vmor %vm528_vm3, %vm529_vm2 }
 0x270   :  { %v524_v38 = vmul.f32 %v616_v30, %v523_v33  ;;  %v517_v39 = vmul.f32 %v614_v23, %v516_v36 }
 0x271   :  { %v550_v40 = vadd.f32 %v547_v35, %v544_v37 }
 0x272   :  { %v525_v41 = vmul.f32 0.5, %v524_v38  ;;  %v521_v42 = vsel %vm520_vm1, %v614_v23, %v517_v39 }
 0x273   :  { %v553_v43 = vmax.f32 %v550_v40, 0.0  ;;  %v533_v44 = vmul.f32 %v521_v42, %v497_v4 }
 0x274   :  { %v526_v45 = vsub.f32 1.5, %v525_v41 }
 0x275   :  { %556 = vst [vmem:[%s988_s10] sm:$0xff] %v553_v43  ;;  %v539_v46 = vmul.f32 %v601_v34, %v533_v44 }
 0x276   :  { %v527_v47 = vmul.f32 %v616_v30, %v526_v45 }
 0x277   :  { %v545_v50 = vadd.f32 %v602_v28, %v539_v46 }
 0x278   :  { %v531_v51 = vsel %vm530_vm4, %v616_v30, %v527_v47 }
 0x279   :  { %v534_v12 = vmul.f32 %v531_v51, %v498_v48  ;;  %v551_v53 = vadd.f32 %v548_v49, %v545_v50 }
 0x27b   :  { %v540_v54 = vmul.f32 %v601_v34, %v534_v12  ;;  %v554_v55 = vmax.f32 %v551_v53, 0.0 }
 0x27d   :  { %v546_v58 = vadd.f32 %v602_v28, %v540_v54  ;;  %557 = vst [vmem:[%s988_s10 + $0x8] sm:$0xff] %v554_v55 }
 0x27f   :  { %v552_v52 = vadd.f32 %v549_v56, %v546_v58 }
 0x281   :  { %v555_v59 = vmax.f32 %v552_v52, 0.0 }
 0x283   :  { %558 = vst [vmem:[%s988_s10 + $0x10] sm:$0xff] %v555_v59 }

// kernel: interactor_forward.25
= control target key start
LH: loop header
LB: loop body
LE: loop exit
PB: predicated region body
PF: predicated region fallthrough
CT: control target
= control target key end

     0   :  { %s801_s0 = inlined_call_operand.vmem [shape: f32[16,128], index: 0, kind: input, shape index: {}]   ;;  %s802_s1 = inlined_call_operand.vmem [shape: f32[16,128], index: 1, kind: input, shape index: {}]   ;;  %s803_s2 = inlined_call_operand.vmem [shape: f32[128,128], index: 2, kind: input, shape index: {}]   ;;  %s804_s3 = inlined_call_operand.vmem [shape: f32[128,128], index: 3, kind: input, shape index: {}]   ;;  %s805_s4 = inlined_call_operand.vmem [shape: f32[1,128], index: 4, kind: input, shape index: {}]   ;;  %s806_s5 = inlined_call_operand.vmem [shape: f32[1,128], index: 5, kind: input, shape index: {}]   ;;  %s807_s6 = inlined_call_operand.vmem [shape: f32[128,128], index: 6, kind: input, shape index: {}]   ;;  %s808_s7 = inlined_call_operand.vmem [shape: f32[1,128], index: 7, kind: input, shape index: {}]   ;;  %s809_s8 = inlined_call_operand.vmem [shape: f32[1,128], index: 8, kind: input, shape index: {}]   ;;  %s810_s9 = inlined_call_operand.vmem [shape: f32[128,128], index: 9, kind: input, shape index: {}]   ;;  %s811_s10 = inlined_call_operand.vmem [shape: f32[1,128], index: 10, kind: input, shape index: {}]   ;;  %s812_s11 = inlined_call_operand.vmem [shape: f32[1,128], index: 11, kind: input, shape index: {}]   ;;  %s813_s12 = inlined_call_operand.hbm [shape: f32[16,128], index: 12, kind: output, shape index: {}]  }
   0x1   :  { %v85_v0 = vld [vmem:[%s804_s3 + $0x70] sm:$0xff]  ;;  %v86_v1 = vld [vmem:[%s804_s3 + $0x78] sm:$0xff]  ;;  %v83_v5 = vld [vmem:[%s804_s3 + $0x60] sm:$0xff] }
   0x2   :  { %v58_v2 = vld [vmem:[%s803_s2 + $0x70] sm:$0xff]  ;;  %v95_v3 = vpack.c.bf16 %v86_v1, %v85_v0  ;;  %v59_v4 = vld [vmem:[%s803_s2 + $0x78] sm:$0xff]  ;;  %v84_v6 = vld [vmem:[%s804_s3 + $0x68] sm:$0xff] }
   0x3   :  { %v68_v7 = vpack.c.bf16 %v59_v4, %v58_v2  ;;  %v56_v8 = vld [vmem:[%s803_s2 + $0x60] sm:$0xff]  ;;  %v57_v9 = vld [vmem:[%s803_s2 + $0x68] sm:$0xff]  ;;  %v94_v10 = vpack.c.bf16 %v84_v6, %v83_v5  ;;  %v81_v12 = vld [vmem:[%s804_s3 + $0x50] sm:$0xff] }
   0x4   :  { %96 = vmatpush.bf16.msra.mxu0 %v95_v3  ;;  %v67_v11 = vpack.c.bf16 %v57_v9, %v56_v8  ;;  %v82_v13 = vld [vmem:[%s804_s3 + $0x58] sm:$0xff]  ;;  %v54_v14 = vld [vmem:[%s803_s2 + $0x50] sm:$0xff]  ;;  %v79_v18 = vld [vmem:[%s804_s3 + $0x40] sm:$0xff] }
   0x5   :  { %110 = vmatpush.bf16.msra.mxu1 %v68_v7  ;;  %v55_v15 = vld [vmem:[%s803_s2 + $0x58] sm:$0xff]  ;;  %v93_v16 = vpack.c.bf16 %v82_v13, %v81_v12  ;;  %v80_v19 = vld [vmem:[%s804_s3 + $0x48] sm:$0xff]  ;;  %v52_v20 = vld [vmem:[%s803_s2 + $0x40] sm:$0xff] }
   0x6   :  { %v66_v17 = vpack.c.bf16 %v55_v15, %v54_v14  ;;  %v53_v21 = vld [vmem:[%s803_s2 + $0x48] sm:$0xff]  ;;  %v77_v22 = vld [vmem:[%s804_s3 + $0x30] sm:$0xff]  ;;  %v92_v23 = vpack.c.bf16 %v80_v19, %v79_v18  ;;  %v78_v24 = vld [vmem:[%s804_s3 + $0x38] sm:$0xff] }
   0x7   :  { %v50_v25 = vld [vmem:[%s803_s2 + $0x30] sm:$0xff]  ;;  %v51_v26 = vld [vmem:[%s803_s2 + $0x38] sm:$0xff]  ;;  %v65_v27 = vpack.c.bf16 %v53_v21, %v52_v20 }
   0x8   :  { %97 = vmatpush.bf16.msra.mxu0 %v94_v10 }
   0x9   :  { %111 = vmatpush.bf16.msra.mxu1 %v67_v11 }
   0xc   :  { %98 = vmatpush.bf16.msra.mxu0 %v93_v16 }
   0xd   :  { %112 = vmatpush.bf16.msra.mxu1 %v66_v17 }
   0xe   :  { %17 = vsyncpa [#allocation3], 0  ;;  %v91_v28 = vpack.c.bf16 %v78_v24, %v77_v22  ;;  %v64_v29 = vpack.c.bf16 %v51_v26, %v50_v25  ;;  %v75_v30 = vld [vmem:[%s804_s3 + $0x20] sm:$0xff]  ;;  %v76_v31 = vld [vmem:[%s804_s3 + $0x28] sm:$0xff]  ;;  %v461_v62 = vmov 128.0   ;;  %s399_s20 = sshll.u32 %s813_s12, 4  ;;  %s400_s20 = int_to_ptr.hbm [resolvable:$true] %s399_s20 }
   0xf   :  { %v48_v32 = vld [vmem:[%s803_s2 + $0x20] sm:$0xff]  ;;  %v49_v33 = vld [vmem:[%s803_s2 + $0x28] sm:$0xff]  ;;  %v90_v34 = vpack.c.bf16 %v76_v31, %v75_v30  ;;  %v73_v36 = vld [vmem:[%s804_s3 + $0x10] sm:$0xff]  ;;  %421 = vrcp.f32 %v461_v62  ;;  %s463_s21 = smov 128   ;;  %s464_s22 = smov 8  }
  0x10   :  { %99 = vmatpush.bf16.msra.mxu0 %v92_v23  ;;  %v63_v35 = vpack.c.bf16 %v49_v33, %v48_v32  ;;  %v74_v37 = vld [vmem:[%s804_s3 + $0x18] sm:$0xff]  ;;  %v46_v38 = vld [vmem:[%s803_s2 + $0x10] sm:$0xff]  ;;  %v71_v42 = vld [vmem:[%s804_s3] sm:$0xff] }
  0x11   :  { %113 = vmatpush.bf16.msra.mxu1 %v65_v27  ;;  %v47_v39 = vld [vmem:[%s803_s2 + $0x18] sm:$0xff]  ;;  %v89_v40 = vpack.c.bf16 %v74_v37, %v73_v36  ;;  %v72_v43 = vld [vmem:[%s804_s3 + $0x8] sm:$0xff]  ;;  %v44_v44 = vld [vmem:[%s803_s2] sm:$0xff] }
  0x12   :  { %v62_v41 = vpack.c.bf16 %v47_v39, %v46_v38  ;;  %v45_v45 = vld [vmem:[%s803_s2 + $0x8] sm:$0xff]  ;;  %v88_v46 = vpack.c.bf16 %v72_v43, %v71_v42  ;;  %v69_v47 = vld [vmem:[%s802_s1] sm:$0xff]  ;;  %v205_v1 = vld [vmem:[%s807_s6 + $0x70] sm:$0xff] }
  0x13   :  { %v70_v48 = vld [vmem:[%s802_s1 + $0x8] sm:$0xff]  ;;  %v61_v49 = vpack.c.bf16 %v45_v45, %v44_v44  ;;  %v635_v50 = vld [vmem:[%s801_s0] sm:$0xff]  ;;  %v206_v2 = vld [vmem:[%s807_s6 + $0x78] sm:$0xff] }
  0x14   :  { %100 = vmatpush.bf16.msra.mxu0 %v91_v28  ;;  %v640_v51 = vld [vmem:[%s801_s0 + $0x8] sm:$0xff]  ;;  %v87_v52 = vpack.c.bf16 %v70_v48, %v69_v47  ;;  %v215_v3 = vpack.c.bf16 %v206_v2, %v205_v1  ;;  %v203_v5 = vld [vmem:[%s807_s6 + $0x60] sm:$0xff]  ;;  %v201_v9 = vld [vmem:[%s807_s6 + $0x50] sm:$0xff] }
  0x15   :  { %114 = vmatpush.bf16.msra.mxu1 %v64_v29  ;;  %v60_v53 = vpack.c.bf16 %v640_v51, %v635_v50  ;;  %v422_v63 = vpop.eup %421  ;;  %v204_v6 = vld [vmem:[%s807_s6 + $0x68] sm:$0xff]  ;;  %v202_v10 = vld [vmem:[%s807_s6 + $0x58] sm:$0xff]  ;;  %v199_v13 = vld [vmem:[%s807_s6 + $0x40] sm:$0xff] }
  0x16   :  { %v131_v0 = vmul.f32 128.0, %v422_v63  ;;  %216 = vmatpush.bf16.msra.mxu2 %v215_v3  ;;  %v214_v7 = vpack.c.bf16 %v204_v6, %v203_v5  ;;  %v213_v11 = vpack.c.bf16 %v202_v10, %v201_v9  ;;  %v200_v14 = vld [vmem:[%s807_s6 + $0x48] sm:$0xff]  ;;  %vm135_vm0 = vweird.f32 %v422_v63  ;;  %v197_v17 = vld [vmem:[%s807_s6 + $0x30] sm:$0xff]  ;;  %v198_v18 = vld [vmem:[%s807_s6 + $0x38] sm:$0xff] }
  0x17   :  { %v212_v15 = vpack.c.bf16 %v200_v14, %v199_v13  ;;  %v211_v19 = vpack.c.bf16 %v198_v18, %v197_v17  ;;  %v195_v23 = vld [vmem:[%s807_s6 + $0x20] sm:$0xff]  ;;  %v196_v24 = vld [vmem:[%s807_s6 + $0x28] sm:$0xff]  ;;  %v193_v28 = vld [vmem:[%s807_s6 + $0x10] sm:$0xff] }
  0x18   :  { %101 = vmatpush.bf16.msra.mxu0 %v90_v34  ;;  %v132_v4 = vsub.f32 1.0, %v131_v0  ;;  %v210_v27 = vpack.c.bf16 %v196_v24, %v195_v23  ;;  %v194_v29 = vld [vmem:[%s807_s6 + $0x18] sm:$0xff]  ;;  %v191_v32 = vld [vmem:[%s807_s6] sm:$0xff]  ;;  %v192_v33 = vld [vmem:[%s807_s6 + $0x8] sm:$0xff] }
  0x19   :  { %115 = vmatpush.bf16.msra.mxu1 %v63_v35  ;;  %v209_v31 = vpack.c.bf16 %v194_v29, %v193_v28  ;;  %v208_v38 = vpack.c.bf16 %v192_v33, %v191_v32  ;;  %v415_v62 = vld [vmem:[%s805_s4] ss:$0 sm:$0xff]  ;;  %v304_v14 = vld [vmem:[%s810_s9 + $0x70] sm:$0xff]  ;;  %v297_v28 = vld [vmem:[%s810_s9 + $0x38] sm:$0xff] }
  0x1a   :  { %217 = vmatpush.bf16.msra.mxu2 %v214_v7  ;;  %v133_v8 = vmul.f32 %v422_v63, %v132_v4  ;;  %v416_v3 = vld [vmem:[%s806_s5] ss:$0 sm:$0xff] }
  0x1b   :  { %v302_v18 = vld [vmem:[%s810_s9 + $0x60] sm:$0xff] }
  0x1c   :  { %102 = vmatpush.bf16.msra.mxu0 %v89_v40  ;;  %v134_v12 = vadd.f32 %v422_v63, %v133_v8  ;;  %v298_v24 = vld [vmem:[%s810_s9 + $0x40] sm:$0xff] }
  0x1d   :  { %116 = vmatpush.bf16.msra.mxu1 %v62_v41  ;;  %v294_v33 = vld [vmem:[%s810_s9 + $0x20] sm:$0xff] }
  0x1e   :  { %218 = vmatpush.bf16.msra.mxu2 %v213_v11  ;;  %v678_v16 = vsel %vm135_vm0, %v422_v63, %v134_v12 }
  0x20   :  { %103 = vmatpush.bf16.msra.mxu0 %v88_v46 }
  0x21   :  { %117 = vmatpush.bf16.msra.mxu1 %v61_v49 }
  0x22   :  { %219 = vmatpush.bf16.msra.mxu2 %v212_v15  ;;  %v305_v15 = vld [vmem:[%s810_s9 + $0x78] sm:$0xff] }
  0x23   :  { %104 = vmatmul.bf16.vlgmr.msra.gmra.mxu0 %v87_v52  ;;  %v314_v17 = vpack.c.bf16 %v305_v15, %v304_v14 }
  0x24   :  { %118 = vmatmul.bf16.vlgmr.msra.gmra.mxu1 %v60_v53 }
  0x25   :  { %315 = vmatpush.bf16.msra.mxu3 %v314_v17 }
  0x26   :  { %220 = vmatpush.bf16.msra.mxu2 %v211_v19  ;;  %v303_v19 = vld [vmem:[%s810_s9 + $0x68] sm:$0xff] }
  0x2a   :  { %221 = vmatpush.bf16.msra.mxu2 %v210_v27  ;;  %v296_v27 = vld [vmem:[%s810_s9 + $0x30] sm:$0xff] }
  0x2b   :  { %v310_v29 = vpack.c.bf16 %v297_v28, %v296_v27 }
  0x2e   :  { %222 = vmatpush.bf16.msra.mxu2 %v209_v31 }
  0x32   :  { %223 = vmatpush.bf16.msra.mxu2 %v208_v38  ;;  %v292_v38 = vld [vmem:[%s810_s9 + $0x10] sm:$0xff] }
  0xa0   :  { %v105_v54 = vpop.f32.mrf.mxu0 }
  0xa1   :  { %v119_v55 = vpop.f32.mrf.mxu1 }
  0xa2   :  { %v644_v56 = vadd.f32 %v119_v55, %v105_v54 }
  0xa4   :  { %126 = vadd.xlane.f32.xlu0 %v644_v56  ;;  %v139_v57 = vmul.f32 %v644_v56, %v644_v56 }
  0xa6   :  { %141 = vadd.xlane.f32.xlu1 %v139_v57 }
  0xa8   :  { %v107_v58 = vpop.f32.mrf.mxu0 }
  0xa9   :  { %v121_v59 = vpop.f32.mrf.mxu1 }
  0xaa   :  { %v649_v60 = vadd.f32 %v121_v59, %v107_v58 }
  0xac   :  { %128 = vadd.xlane.f32.xlu0 %v649_v60  ;;  %v140_v61 = vmul.f32 %v649_v60, %v649_v60 }
  0xae   :  { %143 = vadd.xlane.f32.xlu1 %v140_v61 }
 0x117   :  { %v127_v20 = vpop.xlane.xlu0 %126 }
 0x118   :  { %v137_v21 = vmul.f32 %v678_v16, %v127_v20  ;;  %v313_v20 = vpack.c.bf16 %v303_v19, %v302_v18 }
 0x119   :  { %v142_v22 = vpop.xlane.xlu1 %141 }
 0x11a   :  { %v147_v25 = vmul.f32 %v137_v21, %v137_v21  ;;  %v145_v26 = vmul.f32 %v142_v22, %v678_v16  ;;  %v153_v58 = vsub.f32 %v644_v56, %v137_v21  ;;  %316 = vmatpush.bf16.msra.mxu3 %v313_v20  ;;  %v300_v21 = vld [vmem:[%s810_s9 + $0x50] sm:$0xff]  ;;  %v301_v22 = vld [vmem:[%s810_s9 + $0x58] sm:$0xff] }
 0x11b   :  { %v312_v23 = vpack.c.bf16 %v301_v22, %v300_v21 }
 0x11c   :  { %v149_v30 = vsub.f32 %v145_v26, %v147_v25  ;;  %v299_v25 = vld [vmem:[%s810_s9 + $0x48] sm:$0xff] }
 0x11d   :  { %v311_v26 = vpack.c.bf16 %v299_v25, %v298_v24 }
 0x11e   :  { %v151_v34 = vmax.f32 %v149_v30, 0.0  ;;  %317 = vmatpush.bf16.msra.mxu3 %v312_v23 }
 0x11f   :  { %v129_v35 = vpop.xlane.xlu0 %128 }
 0x120   :  { %v155_v36 = vadd.f32 1e-05, %v151_v34  ;;  %v138_v37 = vmul.f32 %v678_v16, %v129_v35  ;;  %v295_v34 = vld [vmem:[%s810_s9 + $0x28] sm:$0xff] }
 0x121   :  { %v144_v39 = vpop.xlane.xlu1 %143 }
 0x122   :  { %423 = vrsqrt.f32 %v155_v36  ;;  %v148_v40 = vmul.f32 %v138_v37, %v138_v37  ;;  %v146_v41 = vmul.f32 %v144_v39, %v678_v16  ;;  %vm163_vm2 = vweird.f32 %v155_v36  ;;  %318 = vmatpush.bf16.msra.mxu3 %v311_v26  ;;  %v293_v39 = vld [vmem:[%s810_s9 + $0x18] sm:$0xff] }
 0x123   :  { %v154_v1 = vsub.f32 %v649_v60, %v138_v37  ;;  %v309_v37 = vpack.c.bf16 %v295_v34, %v294_v33 }
 0x124   :  { %v150_v42 = vsub.f32 %v146_v41, %v148_v40  ;;  %v308_v41 = vpack.c.bf16 %v293_v39, %v292_v38 }
 0x126   :  { %v152_v43 = vmax.f32 %v150_v42, 0.0  ;;  %319 = vmatpush.bf16.msra.mxu3 %v310_v29  ;;  %v290_v42 = vld [vmem:[%s810_s9] sm:$0xff] }
 0x128   :  { %v424_v44 = vpop.eup %423  ;;  %v156_v46 = vadd.f32 1e-05, %v152_v43  ;;  %v291_v43 = vld [vmem:[%s810_s9 + $0x8] sm:$0xff] }
 0x129   :  { %v158_v45 = vmul.f32 %v424_v44, %v155_v36  ;;  %vm164_vm1 = vweird.f32 %v424_v44 }
 0x12a   :  { %425 = vrsqrt.f32 %v156_v46  ;;  %vm165_vm3 = vmor %vm163_vm2, %vm164_vm1  ;;  %vm173_vm5 = vweird.f32 %v156_v46  ;;  %320 = vmatpush.bf16.msra.mxu3 %v309_v37 }
 0x12b   :  { %v159_v47 = vmul.f32 %v424_v44, %v158_v45 }
 0x12d   :  { %v160_v48 = vmul.f32 0.5, %v159_v47 }
 0x12e   :  { %321 = vmatpush.bf16.msra.mxu3 %v308_v41 }
 0x12f   :  { %v161_v49 = vsub.f32 1.5, %v160_v48  ;;  %v307_v48 = vpack.c.bf16 %v291_v43, %v290_v42 }
 0x130   :  { %v426_v52 = vpop.eup %425 }
 0x131   :  { %v162_v53 = vmul.f32 %v424_v44, %v161_v49  ;;  %v168_v54 = vmul.f32 %v426_v52, %v156_v46  ;;  %vm174_vm4 = vweird.f32 %v426_v52 }
 0x132   :  { %vm175_vm6 = vmor %vm173_vm5, %vm174_vm4  ;;  %322 = vmatpush.bf16.msra.mxu3 %v307_v48 }
 0x133   :  { %v169_v55 = vmul.f32 %v426_v52, %v168_v54  ;;  %v166_v57 = vsel %vm165_vm3, %v424_v44, %v162_v53 }
 0x134   :  { %v177_v61 = vmul.f32 %v166_v57, %v153_v58 }
 0x135   :  { %v170_v59 = vmul.f32 0.5, %v169_v55 }
 0x136   :  { %v182_v2 = vmul.f32 %v415_v62, %v177_v61 }
 0x137   :  { %v171_v63 = vsub.f32 1.5, %v170_v59 }
 0x138   :  { %v187_v6 = vadd.f32 %v416_v3, %v182_v2 }
 0x139   :  { %v172_v0 = vmul.f32 %v426_v52, %v171_v63 }
 0x13a   :  { %v189_v8 = vmax.f32 %v187_v6, 0.0 }
 0x13b   :  { %v176_v4 = vsel %vm175_vm6, %v426_v52, %v172_v0 }
 0x13c   :  { %v178_v56 = vmul.f32 %v176_v4, %v154_v1 }
 0x13e   :  { %v183_v5 = vmul.f32 %v415_v62, %v178_v56 }
 0x140   :  { %v188_v7 = vadd.f32 %v416_v3, %v183_v5 }
 0x142   :  { %v190_v9 = vmax.f32 %v188_v7, 0.0  ;;  %v417_v7 = vld [vmem:[%s808_s7] ss:$0 sm:$0xff] }
 0x144   :  { %v207_v10 = vpack.c.bf16 %v190_v9, %v189_v8 }
 0x146   :  { %224 = vmatmul.bf16.vlgmr.msra.gmra.mxu2 %v207_v10 }
 0x1c9   :  { %v716_v11 = vpop.f32.mrf.mxu2 }
 0x1ca   :  { %232 = vadd.xlane.f32.xlu2 %v716_v11  ;;  %v238_v60 = vmul.f32 %v716_v11, %v716_v11 }
 0x1cc   :  { %240 = vadd.xlane.f32.xlu0 %v238_v60 }
 0x1d1   :  { %v721_v12 = vpop.f32.mrf.mxu2 }
 0x1d2   :  { %234 = vadd.xlane.f32.xlu2 %v721_v12  ;;  %v239_v13 = vmul.f32 %v721_v12, %v721_v12 }
 0x1d4   :  { %242 = vadd.xlane.f32.xlu1 %v239_v13  ;;  %v418_v13 = vld [vmem:[%s809_s8] ss:$0 sm:$0xff] }
 0x23d   :  { %v233_v30 = vpop.xlane.xlu2 %232 }
 0x23e   :  { %v236_v31 = vmul.f32 %v233_v30, %v678_v16 }
 0x23f   :  { %v241_v32 = vpop.xlane.xlu0 %240 }
 0x240   :  { %v246_v35 = vmul.f32 %v236_v31, %v236_v31  ;;  %v244_v36 = vmul.f32 %v241_v32, %v678_v16  ;;  %v252_v56 = vsub.f32 %v716_v11, %v236_v31 }
 0x242   :  { %v248_v40 = vsub.f32 %v244_v36, %v246_v35 }
 0x244   :  { %v250_v44 = vmax.f32 %v248_v40, 0.0 }
 0x245   :  { %v235_v45 = vpop.xlane.xlu2 %234 }
 0x246   :  { %v254_v46 = vadd.f32 1e-05, %v250_v44  ;;  %v237_v47 = vmul.f32 %v235_v45, %v678_v16 }
 0x247   :  { %v243_v49 = vpop.xlane.xlu1 %242 }
 0x248   :  { %427 = vrsqrt.f32 %v254_v46  ;;  %v247_v52 = vmul.f32 %v237_v47, %v237_v47  ;;  %v245_v53 = vmul.f32 %v243_v49, %v678_v16  ;;  %vm262_vm8 = vweird.f32 %v254_v46  ;;  %v419_v49 = vld [vmem:[%s811_s10] ss:$0 sm:$0xff]  ;;  %s462_s10 = smov [#allocation2]  }
 0x249   :  { %v253_v10 = vsub.f32 %v721_v12, %v237_v47  ;;  %s397_s1 = sshll.u32 %s462_s10, 4  ;;  %s398_s1 = int_to_ptr.vmem [resolvable:$true] %s397_s1 }
 0x24a   :  { %v249_v54 = vsub.f32 %v245_v53, %v247_v52 }
 0x24c   :  { %v251_v55 = vmax.f32 %v249_v54, 0.0 }
 0x24e   :  { %v428_v57 = vpop.eup %427  ;;  %v255_v59 = vadd.f32 1e-05, %v251_v55  ;;  %v420_v55 = vld [vmem:[%s812_s11] ss:$0 sm:$0xff] }
 0x24f   :  { %v257_v58 = vmul.f32 %v428_v57, %v254_v46  ;;  %vm263_vm7 = vweird.f32 %v428_v57 }
 0x250   :  { %429 = vrsqrt.f32 %v255_v59  ;;  %vm264_vm9 = vmor %vm262_vm8, %vm263_vm7  ;;  %vm272_vm11 = vweird.f32 %v255_v59 }
 0x251   :  { %v258_v61 = vmul.f32 %v428_v57, %v257_v58 }
 0x253   :  { %v259_v62 = vmul.f32 0.5, %v258_v61 }
 0x255   :  { %v260_v63 = vsub.f32 1.5, %v259_v62 }
 0x256   :  { %v430_v0 = vpop.eup %429 }
 0x257   :  { %v261_v1 = vmul.f32 %v428_v57, %v260_v63  ;;  %v267_v2 = vmul.f32 %v430_v0, %v255_v59  ;;  %vm273_vm10 = vweird.f32 %v430_v0 }
 0x258   :  { %vm274_vm12 = vmor %vm272_vm11, %vm273_vm10 }
 0x259   :  { %v268_v3 = vmul.f32 %v430_v0, %v267_v2  ;;  %v265_v4 = vsel %vm264_vm9, %v428_v57, %v261_v1 }
 0x25a   :  { %v276_v6 = vmul.f32 %v265_v4, %v252_v56 }
 0x25b   :  { %v269_v5 = vmul.f32 0.5, %v268_v3 }
 0x25c   :  { %v281_v60 = vmul.f32 %v417_v7, %v276_v6 }
 0x25d   :  { %v270_v8 = vsub.f32 1.5, %v269_v5 }
 0x25e   :  { %v286_v17 = vadd.f32 %v418_v13, %v281_v60 }
 0x25f   :  { %v271_v9 = vmul.f32 %v430_v0, %v270_v8 }
 0x260   :  { %v288_v19 = vmax.f32 %v286_v17, 0.0 }
 0x261   :  { %v275_v14 = vsel %vm274_vm12, %v430_v0, %v271_v9 }
 0x262   :  { %v277_v11 = vmul.f32 %v275_v14, %v253_v10 }
 0x264   :  { %v282_v15 = vmul.f32 %v417_v7, %v277_v11 }
 0x266   :  { %v287_v18 = vadd.f32 %v418_v13, %v282_v15 }
 0x268   :  { %v289_v20 = vmax.f32 %v287_v18, 0.0 }
 0x26a   :  { %v306_v21 = vpack.c.bf16 %v289_v20, %v288_v19 }
 0x26c   :  { %323 = vmatmul.bf16.vlgmr.msra.gmra.mxu3 %v306_v21 }
 0x2ef   :  { %v324_v22 = vpop.f32.mrf.mxu3 }
 0x2f0   :  { %331 = vadd.xlane.f32.xlu2 %v324_v22  ;;  %v337_v23 = vmul.f32 %v324_v22, %v324_v22 }
 0x2f2   :  { %339 = vadd.xlane.f32.xlu1 %v337_v23 }
 0x2f7   :  { %v326_v12 = vpop.f32.mrf.mxu3 }
 0x2f8   :  { %333 = vadd.xlane.f32.xlu0 %v326_v12  ;;  %v338_v24 = vmul.f32 %v326_v12, %v326_v12 }
 0x2fa   :  { %341 = vadd.xlane.f32.xlu2 %v338_v24 }
 0x363   :  { %v332_v25 = vpop.xlane.xlu2 %331 }
 0x364   :  { %v335_v26 = vmul.f32 %v332_v25, %v678_v16 }
 0x365   :  { %v340_v27 = vpop.xlane.xlu1 %339 }
 0x366   :  { %v345_v28 = vmul.f32 %v335_v26, %v335_v26  ;;  %v343_v29 = vmul.f32 %v340_v27, %v678_v16  ;;  %v351_v48 = vsub.f32 %v324_v22, %v335_v26 }
 0x368   :  { %v347_v30 = vsub.f32 %v343_v29, %v345_v28 }
 0x36a   :  { %v349_v31 = vmax.f32 %v347_v30, 0.0 }
 0x36b   :  { %v334_v32 = vpop.xlane.xlu0 %333 }
 0x36c   :  { %v353_v33 = vadd.f32 1e-05, %v349_v31  ;;  %v336_v34 = vmul.f32 %v334_v32, %v678_v16 }
 0x36d   :  { %v342_v35 = vpop.xlane.xlu2 %341 }
 0x36e   :  { %431 = vrsqrt.f32 %v353_v33  ;;  %v346_v36 = vmul.f32 %v336_v34, %v336_v34  ;;  %v344_v37 = vmul.f32 %v342_v35, %v678_v16  ;;  %vm361_vm14 = vweird.f32 %v353_v33 }
 0x36f   :  { %v352_v0 = vsub.f32 %v326_v12, %v336_v34 }
 0x370   :  { %v348_v38 = vsub.f32 %v344_v37, %v346_v36 }
 0x372   :  { %v350_v39 = vmax.f32 %v348_v38, 0.0 }
 0x374   :  { %v432_v40 = vpop.eup %431  ;;  %v354_v42 = vadd.f32 1e-05, %v350_v39 }
 0x375   :  { %v356_v41 = vmul.f32 %v432_v40, %v353_v33  ;;  %vm362_vm13 = vweird.f32 %v432_v40 }
 0x376   :  { %433 = vrsqrt.f32 %v354_v42  ;;  %vm363_vm15 = vmor %vm361_vm14, %vm362_vm13  ;;  %vm371_vm1 = vweird.f32 %v354_v42 }
 0x377   :  { %v357_v43 = vmul.f32 %v432_v40, %v356_v41 }
 0x379   :  { %v358_v44 = vmul.f32 0.5, %v357_v43 }
 0x37b   :  { %v359_v45 = vsub.f32 1.5, %v358_v44 }
 0x37c   :  { %v434_v46 = vpop.eup %433 }
 0x37d   :  { %v360_v47 = vmul.f32 %v432_v40, %v359_v45  ;;  %v366_v16 = vmul.f32 %v434_v46, %v354_v42  ;;  %vm372_vm0 = vweird.f32 %v434_v46 }
 0x37e   :  { %vm373_vm2 = vmor %vm371_vm1, %vm372_vm0 }
 0x37f   :  { %v364_v52 = vsel %vm363_vm15, %v432_v40, %v360_v47  ;;  %v367_v54 = vmul.f32 %v434_v46, %v366_v16 }
 0x380   :  { %v375_v53 = vmul.f32 %v364_v52, %v351_v48 }
 0x381   :  { %v368_v58 = vmul.f32 0.5, %v367_v54 }
 0x382   :  { %v380_v57 = vmul.f32 %v419_v49, %v375_v53 }
 0x383   :  { %v369_v59 = vsub.f32 1.5, %v368_v58 }
 0x384   :  { %v385_v61 = vadd.f32 %v420_v55, %v380_v57 }
 0x385   :  { %v370_v62 = vmul.f32 %v434_v46, %v369_v59 }
 0x386   :  { %v387_v63 = vadd.f32 %v385_v61, %v635_v50 }
 0x387   :  { %v374_v1 = vsel %vm373_vm2, %v434_v46, %v370_v62 }
 0x388   :  { %v389_v2 = vmax.f32 %v387_v63, 0.0  ;;  %v376_v3 = vmul.f32 %v374_v1, %v352_v0 }
 0x38a   :  { %391 = vst [vmem:[#allocation2] sm:$0xff] %v389_v2  ;;  %v381_v4 = vmul.f32 %v419_v49, %v376_v3 }
 0x38c   :  { %v386_v56 = vadd.f32 %v420_v55, %v381_v4 }
 0x38e   :  { %v388_v5 = vadd.f32 %v386_v56, %v640_v51 }
 0x390   :  { %v390_v6 = vmax.f32 %v388_v5, 0.0 }
 0x392   :  { %392 = vst [vmem:[#allocation2 + $0x8] sm:$0xff] %v390_v6 }
 0x393   :  { %405 = dma.vmem_to_hbm [thread:$0]  %s398_s1, 256, %s400_s20, [#allocation3], %s463_s21, %s463_s21, %s464_s22  }
 0x394   :  { %459 = dma.done.wait [#allocation3], 256  }
 0x395   :  { %460 = vsyncadd [#allocation3], 4294967040 }
 0x396   :  { %410 = vsyncpa [#allocation3], 1 }

// kernel: interactor_forward.24
= control target key start
LH: loop header
LB: loop body
LE: loop exit
PB: predicated region body
PF: predicated region fallthrough
CT: control target
= control target key end

     0   :  { %s1579_s13 = smov 0   ;;  %s1581_s14 = smov 0   ;;  %s2393_s0 = inlined_call_operand.vmem [shape: f32[24,8], index: 0, kind: input, shape index: {}]   ;;  %s2394_s1 = inlined_call_operand.vmem [shape: f32[16,8], index: 1, kind: input, shape index: {}]   ;;  %s2395_s2 = inlined_call_operand.vmem [shape: f32[24,128], index: 2, kind: input, shape index: {}]   ;;  %s2396_s3 = inlined_call_operand.vmem [shape: f32[3,16,8], index: 3, kind: input, shape index: {}]   ;;  %s2397_s4 = inlined_call_operand.vmem [shape: f32[8,128], index: 4, kind: input, shape index: {}]   ;;  %s2398_s5 = inlined_call_operand.vmem [shape: f32[1,128], index: 5, kind: input, shape index: {}]   ;;  %s2399_s6 = inlined_call_operand.vmem [shape: f32[128,128], index: 6, kind: input, shape index: {}]   ;;  %s2400_s7 = inlined_call_operand.vmem [shape: f32[128,128], index: 7, kind: input, shape index: {}]   ;;  %s2401_s8 = inlined_call_operand.vmem [shape: f32[1,128], index: 8, kind: input, shape index: {}]   ;;  %s2402_s9 = inlined_call_operand.vmem [shape: f32[1,128], index: 9, kind: input, shape index: {}]   ;;  %s2403_s10 = inlined_call_operand.vmem [shape: f32[16,128], index: 10, kind: output, shape index: {}]  }
   0x1   :  { %s1583_s15 = smov 0  }
   0x2 LB: > { %s29_s16 = sadd.s32 1, %s1508_s14  ;;  %p1391_p0 = scmp.ge.s32.totalorder %s1512_s15, 1  ;;  %s1512_s15 = sphi %s1583_s15, %s20_s15   ;;  %s1508_s14 = sphi %s1581_s14, %s2444_s14   ;;  %s1504_s13 = sphi %s1579_s13, %s2443_s13  }
   0x3   : > { %p30_p1 = scmp.ge.s32.totalorder %s29_s16, 3  ;;  %p360_p2 = scmp.lt.s32.totalorder %s1512_s15, 4 }
   0x5   : > { %s2446_s16 = smov (%p30_p1, %s29_s16), 0  ;;  %p361_p3 = pnand %p1391_p0, %p360_p2 }
   0x7   : > { %364 = sbr.rel (%p361_p3) target bundleno = 550 (0x226), region = 60 }
   0xc   : > { %p415_p4 = scmp.lt.s32.totalorder %s1504_s13, 2  ;;  %p1396_p5 = scmp.ne.s32.totalorder %s1504_s13, 0 }
   0xe   : > { %s416_s17 = scalar_select %p415_p4, %s1504_s13, 2 }
   0xf   : > { %448 = sbr.rel (%p1396_p5) target bundleno = 23 (0x17), region = 64 }
  0x10   : > { %s1392_s18 = sshll.u32 %s416_s17, 3  ;;  %s1404_s19 = sshll.u32 %s416_s17, 4 }
  0x11   : > { %s418_s22 = scalar_lea.vmem %s2393_s0, %s1392_s18  ;;  %s1603_s25 = scalar_lea.vmem %s2395_s2, %s1392_s18 }
  0x12   : > { %s1608_s28 = scalar_lea.vmem %s2396_s3, %s1404_s19 }
  0x14   : > { %v1514_v0 = vmov 0.0  }
  0x15   : > { %449 = vst [vmem:[%s2403_s10] sm:$0xff] %v1514_v0 }
  0x16   : > { %450 = vst [vmem:[%s2403_s10 + $0x8] sm:$0xff] %v1514_v0 }
  0x17 PF: > { %v451_v1 = vld [vmem:[%s2397_s4] sm:$0xff]  ;;  %vm457_vm0 = vcmask 64512   ;;  %v527_v4 = vld [vmem:[%s2399_s6 + $0x70] sm:$0xff]  ;;  %v528_v5 = vld [vmem:[%s2399_s6 + $0x78] sm:$0xff]  ;;  %v1515_v60 = vmov 1   ;;  %v1516_v61 = vmov 0  }
  0x18   : > { %v452_v2 = vld [vmem:[%s418_s22] sm:$0xff]  ;;  %476 = vmatpush.msra.mxu0 %v451_v1  ;;  %504 = vmatpush.msra.mxu1 %v451_v1  ;;  %v537_v6 = vpack.c.bf16 %v528_v5, %v527_v4  ;;  %v526_v8 = vld [vmem:[%s2399_s6 + $0x68] sm:$0xff]  ;;  %v523_v10 = vld [vmem:[%s2399_s6 + $0x50] sm:$0xff] }
  0x19   : > { %v481_v3 = vld [vmem:[%s2394_s1] sm:$0xff]  ;;  %1397 = vmatmul.msk.f32.vlgmr.msra.gmra.mxu0 %vm457_vm0, %v452_v2  ;;  %v524_v11 = vld [vmem:[%s2399_s6 + $0x58] sm:$0xff]  ;;  %v482_v12 = vld [vmem:[%s2394_s1 + $0x8] sm:$0xff]  ;;  %1440 = vset.pattern.permute.xlu1 %v1515_v60 }
  0x1a   : > { %1398 = vmatmul.msk.f32.vlgmr.msra.gmra.mxu1 %vm457_vm0, %v481_v3  ;;  %v525_v7 = vld [vmem:[%s2399_s6 + $0x60] sm:$0xff]  ;;  %538 = vmatpush.bf16.msra.mxu2 %v537_v6  ;;  %v565_v13 = vld [vmem:[%s2400_s7 + $0x70] sm:$0xff]  ;;  %v566_v14 = vld [vmem:[%s2400_s7 + $0x78] sm:$0xff]  ;;  %v535_v17 = vpack.c.bf16 %v524_v11, %v523_v10 }
  0x1b   : > { %v536_v9 = vpack.c.bf16 %v526_v8, %v525_v7  ;;  %v563_v15 = vld [vmem:[%s2400_s7 + $0x60] sm:$0xff]  ;;  %v564_v16 = vld [vmem:[%s2400_s7 + $0x68] sm:$0xff]  ;;  %v1657_v18 = vpack.c.bf16 %v566_v14, %v565_v13  ;;  %v561_v22 = vld [vmem:[%s2400_s7 + $0x50] sm:$0xff]  ;;  %1439 = vset.pattern.permute.xlu2 %v1516_v61  ;;  %1441 = vset.pattern.permute.xlu0 %v1515_v60 }
  0x1c   : > { %v521_v19 = vld [vmem:[%s2399_s6 + $0x40] sm:$0xff]  ;;  %v522_v20 = vld [vmem:[%s2399_s6 + $0x48] sm:$0xff]  ;;  %v1667_v21 = vpack.c.bf16 %v564_v16, %v563_v15  ;;  %v562_v23 = vld [vmem:[%s2400_s7 + $0x58] sm:$0xff]  ;;  %v1517_v16 = vmov 2  }
  0x1d   : > { %586 = vmatpush.bf16.msra.mxu3 %v1657_v18  ;;  %686 = vmatpush.bf16.msrb.mxu0 %v1657_v18  ;;  %v534_v24 = vpack.c.bf16 %v522_v20, %v521_v19  ;;  %v519_v25 = vld [vmem:[%s2399_s6 + $0x30] sm:$0xff]  ;;  %v520_v26 = vld [vmem:[%s2399_s6 + $0x38] sm:$0xff]  ;;  %v1684_v27 = vpack.c.bf16 %v562_v23, %v561_v22  ;;  %v559_v28 = vld [vmem:[%s2400_s7 + $0x40] sm:$0xff] }
  0x1e   : > { %539 = vmatpush.bf16.msra.mxu2 %v536_v9  ;;  %771 = vmatpush.bf16.msrb.mxu1 %v1657_v18  ;;  %v560_v29 = vld [vmem:[%s2400_s7 + $0x48] sm:$0xff]  ;;  %v533_v30 = vpack.c.bf16 %v520_v26, %v519_v25  ;;  %v517_v31 = vld [vmem:[%s2399_s6 + $0x20] sm:$0xff]  ;;  %v557_v34 = vld [vmem:[%s2400_s7 + $0x30] sm:$0xff] }
  0x1f   : > { %v518_v32 = vld [vmem:[%s2399_s6 + $0x28] sm:$0xff]  ;;  %v1701_v33 = vpack.c.bf16 %v560_v29, %v559_v28  ;;  %v558_v35 = vld [vmem:[%s2400_s7 + $0x38] sm:$0xff]  ;;  %v515_v37 = vld [vmem:[%s2399_s6 + $0x10] sm:$0xff]  ;;  %v1519_v28 = vmov 4  }
  0x20   : > { %v532_v36 = vpack.c.bf16 %v518_v32, %v517_v31  ;;  %v516_v38 = vld [vmem:[%s2399_s6 + $0x18] sm:$0xff]  ;;  %v1718_v39 = vpack.c.bf16 %v558_v35, %v557_v34  ;;  %v555_v40 = vld [vmem:[%s2400_s7 + $0x20] sm:$0xff]  ;;  %v556_v41 = vld [vmem:[%s2400_s7 + $0x28] sm:$0xff] }
  0x21   : > { %587 = vmatpush.bf16.msra.mxu3 %v1667_v21  ;;  %687 = vmatpush.bf16.msrb.mxu0 %v1667_v21  ;;  %v531_v42 = vpack.c.bf16 %v516_v38, %v515_v37  ;;  %v513_v43 = vld [vmem:[%s2399_s6] sm:$0xff]  ;;  %v514_v44 = vld [vmem:[%s2399_s6 + $0x8] sm:$0xff]  ;;  %v569_v45 = vpack.c.bf16 %v556_v41, %v555_v40  ;;  %v553_v46 = vld [vmem:[%s2400_s7 + $0x10] sm:$0xff] }
  0x22   : > { %1399 = vmatmul.msk.f32.gmra.mxu1 %vm457_vm0, %v482_v12  ;;  %540 = vmatpush.bf16.msra.mxu2 %v535_v17  ;;  %v554_v47 = vld [vmem:[%s2400_s7 + $0x18] sm:$0xff]  ;;  %v530_v48 = vpack.c.bf16 %v514_v44, %v513_v43  ;;  %v512_v49 = vld [vmem:[%s1603_s25] sm:$0xff]  ;;  %v552_v52 = vld [vmem:[%s2400_s7 + $0x8] sm:$0xff] }
  0x23   : > { %772 = vmatpush.bf16.msrb.mxu1 %v1667_v21  ;;  %v568_v50 = vpack.c.bf16 %v554_v47, %v553_v46  ;;  %v551_v51 = vld [vmem:[%s2400_s7] sm:$0xff]  ;;  %v529_v53 = vpack.c.bf16 %v512_v49, %v512_v49  ;;  %v1792_v2 = vld [vmem:[%s1608_s28 + $0x8] sm:$0xff] }
  0x24   : > { %v567_v54 = vpack.c.bf16 %v552_v52, %v551_v51  ;;  %v1453_v55 = vld [vmem:[%s2398_s5] ss:$0 sm:$0xff]  ;;  %757 = vperm.xlu0 %1441, %v1792_v2  }
  0x25   : > { %588 = vmatpush.bf16.msra.mxu3 %v1684_v27  ;;  %688 = vmatpush.bf16.msrb.mxu0 %v1684_v27  ;;  %v1781_v58 = vld [vmem:[%s1608_s28] sm:$0xff] }
  0x26   : > { %541 = vmatpush.bf16.msra.mxu2 %v534_v24  ;;  %753 = vperm.xlu1 %1440, %v1781_v58  }
  0x27   : > { %773 = vmatpush.bf16.msrb.mxu1 %v1684_v27  ;;  %667 = vperm.xlu2 %1439, %v1781_v58  }
  0x29   : > { %589 = vmatpush.bf16.msra.mxu3 %v1701_v33  ;;  %689 = vmatpush.bf16.msrb.mxu0 %v1701_v33 }
  0x2a   : > { %542 = vmatpush.bf16.msra.mxu2 %v533_v30 }
  0x2b   : > { %774 = vmatpush.bf16.msrb.mxu1 %v1701_v33 }
  0x2d   : > { %590 = vmatpush.bf16.msra.mxu3 %v1718_v39  ;;  %690 = vmatpush.bf16.msrb.mxu0 %v1718_v39 }
  0x2e   : > { %543 = vmatpush.bf16.msra.mxu2 %v532_v36  ;;  %1443 = vset.pattern.permute.xlu1 %v1517_v16 }
  0x2f   : > { %775 = vmatpush.bf16.msrb.mxu1 %v1718_v39  ;;  %842 = vperm.xlu1 %1443, %v1792_v2  }
  0x30   : > { %672 = vperm.xlu2 %1439, %v1792_v2  }
  0x31   : > { %591 = vmatpush.bf16.msra.mxu3 %v569_v45  ;;  %691 = vmatpush.bf16.msrb.mxu0 %v569_v45 }
  0x32   : > { %544 = vmatpush.bf16.msra.mxu2 %v531_v42 }
  0x33   : > { %776 = vmatpush.bf16.msrb.mxu1 %v569_v45 }
  0x35   : > { %592 = vmatpush.bf16.msra.mxu3 %v568_v50  ;;  %692 = vmatpush.bf16.msrb.mxu0 %v568_v50 }
  0x36   : > { %545 = vmatpush.bf16.msra.mxu2 %v530_v48 }
  0x37   : > { %777 = vmatpush.bf16.msrb.mxu1 %v568_v50  ;;  %1446 = vset.pattern.permute.xlu1 %v1519_v28 }
  0x38   : > { %1442 = vset.pattern.permute.xlu2 %v1517_v16  ;;  %1008 = vperm.xlu1 %1446, %v1781_v58  }
  0x39   : > { %546 = vmatmul.bf16.vlgmr.msra.gmra.mxu2 %v529_v53  ;;  %593 = vmatpush.bf16.msra.mxu3 %v567_v54 }
  0x3a   : > { %856 = vmatpush.bf16.msrb.mxu2 %v1657_v18  ;;  %693 = vmatpush.bf16.msrb.mxu0 %v567_v54 }
  0x3b   : > { %778 = vmatpush.bf16.msrb.mxu1 %v567_v54  ;;  %838 = vperm.xlu2 %1442, %v1781_v58  }
  0x3d   : > { %941 = vmatpush.bf16.msrb.mxu3 %v1657_v18 }
  0x3e   : > { %857 = vmatpush.bf16.msrb.mxu2 %v1667_v21  ;;  %1026 = vmatpush.bf16.msra.mxu0 %v1657_v18 }
  0x3f   : > { %1111 = vmatpush.bf16.msra.mxu1 %v1657_v18 }
  0x40   : > { %1012 = vperm.xlu1 %1446, %v1792_v2  }
  0x41   : > { %942 = vmatpush.bf16.msrb.mxu3 %v1667_v21 }
  0x42   : > { %858 = vmatpush.bf16.msrb.mxu2 %v1684_v27  ;;  %1027 = vmatpush.bf16.msra.mxu0 %v1667_v21 }
  0x43   : > { %1112 = vmatpush.bf16.msra.mxu1 %v1667_v21 }
  0x45   : > { %943 = vmatpush.bf16.msrb.mxu3 %v1684_v27 }
  0x46   : > { %859 = vmatpush.bf16.msrb.mxu2 %v1701_v33  ;;  %1028 = vmatpush.bf16.msra.mxu0 %v1684_v27 }
  0x47   : > { %1113 = vmatpush.bf16.msra.mxu1 %v1684_v27 }
  0x49   : > { %944 = vmatpush.bf16.msrb.mxu3 %v1701_v33 }
  0x4a   : > { %860 = vmatpush.bf16.msrb.mxu2 %v1718_v39  ;;  %1029 = vmatpush.bf16.msra.mxu0 %v1701_v33 }
  0x4b   : > { %1114 = vmatpush.bf16.msra.mxu1 %v1701_v33 }
  0x4d   : > { %945 = vmatpush.bf16.msrb.mxu3 %v1718_v39 }
  0x4e   : > { %861 = vmatpush.bf16.msrb.mxu2 %v569_v45  ;;  %1030 = vmatpush.bf16.msra.mxu0 %v1718_v39 }
  0x4f   : > { %1115 = vmatpush.bf16.msra.mxu1 %v1718_v39 }
  0x51   : > { %946 = vmatpush.bf16.msrb.mxu3 %v569_v45 }
  0x52   : > { %862 = vmatpush.bf16.msrb.mxu2 %v568_v50  ;;  %1031 = vmatpush.bf16.msra.mxu0 %v569_v45 }
  0x53   : > { %1116 = vmatpush.bf16.msra.mxu1 %v569_v45 }
  0x55   : > { %947 = vmatpush.bf16.msrb.mxu3 %v568_v50 }
  0x56   : > { %863 = vmatpush.bf16.msrb.mxu2 %v567_v54  ;;  %1032 = vmatpush.bf16.msra.mxu0 %v568_v50 }
  0x57   : > { %1117 = vmatpush.bf16.msra.mxu1 %v568_v50 }
  0x59   : > { %948 = vmatpush.bf16.msrb.mxu3 %v567_v54 }
  0x5a   : > { %1196 = vmatpush.bf16.msra.mxu2 %v1657_v18  ;;  %1033 = vmatpush.bf16.msra.mxu0 %v567_v54 }
  0x5b   : > { %1118 = vmatpush.bf16.msra.mxu1 %v567_v54 }
  0x5e   : > { %1197 = vmatpush.bf16.msra.mxu2 %v1667_v21  ;;  %v1518_v21 = vmov 3  }
  0x5f   : > { %1444 = vset.pattern.permute.xlu0 %v1518_v21  ;;  %1445 = vset.pattern.permute.xlu2 %v1518_v21 }
  0x60   : > { %923 = vperm.xlu0 %1444, %v1781_v58   ;;  %927 = vperm.xlu2 %1445, %v1792_v2  }
  0x62   : > { %1198 = vmatpush.bf16.msra.mxu2 %v1684_v27 }
  0x66   : > { %1199 = vmatpush.bf16.msra.mxu2 %v1701_v33  ;;  %v1520_v33 = vmov 5  }
  0x68   : > { %1448 = vset.pattern.permute.xlu0 %v1520_v33  ;;  %1447 = vset.pattern.permute.xlu2 %v1520_v33 }
  0x69   : > { %1097 = vperm.xlu0 %1448, %v1792_v2   ;;  %1093 = vperm.xlu2 %1447, %v1781_v58  }
  0x6a   : > { %1200 = vmatpush.bf16.msra.mxu2 %v1718_v39 }
  0x6e   : > { %1201 = vmatpush.bf16.msra.mxu2 %v569_v45 }
  0x72   : > { %1202 = vmatpush.bf16.msra.mxu2 %v568_v50 }
  0x76   : > { %1203 = vmatpush.bf16.msra.mxu2 %v567_v54 }
  0x96   : > { %v478_v56 = vpop.f32.mrf.mxu0 }
  0x97   : > { %v1778_v57 = vpop.f32.mrf.mxu1  ;;  %v1783_v59 = vadd.f32 %v1453_v55, %v478_v56 }
  0x99   : > { %v579_v62 = vperm.slane %v1783_v59, 0  ;;  %v679_v63 = vperm.slane %v1783_v59, 1  ;;  %v764_v0 = vperm.slane %v1783_v59, 2  ;;  %v849_v1 = vperm.slane %v1783_v59, 3 }
  0x9a   : > { %v934_v26 = vperm.slane %v1783_v59, 4  ;;  %v1019_v27 = vperm.slane %v1783_v59, 5  ;;  %v1104_v29 = vperm.slane %v1783_v59, 6  ;;  %v1189_v30 = vperm.slane %v1783_v59, 7 }
  0x9b   : > { %v580_v3 = vsub.f32 %v579_v62, %v1778_v57  ;;  %v680_v4 = vsub.f32 %v679_v63, %v1778_v57  ;;  %v765_v5 = vsub.f32 %v764_v0, %v1778_v57  ;;  %v850_v6 = vsub.f32 %v849_v1, %v1778_v57 }
  0x9c   : > { %v935_v36 = vsub.f32 %v934_v26, %v1778_v57  ;;  %v1020_v37 = vsub.f32 %v1019_v27, %v1778_v57  ;;  %v1105_v38 = vsub.f32 %v1104_v29, %v1778_v57  ;;  %v1190_v39 = vsub.f32 %v1189_v30, %v1778_v57 }
  0x9d   : > { %v582_v12 = vmax.f32 %v580_v3, 0.0  ;;  %v682_v13 = vmax.f32 %v680_v4, 0.0  ;;  %v767_v14 = vmax.f32 %v765_v5, 0.0  ;;  %v852_v15 = vmax.f32 %v850_v6, 0.0 }
  0x9e   : > { %v937_v44 = vmax.f32 %v935_v36, 0.0  ;;  %v1022_v45 = vmax.f32 %v1020_v37, 0.0  ;;  %v1107_v46 = vmax.f32 %v1105_v38, 0.0  ;;  %v1192_v47 = vmax.f32 %v1190_v39, 0.0 }
  0x9f   : > { %v509_v7 = vpop.f32.mrf.mxu1 }
  0xa0   : > { %v581_v8 = vsub.f32 %v579_v62, %v509_v7  ;;  %v681_v9 = vsub.f32 %v679_v63, %v509_v7  ;;  %v766_v10 = vsub.f32 %v764_v0, %v509_v7  ;;  %v851_v11 = vsub.f32 %v849_v1, %v509_v7 }
  0xa1   : > { %v936_v31 = vsub.f32 %v934_v26, %v509_v7  ;;  %v1021_v32 = vsub.f32 %v1019_v27, %v509_v7  ;;  %v1106_v34 = vsub.f32 %v1104_v29, %v509_v7  ;;  %v1191_v35 = vsub.f32 %v1189_v30, %v509_v7 }
  0xa2   : > { %v583_v17 = vmax.f32 %v581_v8, 0.0  ;;  %v683_v18 = vmax.f32 %v681_v9, 0.0  ;;  %v768_v19 = vmax.f32 %v766_v10, 0.0  ;;  %v853_v20 = vmax.f32 %v851_v11, 0.0 }
  0xa3   : > { %v938_v40 = vmax.f32 %v936_v31, 0.0  ;;  %v1023_v41 = vmax.f32 %v1021_v32, 0.0  ;;  %v1108_v42 = vmax.f32 %v1106_v34, 0.0  ;;  %v1193_v43 = vmax.f32 %v1191_v35, 0.0 }
  0xa4   : > { %v584_v22 = vpack.c.bf16 %v583_v17, %v582_v12  ;;  %v684_v23 = vpack.c.bf16 %v683_v18, %v682_v13  ;;  %v769_v24 = vpack.c.bf16 %v768_v19, %v767_v14  ;;  %v854_v25 = vpack.c.bf16 %v853_v20, %v852_v15 }
  0xa5   : > { %v939_v48 = vpack.c.bf16 %v938_v40, %v937_v44  ;;  %v1024_v49 = vpack.c.bf16 %v1023_v41, %v1022_v45  ;;  %v1109_v50 = vpack.c.bf16 %v1108_v42, %v1107_v46  ;;  %v1194_v51 = vpack.c.bf16 %v1193_v43, %v1192_v47  ;;  %v1901_v47 = vpop.permute.xlu2 %667 }
  0xa6   : > { %594 = vmatmul.bf16.vlgmr.msra.gmra.mxu3 %v584_v22  ;;  %694 = vmatmul.bf16.vlgmr.msrb.gmra.mxu0 %v684_v23 }
  0xa7   : > { %779 = vmatmul.bf16.vlgmr.msrb.gmra.mxu1 %v769_v24  ;;  %864 = vmatmul.bf16.vlgmr.msrb.gmra.mxu2 %v854_v25 }
  0xb6   : > { %949 = vmatmul.bf16.vlgmr.msrb.gmra.mxu3 %v939_v48  ;;  %1034 = vmatmul.bf16.vlgmr.msra.gmra.mxu0 %v1024_v49  ;;  %v1904_v48 = vpop.permute.xlu1 %753  ;;  %v1906_v49 = vpop.permute.xlu2 %672 }
  0xb7   : > { %1119 = vmatmul.bf16.vlgmr.msra.gmra.mxu1 %v1109_v50  ;;  %1204 = vmatmul.bf16.vlgmr.msra.gmra.mxu2 %v1194_v51  ;;  %v1909_v50 = vpop.permute.xlu0 %757 }
  0xbc   : > { %v1816_v52 = vpop.f32.mrf.mxu2 }
  0xbd   : > { %v685_v54 = vperm.slane %v1816_v52, 1  ;;  %v770_v55 = vperm.slane %v1816_v52, 2  ;;  %v585_v62 = vperm.slane %v1816_v52, 0  ;;  %v855_v7 = vperm.slane %v1816_v52, 3 }
  0xbe   : > { %v1025_v17 = vperm.slane %v1816_v52, 5  ;;  %v1110_v21 = vperm.slane %v1816_v52, 6  ;;  %v940_v27 = vperm.slane %v1816_v52, 4  ;;  %v1195_v34 = vperm.slane %v1816_v52, 7  ;;  %v1913_v52 = vpop.permute.xlu1 %842 }
  0xbf   : > { %2406 = vst [vmem:[#allocation3_spill] sm:$0xff] %v1913_v52 }
  0xc4   : > { %v549_v53 = vpop.f32.mrf.mxu2 }
  0xc5   : > { %v1521_v53 = vmov 128.0  }
  0xc6   : > { %1456 = vrcp.f32 %v1521_v53 }
 0x123   : > { %v695_v56 = vpop.f32.mrf.mxu0 }
 0x124   : > { %v1820_v57 = vadd.f32 %v695_v56, %v685_v54  ;;  %v780_v59 = vpop.f32.mrf.mxu1  ;;  %v1523_v56 = vmov 7  }
 0x125   : > { %v1822_v60 = vadd.f32 %v780_v59, %v770_v55  ;;  %1451 = vset.pattern.permute.xlu0 %v1523_v56  ;;  %v1457_v59 = vpop.eup %1456 }
 0x126   : > { %700 = vadd.xlane.f32.xlu0 %v1820_v57  ;;  %v706_v61 = vmul.f32 %v1820_v57, %v1820_v57  ;;  %vm609_vm1 = vweird.f32 %v1457_v59 }
 0x127   : > { %785 = vadd.xlane.f32.xlu1 %v1822_v60  ;;  %v791_v4 = vmul.f32 %v1822_v60, %v1822_v60 }
 0x128   : > { %708 = vadd.xlane.f32.xlu2 %v706_v61  ;;  %v1919_v61 = vpop.permute.xlu0 %923 }
 0x129   : > { %v595_v63 = vpop.f32.mrf.mxu3 }
 0x12a   : > { %v1829_v0 = vadd.f32 %v595_v63, %v585_v62  ;;  %v865_v6 = vpop.f32.mrf.mxu2  ;;  %v1922_v63 = vpop.permute.xlu1 %1008 }
 0x12b   : > { %v697_v3 = vpop.f32.mrf.mxu0  ;;  %v1841_v10 = vadd.f32 %v865_v6, %v855_v7 }
 0x12c   : > { %v613_v1 = vmul.f32 %v1829_v0, %v1829_v0  ;;  %v1836_v5 = vadd.f32 %v697_v3, %v685_v54  ;;  %v782_v9 = vpop.f32.mrf.mxu1  ;;  %v1915_v54 = vpop.permute.xlu2 %838 }
 0x12d   : > { %v1844_v11 = vadd.f32 %v782_v9, %v770_v55  ;;  %v876_v13 = vmul.f32 %v1841_v10, %v1841_v10  ;;  %v1522_v55 = vmov 6  }
 0x12e   : > { %600 = vadd.xlane.f32.xlu0 %v1829_v0  ;;  %v707_v8 = vmul.f32 %v1836_v5, %v1836_v5  ;;  %1450 = vset.pattern.permute.xlu2 %v1522_v55 }
 0x12f   : > { %615 = vadd.xlane.f32.xlu1 %v613_v1  ;;  %v792_v12 = vmul.f32 %v1844_v11, %v1844_v11 }
 0x130   : > { %793 = vadd.xlane.f32.xlu2 %v791_v4  ;;  %1449 = vset.pattern.permute.xlu1 %v1522_v55  ;;  %v1926_v6 = vpop.permute.xlu0 %1097 }
 0x131   : > { %v597_v14 = vpop.f32.mrf.mxu3  ;;  %2408 = vst [vmem:[#allocation5_spill] sm:$0xff] %v1926_v6 }
 0x132   : > { %v1852_v15 = vadd.f32 %v597_v14, %v585_v62  ;;  %v867_v22 = vpop.f32.mrf.mxu2  ;;  %v605_v62 = vmul.f32 128.0, %v1457_v59 }
 0x133   : > { %v1035_v16 = vpop.f32.mrf.mxu0  ;;  %v1864_v24 = vadd.f32 %v867_v22, %v855_v7  ;;  %v1928_v7 = vpop.permute.xlu1 %1012 }
 0x134   : > { %v614_v18 = vmul.f32 %v1852_v15, %v1852_v15  ;;  %v1857_v19 = vadd.f32 %v1035_v16, %v1025_v17  ;;  %v1120_v20 = vpop.f32.mrf.mxu1  ;;  %v1924_v1 = vpop.permute.xlu2 %927  ;;  %v606_v3 = vsub.f32 1.0, %v605_v62  ;;  %2409 = vst [vmem:[#allocation6_spill] sm:$0xff] %v1928_v7 }
 0x135   : > { %v1862_v23 = vadd.f32 %v1120_v20, %v1110_v21  ;;  %v877_v28 = vmul.f32 %v1864_v24, %v1864_v24  ;;  %2407 = vst [vmem:[#allocation4_spill] sm:$0xff] %v1924_v1 }
 0x136   : > { %710 = vadd.xlane.f32.xlu0 %v707_v8  ;;  %v1046_v32 = vmul.f32 %v1857_v19, %v1857_v19  ;;  %v607_v4 = vmul.f32 %v1457_v59, %v606_v3 }
 0x137   : > { %702 = vadd.xlane.f32.xlu1 %v1836_v5  ;;  %v1131_v25 = vmul.f32 %v1862_v23, %v1862_v23 }
 0x138   : > { %870 = vadd.xlane.f32.xlu2 %v1841_v10  ;;  %v608_v9 = vadd.f32 %v1457_v59, %v607_v4 }
 0x139   : > { %v950_v26 = vpop.f32.mrf.mxu3 }
 0x13a   : > { %v1873_v29 = vadd.f32 %v950_v26, %v940_v27  ;;  %v1205_v30 = vpop.f32.mrf.mxu2 }
 0x13b   : > { %v1037_v31 = vpop.f32.mrf.mxu0  ;;  %v1883_v37 = vadd.f32 %v1205_v30, %v1195_v34 }
 0x13c   : > { %v1878_v33 = vadd.f32 %v1037_v31, %v1025_v17  ;;  %v1122_v38 = vpop.f32.mrf.mxu1  ;;  %v961_v44 = vmul.f32 %v1873_v29, %v1873_v29  ;;  %v1930_v8 = vpop.permute.xlu2 %1093 }
 0x13d   : > { %v1888_v41 = vadd.f32 %v1122_v38, %v1110_v21  ;;  %v1216_v51 = vmul.f32 %v1883_v37, %v1883_v37  ;;  %2410 = vst [vmem:[#allocation7_spill] sm:$0xff] %v1930_v8 }
 0x13e   : > { %795 = vadd.xlane.f32.xlu0 %v792_v12  ;;  %v1047_v36 = vmul.f32 %v1878_v33, %v1878_v33  ;;  %v1932_v12 = vsel %vm609_vm1, %v1457_v59, %v608_v9 }
 0x13f   : > { %878 = vadd.xlane.f32.xlu1 %v876_v13  ;;  %v1132_v43 = vmul.f32 %v1888_v41, %v1888_v41 }
 0x140   : > { %787 = vadd.xlane.f32.xlu2 %v1844_v11 }
 0x141   : > { %v952_v35 = vpop.f32.mrf.mxu3 }
 0x142   : > { %v1885_v39 = vadd.f32 %v952_v35, %v940_v27  ;;  %v1207_v40 = vpop.f32.mrf.mxu2 }
 0x143   : > { %v1891_v42 = vadd.f32 %v1207_v40, %v1195_v34 }
 0x144   : > { %v962_v46 = vmul.f32 %v1885_v39, %v1885_v39 }
 0x145   : > { %2405 = vst [vmem:[#allocation2_spill] sm:$0xff] %v1891_v42  ;;  %v1217_v45 = vmul.f32 %v1891_v42, %v1891_v42 }
 0x146   : > { %602 = vadd.xlane.f32.xlu0 %v1852_v15 }
 0x147   : > { %617 = vadd.xlane.f32.xlu1 %v614_v18 }
 0x148   : > { %1040 = vadd.xlane.f32.xlu2 %v1857_v19 }
 0x14e   : > { %872 = vadd.xlane.f32.xlu0 %v1864_v24 }
 0x14f   : > { %1133 = vadd.xlane.f32.xlu1 %v1131_v25 }
 0x150   : > { %1125 = vadd.xlane.f32.xlu2 %v1862_v23 }
 0x156   : > { %880 = vadd.xlane.f32.xlu0 %v877_v28 }
 0x157   : > { %955 = vadd.xlane.f32.xlu1 %v1873_v29 }
 0x158   : > { %1048 = vadd.xlane.f32.xlu2 %v1046_v32 }
 0x15e   : > { %1050 = vadd.xlane.f32.xlu0 %v1047_v36 }
 0x15f   : > { %1210 = vadd.xlane.f32.xlu1 %v1883_v37 }
 0x160   : > { %957 = vadd.xlane.f32.xlu2 %v1885_v39 }
 0x166   : > { %1135 = vadd.xlane.f32.xlu0 %v1132_v43 }
 0x167   : > { %963 = vadd.xlane.f32.xlu1 %v961_v44 }
 0x168   : > { %1220 = vadd.xlane.f32.xlu2 %v1217_v45 }
 0x16e   : > { %965 = vadd.xlane.f32.xlu0 %v962_v46 }
 0x16f   : > { %1042 = vadd.xlane.f32.xlu1 %v1878_v33 }
 0x177   : > { %1127 = vadd.xlane.f32.xlu1 %v1888_v41 }
 0x17f   : > { %1218 = vadd.xlane.f32.xlu1 %v1216_v51 }
 0x180   : > { %1182 = vperm.xlu2 %1450, %v1792_v2  }
 0x182   : > { %1263 = vperm.xlu0 %1451, %v1781_v58  }
 0x187   : > { %1212 = vadd.xlane.f32.xlu1 %v1891_v42 }
 0x199   : > { %v701_v13 = vpop.xlane.xlu0 %700 }
 0x19a   : > { %v786_v14 = vpop.xlane.xlu1 %785  ;;  %v1935_v16 = vmul.f32 %v701_v13, %v1932_v12 }
 0x19b   : > { %v709_v17 = vpop.xlane.xlu2 %708  ;;  %v1942_v25 = vmul.f32 %v786_v14, %v1932_v12 }
 0x19c   : > { %v714_v18 = vmul.f32 %v1935_v16, %v1935_v16  ;;  %v712_v20 = vmul.f32 %v709_v17, %v1932_v12 }
 0x19d   : > { %v799_v35 = vmul.f32 %v1942_v25, %v1942_v25 }
 0x19e   : > { %v716_v21 = vsub.f32 %v712_v20, %v714_v18 }
 0x1a0   : > { %v718_v22 = vmax.f32 %v716_v21, 0.0  ;;  %1178 = vperm.xlu1 %1449, %v1781_v58  }
 0x1a1   : > { %v601_v26 = vpop.xlane.xlu0 %600 }
 0x1a2   : > { %v722_v27 = vadd.f32 1e-05, %v718_v22  ;;  %v1945_v28 = vmul.f32 %v1932_v12, %v601_v26  ;;  %v616_v30 = vpop.xlane.xlu1 %615 }
 0x1a3   : > { %v794_v31 = vpop.xlane.xlu2 %793  ;;  %v619_v34 = vmul.f32 %v616_v30, %v1932_v12 }
 0x1a4   : > { %1458 = vrsqrt.f32 %v722_v27  ;;  %v621_v32 = vmul.f32 %v1945_v28, %v1945_v28  ;;  %v797_v58 = vmul.f32 %v794_v31, %v1932_v12  ;;  %vm730_vm3 = vweird.f32 %v722_v27 }
 0x1a6   : > { %v623_v36 = vsub.f32 %v619_v34, %v621_v32  ;;  %v801_v38 = vsub.f32 %v797_v58, %v799_v35 }
 0x1a8   : > { %v625_v40 = vmax.f32 %v623_v36, 0.0  ;;  %1452 = vset.pattern.permute.xlu1 %v1523_v56  ;;  %v803_v43 = vmax.f32 %v801_v38, 0.0 }
 0x1a9   : > { %v711_v44 = vpop.xlane.xlu0 %710  ;;  %1267 = vperm.xlu1 %1452, %v1792_v2  }
 0x1aa   : > { %v1459_v45 = vpop.eup %1458  ;;  %v629_v46 = vadd.f32 1e-05, %v625_v40  ;;  %v703_v51 = vpop.xlane.xlu1 %702  ;;  %v807_v55 = vadd.f32 1e-05, %v803_v43  ;;  %v713_v31 = vmul.f32 %v711_v44, %v1932_v12  ;;  %v720_v44 = vsub.f32 %v1820_v57, %v1935_v16 }
 0x1ab   : > { %v725_v53 = vmul.f32 %v1459_v45, %v722_v27  ;;  %v871_v59 = vpop.xlane.xlu2 %870  ;;  %v1955_v4 = vmul.f32 %v703_v51, %v1932_v12  ;;  %vm731_vm2 = vweird.f32 %v1459_v45 }
 0x1ac   : > { %1460 = vrsqrt.f32 %v629_v46  ;;  %vm1960_vm4 = vmor %vm730_vm3, %vm731_vm2  ;;  %vm637_vm7 = vweird.f32 %v629_v46  ;;  %vm815_vm9 = vweird.f32 %v807_v55  ;;  %v1976_v57 = vmul.f32 %v871_v59, %v1932_v12 }
 0x1ad   : > { %v726_v62 = vmul.f32 %v1459_v45, %v725_v53  ;;  %1462 = vrsqrt.f32 %v807_v55  ;;  %v715_v21 = vmul.f32 %v1955_v4, %v1955_v4 }
 0x1af   : > { %v727_v3 = vmul.f32 0.5, %v726_v62  ;;  %v717_v35 = vsub.f32 %v713_v31, %v715_v21  ;;  %v627_v62 = vsub.f32 %v1829_v0, %v1945_v28  ;;  %v805_v0 = vsub.f32 %v1822_v60, %v1942_v25 }
 0x1b0   : > { %v884_v60 = vmul.f32 %v1976_v57, %v1976_v57 }
 0x1b1   : > { %v796_v9 = vpop.xlane.xlu0 %795  ;;  %v728_v56 = vsub.f32 1.5, %v727_v3 }
 0x1b2   : > { %v1461_v13 = vpop.eup %1460  ;;  %v879_v14 = vpop.xlane.xlu1 %878  ;;  %v798_v58 = vmul.f32 %v796_v9, %v1932_v12 }
 0x1b3   : > { %v1463_v17 = vpop.eup %1462  ;;  %v632_v18 = vmul.f32 %v1461_v13, %v629_v46  ;;  %v788_v2 = vpop.xlane.xlu2 %787  ;;  %v729_v26 = vmul.f32 %v1459_v45, %v728_v56  ;;  %vm638_vm5 = vweird.f32 %v1461_v13  ;;  %v719_v56 = vmax.f32 %v717_v35, 0.0 }
 0x1b4   : > { %v810_v20 = vmul.f32 %v1463_v17, %v807_v55  ;;  %vm816_vm6 = vweird.f32 %v1463_v17  ;;  %vm639_vm8 = vmor %vm637_vm7, %vm638_vm5  ;;  %v882_v28 = vmul.f32 %v879_v14, %v1932_v12 }
 0x1b5   : > { %v633_v22 = vmul.f32 %v1461_v13, %v632_v18  ;;  %v733_v40 = vsel %vm1960_vm4, %v1459_v45, %v729_v26  ;;  %v1973_v45 = vld [vmem:[%s2401_s8] ss:$0 sm:$0xff]  ;;  %vm817_vm10 = vmor %vm815_vm9, %vm816_vm6  ;;  %v1982_v21 = vadd.f32 1e-05, %v719_v56 }
 0x1b6   : > { %v811_v30 = vmul.f32 %v1463_v17, %v810_v20  ;;  %v744_v18 = vmul.f32 %v733_v40, %v720_v44 }
 0x1b7   : > { %v634_v32 = vmul.f32 0.5, %v633_v22  ;;  %v1985_v22 = vmul.f32 %v788_v2, %v1932_v12  ;;  %1464 = vrsqrt.f32 %v1982_v21  ;;  %vm740_vm12 = vweird.f32 %v1982_v21 }
 0x1b8   : > { %v812_v34 = vmul.f32 0.5, %v811_v30  ;;  %v746_v59 = vmul.f32 %v1973_v45, %v744_v18  ;;  %v886_v30 = vsub.f32 %v882_v28, %v884_v60 }
 0x1b9   : > { %v635_v36 = vsub.f32 1.5, %v634_v32  ;;  %v603_v38 = vpop.xlane.xlu0 %602  ;;  %v800_v2 = vmul.f32 %v1985_v22, %v1985_v22 }
 0x1ba   : > { %v813_v43 = vsub.f32 1.5, %v812_v34  ;;  %v618_v51 = vpop.xlane.xlu1 %617  ;;  %v2000_v31 = vmul.f32 %v1932_v12, %v603_v38 }
 0x1bb   : > { %v636_v53 = vmul.f32 %v1461_v13, %v635_v36  ;;  %v1041_v27 = vpop.xlane.xlu2 %1040  ;;  %v888_v36 = vmax.f32 %v886_v30, 0.0  ;;  %v620_v38 = vmul.f32 %v618_v51, %v1932_v12 }
 0x1bc   : > { %v814_v3 = vmul.f32 %v1463_v17, %v813_v43  ;;  %v802_v43 = vsub.f32 %v798_v58, %v800_v2  ;;  %v622_v44 = vmul.f32 %v2000_v31, %v2000_v31  ;;  %v2025_v60 = vmul.f32 %v1041_v27, %v1932_v12 }
 0x1bd   : > { %v640_v20 = vsel %vm639_vm8, %v1461_v13, %v636_v53  ;;  %v1990_v13 = vld [vmem:[%s2402_s9] ss:$0 sm:$0xff]  ;;  %v2008_v56 = vpop.eup %1464 }
 0x1be   : > { %v651_v16 = vmul.f32 %v640_v20, %v627_v62  ;;  %v818_v46 = vsel %vm817_vm10, %v1463_v17, %v814_v3  ;;  %v748_v34 = vadd.f32 %v1990_v13, %v746_v59  ;;  %v2011_v20 = vadd.f32 1e-05, %v888_v36 }
 0x1bf   : > { %v829_v17 = vmul.f32 %v818_v46, %v805_v0  ;;  %v804_v9 = vmax.f32 %v802_v43, 0.0  ;;  %v624_v46 = vsub.f32 %v620_v38, %v622_v44  ;;  %v735_v0 = vmul.f32 %v2008_v56, %v1982_v21 }
 0x1c0   : > { %v656_v55 = vmul.f32 %v1973_v45, %v651_v16  ;;  %v750_v62 = vmax.f32 %v748_v34, 0.0  ;;  %1466 = vrsqrt.f32 %v2011_v20  ;;  %v1054_v36 = vmul.f32 %v2025_v60, %v2025_v60 }
 0x1c1   : > { %v873_v25 = vpop.xlane.xlu0 %872  ;;  %v831_v35 = vmul.f32 %v1973_v45, %v829_v17  ;;  %v626_v30 = vmax.f32 %v624_v46, 0.0  ;;  %vm741_vm11 = vweird.f32 %v2008_v56  ;;  %vm900_vm14 = vweird.f32 %v2011_v20 }
 0x1c2   : > { %v1134_v14 = vpop.xlane.xlu1 %1133  ;;  %v661_v26 = vadd.f32 %v1990_v13, %v656_v55  ;;  %v760_v28 = vmul.f32 %v1904_v48, %v750_v62  ;;  %v2018_v59 = vmul.f32 %v873_v25, %v1932_v12  ;;  %v736_v48 = vmul.f32 %v2008_v56, %v735_v0  ;;  %vm742_vm13 = vmor %vm740_vm12, %vm741_vm11 }
 0x1c3   : > { %v1126_v32 = vpop.xlane.xlu2 %1125  ;;  %v833_v3 = vadd.f32 %v1990_v13, %v831_v35  ;;  %v2044_v43 = vadd.f32 1e-05, %v626_v30  ;;  %v1137_v44 = vmul.f32 %v1134_v14, %v1932_v12 }
 0x1c4   : > { %v663_v40 = vmax.f32 %v661_v26, 0.0  ;;  %v2021_v17 = vmul.f32 %v1126_v32, %v1932_v12  ;;  %v2027_v26 = vadd.f32 1e-05, %v804_v9  ;;  %v885_v35 = vmul.f32 %v2018_v59, %v2018_v59 }
 0x1c5   : > { %v835_v55 = vmax.f32 %v833_v3, 0.0  ;;  %v737_v62 = vmul.f32 0.5, %v736_v48  ;;  %vm647_vm3 = vweird.f32 %v2044_v43 }
 0x1c6   : > { %v675_v16 = vmul.f32 %v1901_v47, %v663_v40  ;;  %v1139_v27 = vmul.f32 %v2021_v17, %v2021_v17  ;;  %1468 = vrsqrt.f32 %v2027_v26  ;;  %vm825_vm0 = vweird.f32 %v2027_v26 }
 0x1c7   : > { %v845_v32 = vmul.f32 %v1915_v54, %v835_v55  ;;  %1470 = vrsqrt.f32 %v2044_v43  ;;  %v738_v0 = vsub.f32 1.5, %v737_v62 }
 0x1c8   : > { %v762_v47 = vadd.f32 %v760_v28, %v675_v16  ;;  %v1141_v38 = vsub.f32 %v1137_v44, %v1139_v27 }
 0x1c9   : > { %v881_v53 = vpop.xlane.xlu0 %880 }
 0x1ca   : > { %v956_v18 = vpop.xlane.xlu1 %955  ;;  %v883_v2 = vmul.f32 %v881_v53, %v1932_v12  ;;  %v2041_v40 = vadd.f32 %v845_v32, %v762_v47  ;;  %v2047_v53 = vpop.eup %1466  ;;  %v739_v32 = vmul.f32 %v2008_v56, %v738_v0 }
 0x1cb   : > { %v1049_v51 = vpop.xlane.xlu2 %1048  ;;  %v2050_v16 = vmul.f32 %v956_v18, %v1932_v12  ;;  %v895_v9 = vmul.f32 %v2047_v53, %v2011_v20  ;;  %vm901_vm15 = vweird.f32 %v2047_v53 }
 0x1cc   : > { %v1052_v25 = vmul.f32 %v1049_v51, %v1932_v12  ;;  %v887_v54 = vsub.f32 %v883_v2, %v885_v35  ;;  %v2057_v14 = vpop.eup %1468  ;;  %v1143_v51 = vmax.f32 %v1141_v38, 0.0  ;;  %v721_v38 = vsub.f32 %v1836_v5, %v1955_v4  ;;  %vm2129_vm1 = vmor %vm900_vm14, %vm901_vm15 }
 0x1cd   : > { %v969_v30 = vmul.f32 %v2050_v16, %v2050_v16  ;;  %v896_v48 = vmul.f32 %v2047_v53, %v895_v9  ;;  %v820_v35 = vmul.f32 %v2057_v14, %v2027_v26  ;;  %v2071_v44 = vpop.eup %1470  ;;  %vm826_vm2 = vweird.f32 %v2057_v14 }
 0x1ce   : > { %v1056_v3 = vsub.f32 %v1052_v25, %v1054_v36  ;;  %v889_v46 = vmax.f32 %v887_v54, 0.0  ;;  %v2073_v54 = vadd.f32 1e-05, %v1143_v51  ;;  %vm648_vm4 = vweird.f32 %v2071_v44  ;;  %vm2178_vm5 = vmor %vm825_vm0, %vm826_vm2 }
 0x1cf   : > { %v897_v9 = vmul.f32 0.5, %v896_v48  ;;  %v821_v0 = vmul.f32 %v2057_v14, %v820_v35  ;;  %vm2208_vm8 = vmor %vm647_vm3, %vm648_vm4 }
 0x1d0   : > { %v1058_v28 = vmax.f32 %v1056_v3, 0.0  ;;  %v2064_v25 = vadd.f32 1e-05, %v889_v46  ;;  %v743_v46 = vsel %vm742_vm13, %v2008_v56, %v739_v32  ;;  %vm1155_vm9 = vweird.f32 %v2073_v54 }
 0x1d1   : > { %v1051_v34 = vpop.xlane.xlu0 %1050  ;;  %v822_v48 = vmul.f32 0.5, %v821_v0 }
 0x1d2   : > { %v2037_v58 = vpop.xlane.xlu1 %1210  ;;  %v2069_v27 = vadd.f32 1e-05, %v1058_v28  ;;  %1472 = vrsqrt.f32 %v2064_v25  ;;  %v642_v28 = vmul.f32 %v2071_v44, %v2044_v43  ;;  %v1053_v32 = vmul.f32 %v1051_v34, %v1932_v12 }
 0x1d3   : > { %v958_v2 = vpop.xlane.xlu2 %957  ;;  %vm910_vm11 = vweird.f32 %v2064_v25 }
 0x1d4   : > { %v2076_v62 = vmul.f32 %v958_v2, %v1932_v12  ;;  %1474 = vrsqrt.f32 %v2069_v27  ;;  %v898_v2 = vsub.f32 1.5, %v897_v9  ;;  %vm1070_vm0 = vweird.f32 %v2069_v27 }
 0x1d5   : > { %1476 = vrsqrt.f32 %v2073_v54 }
 0x1d6   : > { %v970_v21 = vmul.f32 %v2076_v62, %v2076_v62 }
 0x1d9   : > { %v2055_v55 = vpop.xlane.xlu0 %1135 }
 0x1da   : > { %v964_v47 = vpop.xlane.xlu1 %963 }
 0x1db   : > { %v967_v18 = vmul.f32 %v964_v47, %v1932_v12 }
 0x1dd   : > { %v971_v36 = vsub.f32 %v967_v18, %v969_v30  ;;  %v745_v30 = vmul.f32 %v743_v46, %v721_v38  ;;  %v890_v38 = vsub.f32 %v1841_v10, %v1976_v57 }
 0x1df   : > { %v973_v3 = vmax.f32 %v971_v36, 0.0  ;;  %v2100_v36 = vpop.eup %1472  ;;  %v747_v0 = vmul.f32 %v1973_v45, %v745_v30 }
 0x1e0   : > { %v2103_v6 = vpop.eup %1474  ;;  %v905_v57 = vmul.f32 %v2100_v36, %v2064_v25  ;;  %vm911_vm12 = vweird.f32 %v2100_v36 }
 0x1e1   : > { %v966_v51 = vpop.xlane.xlu0 %965  ;;  %v2090_v5 = vadd.f32 1e-05, %v973_v3  ;;  %v643_v3 = vmul.f32 %v2071_v44, %v642_v28  ;;  %v2110_v34 = vpop.eup %1476  ;;  %v1065_v30 = vmul.f32 %v2103_v6, %v2069_v27  ;;  %v2142_v10 = vadd.f32 %v1990_v13, %v747_v0  ;;  %vm2255_vm15 = vmor %vm910_vm11, %vm911_vm12 }
 0x1e2   : > { %v968_v4 = vmul.f32 %v966_v51, %v1932_v12  ;;  %v1043_v47 = vpop.xlane.xlu1 %1042  ;;  %v906_v7 = vmul.f32 %v2100_v36, %v905_v57  ;;  %v2166_v57 = vmul.f32 %v2037_v58, %v1932_v12  ;;  %vm1071_vm13 = vweird.f32 %v2103_v6 }
 0x1e3   : > { %v2094_v56 = vmul.f32 %v1043_v47, %v1932_v12  ;;  %1478 = vrsqrt.f32 %v2090_v5  ;;  %v1066_v42 = vmul.f32 %v2103_v6, %v1065_v30  ;;  %vm985_vm7 = vweird.f32 %v2090_v5 }
 0x1e4   : > { %v972_v18 = vsub.f32 %v968_v4, %v970_v21  ;;  %v899_v21 = vmul.f32 %v2047_v53, %v898_v2  ;;  %v823_v4 = vsub.f32 1.5, %v822_v48  ;;  %v907_v58 = vmul.f32 0.5, %v906_v7 }
 0x1e5   : > { %v1055_v35 = vmul.f32 %v2094_v56, %v2094_v56  ;;  %v1224_v52 = vmul.f32 %v2166_v57, %v2166_v57  ;;  %vm1156_vm14 = vweird.f32 %v2110_v34 }
 0x1e6   : > { %v974_v51 = vmax.f32 %v972_v18, 0.0  ;;  %v903_v20 = vsel %vm2129_vm1, %v2047_v53, %v899_v21  ;;  %v1138_v53 = vmul.f32 %v2055_v55, %v1932_v12  ;;  %vm2266_vm1 = vmor %vm1070_vm0, %vm1071_vm13 }
 0x1e7   : > { %v1057_v46 = vsub.f32 %v1053_v32, %v1055_v35  ;;  %v644_v32 = vmul.f32 0.5, %v643_v3  ;;  %v824_v35 = vmul.f32 %v2057_v14, %v823_v4  ;;  %v914_v1 = vmul.f32 %v903_v20, %v890_v38  ;;  %vm2283_vm3 = vmor %vm1155_vm9, %vm1156_vm14 }
 0x1e8   : > { %v2115_v28 = vadd.f32 1e-05, %v974_v51  ;;  %v1150_v51 = vmul.f32 %v2110_v34, %v2073_v54  ;;  %v1067_v38 = vmul.f32 0.5, %v1066_v42 }
 0x1e9   : > { %v1059_v47 = vmax.f32 %v1057_v46, 0.0  ;;  %v2121_v18 = vpop.eup %1478  ;;  %v645_v0 = vsub.f32 1.5, %v644_v32  ;;  %v828_v4 = vsel %vm2178_vm5, %v2057_v14, %v824_v35  ;;  %v2417_v35 = vsub.f32 %v1844_v11, %v1985_v22 }
 0x1ea   : > { %1480 = vrsqrt.f32 %v2115_v28  ;;  %v1128_v2 = vpop.xlane.xlu1 %1127  ;;  %v980_v3 = vmul.f32 %v2121_v18, %v2090_v5  ;;  %vm986_vm6 = vweird.f32 %v2121_v18  ;;  %v916_v11 = vmul.f32 %v1973_v45, %v914_v1 }
 0x1eb   : > { %v2139_v46 = vadd.f32 1e-05, %v1059_v47  ;;  %v2149_v9 = vmul.f32 %v1128_v2, %v1932_v12  ;;  %v1151_v2 = vmul.f32 %v2110_v34, %v1150_v51  ;;  %v1068_v51 = vsub.f32 1.5, %v1067_v38  ;;  %vm2220_vm10 = vmor %vm985_vm7, %vm986_vm6 }
 0x1ec   : > { %v981_v47 = vmul.f32 %v2121_v18, %v980_v3  ;;  %v976_v22 = vsub.f32 %v1885_v39, %v2076_v62  ;;  %vm995_vm4 = vweird.f32 %v2115_v28 }
 0x1ed   : > { %1482 = vrsqrt.f32 %v2139_v46  ;;  %v1140_v21 = vmul.f32 %v2149_v9, %v2149_v9  ;;  %v1152_v26 = vmul.f32 0.5, %v1151_v2  ;;  %v908_v2 = vsub.f32 1.5, %v907_v58 }
 0x1ee   : > { %v982_v48 = vmul.f32 0.5, %v981_v47  ;;  %v1069_v38 = vmul.f32 %v2103_v6, %v1068_v51  ;;  %vm1080_vm7 = vweird.f32 %v2139_v46 }
 0x1ef   : > { %v1142_v30 = vsub.f32 %v1138_v53, %v1140_v21  ;;  %v646_v53 = vmul.f32 %v2071_v44, %v645_v0  ;;  %v830_v0 = vmul.f32 %v828_v4, %v2417_v35  ;;  %v1153_v4 = vsub.f32 1.5, %v1152_v26 }
 0x1f0   : > { %v2168_v3 = vpop.eup %1480  ;;  %v983_v47 = vsub.f32 1.5, %v982_v48 }
 0x1f1   : > { %v990_v32 = vmul.f32 %v2168_v3, %v2115_v28  ;;  %v1144_v20 = vmax.f32 %v1142_v30, 0.0  ;;  %v650_v5 = vsel %vm2208_vm8, %v2071_v44, %v646_v53  ;;  %v1221_v44 = vpop.xlane.xlu2 %1220  ;;  %v1154_v35 = vmul.f32 %v2110_v34, %v1153_v4 }
 0x1f2   : > { %v1219_v21 = vpop.xlane.xlu1 %1218  ;;  %v984_v8 = vmul.f32 %v2121_v18, %v983_v47  ;;  %v1223_v25 = vmul.f32 %v1221_v44, %v1932_v12  ;;  %vm996_vm2 = vweird.f32 %v2168_v3 }
 0x1f3   : > { %v2188_v55 = vpop.eup %1482  ;;  %v991_v7 = vmul.f32 %v2168_v3, %v990_v32  ;;  %v1222_v48 = vmul.f32 %v1219_v21, %v1932_v12  ;;  %v2198_v42 = vadd.f32 1e-05, %v1144_v20  ;;  %v1073_v32 = vsel %vm2266_vm1, %v2103_v6, %v1069_v38  ;;  %vm997_vm5 = vmor %vm995_vm4, %vm996_vm2 }
 0x1f4   : > { %v1075_v14 = vmul.f32 %v2188_v55, %v2139_v46  ;;  %v988_v1 = vsel %vm2220_vm10, %v2121_v18, %v984_v8  ;;  %v2422_v8 = vsub.f32 %v1852_v15, %v2000_v31  ;;  %v918_v15 = vadd.f32 %v1990_v13, %v916_v11 }
 0x1f5   : > { %v1226_v30 = vsub.f32 %v1222_v48, %v1224_v52  ;;  %v992_v47 = vmul.f32 0.5, %v991_v7  ;;  %1484 = vrsqrt.f32 %v2198_v42  ;;  %v975_v52 = vsub.f32 %v1873_v29, %v2050_v16 }
 0x1f6   : > { %v1076_v20 = vmul.f32 %v2188_v55, %v1075_v14  ;;  %v2232_v29 = vmul.f32 %v1973_v45, %v830_v0  ;;  %v909_v16 = vmul.f32 %v2100_v36, %v908_v2  ;;  %v652_v18 = vmul.f32 %v650_v5, %v2422_v8 }
 0x1f7   : > { %v1228_v43 = vmax.f32 %v1226_v30, 0.0  ;;  %v993_v53 = vsub.f32 1.5, %v992_v47  ;;  %v999_v7 = vmul.f32 %v988_v1, %v975_v52  ;;  %v1158_v6 = vsel %vm2283_vm3, %v2110_v34, %v1154_v35 }
 0x1f8   : > { %v1077_v21 = vmul.f32 0.5, %v1076_v20  ;;  %v913_v31 = vsel %vm2255_vm15, %v2100_v36, %v909_v16  ;;  %v657_v47 = vmul.f32 %v1973_v45, %v652_v18  ;;  %v2429_v5 = vsub.f32 %v1864_v24, %v2018_v59 }
 0x1f9   : > { %v2236_v58 = vadd.f32 1e-05, %v1228_v43  ;;  %v994_v36 = vmul.f32 %v2168_v3, %v993_v53  ;;  %v1001_v52 = vmul.f32 %v1973_v45, %v999_v7  ;;  %v920_v43 = vmax.f32 %v918_v15, 0.0 }
 0x1fa   : > { %v1213_v26 = vpop.xlane.xlu1 %1212  ;;  %v1078_v51 = vsub.f32 1.5, %v1077_v21  ;;  %v915_v4 = vmul.f32 %v913_v31, %v2429_v5  ;;  %v2430_v1 = vsub.f32 %v1857_v19, %v2025_v60  ;;  %vm1081_vm6 = vweird.f32 %v2188_v55 }
 0x1fb   : > { %1486 = vrsqrt.f32 %v2236_v58  ;;  %v2245_v48 = vmul.f32 %v1213_v26, %v1932_v12  ;;  %v2247_v14 = vpop.eup %1484  ;;  %v998_v34 = vsel %vm997_vm5, %v2168_v3, %v994_v36  ;;  %v662_v62 = vadd.f32 %v1990_v13, %v657_v47  ;;  %vm2314_vm9 = vmor %vm1080_vm7, %vm1081_vm6 }
 0x1fc   : > { %v1160_v30 = vmul.f32 %v2247_v14, %v2198_v42  ;;  %v1084_v16 = vmul.f32 %v1073_v32, %v2430_v1  ;;  %v1079_v53 = vmul.f32 %v2188_v55, %v1078_v51  ;;  %v1003_v59 = vadd.f32 %v1990_v13, %v1001_v52 }
 0x1fd   : > { %v1225_v27 = vmul.f32 %v2245_v48, %v2245_v48  ;;  %v2431_v19 = vsub.f32 %v1862_v23, %v2021_v17  ;;  %vm1166_vm8 = vweird.f32 %v2247_v14  ;;  %v1000_v21 = vmul.f32 %v998_v34, %v976_v22 }
 0x1fe   : > { %v1161_v20 = vmul.f32 %v2247_v14, %v1160_v30  ;;  %v1086_v18 = vmul.f32 %v1973_v45, %v1084_v16  ;;  %v917_v7 = vmul.f32 %v1973_v45, %v915_v4  ;;  %v1083_v23 = vsel %vm2314_vm9, %v2188_v55, %v1079_v53  ;;  %v2438_v53 = vld [vmem:[#allocation3_spill] sm:$0xff] }
 0x1ff   : > { %v1227_v11 = vsub.f32 %v1223_v25, %v1225_v27  ;;  %v1169_v60 = vmul.f32 %v1158_v6, %v2431_v19  ;;  %vm1165_vm10 = vweird.f32 %v2198_v42  ;;  %v1061_v46 = vsub.f32 %v1878_v33, %v2094_v56  ;;  %v1264_v19 = vpop.permute.xlu0 %1263 }
 0x200   : > { %v1162_v38 = vmul.f32 0.5, %v1161_v20  ;;  %vm2328_vm11 = vmor %vm1165_vm10, %vm1166_vm8  ;;  %v664_v0 = vmax.f32 %v662_v62, 0.0  ;;  %v930_v15 = vmul.f32 %v1919_v61, %v920_v43  ;;  %v1005_v31 = vmax.f32 %v1003_v59, 0.0  ;;  %v2439_v62 = vld [vmem:[#allocation4_spill] sm:$0xff] }
 0x201   : > { %v1487_v54 = vpop.eup %1486  ;;  %v1229_v44 = vmax.f32 %v1227_v11, 0.0  ;;  %v1171_v55 = vmul.f32 %v1973_v45, %v1169_v60  ;;  %v1085_v42 = vmul.f32 %v1083_v23, %v1061_v46  ;;  %v1146_v33 = vsub.f32 %v1888_v41, %v2149_v9 }
 0x202   : > { %v1235_v39 = vmul.f32 %v1487_v54, %v2236_v58  ;;  %v1163_v28 = vsub.f32 1.5, %v1162_v38  ;;  %vm1241_vm12 = vweird.f32 %v1487_v54  ;;  %v1002_v56 = vmul.f32 %v1973_v45, %v1000_v21 }
 0x203   : > { %v2306_v24 = vadd.f32 1e-05, %v1229_v44  ;;  %v1088_v30 = vadd.f32 %v1990_v13, %v1086_v18  ;;  %v834_v61 = vadd.f32 %v1990_v13, %v2232_v29  ;;  %vm1240_vm13 = vweird.f32 %v2236_v58  ;;  %v2437_v44 = vld [vmem:[#allocation7_spill] sm:$0xff] }
 0x204   : > { %v1236_v3 = vmul.f32 %v1487_v54, %v1235_v39  ;;  %v1164_v8 = vmul.f32 %v2247_v14, %v1163_v28  ;;  %v919_v27 = vadd.f32 %v1990_v13, %v917_v7  ;;  %v1230_v36 = vsub.f32 %v1883_v37, %v2166_v57  ;;  %vm1242_vm14 = vmor %vm1240_vm13, %vm1241_vm12 }
 0x205   : > { %1488 = vrsqrt.f32 %v2306_v24  ;;  %v932_v41 = vadd.f32 %v930_v15, %v2041_v40  ;;  %v1015_v9 = vmul.f32 %v1922_v63, %v1005_v31  ;;  %v676_v12 = vmul.f32 %v1906_v49, %v664_v0 }
 0x206   : > { %v1237_v17 = vmul.f32 0.5, %v1236_v3  ;;  %v1168_v2 = vsel %vm2328_vm11, %v2247_v14, %v1164_v8  ;;  %v1173_v29 = vadd.f32 %v1990_v13, %v1171_v55  ;;  %v1087_v20 = vmul.f32 %v1973_v45, %v1085_v42  ;;  %v2440_v8 = vld [vmem:[#allocation2_spill] sm:$0xff] }
 0x207   : > { %v1170_v51 = vmul.f32 %v1168_v2, %v1146_v33  ;;  %v1004_v11 = vadd.f32 %v1990_v13, %v1002_v56  ;;  %v1090_v52 = vmax.f32 %v1088_v30, 0.0  ;;  %v2436_v37 = vmax.f32 %v2142_v10, 0.0  ;;  %v1274_v2 = vld [vmem:[%s2403_s10] sm:$0xff]  ;;  %v2442_v30 = vld [vmem:[#allocation5_spill] sm:$0xff] }
 0x208   : > { %v1238_v25 = vsub.f32 1.5, %v1237_v17  ;;  %v836_v40 = vmax.f32 %v834_v61, 0.0  ;;  %v921_v63 = vmax.f32 %v919_v27, 0.0  ;;  %v1017_v5 = vadd.f32 %v1015_v9, %v932_v41  ;;  %v2441_v17 = vld [vmem:[#allocation6_spill] sm:$0xff] }
 0x209   : > { %v761_v57 = vmul.f32 %v1909_v50, %v2436_v37  ;;  %v1172_v43 = vmul.f32 %v1973_v45, %v1170_v51  ;;  %v1175_v1 = vmax.f32 %v1173_v29, 0.0  ;;  %v1089_v16 = vadd.f32 %v1990_v13, %v1087_v20 }
 0x20a   : > { %v1239_v14 = vmul.f32 %v1487_v54, %v1238_v25  ;;  %v1006_v38 = vmax.f32 %v1004_v11, 0.0  ;;  %v1100_v34 = vmul.f32 %v2437_v44, %v1090_v52  ;;  %v846_v50 = vmul.f32 %v2438_v53, %v836_v40 }
 0x20b   : > { %v1489_v32 = vpop.eup %1488  ;;  %v931_v28 = vmul.f32 %v2439_v62, %v921_v63  ;;  %v1174_v60 = vadd.f32 %v1990_v13, %v1172_v43  ;;  %v1231_v18 = vsub.f32 %v2440_v8, %v2245_v48  ;;  %vm1250_vm0 = vweird.f32 %v2306_v24  ;;  %v1183_v48 = vpop.permute.xlu2 %1182 }
 0x20c   : > { %v1245_v47 = vmul.f32 %v1489_v32, %v2306_v24  ;;  %v1243_v58 = vsel %vm1242_vm14, %v1487_v54, %v1239_v14  ;;  %v763_v54 = vadd.f32 %v761_v57, %v676_v12  ;;  %vm1251_vm15 = vweird.f32 %v1489_v32  ;;  %v1275_v12 = vld [vmem:[%s2403_s10 + $0x8] sm:$0xff] }
 0x20d   : > { %v1254_v6 = vmul.f32 %v1243_v58, %v1230_v36  ;;  %v1102_v3 = vadd.f32 %v1100_v34, %v1017_v5  ;;  %vm1252_vm1 = vmor %vm1250_vm0, %vm1251_vm15  ;;  %v1016_v46 = vmul.f32 %v2441_v17, %v1006_v38  ;;  %v1091_v35 = vmax.f32 %v1089_v16, 0.0 }
 0x20e   : > { %v1246_v22 = vmul.f32 %v1489_v32, %v1245_v47  ;;  %v848_v23 = vadd.f32 %v846_v50, %v763_v54  ;;  %v1176_v42 = vmax.f32 %v1174_v60, 0.0 }
 0x20f   : > { %v1256_v49 = vmul.f32 %v1973_v45, %v1254_v6  ;;  %v1101_v24 = vmul.f32 %v2442_v30, %v1091_v35 }
 0x210   : > { %v1247_v4 = vmul.f32 0.5, %v1246_v22  ;;  %v933_v55 = vadd.f32 %v931_v28, %v848_v23  ;;  %v1186_v14 = vmul.f32 %v1183_v48, %v1176_v42 }
 0x211   : > { %v1258_v10 = vadd.f32 %v1990_v13, %v1256_v49 }
 0x212   : > { %v1248_v39 = vsub.f32 1.5, %v1247_v4  ;;  %v1179_v59 = vpop.permute.xlu1 %1178  ;;  %v1018_v56 = vadd.f32 %v1016_v46, %v933_v55 }
 0x213   : > { %v1185_v21 = vmul.f32 %v1179_v59, %v1175_v1  ;;  %v1260_v26 = vmax.f32 %v1258_v10, 0.0 }
 0x214   : > { %v1249_v7 = vmul.f32 %v1489_v32, %v1248_v39  ;;  %v1103_v51 = vadd.f32 %v1101_v24, %v1018_v56 }
 0x215   : > { %v1187_v0 = vadd.f32 %v1185_v21, %v1102_v3  ;;  %v1270_v15 = vmul.f32 %v1264_v19, %v1260_v26 }
 0x216   : > { %v1253_v31 = vsel %vm1252_vm1, %v1489_v32, %v1249_v7  ;;  %v1188_v9 = vadd.f32 %v1186_v14, %v1103_v51 }
 0x217   : > { %v1255_v25 = vmul.f32 %v1253_v31, %v1231_v18  ;;  %v1272_v33 = vadd.f32 %v1270_v15, %v1187_v0 }
 0x219   : > { %v1276_v61 = vadd.f32 %v1274_v2, %v1272_v33  ;;  %v1257_v27 = vmul.f32 %v1973_v45, %v1255_v25 }
 0x21b   : > { %1278 = vst [vmem:[%s2403_s10] sm:$0xff] %v1276_v61  ;;  %v1259_v32 = vadd.f32 %v1990_v13, %v1257_v27  ;;  %v1268_v36 = vpop.permute.xlu1 %1267 }
 0x21d   : > { %v1261_v41 = vmax.f32 %v1259_v32, 0.0 }
 0x21f   : > { %v1271_v47 = vmul.f32 %v1268_v36, %v1261_v41 }
 0x221   : > { %v1273_v29 = vadd.f32 %v1271_v47, %v1188_v9 }
 0x223   : > { %v1277_v58 = vadd.f32 %v1275_v12, %v1273_v29 }
 0x225   : > { %1279 = vst [vmem:[%s2403_s10 + $0x8] sm:$0xff] %v1277_v58 }
 0x226 PF: > { %s20_s15 = sadd.s32 1, %s1512_s15   ;;  %s2443_s13 = smov %s1508_s14 }
 0x227   : > { %p17_p6 = scmp.ge.s32.totalorder %s20_s15, 5   ;;  %s2444_s14 = smov %s2446_s16 }
 0x229   :  { %19 = sbr.rel (!%p17_p6) target bundleno = 2 (0x2), region = 103 }

</bundles_post_ra>
